<compile_context>
chip_gen: v5e
topology: v5e:2x2
jax: 0.10.0
libtpu: 0.0.40
codegen_flags: <defaults>
</compile_context>

<pallas_src>
import functools

import jax
import jax.numpy as jnp
from jax.experimental import pallas as pl
from jax.experimental.pallas import tpu as pltpu

POS_MEAN = 13.635
POS_VAR = 61.97
POS_STD = float(POS_VAR ** 0.5)

FEAT = 128     # lane-padded state width (cols 0..5 real)
HIDDEN = 128   # MLP hidden dim (hidden_dim=128 in the module)
OUT_W = 8      # lanes written per step to HBM (cols 0..5 real, 6..7 zero)


def _softplus(x):
    # torch.nn.Softplus(beta=1, threshold=20); overflow branch is selected away.
    return jnp.where(x > 20.0, x, jnp.log1p(jnp.exp(x)))


def integrate_kernel(dt_ref, x0_ref,
                     fw1_ref, fb1_ref, fw2_ref, fb2_ref,
                     w1_ref, b1_ref, w2_ref, b2_ref, w3_ref, b3_ref,
                     o_ref, x_sc):
    """Grid = (particle_tile, time_step).  One 3/8-rule RK4 step per call.

    State for the current particle tile is carried across the time axis in the
    VMEM scratch `x_sc`; weights are VMEM-resident (constant index_maps).
    """
    s = pl.program_id(1)

    @pl.when(s == 0)
    def _():
        x_sc[...] = x0_ref[...]

    x = x_sc[...]                          # (tile_n, 128) f32
    dt = dt_ref[s]                         # SMEM scalar
    dt_3 = dt * (1.0 / 3.0)
    dt_8 = dt * 0.125

    def f(y):
        yb = y.astype(jnp.bfloat16)
        # force-predictor stand-in layers 1-2 (denormalize_pos folded into fw1)
        h = _softplus(jnp.dot(yb, fw1_ref[...],
                              preferred_element_type=jnp.float32) + fb1_ref[...])
        h = _softplus(jnp.dot(h.astype(jnp.bfloat16), fw2_ref[...],
                              preferred_element_type=jnp.float32) + fb2_ref[...])
        # force output layer folded into the main-MLP first layer: one K=256 dot
        ycat = jnp.concatenate([yb, h.astype(jnp.bfloat16)], axis=-1)  # (tile, 256)
        g = _softplus(jnp.dot(ycat, w1_ref[...],
                              preferred_element_type=jnp.float32) + b1_ref[...])
        g = _softplus(jnp.dot(g.astype(jnp.bfloat16), w2_ref[...],
                              preferred_element_type=jnp.float32) + b2_ref[...])
        return jnp.dot(g.astype(jnp.bfloat16), w3_ref[...],
                       preferred_element_type=jnp.float32) + b3_ref[...]  # cols 0..5

    # torchdiffeq fixed-grid 'rk4' (3/8-rule), f32 state combine
    k1 = f(x)
    k2 = f(x + dt_3 * k1)
    k3 = f(x + dt * k2 - dt_3 * k1)
    k4 = f(x + dt * (k1 - k2 + k3))
    x_new = x + dt_8 * (k1 + 3.0 * (k2 + k3) + k4)

    x_sc[...] = x_new
    o_ref[0] = x_new[:, :OUT_W]            # only the 8 useful lanes go to HBM


@functools.lru_cache(maxsize=None)
def make_integrator(n_pad, tile_n, n_steps):
    n_tiles = n_pad // tile_n

    def w_spec(shape):
        return pl.BlockSpec(shape, lambda p, s, dt, _nd=len(shape): (0,) * _nd)

    grid_spec = pltpu.PrefetchScalarGridSpec(
        num_scalar_prefetch=1,                      # dt vector -> SMEM
        grid=(n_tiles, n_steps),
        in_specs=[
            pl.BlockSpec((tile_n, FEAT), lambda p, s, dt: (p, 0)),     # x0
            w_spec((FEAT, HIDDEN)), w_spec((1, HIDDEN)),               # fw1, fb1
            w_spec((HIDDEN, HIDDEN)), w_spec((1, HIDDEN)),             # fw2, fb2
            w_spec((FEAT + HIDDEN, HIDDEN)), w_spec((1, HIDDEN)),      # w1cat, b1'
            w_spec((HIDDEN, HIDDEN)), w_spec((1, HIDDEN)),             # w2, b2
            w_spec((HIDDEN, FEAT)), w_spec((1, FEAT)),                 # w3, b3
        ],
        out_specs=pl.BlockSpec((1, tile_n, OUT_W), lambda p, s, dt: (s, p, 0)),
        scratch_shapes=[pltpu.VMEM((tile_n, FEAT), jnp.float32)],
    )
    return pl.pallas_call(
        integrate_kernel,
        out_shape=jax.ShapeDtypeStruct((n_steps, n_pad, OUT_W), jnp.float32),
        grid_spec=grid_spec,
        compiler_params=pltpu.CompilerParams(
            dimension_semantics=("parallel", "arbitrary")),
    )


def init_params(key):
    """Deterministic synthetic parameters in the lane-padded / fused layout.

    denormalize_pos is folded into fw1/fb1; the force output layer (fw3, fb3)
    is folded into the main-MLP first layer (w1cat, b1').  Matmul weights are
    bf16, biases f32.
    """
    ks = jax.random.split(key, 12)

    def lin(k, fan_in, shape, scale=0.1):
        return (scale / (fan_in ** 0.5)) * jax.random.normal(k, shape, jnp.float32)

    # force predictor stand-in: 3 -> 128 -> 128 -> 3 (softplus)
    fw1_raw = lin(ks[0], 3, (3, HIDDEN))
    fb1_raw = lin(ks[1], 1, (HIDDEN,))
    fw2_raw = lin(ks[2], HIDDEN, (HIDDEN, HIDDEN))
    fb2_raw = lin(ks[3], 1, (HIDDEN,))
    fw3_raw = lin(ks[4], HIDDEN, (HIDDEN, 3))
    fb3_raw = lin(ks[5], 1, (3,))

    # SONODE.fc: MLP(9, 6, hidden_dim=128, hidden_layer=3, softplus)
    w1_raw = lin(ks[6], 9, (9, HIDDEN))
    b1_raw = lin(ks[7], 1, (HIDDEN,))
    w2_raw = lin(ks[8], HIDDEN, (HIDDEN, HIDDEN))
    b2_raw = lin(ks[9], 1, (HIDDEN,))
    w3_raw = lin(ks[10], HIDDEN, (HIDDEN, 6))
    b3_raw = lin(ks[11], 1, (6,))

    # fold denormalize_pos: (y*STD + MEAN) @ W + b == y @ (STD*W) + (b + MEAN*sum_rows(W))
    fw1 = jnp.zeros((FEAT, HIDDEN), jnp.float32).at[:3, :].set(POS_STD * fw1_raw)
    fb1 = (fb1_raw + POS_MEAN * fw1_raw.sum(axis=0)).reshape(1, HIDDEN)
    fw2 = fw2_raw
    fb2 = fb2_raw.reshape(1, HIDDEN)

    # fold fw3/fb3 into w1:  cat(y, force) @ W1 == y @ W1[:6] + h2 @ (fw3 @ W1[6:9])
    w1_top = jnp.zeros((FEAT, HIDDEN), jnp.float32).at[:6, :].set(w1_raw[:6])
    w1_force = fw3_raw @ w1_raw[6:9]                           # (HIDDEN, HIDDEN)
    w1cat = jnp.concatenate([w1_top, w1_force], axis=0)        # (256, 128)
    b1p = (b1_raw + fb3_raw @ w1_raw[6:9]).reshape(1, HIDDEN)

    w2 = w2_raw
    b2 = b2_raw.reshape(1, HIDDEN)
    w3 = jnp.zeros((HIDDEN, FEAT), jnp.float32).at[:, :6].set(w3_raw)
    b3 = jnp.zeros((1, FEAT), jnp.float32).at[0, :6].set(b3_raw)

    bf = jnp.bfloat16
    return (fw1.astype(bf), fb1, fw2.astype(bf), fb2,
            w1cat.astype(bf), b1p, w2.astype(bf), b2, w3.astype(bf), b3)


def _choose_tiling(n):
    """Tile the particle axis: tile_n multiple of 128, max 512; >=2 tiles when
    n > 128 so the 'parallel' axis can be split across v7x's two TensorCores."""
    if n <= 128:
        tile_n = 128
    else:
        half = (n + 1) // 2
        tile_n = min(512, ((half + 127) // 128) * 128)
    n_pad = ((n + tile_n - 1) // tile_n) * tile_n
    return tile_n, n_pad


def _entire_model_forward(params, fluid_pos, fluid_vel, t):
    """EntireModel.forward for architecture='assisted', augmentation=False."""
    n = fluid_pos.shape[0]
    n_steps = t.shape[0] - 1
    tile_n, n_pad = _choose_tiling(n)

    inp = jnp.concatenate([fluid_pos, fluid_vel], axis=1)               # (N, 6)
    x0 = jnp.zeros((n_pad, FEAT), jnp.float32).at[:n, :6].set(inp)      # lane-pad

    dt = (t[1:] - t[:-1]).astype(jnp.float32)                           # (T-1,)

    integrator = make_integrator(n_pad, tile_n, n_steps)
    traj = integrator(dt, x0, *params)                                  # (T-1, n_pad, 8)

    pos_result = traj[:, :n, :3]                                        # == result[1:,:, :3]
    vel_result = traj[:, :n, 3:6]
    return pos_result, vel_result


entire_model_forward = jax.jit(_entire_model_forward)


if __name__ == "__main__":
    key = jax.random.PRNGKey(0)
    k_pos, k_vel, k_param = jax.random.split(key, 3)

    N = 32                                            # particles
    T = 4                                             # integration-time points
    fluid_pos = jax.random.normal(k_pos, (N, 3), jnp.float32)   # normalized positions
    fluid_vel = jax.random.normal(k_vel, (N, 3), jnp.float32)
    t = jnp.linspace(0.0, 1.0, T).astype(jnp.float32)

    params = init_params(k_param)

    pos_result, vel_result = entire_model_forward(params, fluid_pos, fluid_vel, t)
    jax.block_until_ready((pos_result, vel_result))

    assert pos_result.shape == (T - 1, N, 3)
    assert vel_result.shape == (T - 1, N, 3)
    assert bool(jnp.all(jnp.isfinite(pos_result))) and bool(jnp.all(jnp.isfinite(vel_result)))
    print("KERNEL_OK")
</pallas_src>

<mosaic_0001>
module attributes {stable_mosaic.version = 11 : i64} {
  func.func @integrate_kernel(%arg0: i32, %arg1: i32, %arg2: memref<3xf32, #tpu.memory_space<smem>>, %arg3: memref<128x128xf32, #tpu.memory_space<vmem>>, %arg4: memref<128x128xbf16, #tpu.memory_space<vmem>>, %arg5: memref<1x128xf32, #tpu.memory_space<vmem>>, %arg6: memref<128x128xbf16, #tpu.memory_space<vmem>>, %arg7: memref<1x128xf32, #tpu.memory_space<vmem>>, %arg8: memref<256x128xbf16, #tpu.memory_space<vmem>>, %arg9: memref<1x128xf32, #tpu.memory_space<vmem>>, %arg10: memref<128x128xbf16, #tpu.memory_space<vmem>>, %arg11: memref<1x128xf32, #tpu.memory_space<vmem>>, %arg12: memref<128x128xbf16, #tpu.memory_space<vmem>>, %arg13: memref<1x128xf32, #tpu.memory_space<vmem>>, %arg14: memref<1x128x8xf32, #tpu.memory_space<vmem>>, %arg15: memref<128x128xf32, #tpu.memory_space<vmem>>) attributes {dimension_semantics = [#tpu.dimension_semantics<parallel>, #tpu.dimension_semantics<arbitrary>], iteration_bounds = array<i64: 1, 3>, scalar_prefetch = 1 : i64, scratch_operands = 1 : i64, tpu.core_type = #tpu.core_type<tc>, window_params = [{transform_indices = @transform_0, window_bounds = array<i64: 128, 128>}, {pipeline_mode = #tpu.pipeline_mode<synchronous>, transform_indices = @transform_1, window_bounds = array<i64: 128, 128>}, {pipeline_mode = #tpu.pipeline_mode<synchronous>, transform_indices = @transform_2, window_bounds = array<i64: 1, 128>}, {pipeline_mode = #tpu.pipeline_mode<synchronous>, transform_indices = @transform_3, window_bounds = array<i64: 128, 128>}, {pipeline_mode = #tpu.pipeline_mode<synchronous>, transform_indices = @transform_4, window_bounds = array<i64: 1, 128>}, {pipeline_mode = #tpu.pipeline_mode<synchronous>, transform_indices = @transform_5, window_bounds = array<i64: 256, 128>}, {pipeline_mode = #tpu.pipeline_mode<synchronous>, transform_indices = @transform_6, window_bounds = array<i64: 1, 128>}, {pipeline_mode = #tpu.pipeline_mode<synchronous>, transform_indices = @transform_7, window_bounds = array<i64: 128, 128>}, {pipeline_mode = #tpu.pipeline_mode<synchronous>, transform_indices = @transform_8, window_bounds = array<i64: 1, 128>}, {pipeline_mode = #tpu.pipeline_mode<synchronous>, transform_indices = @transform_9, window_bounds = array<i64: 128, 128>}, {pipeline_mode = #tpu.pipeline_mode<synchronous>, transform_indices = @transform_10, window_bounds = array<i64: 1, 128>}, {transform_indices = @transform_11, window_bounds = array<i64: 1, 128, 8>}]} {
    %c0_i32 = arith.constant 0 : i32
    %0 = arith.cmpi eq, %arg1, %c0_i32 : i32
    %1 = arith.extui %0 : i1 to i32
    %c0_i32_0 = arith.constant 0 : i32
    %2 = arith.cmpi ne, %1, %c0_i32_0 : i32
    scf.if %2 {
      %c0_125 = arith.constant 0 : index
      %c0_126 = arith.constant 0 : index
      %239 = vector.load %arg3[%c0_125, %c0_126] : memref<128x128xf32, #tpu.memory_space<vmem>>, vector<128x128xf32>
      %c0_127 = arith.constant 0 : index
      %c0_128 = arith.constant 0 : index
      %240 = vector.load %arg15[%c0_127, %c0_128] : memref<128x128xf32, #tpu.memory_space<vmem>>, vector<128x128xf32>
      tpu.vector_store %arg15[%c0_127, %c0_128], %239 {strides = array<i32>} : memref<128x128xf32, #tpu.memory_space<vmem>>, vector<128x128xf32>,
    } else {
    }
    %c0 = arith.constant 0 : index
    %c0_1 = arith.constant 0 : index
    %3 = vector.load %arg15[%c0, %c0_1] : memref<128x128xf32, #tpu.memory_space<vmem>>, vector<128x128xf32>
    %4 = arith.index_cast %arg1 : i32 to index
    %5 = memref.load %arg2[%4] : memref<3xf32, #tpu.memory_space<smem>>
    %cst = arith.constant 0.333333343 : f32
    %6 = arith.mulf %5, %cst : f32
    %cst_2 = arith.constant 1.250000e-01 : f32
    %7 = arith.mulf %5, %cst_2 : f32
    %8 = arith.truncf %3 : vector<128x128xf32> to vector<128x128xbf16>
    %c0_3 = arith.constant 0 : index
    %c0_4 = arith.constant 0 : index
    %9 = vector.load %arg4[%c0_3, %c0_4] : memref<128x128xbf16, #tpu.memory_space<vmem>>, vector<128x128xbf16>
    %cst_5 = arith.constant dense<0.000000e+00> : vector<128x128xf32>
    %10 = tpu.matmul %8, %9, %cst_5 {dimension_numbers = #tpu.dot_dimension_numbers<[1], [0], [0], [1], [0, 0, 1, 1], [], []>} : vector<128x128xbf16>, vector<128x128xbf16>, vector<128x128xf32> -> vector<128x128xf32>
    %c0_6 = arith.constant 0 : index
    %c0_7 = arith.constant 0 : index
    %11 = vector.load %arg5[%c0_6, %c0_7] : memref<1x128xf32, #tpu.memory_space<vmem>>, vector<1x128xf32>
    %12 = vector.broadcast %11 : vector<1x128xf32> to vector<128x128xf32>
    %13 = arith.addf %10, %12 : vector<128x128xf32>
    %cst_8 = arith.constant 2.000000e+01 : f32
    %14 = vector.broadcast %cst_8 : f32 to vector<128x128xf32>
    %15 = arith.cmpf ogt, %13, %14 : vector<128x128xf32>
    %16 = math.exp %13 : vector<128x128xf32>
    %17 = math.log1p %16 : vector<128x128xf32>
    %18 = arith.select %15, %13, %17 : vector<128x128xi1>, vector<128x128xf32>
    %19 = arith.truncf %18 : vector<128x128xf32> to vector<128x128xbf16>
    %c0_9 = arith.constant 0 : index
    %c0_10 = arith.constant 0 : index
    %20 = vector.load %arg6[%c0_9, %c0_10] : memref<128x128xbf16, #tpu.memory_space<vmem>>, vector<128x128xbf16>
    %cst_11 = arith.constant dense<0.000000e+00> : vector<128x128xf32>
    %21 = tpu.matmul %19, %20, %cst_11 {dimension_numbers = #tpu.dot_dimension_numbers<[1], [0], [0], [1], [0, 0, 1, 1], [], []>} : vector<128x128xbf16>, vector<128x128xbf16>, vector<128x128xf32> -> vector<128x128xf32>
    %c0_12 = arith.constant 0 : index
    %c0_13 = arith.constant 0 : index
    %22 = vector.load %arg7[%c0_12, %c0_13] : memref<1x128xf32, #tpu.memory_space<vmem>>, vector<1x128xf32>
    %23 = vector.broadcast %22 : vector<1x128xf32> to vector<128x128xf32>
    %24 = arith.addf %21, %23 : vector<128x128xf32>
    %cst_14 = arith.constant 2.000000e+01 : f32
    %25 = vector.broadcast %cst_14 : f32 to vector<128x128xf32>
    %26 = arith.cmpf ogt, %24, %25 : vector<128x128xf32>
    %27 = math.exp %24 : vector<128x128xf32>
    %28 = math.log1p %27 : vector<128x128xf32>
    %29 = arith.select %26, %24, %28 : vector<128x128xi1>, vector<128x128xf32>
    %30 = arith.truncf %29 : vector<128x128xf32> to vector<128x128xbf16>
    %31 = tpu.concatenate %8, %30 in 1 : vector<128x128xbf16>, vector<128x128xbf16> -> vector<128x256xbf16>
    %c0_15 = arith.constant 0 : index
    %c0_16 = arith.constant 0 : index
    %32 = vector.load %arg8[%c0_15, %c0_16] : memref<256x128xbf16, #tpu.memory_space<vmem>>, vector<256x128xbf16>
    %cst_17 = arith.constant dense<0.000000e+00> : vector<128x128xf32>
    %33 = tpu.matmul %31, %32, %cst_17 {dimension_numbers = #tpu.dot_dimension_numbers<[1], [0], [0], [1], [0, 0, 1, 1], [], []>} : vector<128x256xbf16>, vector<256x128xbf16>, vector<128x128xf32> -> vector<128x128xf32>
    %c0_18 = arith.constant 0 : index
    %c0_19 = arith.constant 0 : index
    %34 = vector.load %arg9[%c0_18, %c0_19] : memref<1x128xf32, #tpu.memory_space<vmem>>, vector<1x128xf32>
    %35 = vector.broadcast %34 : vector<1x128xf32> to vector<128x128xf32>
    %36 = arith.addf %33, %35 : vector<128x128xf32>
    %cst_20 = arith.constant 2.000000e+01 : f32
    %37 = vector.broadcast %cst_20 : f32 to vector<128x128xf32>
    %38 = arith.cmpf ogt, %36, %37 : vector<128x128xf32>
    %39 = math.exp %36 : vector<128x128xf32>
    %40 = math.log1p %39 : vector<128x128xf32>
    %41 = arith.select %38, %36, %40 : vector<128x128xi1>, vector<128x128xf32>
    %42 = arith.truncf %41 : vector<128x128xf32> to vector<128x128xbf16>
    %c0_21 = arith.constant 0 : index
    %c0_22 = arith.constant 0 : index
    %43 = vector.load %arg10[%c0_21, %c0_22] : memref<128x128xbf16, #tpu.memory_space<vmem>>, vector<128x128xbf16>
    %cst_23 = arith.constant dense<0.000000e+00> : vector<128x128xf32>
    %44 = tpu.matmul %42, %43, %cst_23 {dimension_numbers = #tpu.dot_dimension_numbers<[1], [0], [0], [1], [0, 0, 1, 1], [], []>} : vector<128x128xbf16>, vector<128x128xbf16>, vector<128x128xf32> -> vector<128x128xf32>
    %c0_24 = arith.constant 0 : index
    %c0_25 = arith.constant 0 : index
    %45 = vector.load %arg11[%c0_24, %c0_25] : memref<1x128xf32, #tpu.memory_space<vmem>>, vector<1x128xf32>
    %46 = vector.broadcast %45 : vector<1x128xf32> to vector<128x128xf32>
    %47 = arith.addf %44, %46 : vector<128x128xf32>
    %cst_26 = arith.constant 2.000000e+01 : f32
    %48 = vector.broadcast %cst_26 : f32 to vector<128x128xf32>
    %49 = arith.cmpf ogt, %47, %48 : vector<128x128xf32>
    %50 = math.exp %47 : vector<128x128xf32>
    %51 = math.log1p %50 : vector<128x128xf32>
    %52 = arith.select %49, %47, %51 : vector<128x128xi1>, vector<128x128xf32>
    %53 = arith.truncf %52 : vector<128x128xf32> to vector<128x128xbf16>
    %c0_27 = arith.constant 0 : index
    %c0_28 = arith.constant 0 : index
    %54 = vector.load %arg12[%c0_27, %c0_28] : memref<128x128xbf16, #tpu.memory_space<vmem>>, vector<128x128xbf16>
    %cst_29 = arith.constant dense<0.000000e+00> : vector<128x128xf32>
    %55 = tpu.matmul %53, %54, %cst_29 {dimension_numbers = #tpu.dot_dimension_numbers<[1], [0], [0], [1], [0, 0, 1, 1], [], []>} : vector<128x128xbf16>, vector<128x128xbf16>, vector<128x128xf32> -> vector<128x128xf32>
    %c0_30 = arith.constant 0 : index
    %c0_31 = arith.constant 0 : index
    %56 = vector.load %arg13[%c0_30, %c0_31] : memref<1x128xf32, #tpu.memory_space<vmem>>, vector<1x128xf32>
    %57 = vector.broadcast %56 : vector<1x128xf32> to vector<128x128xf32>
    %58 = arith.addf %55, %57 : vector<128x128xf32>
    %59 = vector.broadcast %6 : f32 to vector<128x128xf32>
    %60 = arith.mulf %59, %58 : vector<128x128xf32>
    %61 = arith.addf %3, %60 : vector<128x128xf32>
    %62 = arith.truncf %61 : vector<128x128xf32> to vector<128x128xbf16>
    %c0_32 = arith.constant 0 : index
    %c0_33 = arith.constant 0 : index
    %63 = vector.load %arg4[%c0_32, %c0_33] : memref<128x128xbf16, #tpu.memory_space<vmem>>, vector<128x128xbf16>
    %cst_34 = arith.constant dense<0.000000e+00> : vector<128x128xf32>
    %64 = tpu.matmul %62, %63, %cst_34 {dimension_numbers = #tpu.dot_dimension_numbers<[1], [0], [0], [1], [0, 0, 1, 1], [], []>} : vector<128x128xbf16>, vector<128x128xbf16>, vector<128x128xf32> -> vector<128x128xf32>
    %c0_35 = arith.constant 0 : index
    %c0_36 = arith.constant 0 : index
    %65 = vector.load %arg5[%c0_35, %c0_36] : memref<1x128xf32, #tpu.memory_space<vmem>>, vector<1x128xf32>
    %66 = vector.broadcast %65 : vector<1x128xf32> to vector<128x128xf32>
    %67 = arith.addf %64, %66 : vector<128x128xf32>
    %cst_37 = arith.constant 2.000000e+01 : f32
    %68 = vector.broadcast %cst_37 : f32 to vector<128x128xf32>
    %69 = arith.cmpf ogt, %67, %68 : vector<128x128xf32>
    %70 = math.exp %67 : vector<128x128xf32>
    %71 = math.log1p %70 : vector<128x128xf32>
    %72 = arith.select %69, %67, %71 : vector<128x128xi1>, vector<128x128xf32>
    %73 = arith.truncf %72 : vector<128x128xf32> to vector<128x128xbf16>
    %c0_38 = arith.constant 0 : index
    %c0_39 = arith.constant 0 : index
    %74 = vector.load %arg6[%c0_38, %c0_39] : memref<128x128xbf16, #tpu.memory_space<vmem>>, vector<128x128xbf16>
    %cst_40 = arith.constant dense<0.000000e+00> : vector<128x128xf32>
    %75 = tpu.matmul %73, %74, %cst_40 {dimension_numbers = #tpu.dot_dimension_numbers<[1], [0], [0], [1], [0, 0, 1, 1], [], []>} : vector<128x128xbf16>, vector<128x128xbf16>, vector<128x128xf32> -> vector<128x128xf32>
    %c0_41 = arith.constant 0 : index
    %c0_42 = arith.constant 0 : index
    %76 = vector.load %arg7[%c0_41, %c0_42] : memref<1x128xf32, #tpu.memory_space<vmem>>, vector<1x128xf32>
    %77 = vector.broadcast %76 : vector<1x128xf32> to vector<128x128xf32>
    %78 = arith.addf %75, %77 : vector<128x128xf32>
    %cst_43 = arith.constant 2.000000e+01 : f32
    %79 = vector.broadcast %cst_43 : f32 to vector<128x128xf32>
    %80 = arith.cmpf ogt, %78, %79 : vector<128x128xf32>
    %81 = math.exp %78 : vector<128x128xf32>
    %82 = math.log1p %81 : vector<128x128xf32>
    %83 = arith.select %80, %78, %82 : vector<128x128xi1>, vector<128x128xf32>
    %84 = arith.truncf %83 : vector<128x128xf32> to vector<128x128xbf16>
    %85 = tpu.concatenate %62, %84 in 1 : vector<128x128xbf16>, vector<128x128xbf16> -> vector<128x256xbf16>
    %c0_44 = arith.constant 0 : index
    %c0_45 = arith.constant 0 : index
    %86 = vector.load %arg8[%c0_44, %c0_45] : memref<256x128xbf16, #tpu.memory_space<vmem>>, vector<256x128xbf16>
    %cst_46 = arith.constant dense<0.000000e+00> : vector<128x128xf32>
    %87 = tpu.matmul %85, %86, %cst_46 {dimension_numbers = #tpu.dot_dimension_numbers<[1], [0], [0], [1], [0, 0, 1, 1], [], []>} : vector<128x256xbf16>, vector<256x128xbf16>, vector<128x128xf32> -> vector<128x128xf32>
    %c0_47 = arith.constant 0 : index
    %c0_48 = arith.constant 0 : index
    %88 = vector.load %arg9[%c0_47, %c0_48] : memref<1x128xf32, #tpu.memory_space<vmem>>, vector<1x128xf32>
    %89 = vector.broadcast %88 : vector<1x128xf32> to vector<128x128xf32>
    %90 = arith.addf %87, %89 : vector<128x128xf32>
    %cst_49 = arith.constant 2.000000e+01 : f32
    %91 = vector.broadcast %cst_49 : f32 to vector<128x128xf32>
    %92 = arith.cmpf ogt, %90, %91 : vector<128x128xf32>
    %93 = math.exp %90 : vector<128x128xf32>
    %94 = math.log1p %93 : vector<128x128xf32>
    %95 = arith.select %92, %90, %94 : vector<128x128xi1>, vector<128x128xf32>
    %96 = arith.truncf %95 : vector<128x128xf32> to vector<128x128xbf16>
    %c0_50 = arith.constant 0 : index
    %c0_51 = arith.constant 0 : index
    %97 = vector.load %arg10[%c0_50, %c0_51] : memref<128x128xbf16, #tpu.memory_space<vmem>>, vector<128x128xbf16>
    %cst_52 = arith.constant dense<0.000000e+00> : vector<128x128xf32>
    %98 = tpu.matmul %96, %97, %cst_52 {dimension_numbers = #tpu.dot_dimension_numbers<[1], [0], [0], [1], [0, 0, 1, 1], [], []>} : vector<128x128xbf16>, vector<128x128xbf16>, vector<128x128xf32> -> vector<128x128xf32>
    %c0_53 = arith.constant 0 : index
    %c0_54 = arith.constant 0 : index
    %99 = vector.load %arg11[%c0_53, %c0_54] : memref<1x128xf32, #tpu.memory_space<vmem>>, vector<1x128xf32>
    %100 = vector.broadcast %99 : vector<1x128xf32> to vector<128x128xf32>
    %101 = arith.addf %98, %100 : vector<128x128xf32>
    %cst_55 = arith.constant 2.000000e+01 : f32
    %102 = vector.broadcast %cst_55 : f32 to vector<128x128xf32>
    %103 = arith.cmpf ogt, %101, %102 : vector<128x128xf32>
    %104 = math.exp %101 : vector<128x128xf32>
    %105 = math.log1p %104 : vector<128x128xf32>
    %106 = arith.select %103, %101, %105 : vector<128x128xi1>, vector<128x128xf32>
    %107 = arith.truncf %106 : vector<128x128xf32> to vector<128x128xbf16>
    %c0_56 = arith.constant 0 : index
    %c0_57 = arith.constant 0 : index
    %108 = vector.load %arg12[%c0_56, %c0_57] : memref<128x128xbf16, #tpu.memory_space<vmem>>, vector<128x128xbf16>
    %cst_58 = arith.constant dense<0.000000e+00> : vector<128x128xf32>
    %109 = tpu.matmul %107, %108, %cst_58 {dimension_numbers = #tpu.dot_dimension_numbers<[1], [0], [0], [1], [0, 0, 1, 1], [], []>} : vector<128x128xbf16>, vector<128x128xbf16>, vector<128x128xf32> -> vector<128x128xf32>
    %c0_59 = arith.constant 0 : index
    %c0_60 = arith.constant 0 : index
    %110 = vector.load %arg13[%c0_59, %c0_60] : memref<1x128xf32, #tpu.memory_space<vmem>>, vector<1x128xf32>
    %111 = vector.broadcast %110 : vector<1x128xf32> to vector<128x128xf32>
    %112 = arith.addf %109, %111 : vector<128x128xf32>
    %113 = vector.broadcast %5 : f32 to vector<128x128xf32>
    %114 = arith.mulf %113, %112 : vector<128x128xf32>
    %115 = arith.addf %3, %114 : vector<128x128xf32>
    %116 = vector.broadcast %6 : f32 to vector<128x128xf32>
    %117 = arith.mulf %116, %58 : vector<128x128xf32>
    %118 = arith.subf %115, %117 : vector<128x128xf32>
    %119 = arith.truncf %118 : vector<128x128xf32> to vector<128x128xbf16>
    %c0_61 = arith.constant 0 : index
    %c0_62 = arith.constant 0 : index
    %120 = vector.load %arg4[%c0_61, %c0_62] : memref<128x128xbf16, #tpu.memory_space<vmem>>, vector<128x128xbf16>
    %cst_63 = arith.constant dense<0.000000e+00> : vector<128x128xf32>
    %121 = tpu.matmul %119, %120, %cst_63 {dimension_numbers = #tpu.dot_dimension_numbers<[1], [0], [0], [1], [0, 0, 1, 1], [], []>} : vector<128x128xbf16>, vector<128x128xbf16>, vector<128x128xf32> -> vector<128x128xf32>
    %c0_64 = arith.constant 0 : index
    %c0_65 = arith.constant 0 : index
    %122 = vector.load %arg5[%c0_64, %c0_65] : memref<1x128xf32, #tpu.memory_space<vmem>>, vector<1x128xf32>
    %123 = vector.broadcast %122 : vector<1x128xf32> to vector<128x128xf32>
    %124 = arith.addf %121, %123 : vector<128x128xf32>
    %cst_66 = arith.constant 2.000000e+01 : f32
    %125 = vector.broadcast %cst_66 : f32 to vector<128x128xf32>
    %126 = arith.cmpf ogt, %124, %125 : vector<128x128xf32>
    %127 = math.exp %124 : vector<128x128xf32>
    %128 = math.log1p %127 : vector<128x128xf32>
    %129 = arith.select %126, %124, %128 : vector<128x128xi1>, vector<128x128xf32>
    %130 = arith.truncf %129 : vector<128x128xf32> to vector<128x128xbf16>
    %c0_67 = arith.constant 0 : index
    %c0_68 = arith.constant 0 : index
    %131 = vector.load %arg6[%c0_67, %c0_68] : memref<128x128xbf16, #tpu.memory_space<vmem>>, vector<128x128xbf16>
    %cst_69 = arith.constant dense<0.000000e+00> : vector<128x128xf32>
    %132 = tpu.matmul %130, %131, %cst_69 {dimension_numbers = #tpu.dot_dimension_numbers<[1], [0], [0], [1], [0, 0, 1, 1], [], []>} : vector<128x128xbf16>, vector<128x128xbf16>, vector<128x128xf32> -> vector<128x128xf32>
    %c0_70 = arith.constant 0 : index
    %c0_71 = arith.constant 0 : index
    %133 = vector.load %arg7[%c0_70, %c0_71] : memref<1x128xf32, #tpu.memory_space<vmem>>, vector<1x128xf32>
    %134 = vector.broadcast %133 : vector<1x128xf32> to vector<128x128xf32>
    %135 = arith.addf %132, %134 : vector<128x128xf32>
    %cst_72 = arith.constant 2.000000e+01 : f32
    %136 = vector.broadcast %cst_72 : f32 to vector<128x128xf32>
    %137 = arith.cmpf ogt, %135, %136 : vector<128x128xf32>
    %138 = math.exp %135 : vector<128x128xf32>
    %139 = math.log1p %138 : vector<128x128xf32>
    %140 = arith.select %137, %135, %139 : vector<128x128xi1>, vector<128x128xf32>
    %141 = arith.truncf %140 : vector<128x128xf32> to vector<128x128xbf16>
    %142 = tpu.concatenate %119, %141 in 1 : vector<128x128xbf16>, vector<128x128xbf16> -> vector<128x256xbf16>
    %c0_73 = arith.constant 0 : index
    %c0_74 = arith.constant 0 : index
    %143 = vector.load %arg8[%c0_73, %c0_74] : memref<256x128xbf16, #tpu.memory_space<vmem>>, vector<256x128xbf16>
    %cst_75 = arith.constant dense<0.000000e+00> : vector<128x128xf32>
    %144 = tpu.matmul %142, %143, %cst_75 {dimension_numbers = #tpu.dot_dimension_numbers<[1], [0], [0], [1], [0, 0, 1, 1], [], []>} : vector<128x256xbf16>, vector<256x128xbf16>, vector<128x128xf32> -> vector<128x128xf32>
    %c0_76 = arith.constant 0 : index
    %c0_77 = arith.constant 0 : index
    %145 = vector.load %arg9[%c0_76, %c0_77] : memref<1x128xf32, #tpu.memory_space<vmem>>, vector<1x128xf32>
    %146 = vector.broadcast %145 : vector<1x128xf32> to vector<128x128xf32>
    %147 = arith.addf %144, %146 : vector<128x128xf32>
    %cst_78 = arith.constant 2.000000e+01 : f32
    %148 = vector.broadcast %cst_78 : f32 to vector<128x128xf32>
    %149 = arith.cmpf ogt, %147, %148 : vector<128x128xf32>
    %150 = math.exp %147 : vector<128x128xf32>
    %151 = math.log1p %150 : vector<128x128xf32>
    %152 = arith.select %149, %147, %151 : vector<128x128xi1>, vector<128x128xf32>
    %153 = arith.truncf %152 : vector<128x128xf32> to vector<128x128xbf16>
    %c0_79 = arith.constant 0 : index
    %c0_80 = arith.constant 0 : index
    %154 = vector.load %arg10[%c0_79, %c0_80] : memref<128x128xbf16, #tpu.memory_space<vmem>>, vector<128x128xbf16>
    %cst_81 = arith.constant dense<0.000000e+00> : vector<128x128xf32>
    %155 = tpu.matmul %153, %154, %cst_81 {dimension_numbers = #tpu.dot_dimension_numbers<[1], [0], [0], [1], [0, 0, 1, 1], [], []>} : vector<128x128xbf16>, vector<128x128xbf16>, vector<128x128xf32> -> vector<128x128xf32>
    %c0_82 = arith.constant 0 : index
    %c0_83 = arith.constant 0 : index
    %156 = vector.load %arg11[%c0_82, %c0_83] : memref<1x128xf32, #tpu.memory_space<vmem>>, vector<1x128xf32>
    %157 = vector.broadcast %156 : vector<1x128xf32> to vector<128x128xf32>
    %158 = arith.addf %155, %157 : vector<128x128xf32>
    %cst_84 = arith.constant 2.000000e+01 : f32
    %159 = vector.broadcast %cst_84 : f32 to vector<128x128xf32>
    %160 = arith.cmpf ogt, %158, %159 : vector<128x128xf32>
    %161 = math.exp %158 : vector<128x128xf32>
    %162 = math.log1p %161 : vector<128x128xf32>
    %163 = arith.select %160, %158, %162 : vector<128x128xi1>, vector<128x128xf32>
    %164 = arith.truncf %163 : vector<128x128xf32> to vector<128x128xbf16>
    %c0_85 = arith.constant 0 : index
    %c0_86 = arith.constant 0 : index
    %165 = vector.load %arg12[%c0_85, %c0_86] : memref<128x128xbf16, #tpu.memory_space<vmem>>, vector<128x128xbf16>
    %cst_87 = arith.constant dense<0.000000e+00> : vector<128x128xf32>
    %166 = tpu.matmul %164, %165, %cst_87 {dimension_numbers = #tpu.dot_dimension_numbers<[1], [0], [0], [1], [0, 0, 1, 1], [], []>} : vector<128x128xbf16>, vector<128x128xbf16>, vector<128x128xf32> -> vector<128x128xf32>
    %c0_88 = arith.constant 0 : index
    %c0_89 = arith.constant 0 : index
    %167 = vector.load %arg13[%c0_88, %c0_89] : memref<1x128xf32, #tpu.memory_space<vmem>>, vector<1x128xf32>
    %168 = vector.broadcast %167 : vector<1x128xf32> to vector<128x128xf32>
    %169 = arith.addf %166, %168 : vector<128x128xf32>
    %170 = arith.subf %58, %112 : vector<128x128xf32>
    %171 = arith.addf %170, %169 : vector<128x128xf32>
    %172 = vector.broadcast %5 : f32 to vector<128x128xf32>
    %173 = arith.mulf %172, %171 : vector<128x128xf32>
    %174 = arith.addf %3, %173 : vector<128x128xf32>
    %175 = arith.truncf %174 : vector<128x128xf32> to vector<128x128xbf16>
    %c0_90 = arith.constant 0 : index
    %c0_91 = arith.constant 0 : index
    %176 = vector.load %arg4[%c0_90, %c0_91] : memref<128x128xbf16, #tpu.memory_space<vmem>>, vector<128x128xbf16>
    %cst_92 = arith.constant dense<0.000000e+00> : vector<128x128xf32>
    %177 = tpu.matmul %175, %176, %cst_92 {dimension_numbers = #tpu.dot_dimension_numbers<[1], [0], [0], [1], [0, 0, 1, 1], [], []>} : vector<128x128xbf16>, vector<128x128xbf16>, vector<128x128xf32> -> vector<128x128xf32>
    %c0_93 = arith.constant 0 : index
    %c0_94 = arith.constant 0 : index
    %178 = vector.load %arg5[%c0_93, %c0_94] : memref<1x128xf32, #tpu.memory_space<vmem>>, vector<1x128xf32>
    %179 = vector.broadcast %178 : vector<1x128xf32> to vector<128x128xf32>
    %180 = arith.addf %177, %179 : vector<128x128xf32>
    %cst_95 = arith.constant 2.000000e+01 : f32
    %181 = vector.broadcast %cst_95 : f32 to vector<128x128xf32>
    %182 = arith.cmpf ogt, %180, %181 : vector<128x128xf32>
    %183 = math.exp %180 : vector<128x128xf32>
    %184 = math.log1p %183 : vector<128x128xf32>
    %185 = arith.select %182, %180, %184 : vector<128x128xi1>, vector<128x128xf32>
    %186 = arith.truncf %185 : vector<128x128xf32> to vector<128x128xbf16>
    %c0_96 = arith.constant 0 : index
    %c0_97 = arith.constant 0 : index
    %187 = vector.load %arg6[%c0_96, %c0_97] : memref<128x128xbf16, #tpu.memory_space<vmem>>, vector<128x128xbf16>
    %cst_98 = arith.constant dense<0.000000e+00> : vector<128x128xf32>
    %188 = tpu.matmul %186, %187, %cst_98 {dimension_numbers = #tpu.dot_dimension_numbers<[1], [0], [0], [1], [0, 0, 1, 1], [], []>} : vector<128x128xbf16>, vector<128x128xbf16>, vector<128x128xf32> -> vector<128x128xf32>
    %c0_99 = arith.constant 0 : index
    %c0_100 = arith.constant 0 : index
    %189 = vector.load %arg7[%c0_99, %c0_100] : memref<1x128xf32, #tpu.memory_space<vmem>>, vector<1x128xf32>
    %190 = vector.broadcast %189 : vector<1x128xf32> to vector<128x128xf32>
    %191 = arith.addf %188, %190 : vector<128x128xf32>
    %cst_101 = arith.constant 2.000000e+01 : f32
    %192 = vector.broadcast %cst_101 : f32 to vector<128x128xf32>
    %193 = arith.cmpf ogt, %191, %192 : vector<128x128xf32>
    %194 = math.exp %191 : vector<128x128xf32>
    %195 = math.log1p %194 : vector<128x128xf32>
    %196 = arith.select %193, %191, %195 : vector<128x128xi1>, vector<128x128xf32>
    %197 = arith.truncf %196 : vector<128x128xf32> to vector<128x128xbf16>
    %198 = tpu.concatenate %175, %197 in 1 : vector<128x128xbf16>, vector<128x128xbf16> -> vector<128x256xbf16>
    %c0_102 = arith.constant 0 : index
    %c0_103 = arith.constant 0 : index
    %199 = vector.load %arg8[%c0_102, %c0_103] : memref<256x128xbf16, #tpu.memory_space<vmem>>, vector<256x128xbf16>
    %cst_104 = arith.constant dense<0.000000e+00> : vector<128x128xf32>
    %200 = tpu.matmul %198, %199, %cst_104 {dimension_numbers = #tpu.dot_dimension_numbers<[1], [0], [0], [1], [0, 0, 1, 1], [], []>} : vector<128x256xbf16>, vector<256x128xbf16>, vector<128x128xf32> -> vector<128x128xf32>
    %c0_105 = arith.constant 0 : index
    %c0_106 = arith.constant 0 : index
    %201 = vector.load %arg9[%c0_105, %c0_106] : memref<1x128xf32, #tpu.memory_space<vmem>>, vector<1x128xf32>
    %202 = vector.broadcast %201 : vector<1x128xf32> to vector<128x128xf32>
    %203 = arith.addf %200, %202 : vector<128x128xf32>
    %cst_107 = arith.constant 2.000000e+01 : f32
    %204 = vector.broadcast %cst_107 : f32 to vector<128x128xf32>
    %205 = arith.cmpf ogt, %203, %204 : vector<128x128xf32>
    %206 = math.exp %203 : vector<128x128xf32>
    %207 = math.log1p %206 : vector<128x128xf32>
    %208 = arith.select %205, %203, %207 : vector<128x128xi1>, vector<128x128xf32>
    %209 = arith.truncf %208 : vector<128x128xf32> to vector<128x128xbf16>
    %c0_108 = arith.constant 0 : index
    %c0_109 = arith.constant 0 : index
    %210 = vector.load %arg10[%c0_108, %c0_109] : memref<128x128xbf16, #tpu.memory_space<vmem>>, vector<128x128xbf16>
    %cst_110 = arith.constant dense<0.000000e+00> : vector<128x128xf32>
    %211 = tpu.matmul %209, %210, %cst_110 {dimension_numbers = #tpu.dot_dimension_numbers<[1], [0], [0], [1], [0, 0, 1, 1], [], []>} : vector<128x128xbf16>, vector<128x128xbf16>, vector<128x128xf32> -> vector<128x128xf32>
    %c0_111 = arith.constant 0 : index
    %c0_112 = arith.constant 0 : index
    %212 = vector.load %arg11[%c0_111, %c0_112] : memref<1x128xf32, #tpu.memory_space<vmem>>, vector<1x128xf32>
    %213 = vector.broadcast %212 : vector<1x128xf32> to vector<128x128xf32>
    %214 = arith.addf %211, %213 : vector<128x128xf32>
    %cst_113 = arith.constant 2.000000e+01 : f32
    %215 = vector.broadcast %cst_113 : f32 to vector<128x128xf32>
    %216 = arith.cmpf ogt, %214, %215 : vector<128x128xf32>
    %217 = math.exp %214 : vector<128x128xf32>
    %218 = math.log1p %217 : vector<128x128xf32>
    %219 = arith.select %216, %214, %218 : vector<128x128xi1>, vector<128x128xf32>
    %220 = arith.truncf %219 : vector<128x128xf32> to vector<128x128xbf16>
    %c0_114 = arith.constant 0 : index
    %c0_115 = arith.constant 0 : index
    %221 = vector.load %arg12[%c0_114, %c0_115] : memref<128x128xbf16, #tpu.memory_space<vmem>>, vector<128x128xbf16>
    %cst_116 = arith.constant dense<0.000000e+00> : vector<128x128xf32>
    %222 = tpu.matmul %220, %221, %cst_116 {dimension_numbers = #tpu.dot_dimension_numbers<[1], [0], [0], [1], [0, 0, 1, 1], [], []>} : vector<128x128xbf16>, vector<128x128xbf16>, vector<128x128xf32> -> vector<128x128xf32>
    %c0_117 = arith.constant 0 : index
    %c0_118 = arith.constant 0 : index
    %223 = vector.load %arg13[%c0_117, %c0_118] : memref<1x128xf32, #tpu.memory_space<vmem>>, vector<1x128xf32>
    %224 = vector.broadcast %223 : vector<1x128xf32> to vector<128x128xf32>
    %225 = arith.addf %222, %224 : vector<128x128xf32>
    %226 = arith.addf %112, %169 : vector<128x128xf32>
    %cst_119 = arith.constant 3.000000e+00 : f32
    %227 = vector.broadcast %cst_119 : f32 to vector<128x128xf32>
    %228 = arith.mulf %227, %226 : vector<128x128xf32>
    %229 = arith.addf %58, %228 : vector<128x128xf32>
    %230 = arith.addf %229, %225 : vector<128x128xf32>
    %231 = vector.broadcast %7 : f32 to vector<128x128xf32>
    %232 = arith.mulf %231, %230 : vector<128x128xf32>
    %233 = arith.addf %3, %232 : vector<128x128xf32>
    %c0_120 = arith.constant 0 : index
    %c0_121 = arith.constant 0 : index
    %234 = vector.load %arg15[%c0_120, %c0_121] : memref<128x128xf32, #tpu.memory_space<vmem>>, vector<128x128xf32>
    tpu.vector_store %arg15[%c0_120, %c0_121], %233 {strides = array<i32>} : memref<128x128xf32, #tpu.memory_space<vmem>>, vector<128x128xf32>,
    %235 = vector.extract_strided_slice %233 {offsets = [0, 0], sizes = [128, 8], strides = [1, 1]} : vector<128x128xf32> to vector<128x8xf32>
    %c0_122 = arith.constant 0 : index
    %c0_123 = arith.constant 0 : index
    %c0_124 = arith.constant 0 : index
    %236 = vector.load %arg14[%c0_122, %c0_123, %c0_124] : memref<1x128x8xf32, #tpu.memory_space<vmem>>, vector<1x128x8xf32>
    %237 = vector.shape_cast %236 : vector<1x128x8xf32> to vector<128x8xf32>
    %238 = vector.shape_cast %235 : vector<128x8xf32> to vector<1x128x8xf32>
    tpu.vector_store %arg14[%c0_122, %c0_123, %c0_124], %238 {strides = array<i32>} : memref<1x128x8xf32, #tpu.memory_space<vmem>>, vector<1x128x8xf32>,
    return
  }
  func.func @transform_0(%arg0: i32, %arg1: i32, %arg2: memref<3xf32, #tpu.memory_space<smem>>) -> (i32, i32) {
    %c0_i32 = arith.constant 0 : i32
    %c0_i32_0 = arith.constant 0 : i32
    return %arg0, %c0_i32 : i32, i32
  }
  func.func @transform_1(%arg0: i32, %arg1: i32, %arg2: memref<3xf32, #tpu.memory_space<smem>>) -> (i32, i32) {
    %c0_i32 = arith.constant 0 : i32
    %c0_i32_0 = arith.constant 0 : i32
    %c0_i32_1 = arith.constant 0 : i32
    return %c0_i32, %c0_i32_0 : i32, i32
  }
  func.func @transform_2(%arg0: i32, %arg1: i32, %arg2: memref<3xf32, #tpu.memory_space<smem>>) -> (i32, i32) {
    %c0_i32 = arith.constant 0 : i32
    %c0_i32_0 = arith.constant 0 : i32
    %c0_i32_1 = arith.constant 0 : i32
    return %c0_i32, %c0_i32_0 : i32, i32
  }
  func.func @transform_3(%arg0: i32, %arg1: i32, %arg2: memref<3xf32, #tpu.memory_space<smem>>) -> (i32, i32) {
    %c0_i32 = arith.constant 0 : i32
    %c0_i32_0 = arith.constant 0 : i32
    %c0_i32_1 = arith.constant 0 : i32
    return %c0_i32, %c0_i32_0 : i32, i32
  }
  func.func @transform_4(%arg0: i32, %arg1: i32, %arg2: memref<3xf32, #tpu.memory_space<smem>>) -> (i32, i32) {
    %c0_i32 = arith.constant 0 : i32
    %c0_i32_0 = arith.constant 0 : i32
    %c0_i32_1 = arith.constant 0 : i32
    return %c0_i32, %c0_i32_0 : i32, i32
  }
  func.func @transform_5(%arg0: i32, %arg1: i32, %arg2: memref<3xf32, #tpu.memory_space<smem>>) -> (i32, i32) {
    %c0_i32 = arith.constant 0 : i32
    %c0_i32_0 = arith.constant 0 : i32
    %c0_i32_1 = arith.constant 0 : i32
    return %c0_i32, %c0_i32_0 : i32, i32
  }
  func.func @transform_6(%arg0: i32, %arg1: i32, %arg2: memref<3xf32, #tpu.memory_space<smem>>) -> (i32, i32) {
    %c0_i32 = arith.constant 0 : i32
    %c0_i32_0 = arith.constant 0 : i32
    %c0_i32_1 = arith.constant 0 : i32
    return %c0_i32, %c0_i32_0 : i32, i32
  }
  func.func @transform_7(%arg0: i32, %arg1: i32, %arg2: memref<3xf32, #tpu.memory_space<smem>>) -> (i32, i32) {
    %c0_i32 = arith.constant 0 : i32
    %c0_i32_0 = arith.constant 0 : i32
    %c0_i32_1 = arith.constant 0 : i32
    return %c0_i32, %c0_i32_0 : i32, i32
  }
  func.func @transform_8(%arg0: i32, %arg1: i32, %arg2: memref<3xf32, #tpu.memory_space<smem>>) -> (i32, i32) {
    %c0_i32 = arith.constant 0 : i32
    %c0_i32_0 = arith.constant 0 : i32
    %c0_i32_1 = arith.constant 0 : i32
    return %c0_i32, %c0_i32_0 : i32, i32
  }
  func.func @transform_9(%arg0: i32, %arg1: i32, %arg2: memref<3xf32, #tpu.memory_space<smem>>) -> (i32, i32) {
    %c0_i32 = arith.constant 0 : i32
    %c0_i32_0 = arith.constant 0 : i32
    %c0_i32_1 = arith.constant 0 : i32
    return %c0_i32, %c0_i32_0 : i32, i32
  }
  func.func @transform_10(%arg0: i32, %arg1: i32, %arg2: memref<3xf32, #tpu.memory_space<smem>>) -> (i32, i32) {
    %c0_i32 = arith.constant 0 : i32
    %c0_i32_0 = arith.constant 0 : i32
    %c0_i32_1 = arith.constant 0 : i32
    return %c0_i32, %c0_i32_0 : i32, i32
  }
  func.func @transform_11(%arg0: i32, %arg1: i32, %arg2: memref<3xf32, #tpu.memory_space<smem>>) -> (i32, i32, i32) {
    %c0_i32 = arith.constant 0 : i32
    %c0_i32_0 = arith.constant 0 : i32
    return %arg1, %arg0, %c0_i32 : i32, i32, i32
  }
}

</mosaic_0001>

<bundles_post_ra>
// kernel: _entire_model_forward.1
= control target key start
LH: loop header
LB: loop body
LE: loop exit
PB: predicated region body
PF: predicated region fallthrough
CT: control target
= control target key end

     0   :  { %s8094_s24 = smov [#allocation4]   ;;  %s10117_s0 = inlined_call_operand.vmem [shape: f32[3], index: 0, kind: input, shape index: {}]   ;;  %s10118_s1 = inlined_call_operand.vmem [shape: f32[128,128], index: 1, kind: input, shape index: {}]   ;;  %s10119_s2 = inlined_call_operand.vmem [shape: bf16[128,128], index: 2, kind: input, shape index: {}]   ;;  %s10120_s3 = inlined_call_operand.vmem [shape: f32[1,128], index: 3, kind: input, shape index: {}]   ;;  %s10121_s4 = inlined_call_operand.hbm [shape: bf16[128,128], index: 4, kind: input, shape index: {}]   ;;  %s10122_s5 = inlined_call_operand.vmem [shape: f32[1,128], index: 5, kind: input, shape index: {}]   ;;  %s10123_s6 = inlined_call_operand.vmem [shape: bf16[256,128], index: 6, kind: input, shape index: {}]   ;;  %s10124_s7 = inlined_call_operand.vmem [shape: f32[1,128], index: 7, kind: input, shape index: {}]   ;;  %s10125_s8 = inlined_call_operand.hbm [shape: bf16[128,128], index: 8, kind: input, shape index: {}]   ;;  %s10126_s9 = inlined_call_operand.vmem [shape: f32[1,128], index: 9, kind: input, shape index: {}]   ;;  %s10127_s10 = inlined_call_operand.hbm [shape: bf16[128,128], index: 10, kind: input, shape index: {}]   ;;  %s10128_s11 = inlined_call_operand.vmem [shape: f32[1,128], index: 11, kind: input, shape index: {}]   ;;  %s10129_s12 = inlined_call_operand.vmem [shape: f32[3,128,8], index: 12, kind: output, shape index: {}]  }
   0x1   :  { %10145 = sst [smem:[#allocation28_spill]] %s10125_s8  ;;  %s18_s23 = sshll.u32 %s10117_s0, 4  ;;  %s19_s23 = int_to_ptr.vmem [resolvable:$true] %s18_s23 }
   0x2   :  { %21 = dma.vmem_to_smem %s19_s23, 16, %s8094_s24, [#allocation3] }
   0x3   :  { %8072 = dma.done.wait [#allocation3], 16 }
   0x4   :  { %8073 = vsyncadd [#allocation3], 4294967280 }
   0x5   :  { %24 = sfence }
   0x6   :  { %25 = vsyncpa [#allocation6], 0 }
   0x7   :  { %26 = vsyncpa [#allocation8], 0  ;;  %s8168_s25 = smov 0   ;;  %s8170_s26 = smov 0  }
   0x8   :  { %s8172_s27 = smov 0  }
   0x9 LB: > { %10146 = sst [smem:[#allocation13_spill]] %s8088_s26  ;;  %s6433_s0 = sadd.s32 4294967295, %s8092_s27   ;;  %s8092_s27 = sphi %s8172_s27, %s32_s27   ;;  %s8088_s26 = sphi %s8170_s26, %s10182_s26   ;;  %s8084_s25 = sphi %s8168_s25, %s10181_s25  }
   0xa   : > { %p6435_p0 = scmp.ge.s32.totalorder %s8092_s27, 1  ;;  %p313_p1 = scmp.lt.s32.totalorder %s8092_s27, 4 }
   0xb   : > { %p8186_p2 = scmp.eq.s32.totalorder %s6433_s0, 0  ;;  %s10148_s8 = sld [smem:[#allocation28_spill]] }
   0xc   : > { %p8193_p3 = pnand %p6435_p0, %p313_p1  ;;  %s8095_s15 = smov [#allocation7]  }
   0xd   : > { %s364_s16 = sshll.u32 %s8095_s15, 4  ;;  %s41_s18 = sadd.s32 1, %s8088_s26  ;;  %s365_s16 = int_to_ptr.vmem [resolvable:$true] %s364_s16 }
   0xe   : > { %p6702_p4 = pneg %p8193_p3  ;;  %p42_p6 = scmp.ge.s32.totalorder %s41_s18, 3 }
   0xf   : > { %s8096_s19 = smov 64   ;;  %s8097_s20 = smov 4  }
  0x10   : > { %p8201_p5 = pnand %p8186_p2, %p6702_p4  ;;  %s10184_s18 = smov (%p42_p6, %s41_s18), 0 }
  0x11   : > { %s362_s13 = sshll.u32 %s10148_s8, 4  ;;  %s339_s23 = sshll.u32 %s10121_s4, 4  ;;  %s363_s13 = int_to_ptr.hbm [resolvable:$true] %s362_s13  ;;  %s340_s23 = int_to_ptr.hbm [resolvable:$true] %s339_s23 }
  0x12   : > { %6708 = dma.hbm_to_vmem [thread:$0]  (!%p8201_p5), %s363_s13, 1024, %s365_s16, [#allocation8], %s8096_s19, %s8096_s19, %s8097_s20  }
  0x13   : > { %s8098_s24 = smov [#allocation5]   ;;  %s379_s15 = sshll.u32 %s10127_s10, 4  ;;  %s380_s15 = int_to_ptr.hbm [resolvable:$true] %s379_s15 }
  0x14   : > { %s341_s0 = sshll.u32 %s8098_s24, 4  ;;  %s8099_s8 = smov [#allocation9]   ;;  %s342_s0 = int_to_ptr.vmem [resolvable:$true] %s341_s0 }
  0x15   : > { %6705 = dma.hbm_to_vmem [thread:$0]  (!%p8201_p5), %s340_s23, 1024, %s342_s0, [#allocation6], %s8096_s19, %s8096_s19, %s8097_s20  }
  0x16   : > { %s381_s26 = sshll.u32 %s8099_s8, 4  ;;  %400 = sbr.rel (%p8193_p3) target bundleno = 3421 (0xd5d), region = 64  ;;  %s382_s26 = int_to_ptr.vmem [resolvable:$true] %s381_s26 }
  0x17   : > { %6711 = dma.hbm_to_vmem [thread:$0]  (!%p8201_p5), %s380_s15, 1024, %s382_s26, [#allocation8], %s8096_s19, %s8096_s19, %s8097_s20  }
  0x1b   : > { %8075 = dma.done.wait (%p8186_p2), [#allocation6], 1024  }
  0x1c   : > { %8077 = vsyncadd (%p8186_p2), [#allocation6], 4294966272 }
  0x1d   : > { %8079 = dma.done.wait (%p8186_p2), [#allocation8], 2048  }
  0x1e   : > { %8081 = vsyncadd (%p8186_p2), [#allocation8], 4294965248  ;;  %p462_p7 = scmp.lt.s32.totalorder %s8084_s25, 2  ;;  %p6446_p8 = scmp.ne.s32.totalorder %s8084_s25, 0 }
  0x20   : > { %s463_s8 = scalar_select %p462_p7, %s8084_s25, 2 }
  0x21   : > { %474 = sbr.rel (%p6446_p8) target bundleno = 55 (0x37), region = 80 }
  0x22   : > { %s6641_s26 = sshll.u32 %s463_s8, 7 }
  0x23   : > { %s8235_s16 = scalar_lea.vmem %s10129_s12, %s6641_s26 }
  0x26   : > { %v475_v0 = vld [vmem:[%s10118_s1] sm:$0xff]  ;;  %v476_v1 = vld [vmem:[%s10118_s1 + $0x8] sm:$0xff]  ;;  %v477_v2 = vld [vmem:[%s10118_s1 + $0x10] sm:$0xff] }
  0x27   : > { %491 = vst [vmem:[#allocation2 + $0x30] sm:$0xff] %v475_v0  ;;  %v478_v3 = vld [vmem:[%s10118_s1 + $0x18] sm:$0xff]  ;;  %v479_v4 = vld [vmem:[%s10118_s1 + $0x20] sm:$0xff]  ;;  %v480_v5 = vld [vmem:[%s10118_s1 + $0x28] sm:$0xff] }
  0x28   : > { %492 = vst [vmem:[#allocation2] sm:$0xff] %v476_v1  ;;  %v481_v6 = vld [vmem:[%s10118_s1 + $0x30] sm:$0xff]  ;;  %v482_v7 = vld [vmem:[%s10118_s1 + $0x38] sm:$0xff]  ;;  %v483_v8 = vld [vmem:[%s10118_s1 + $0x40] sm:$0xff] }
  0x29   : > { %493 = vst [vmem:[#allocation2 + $0x58] sm:$0xff] %v477_v2  ;;  %v484_v9 = vld [vmem:[%s10118_s1 + $0x48] sm:$0xff]  ;;  %v485_v10 = vld [vmem:[%s10118_s1 + $0x50] sm:$0xff]  ;;  %v486_v11 = vld [vmem:[%s10118_s1 + $0x58] sm:$0xff] }
  0x2a   : > { %494 = vst [vmem:[#allocation2 + $0x18] sm:$0xff] %v478_v3  ;;  %v487_v12 = vld [vmem:[%s10118_s1 + $0x60] sm:$0xff]  ;;  %v488_v13 = vld [vmem:[%s10118_s1 + $0x68] sm:$0xff]  ;;  %v489_v14 = vld [vmem:[%s10118_s1 + $0x70] sm:$0xff] }
  0x2b   : > { %495 = vst [vmem:[#allocation2 + $0x50] sm:$0xff] %v479_v4  ;;  %v490_v15 = vld [vmem:[%s10118_s1 + $0x78] sm:$0xff] }
  0x2c   : > { %496 = vst [vmem:[#allocation2 + $0x68] sm:$0xff] %v480_v5 }
  0x2d   : > { %497 = vst [vmem:[#allocation2 + $0x8] sm:$0xff] %v481_v6 }
  0x2e   : > { %498 = vst [vmem:[#allocation2 + $0x48] sm:$0xff] %v482_v7 }
  0x2f   : > { %499 = vst [vmem:[#allocation2 + $0x40] sm:$0xff] %v483_v8 }
  0x30   : > { %500 = vst [vmem:[#allocation2 + $0x20] sm:$0xff] %v484_v9 }
  0x31   : > { %501 = vst [vmem:[#allocation2 + $0x10] sm:$0xff] %v485_v10 }
  0x32   : > { %502 = vst [vmem:[#allocation2 + $0x38] sm:$0xff] %v486_v11 }
  0x33   : > { %503 = vst [vmem:[#allocation2 + $0x60] sm:$0xff] %v487_v12 }
  0x34   : > { %504 = vst [vmem:[#allocation2 + $0x70] sm:$0xff] %v488_v13 }
  0x35   : > { %505 = vst [vmem:[#allocation2 + $0x78] sm:$0xff] %v489_v14 }
  0x36   : > { %506 = vst [vmem:[#allocation2 + $0x28] sm:$0xff] %v490_v15 }
  0x37 PF: > { %v8289_v16 = vld [vmem:[%s10119_s2 + $0x38] sm:$0xff]  ;;  %v8295_v17 = vld [vmem:[%s10119_s2 + $0x30] sm:$0xff]  ;;  %v8301_v18 = vld [vmem:[%s10119_s2 + $0x28] sm:$0xff]  ;;  %s8830_s0 = sld [smem:[#allocation4 + %s8084_s25]] }
  0x38   : > { %658 = vmatpush.bf16.msra.mxu0 %v8289_v16  ;;  %v8307_v19 = vld [vmem:[%s10119_s2 + $0x20] sm:$0xff]  ;;  %v8313_v20 = vld [vmem:[%s10119_s2 + $0x18] sm:$0xff]  ;;  %v8319_v21 = vld [vmem:[%s10119_s2 + $0x10] sm:$0xff] }
  0x39   : > { %v507_v22 = vld [vmem:[#allocation2 + $0x30] sm:$0xff]  ;;  %v508_v23 = vld [vmem:[#allocation2] sm:$0xff]  ;;  %v8325_v26 = vld [vmem:[%s10119_s2 + $0x8] sm:$0xff] }
  0x3a   : > { %v526_v24 = vpack.c.bf16 %v507_v22, %v507_v22  ;;  %v527_v25 = vpack.c.bf16 %v508_v23, %v508_v23  ;;  %v8331_v29 = vld [vmem:[%s10119_s2] sm:$0xff]  ;;  %v509_v31 = vld [vmem:[#allocation2 + $0x58] sm:$0xff]  ;;  %v511_v38 = vld [vmem:[#allocation2 + $0x50] sm:$0xff] }
  0x3b   : > { %v510_v32 = vld [vmem:[#allocation2 + $0x18] sm:$0xff]  ;;  %v528_v33 = vpack.c.bf16 %v509_v31, %v509_v31  ;;  %v512_v39 = vld [vmem:[#allocation2 + $0x68] sm:$0xff]  ;;  %v530_v40 = vpack.c.bf16 %v511_v38, %v511_v38  ;;  %v515_v52 = vld [vmem:[#allocation2 + $0x40] sm:$0xff] }
  0x3c   : > { %659 = vmatpush.bf16.msra.mxu0 %v8295_v17  ;;  %v578_v27 = vunpack.c.l.b16 %v526_v24  ;;  %v579_v28 = vunpack.c.l.b16 %v527_v25  ;;  %v529_v34 = vpack.c.bf16 %v510_v32, %v510_v32  ;;  %v531_v41 = vpack.c.bf16 %v512_v39, %v512_v39  ;;  %v513_v45 = vld [vmem:[#allocation2 + $0x8] sm:$0xff]  ;;  %v516_v53 = vld [vmem:[#allocation2 + $0x20] sm:$0xff]  ;;  %v517_v59 = vld [vmem:[#allocation2 + $0x10] sm:$0xff] }
  0x3d   : > { %v580_v35 = vunpack.c.l.b16 %v528_v33  ;;  %v582_v42 = vunpack.c.l.b16 %v530_v40  ;;  %v514_v46 = vld [vmem:[#allocation2 + $0x48] sm:$0xff]  ;;  %v532_v47 = vpack.c.bf16 %v513_v45, %v513_v45  ;;  %v534_v54 = vpack.c.bf16 %v515_v52, %v515_v52  ;;  %v518_v60 = vld [vmem:[#allocation2 + $0x38] sm:$0xff]  ;;  %v519_v2 = vld [vmem:[#allocation2 + $0x60] sm:$0xff]  ;;  %s524_s15 = smul.f32 0.33333334, %s8830_s0 }
  0x3e   : > { %v8333_v30 = vpack.c.b16 %v579_v28, %v578_v27  ;;  %v581_v36 = vunpack.c.l.b16 %v529_v34  ;;  %v583_v43 = vunpack.c.l.b16 %v531_v41  ;;  %v533_v48 = vpack.c.bf16 %v514_v46, %v514_v46  ;;  %v520_v3 = vld [vmem:[#allocation2 + $0x70] sm:$0xff]  ;;  %v8354_v9 = vld [vmem:[#allocation5 + $0x38] sm:$0xff]  ;;  %v522_v11 = vld [vmem:[#allocation2 + $0x28] sm:$0xff]  ;;  %s525_s28 = smul.f32 0.125, %s8830_s0 }
  0x3f   : > { %v584_v49 = vunpack.c.l.b16 %v532_v47  ;;  %v535_v55 = vpack.c.bf16 %v516_v53, %v516_v53  ;;  %v586_v56 = vunpack.c.l.b16 %v534_v54  ;;  %v536_v61 = vpack.c.bf16 %v517_v59, %v517_v59  ;;  %v521_v10 = vld [vmem:[#allocation2 + $0x78] sm:$0xff]  ;;  %991 = vmatpush.bf16.msra.mxu1 %v8354_v9  ;;  %v8358_v12 = vld [vmem:[#allocation5 + $0x30] sm:$0xff]  ;;  %v8361_v15 = vld [vmem:[#allocation5 + $0x28] sm:$0xff] }
  0x40   : > { %660 = vmatpush.bf16.msra.mxu0 %v8301_v18  ;;  %v8337_v37 = vpack.c.b16 %v581_v36, %v580_v35  ;;  %v8340_v44 = vpack.c.b16 %v583_v43, %v582_v42  ;;  %v585_v50 = vunpack.c.l.b16 %v533_v48  ;;  %v537_v62 = vpack.c.bf16 %v518_v60, %v518_v60  ;;  %v8364_v24 = vld [vmem:[#allocation5 + $0x20] sm:$0xff]  ;;  %v8369_v27 = vld [vmem:[#allocation5 + $0x18] sm:$0xff]  ;;  %v8373_v28 = vld [vmem:[#allocation5 + $0x10] sm:$0xff] }
  0x41   : > { %v587_v57 = vunpack.c.l.b16 %v535_v55  ;;  %v588_v63 = vunpack.c.l.b16 %v536_v61  ;;  %v538_v4 = vpack.c.bf16 %v519_v2, %v519_v2  ;;  %v539_v5 = vpack.c.bf16 %v520_v3, %v520_v3  ;;  %v8376_v31 = vld [vmem:[#allocation5 + $0x8] sm:$0xff]  ;;  %v8382_v32 = vld [vmem:[%s10120_s3] ss:$0 sm:$0xff] }
  0x42   : > { %v8343_v51 = vpack.c.b16 %v585_v50, %v584_v49  ;;  %v589_v0 = vunpack.c.l.b16 %v537_v62  ;;  %v540_v13 = vpack.c.bf16 %v521_v10, %v521_v10  ;;  %v541_v14 = vpack.c.bf16 %v522_v11, %v522_v11  ;;  %v8384_v33 = vld [vmem:[#allocation5] sm:$0xff] }
  0x43   : > { %v8346_v58 = vpack.c.b16 %v587_v57, %v586_v56  ;;  %v590_v6 = vunpack.c.l.b16 %v538_v4  ;;  %v591_v7 = vunpack.c.l.b16 %v539_v5  ;;  %992 = vmatpush.bf16.msra.mxu1 %v8358_v12 }
  0x44   : > { %661 = vmatpush.bf16.msra.mxu0 %v8307_v19  ;;  %v8349_v1 = vpack.c.b16 %v589_v0, %v588_v63  ;;  %v592_v22 = vunpack.c.l.b16 %v540_v13  ;;  %v593_v23 = vunpack.c.l.b16 %v541_v14 }
  0x45   : > { %v8352_v8 = vpack.c.b16 %v591_v7, %v590_v6 }
  0x46   : > { %v8366_v25 = vpack.c.b16 %v593_v23, %v592_v22 }
  0x47   : > { %993 = vmatpush.bf16.msra.mxu1 %v8361_v15 }
  0x48   : > { %662 = vmatpush.bf16.msra.mxu0 %v8313_v20 }
  0x4b   : > { %994 = vmatpush.bf16.msra.mxu1 %v8364_v24 }
  0x4c   : > { %663 = vmatpush.bf16.msra.mxu0 %v8319_v21 }
  0x4f   : > { %995 = vmatpush.bf16.msra.mxu1 %v8369_v27 }
  0x50   : > { %664 = vmatpush.bf16.msra.mxu0 %v8325_v26 }
  0x53   : > { %996 = vmatpush.bf16.msra.mxu1 %v8373_v28 }
  0x54   : > { %665 = vmatpush.bf16.msra.mxu0 %v8331_v29 }
  0x57   : > { %666 = vmatmul.bf16.vlgmr.msra.gmra.mxu0 %v8333_v30  ;;  %997 = vmatpush.bf16.msra.mxu1 %v8376_v31 }
  0x5b   : > { %998 = vmatpush.bf16.msra.mxu1 %v8384_v33 }
  0x67   : > { %671 = vmatmul.bf16.gmra.mxu0 %v8337_v37 }
  0x77   : > { %676 = vmatmul.bf16.gmra.mxu0 %v8340_v44 }
  0x87   : > { %681 = vmatmul.bf16.gmra.mxu0 %v8343_v51 }
  0x97   : > { %686 = vmatmul.bf16.gmra.mxu0 %v8346_v58 }
  0xa7   : > { %691 = vmatmul.bf16.gmra.mxu0 %v8349_v1 }
  0xb7   : > { %696 = vmatmul.bf16.gmra.mxu0 %v8352_v8 }
  0xc7   : > { %701 = vmatmul.bf16.gmra.mxu0 %v8366_v25 }
  0xd4   : > { %v667_v34 = vpop.f32.mrf.mxu0 }
  0xd5   : > { %v668_v35 = vadd.f32 %v8382_v32, %v667_v34 }
  0xd7   : > { %v723_v36 = vmul.f32 1.442695, %v668_v35  ;;  %vm707_vm2 = vcmp.gt.f32.partialorder %v668_v35, 20.0 }
  0xd9   : > { %6753 = vpow2.f32 %v723_v36 }
  0xdc   : > { %v669_v38 = vpop.f32.mrf.mxu0 }
  0xdd   : > { %v670_v39 = vadd.f32 %v8382_v32, %v669_v38 }
  0xdf   : > { %v6754_v40 = vpop.eup %6753  ;;  %v725_v41 = vmul.f32 1.442695, %v670_v39  ;;  %vm708_vm3 = vcmp.gt.f32.partialorder %v670_v39, 20.0 }
  0xe0   : > { %v755_v42 = vadd.f32 1.0, %v6754_v40  ;;  %v758_v48 = vmul.f32 -0.5, %v6754_v40  ;;  %v761_v55 = vand.u32 2147483647, %v6754_v40 }
  0xe1   : > { %6755 = vpow2.f32 %v725_v41 }
  0xe2   : > { %6757 = vlog2.f32 %v755_v42  ;;  %v759_v53 = vadd.f32 1.0, %v758_v48  ;;  %vm762_vm0 = vcmp.lt.f32.partialorder %v761_v55, 0.0004427343 }
  0xe4   : > { %v672_v43 = vpop.f32.mrf.mxu0  ;;  %v760_v63 = vmul.f32 %v6754_v40, %v759_v53 }
  0xe5   : > { %v8390_v45 = vadd.f32 %v8382_v32, %v672_v43 }
  0xe7   : > { %v6756_v46 = vpop.eup %6755  ;;  %v727_v47 = vmul.f32 1.442695, %v8390_v45  ;;  %vm709_vm6 = vcmp.gt.f32.partialorder %v8390_v45, 20.0 }
  0xe8   : > { %v764_v49 = vadd.f32 1.0, %v6756_v46  ;;  %v767_v50 = vmul.f32 -0.5, %v6756_v46  ;;  %v6758_v52 = vpop.eup %6757  ;;  %v770_v60 = vand.u32 2147483647, %v6756_v46 }
  0xe9   : > { %6759 = vpow2.f32 %v727_v47  ;;  %v757_v57 = vmul.f32 0.6931472, %v6758_v52 }
  0xea   : > { %6761 = vlog2.f32 %v764_v49  ;;  %v768_v59 = vadd.f32 1.0, %v767_v50  ;;  %vm771_vm1 = vcmp.lt.f32.partialorder %v770_v60, 0.0004427343 }
  0xeb   : > { %v763_v3 = vsel %vm762_vm0, %v760_v63, %v757_v57 }
  0xec   : > { %v674_v54 = vpop.f32.mrf.mxu0  ;;  %v769_v5 = vmul.f32 %v6756_v46, %v768_v59  ;;  %v899_v10 = vsel %vm707_vm2, %v668_v35, %v763_v3 }
  0xed   : > { %v675_v56 = vadd.f32 %v8382_v32, %v674_v54 }
  0xef   : > { %v6760_v61 = vpop.eup %6759  ;;  %v729_v62 = vmul.f32 1.442695, %v675_v56  ;;  %vm710_vm7 = vcmp.gt.f32.partialorder %v675_v56, 20.0 }
  0xf0   : > { %v6762_v0 = vpop.eup %6761  ;;  %v773_v2 = vadd.f32 1.0, %v6760_v61  ;;  %v776_v34 = vmul.f32 -0.5, %v6760_v61  ;;  %v779_v43 = vand.u32 2147483647, %v6760_v61 }
  0xf1   : > { %6763 = vpow2.f32 %v729_v62  ;;  %v766_v4 = vmul.f32 0.6931472, %v6762_v0 }
  0xf2   : > { %6765 = vlog2.f32 %v773_v2  ;;  %v777_v41 = vadd.f32 1.0, %v776_v34  ;;  %vm780_vm4 = vcmp.lt.f32.partialorder %v779_v43, 0.0004427343 }
  0xf3   : > { %v772_v6 = vsel %vm771_vm1, %v769_v5, %v766_v4 }
  0xf4   : > { %v677_v7 = vpop.f32.mrf.mxu0  ;;  %v900_v11 = vsel %vm708_vm3, %v670_v39, %v772_v6  ;;  %v778_v50 = vmul.f32 %v6760_v61, %v777_v41 }
  0xf5   : > { %v8395_v13 = vadd.f32 %v8382_v32, %v677_v7  ;;  %v915_v14 = vpack.c.bf16 %v900_v11, %v899_v10 }
  0xf7   : > { %v6764_v22 = vpop.eup %6763  ;;  %v731_v23 = vmul.f32 1.442695, %v8395_v13  ;;  %999 = vmatmul.bf16.vlgmr.msra.gmra.mxu1 %v915_v14  ;;  %vm711_vm10 = vcmp.gt.f32.partialorder %v8395_v13, 20.0 }
  0xf8   : > { %v782_v36 = vadd.f32 1.0, %v6764_v22  ;;  %v785_v38 = vmul.f32 -0.5, %v6764_v22  ;;  %v6766_v40 = vpop.eup %6765  ;;  %v788_v47 = vand.u32 2147483647, %v6764_v22 }
  0xf9   : > { %6767 = vpow2.f32 %v731_v23  ;;  %v775_v39 = vmul.f32 0.6931472, %v6766_v40 }
  0xfa   : > { %6769 = vlog2.f32 %v782_v36  ;;  %v786_v46 = vadd.f32 1.0, %v785_v38  ;;  %vm789_vm5 = vcmp.lt.f32.partialorder %v788_v47, 0.0004427343 }
  0xfb   : > { %v781_v54 = vsel %vm780_vm4, %v778_v50, %v775_v39 }
  0xfc   : > { %v679_v42 = vpop.f32.mrf.mxu0  ;;  %v787_v57 = vmul.f32 %v6764_v22, %v786_v46  ;;  %v901_v62 = vsel %vm709_vm6, %v8390_v45, %v781_v54 }
  0xfd   : > { %v680_v35 = vadd.f32 %v8382_v32, %v679_v42 }
  0xff   : > { %v6768_v48 = vpop.eup %6767  ;;  %v733_v49 = vmul.f32 1.442695, %v680_v35  ;;  %vm712_vm11 = vcmp.gt.f32.partialorder %v680_v35, 20.0 }
 0x100   : > { %v6770_v52 = vpop.eup %6769  ;;  %v791_v53 = vadd.f32 1.0, %v6768_v48  ;;  %v794_v4 = vmul.f32 -0.5, %v6768_v48  ;;  %v797_v14 = vand.u32 2147483647, %v6768_v48 }
 0x101   : > { %6771 = vpow2.f32 %v733_v49  ;;  %v784_v55 = vmul.f32 0.6931472, %v6770_v52 }
 0x102   : > { %6773 = vlog2.f32 %v791_v53  ;;  %v795_v10 = vadd.f32 1.0, %v794_v4  ;;  %vm798_vm8 = vcmp.lt.f32.partialorder %v797_v14, 0.0004427343 }
 0x103   : > { %v790_v59 = vsel %vm789_vm5, %v787_v57, %v784_v55 }
 0x104   : > { %v682_v60 = vpop.f32.mrf.mxu0  ;;  %v902_v63 = vsel %vm710_vm7, %v675_v56, %v790_v59  ;;  %v796_v38 = vmul.f32 %v6768_v48, %v795_v10 }
 0x105   : > { %v8402_v0 = vadd.f32 %v8382_v32, %v682_v60  ;;  %v916_v61 = vpack.c.bf16 %v902_v63, %v901_v62 }
 0x107   : > { %v6772_v2 = vpop.eup %6771  ;;  %v735_v3 = vmul.f32 1.442695, %v8402_v0  ;;  %1004 = vmatmul.bf16.gmra.mxu1 %v916_v61  ;;  %vm713_vm14 = vcmp.gt.f32.partialorder %v8402_v0, 20.0 }
 0x108   : > { %v800_v5 = vadd.f32 1.0, %v6772_v2  ;;  %v803_v6 = vmul.f32 -0.5, %v6772_v2  ;;  %v6774_v7 = vpop.eup %6773  ;;  %v806_v23 = vand.u32 2147483647, %v6772_v2 }
 0x109   : > { %6775 = vpow2.f32 %v735_v3  ;;  %v793_v56 = vmul.f32 0.6931472, %v6774_v7 }
 0x10a   : > { %6777 = vlog2.f32 %v800_v5  ;;  %v804_v22 = vadd.f32 1.0, %v803_v6  ;;  %vm807_vm9 = vcmp.lt.f32.partialorder %v806_v23, 0.0004427343 }
 0x10b   : > { %v799_v42 = vsel %vm798_vm8, %v796_v38, %v793_v56 }
 0x10c   : > { %v684_v11 = vpop.f32.mrf.mxu0  ;;  %v805_v39 = vmul.f32 %v6772_v2, %v804_v22  ;;  %v903_v49 = vsel %vm711_vm10, %v8395_v13, %v799_v42 }
 0x10d   : > { %v685_v45 = vadd.f32 %v8382_v32, %v684_v11 }
 0x10f   : > { %v6776_v34 = vpop.eup %6775  ;;  %v737_v36 = vmul.f32 1.442695, %v685_v45  ;;  %vm714_vm15 = vcmp.gt.f32.partialorder %v685_v45, 20.0 }
 0x110   : > { %v6778_v40 = vpop.eup %6777  ;;  %v809_v41 = vadd.f32 1.0, %v6776_v34  ;;  %v812_v55 = vmul.f32 -0.5, %v6776_v34  ;;  %v815_v61 = vand.u32 2147483647, %v6776_v34 }
 0x111   : > { %6779 = vpow2.f32 %v737_v36  ;;  %v802_v43 = vmul.f32 0.6931472, %v6778_v40 }
 0x112   : > { %6781 = vlog2.f32 %v809_v41  ;;  %v813_v62 = vadd.f32 1.0, %v812_v55  ;;  %vm816_vm12 = vcmp.lt.f32.partialorder %v815_v61, 0.0004427343 }
 0x113   : > { %v808_v46 = vsel %vm807_vm9, %v805_v39, %v802_v43 }
 0x114   : > { %v687_v47 = vpop.f32.mrf.mxu0  ;;  %v904_v50 = vsel %vm712_vm11, %v680_v35, %v808_v46  ;;  %v814_v6 = vmul.f32 %v6776_v34, %v813_v62 }
 0x115   : > { %v8409_v52 = vadd.f32 %v8382_v32, %v687_v47  ;;  %v917_v48 = vpack.c.bf16 %v904_v50, %v903_v49 }
 0x117   : > { %v6780_v53 = vpop.eup %6779  ;;  %v739_v54 = vmul.f32 1.442695, %v8409_v52  ;;  %1009 = vmatmul.bf16.gmra.mxu1 %v917_v48  ;;  %vm715_vm2 = vcmp.gt.f32.partialorder %v8409_v52, 20.0 }
 0x118   : > { %v818_v57 = vadd.f32 1.0, %v6780_v53  ;;  %v821_v59 = vmul.f32 -0.5, %v6780_v53  ;;  %v6782_v60 = vpop.eup %6781  ;;  %v824_v3 = vand.u32 2147483647, %v6780_v53 }
 0x119   : > { %6783 = vpow2.f32 %v739_v54  ;;  %v811_v35 = vmul.f32 0.6931472, %v6782_v60 }
 0x11a   : > { %6785 = vlog2.f32 %v818_v57  ;;  %v822_v2 = vadd.f32 1.0, %v821_v59  ;;  %vm825_vm13 = vcmp.lt.f32.partialorder %v824_v3, 0.0004427343 }
 0x11b   : > { %v817_v11 = vsel %vm816_vm12, %v814_v6, %v811_v35 }
 0x11c   : > { %v689_v63 = vpop.f32.mrf.mxu0  ;;  %v823_v56 = vmul.f32 %v6780_v53, %v822_v2  ;;  %v905_v36 = vsel %vm713_vm14, %v8402_v0, %v817_v11 }
 0x11d   : > { %v690_v13 = vadd.f32 %v8382_v32, %v689_v63 }
 0x11f   : > { %v6784_v4 = vpop.eup %6783  ;;  %v741_v5 = vmul.f32 1.442695, %v690_v13  ;;  %vm716_vm3 = vcmp.gt.f32.partialorder %v690_v13, 20.0 }
 0x120   : > { %v6786_v7 = vpop.eup %6785  ;;  %v827_v10 = vadd.f32 1.0, %v6784_v4  ;;  %v830_v43 = vmul.f32 -0.5, %v6784_v4  ;;  %v833_v48 = vand.u32 2147483647, %v6784_v4 }
 0x121   : > { %6787 = vpow2.f32 %v741_v5  ;;  %v820_v14 = vmul.f32 0.6931472, %v6786_v7 }
 0x122   : > { %6789 = vlog2.f32 %v827_v10  ;;  %v831_v49 = vadd.f32 1.0, %v830_v43  ;;  %vm834_vm0 = vcmp.lt.f32.partialorder %v833_v48, 0.0004427343 }
 0x123   : > { %v826_v22 = vsel %vm825_vm13, %v823_v56, %v820_v14 }
 0x124   : > { %v692_v23 = vpop.f32.mrf.mxu0  ;;  %v906_v38 = vsel %vm714_vm15, %v685_v45, %v826_v22  ;;  %v832_v59 = vmul.f32 %v6784_v4, %v831_v49 }
 0x125   : > { %v8416_v40 = vadd.f32 %v8382_v32, %v692_v23  ;;  %v918_v34 = vpack.c.bf16 %v906_v38, %v905_v36 }
 0x127   : > { %v6788_v41 = vpop.eup %6787  ;;  %v743_v42 = vmul.f32 1.442695, %v8416_v40  ;;  %1014 = vmatmul.bf16.gmra.mxu1 %v918_v34  ;;  %vm717_vm6 = vcmp.gt.f32.partialorder %v8416_v40, 20.0 }
 0x128   : > { %v836_v39 = vadd.f32 1.0, %v6788_v41  ;;  %v839_v46 = vmul.f32 -0.5, %v6788_v41  ;;  %v6790_v47 = vpop.eup %6789  ;;  %v842_v54 = vand.u32 2147483647, %v6788_v41 }
 0x129   : > { %6791 = vpow2.f32 %v743_v42  ;;  %v829_v45 = vmul.f32 0.6931472, %v6790_v47 }
 0x12a   : > { %6793 = vlog2.f32 %v836_v39  ;;  %v840_v53 = vadd.f32 1.0, %v839_v46  ;;  %vm843_vm1 = vcmp.lt.f32.partialorder %v842_v54, 0.0004427343 }
 0x12b   : > { %v835_v63 = vsel %vm834_vm0, %v832_v59, %v829_v45 }
 0x12c   : > { %v694_v50 = vpop.f32.mrf.mxu0  ;;  %v841_v35 = vmul.f32 %v6788_v41, %v840_v53  ;;  %v907_v5 = vsel %vm715_vm2, %v8409_v52, %v835_v63 }
 0x12d   : > { %v695_v0 = vadd.f32 %v8382_v32, %v694_v50 }
 0x12f   : > { %v6792_v55 = vpop.eup %6791  ;;  %v745_v57 = vmul.f32 1.442695, %v695_v0  ;;  %vm718_vm7 = vcmp.gt.f32.partialorder %v695_v0, 20.0 }
 0x130   : > { %v6794_v60 = vpop.eup %6793  ;;  %v845_v62 = vadd.f32 1.0, %v6792_v55  ;;  %v848_v14 = vmul.f32 -0.5, %v6792_v55  ;;  %v851_v34 = vand.u32 2147483647, %v6792_v55 }
 0x131   : > { %6795 = vpow2.f32 %v745_v57  ;;  %v838_v61 = vmul.f32 0.6931472, %v6794_v60 }
 0x132   : > { %6797 = vlog2.f32 %v845_v62  ;;  %v849_v36 = vadd.f32 1.0, %v848_v14  ;;  %vm852_vm4 = vcmp.lt.f32.partialorder %v851_v34, 0.0004427343 }
 0x133   : > { %v844_v2 = vsel %vm843_vm1, %v841_v35, %v838_v61  ;;  %v8436_v35 = vld [vmem:[%s10123_s6 + $0x38] sm:$0xff] }
 0x134   : > { %v697_v3 = vpop.f32.mrf.mxu0  ;;  %v908_v6 = vsel %vm716_vm3, %v690_v13, %v844_v2  ;;  %v850_v46 = vmul.f32 %v6792_v55, %v849_v36  ;;  %1444 = vmatpush.bf16.msra.mxu2 %v8436_v35 }
 0x135   : > { %v8423_v7 = vadd.f32 %v8382_v32, %v697_v3  ;;  %v919_v4 = vpack.c.bf16 %v908_v6, %v907_v5 }
 0x137   : > { %v6796_v10 = vpop.eup %6795  ;;  %v747_v11 = vmul.f32 1.442695, %v8423_v7  ;;  %1019 = vmatmul.bf16.gmra.mxu1 %v919_v4  ;;  %vm719_vm10 = vcmp.gt.f32.partialorder %v8423_v7, 20.0 }
 0x138   : > { %v854_v56 = vadd.f32 1.0, %v6796_v10  ;;  %v857_v22 = vmul.f32 -0.5, %v6796_v10  ;;  %v6798_v23 = vpop.eup %6797  ;;  %v860_v42 = vand.u32 2147483647, %v6796_v10 }
 0x139   : > { %6799 = vpow2.f32 %v747_v11  ;;  %v847_v13 = vmul.f32 0.6931472, %v6798_v23 }
 0x13a   : > { %6801 = vlog2.f32 %v854_v56  ;;  %v858_v41 = vadd.f32 1.0, %v857_v22  ;;  %vm861_vm5 = vcmp.lt.f32.partialorder %v860_v42, 0.0004427343 }
 0x13b   : > { %v853_v50 = vsel %vm852_vm4, %v850_v46, %v847_v13 }
 0x13c   : > { %v699_v38 = vpop.f32.mrf.mxu0  ;;  %v859_v45 = vmul.f32 %v6796_v10, %v858_v41  ;;  %v909_v57 = vsel %vm717_vm6, %v8416_v40, %v853_v50 }
 0x13d   : > { %v700_v52 = vadd.f32 %v8382_v32, %v699_v38 }
 0x13f   : > { %v6800_v43 = vpop.eup %6799  ;;  %v749_v39 = vmul.f32 1.442695, %v700_v52  ;;  %vm720_vm11 = vcmp.gt.f32.partialorder %v700_v52, 20.0 }
 0x140   : > { %v6802_v47 = vpop.eup %6801  ;;  %v863_v49 = vadd.f32 1.0, %v6800_v43  ;;  %v866_v61 = vmul.f32 -0.5, %v6800_v43  ;;  %v869_v6 = vand.u32 2147483647, %v6800_v43 }
 0x141   : > { %6803 = vpow2.f32 %v749_v39  ;;  %v856_v48 = vmul.f32 0.6931472, %v6802_v47 }
 0x142   : > { %6805 = vlog2.f32 %v863_v49  ;;  %vm870_vm8 = vcmp.lt.f32.partialorder %v869_v6, 0.0004427343  ;;  %v6671_v6 = vld [vmem:[%s10123_s6 + $0x68] sm:$0xff] }
 0x143   : > { %v862_v53 = vsel %vm861_vm5, %v859_v45, %v856_v48  ;;  %v8451_v48 = vld [vmem:[%s10123_s6 + $0x28] sm:$0xff]  ;;  %v6673_v45 = vld [vmem:[%s10123_s6 + $0x78] sm:$0xff] }
 0x144   : > { %v702_v54 = vpop.f32.mrf.mxu0  ;;  %v910_v59 = vsel %vm718_vm7, %v695_v0, %v862_v53  ;;  %v867_v0 = vadd.f32 1.0, %v866_v61  ;;  %1493 = vmatpush.bf16.msra.mxu3 %v6673_v45 }
 0x145   : > { %v8430_v60 = vadd.f32 %v8382_v32, %v702_v54  ;;  %v920_v55 = vpack.c.bf16 %v910_v59, %v909_v57  ;;  %v8460_v57 = vld [vmem:[%s10123_s6 + $0x20] sm:$0xff] }
 0x146   : > { %v868_v23 = vmul.f32 %v6800_v43, %v867_v0  ;;  %v8445_v43 = vld [vmem:[%s10123_s6 + $0x30] sm:$0xff] }
 0x147   : > { %v6804_v62 = vpop.eup %6803  ;;  %v751_v63 = vmul.f32 1.442695, %v8430_v60  ;;  %1024 = vmatmul.bf16.gmra.mxu1 %v920_v55  ;;  %1445 = vmatpush.bf16.msra.mxu2 %v8445_v43  ;;  %vm721_vm14 = vcmp.gt.f32.partialorder %v8430_v60, 20.0 }
 0x148   : > { %v872_v2 = vadd.f32 1.0, %v6804_v62  ;;  %v875_v3 = vmul.f32 -0.5, %v6804_v62  ;;  %v6806_v40 = vpop.eup %6805  ;;  %v878_v14 = vand.u32 2147483647, %v6804_v62 }
 0x149   : > { %6807 = vpow2.f32 %v751_v63  ;;  %v865_v10 = vmul.f32 0.6931472, %v6806_v40  ;;  %v6672_v63 = vld [vmem:[%s10123_s6 + $0x70] sm:$0xff] }
 0x14a   : > { %6809 = vlog2.f32 %v872_v2  ;;  %v876_v11 = vadd.f32 1.0, %v875_v3  ;;  %vm879_vm9 = vcmp.lt.f32.partialorder %v878_v14, 0.0004427343  ;;  %1494 = vmatpush.bf16.msra.mxu3 %v6672_v63  ;;  %v8469_v3 = vld [vmem:[%s10123_s6 + $0x18] sm:$0xff] }
 0x14b   : > { %v871_v34 = vsel %vm870_vm8, %v868_v23, %v865_v10  ;;  %1446 = vmatpush.bf16.msra.mxu2 %v8451_v48  ;;  %v6670_v23 = vld [vmem:[%s10123_s6 + $0x60] sm:$0xff] }
 0x14c   : > { %v704_v5 = vpop.f32.mrf.mxu0  ;;  %v877_v41 = vmul.f32 %v6804_v62, %v876_v11 }
 0x14d   : > { %v705_v4 = vadd.f32 %v8382_v32, %v704_v5  ;;  %v911_v32 = vsel %vm719_vm10, %v8423_v7, %v871_v34  ;;  %v8508_v34 = vld [vmem:[%s10122_s5] ss:$0 sm:$0xff] }
 0x14e   : > { %1495 = vmatpush.bf16.msra.mxu3 %v6671_v6 }
 0x14f   : > { %v6808_v56 = vpop.eup %6807  ;;  %v753_v22 = vmul.f32 1.442695, %v705_v4  ;;  %1447 = vmatpush.bf16.msra.mxu2 %v8460_v57  ;;  %vm722_vm15 = vcmp.gt.f32.partialorder %v705_v4, 20.0 }
 0x150   : > { %v6810_v36 = vpop.eup %6809  ;;  %v881_v38 = vadd.f32 1.0, %v6808_v56  ;;  %v884_v49 = vmul.f32 -0.5, %v6808_v56  ;;  %v887_v54 = vand.u32 2147483647, %v6808_v56 }
 0x151   : > { %6811 = vpow2.f32 %v753_v22  ;;  %v874_v13 = vmul.f32 0.6931472, %v6810_v36  ;;  %v8498_v36 = vld [vmem:[%s10123_s6] sm:$0xff] }
 0x152   : > { %6813 = vlog2.f32 %v881_v38  ;;  %v885_v53 = vadd.f32 1.0, %v884_v49  ;;  %vm888_vm12 = vcmp.lt.f32.partialorder %v887_v54, 0.0004427343  ;;  %1496 = vmatpush.bf16.msra.mxu3 %v6670_v23  ;;  %v6668_v38 = vld [vmem:[%s10123_s6 + $0x50] sm:$0xff] }
 0x153   : > { %v880_v42 = vsel %vm879_vm9, %v877_v41, %v874_v13  ;;  %1448 = vmatpush.bf16.msra.mxu2 %v8469_v3  ;;  %v6667_v13 = vld [vmem:[%s10123_s6 + $0x48] sm:$0xff] }
 0x154   : > { %v912_v39 = vsel %vm720_vm11, %v700_v52, %v880_v42  ;;  %v886_v61 = vmul.f32 %v6808_v56, %v885_v53  ;;  %v8480_v56 = vld [vmem:[%s10123_s6 + $0x10] sm:$0xff] }
 0x155   : > { %v921_v46 = vpack.c.bf16 %v912_v39, %v911_v32 }
 0x157   : > { %v6812_v47 = vpop.eup %6811  ;;  %1029 = vmatmul.bf16.gmra.mxu1 %v921_v46  ;;  %1449 = vmatpush.bf16.msra.mxu2 %v8480_v56 }
 0x158   : > { %v890_v50 = vadd.f32 1.0, %v6812_v47  ;;  %v893_v7 = vmul.f32 -0.5, %v6812_v47  ;;  %v6814_v52 = vpop.eup %6813  ;;  %v896_v62 = vand.u32 2147483647, %v6812_v47 }
 0x159   : > { %v883_v59 = vmul.f32 0.6931472, %v6814_v52 }
 0x15a   : > { %6815 = vlog2.f32 %v890_v50  ;;  %v894_v55 = vadd.f32 1.0, %v893_v7  ;;  %vm897_vm13 = vcmp.lt.f32.partialorder %v896_v62, 0.0004427343 }
 0x15b   : > { %v889_v40 = vsel %vm888_vm12, %v886_v61, %v883_v59 }
 0x15c   : > { %v895_v5 = vmul.f32 %v6812_v47, %v894_v55  ;;  %v913_v11 = vsel %vm721_vm14, %v8430_v60, %v889_v40  ;;  %v8489_v60 = vld [vmem:[%s10123_s6 + $0x8] sm:$0xff] }
 0x15d   : > { %1450 = vmatpush.bf16.msra.mxu2 %v8489_v60 }
 0x160   : > { %v6816_v2 = vpop.eup %6815 }
 0x161   : > { %v892_v0 = vmul.f32 0.6931472, %v6816_v2  ;;  %1451 = vmatpush.bf16.msra.mxu2 %v8498_v36 }
 0x163   : > { %v898_v10 = vsel %vm897_vm13, %v895_v5, %v892_v0 }
 0x164   : > { %v914_v14 = vsel %vm722_vm15, %v705_v4, %v898_v10  ;;  %v6669_v4 = vld [vmem:[%s10123_s6 + $0x58] sm:$0xff]  ;;  %1452 = vmatmul.bf16.vlgmr.msra.gmra.mxu2 %v8333_v30 }
 0x165   : > { %v922_v22 = vpack.c.bf16 %v914_v14, %v913_v11  ;;  %1497 = vmatpush.bf16.msra.mxu3 %v6669_v4  ;;  %2305 = vmatpush.bf16.msrb.mxu2 %v8289_v16  ;;  %v6666_v16 = vld [vmem:[%s10123_s6 + $0x40] sm:$0xff] }
 0x167   : > { %1034 = vmatmul.bf16.gmra.mxu1 %v922_v22 }
 0x169   : > { %1498 = vmatpush.bf16.msra.mxu3 %v6668_v38  ;;  %2306 = vmatpush.bf16.msrb.mxu2 %v8295_v17 }
 0x16d   : > { %1499 = vmatpush.bf16.msra.mxu3 %v6667_v13  ;;  %2307 = vmatpush.bf16.msrb.mxu2 %v8301_v18 }
 0x171   : > { %1500 = vmatpush.bf16.msra.mxu3 %v6666_v16  ;;  %2308 = vmatpush.bf16.msrb.mxu2 %v8307_v19 }
 0x174   : > { %v1000_v41 = vpop.f32.mrf.mxu1  ;;  %1457 = vmatmul.bf16.gmra.mxu2 %v8337_v37 }
 0x175   : > { %v1001_v42 = vadd.f32 %v8508_v34, %v1000_v41  ;;  %2570 = vmatpush.bf16.msrb.mxu3 %v8354_v9  ;;  %2309 = vmatpush.bf16.msrb.mxu2 %v8313_v20 }
 0x177   : > { %v1056_v32 = vmul.f32 1.442695, %v1001_v42  ;;  %vm1040_vm1 = vcmp.gt.f32.partialorder %v1001_v42, 20.0 }
 0x179   : > { %6817 = vpow2.f32 %v1056_v32  ;;  %2571 = vmatpush.bf16.msrb.mxu3 %v8358_v12  ;;  %2310 = vmatpush.bf16.msrb.mxu2 %v8319_v21 }
 0x17c   : > { %v1002_v30 = vpop.f32.mrf.mxu1 }
 0x17d   : > { %v1003_v17 = vadd.f32 %v8508_v34, %v1002_v30  ;;  %2572 = vmatpush.bf16.msrb.mxu3 %v8361_v15  ;;  %2311 = vmatpush.bf16.msrb.mxu2 %v8325_v26 }
 0x17f   : > { %v6818_v39 = vpop.eup %6817  ;;  %v1058_v46 = vmul.f32 1.442695, %v1003_v17  ;;  %vm1041_vm3 = vcmp.gt.f32.partialorder %v1003_v17, 20.0 }
 0x180   : > { %v1088_v47 = vadd.f32 1.0, %v6818_v39  ;;  %v1091_v18 = vmul.f32 -0.5, %v6818_v39  ;;  %v1094_v37 = vand.u32 2147483647, %v6818_v39 }
 0x181   : > { %6819 = vpow2.f32 %v1058_v46  ;;  %2573 = vmatpush.bf16.msrb.mxu3 %v8364_v24  ;;  %2312 = vmatpush.bf16.msrb.mxu2 %v8331_v29 }
 0x182   : > { %6821 = vlog2.f32 %v1088_v47  ;;  %v1092_v20 = vadd.f32 1.0, %v1091_v18  ;;  %vm1095_vm0 = vcmp.lt.f32.partialorder %v1094_v37, 0.0004427343 }
 0x184   : > { %v1005_v19 = vpop.f32.mrf.mxu1  ;;  %v1093_v21 = vmul.f32 %v6818_v39, %v1092_v20  ;;  %1462 = vmatmul.bf16.gmra.mxu2 %v8340_v44 }
 0x185   : > { %v8529_v9 = vadd.f32 %v8508_v34, %v1005_v19  ;;  %2574 = vmatpush.bf16.msrb.mxu3 %v8369_v27 }
 0x187   : > { %v6820_v12 = vpop.eup %6819  ;;  %v1060_v49 = vmul.f32 1.442695, %v8529_v9  ;;  %vm1042_vm5 = vcmp.gt.f32.partialorder %v8529_v9, 20.0 }
 0x188   : > { %v6822_v50 = vpop.eup %6821  ;;  %v1097_v7 = vadd.f32 1.0, %v6820_v12  ;;  %v1100_v52 = vmul.f32 -0.5, %v6820_v12  ;;  %v1103_v26 = vand.u32 2147483647, %v6820_v12 }
 0x189   : > { %6823 = vpow2.f32 %v1060_v49  ;;  %v1090_v15 = vmul.f32 0.6931472, %v6822_v50  ;;  %2575 = vmatpush.bf16.msrb.mxu3 %v8373_v28  ;;  %v6681_v50 = vld [vmem:[#allocation7 + $0x38] sm:$0xff] }
 0x18a   : > { %6825 = vlog2.f32 %v1097_v7  ;;  %v1101_v54 = vadd.f32 1.0, %v1100_v52  ;;  %vm1104_vm2 = vcmp.lt.f32.partialorder %v1103_v26, 0.0004427343  ;;  %1826 = vmatpush.bf16.msrb.mxu0 %v6681_v50  ;;  %3205 = vmatpush.bf16.msra.mxu2 %v6681_v50 }
 0x18b   : > { %v1096_v53 = vsel %vm1095_vm0, %v1093_v21, %v1090_v15 }
 0x18c   : > { %v1007_v45 = vpop.f32.mrf.mxu1  ;;  %v1232_v27 = vsel %vm1040_vm1, %v1001_v42, %v1096_v53  ;;  %v1102_v29 = vmul.f32 %v6820_v12, %v1101_v54 }
 0x18d   : > { %v8537_v24 = vadd.f32 %v8508_v34, %v1007_v45  ;;  %2576 = vmatpush.bf16.msrb.mxu3 %v8376_v31  ;;  %v1248_v28 = vpack.c.bf16 %v1232_v27, %v1232_v27 }
 0x18f   : > { %v6824_v59 = vpop.eup %6823  ;;  %v1062_v55 = vmul.f32 1.442695, %v8537_v24  ;;  %v1280_v44 = vunpack.c.l.b16 %v1248_v28  ;;  %vm1043_vm7 = vcmp.gt.f32.partialorder %v8537_v24, 20.0 }
 0x190   : > { %v6826_v62 = vpop.eup %6825  ;;  %v1106_v63 = vadd.f32 1.0, %v6824_v59  ;;  %v1109_v40 = vmul.f32 -0.5, %v6824_v59  ;;  %v1112_v4 = vand.u32 2147483647, %v6824_v59 }
 0x191   : > { %6827 = vpow2.f32 %v1062_v55  ;;  %v1099_v61 = vmul.f32 0.6931472, %v6826_v62  ;;  %2577 = vmatpush.bf16.msrb.mxu3 %v8384_v33 }
 0x192   : > { %6829 = vlog2.f32 %v1106_v63  ;;  %v1110_v31 = vadd.f32 1.0, %v1109_v40  ;;  %vm1113_vm4 = vcmp.lt.f32.partialorder %v1112_v4, 0.0004427343  ;;  %v6680_v4 = vld [vmem:[#allocation7 + $0x30] sm:$0xff] }
 0x193   : > { %v1105_v2 = vsel %vm1104_vm2, %v1102_v29, %v1099_v61  ;;  %1827 = vmatpush.bf16.msrb.mxu0 %v6680_v4  ;;  %3206 = vmatpush.bf16.msra.mxu2 %v6680_v4 }
 0x194   : > { %v1010_v0 = vpop.f32.mrf.mxu1  ;;  %v1233_v5 = vsel %vm1041_vm3, %v1003_v17, %v1105_v2  ;;  %v1111_v16 = vmul.f32 %v6824_v59, %v1110_v31  ;;  %1467 = vmatmul.bf16.gmra.mxu2 %v8343_v51 }
 0x195   : > { %v8544_v6 = vadd.f32 %v8508_v34, %v1010_v0  ;;  %v1249_v10 = vpack.c.bf16 %v1233_v5, %v1233_v5 }
 0x197   : > { %v6828_v11 = vpop.eup %6827  ;;  %v1064_v14 = vmul.f32 1.442695, %v8544_v6  ;;  %v1281_v22 = vunpack.c.l.b16 %v1249_v10  ;;  %vm1044_vm9 = vcmp.gt.f32.partialorder %v8544_v6, 20.0 }
 0x198   : > { %v6830_v23 = vpop.eup %6829  ;;  %v1115_v38 = vadd.f32 1.0, %v6828_v11  ;;  %v1118_v42 = vmul.f32 -0.5, %v6828_v11  ;;  %v1121_v39 = vand.u32 2147483647, %v6828_v11 }
 0x199   : > { %6831 = vpow2.f32 %v1064_v14  ;;  %v1296_v13 = vpack.c.b16 %v1281_v22, %v1280_v44  ;;  %v1108_v41 = vmul.f32 0.6931472, %v6830_v23 }
 0x19a   : > { %6833 = vlog2.f32 %v1115_v38  ;;  %v1119_v17 = vadd.f32 1.0, %v1118_v42  ;;  %vm1122_vm6 = vcmp.lt.f32.partialorder %v1121_v39, 0.0004427343 }
 0x19b   : > { %1501 = vmatmul.bf16.vlgmr.msra.gmra.mxu3 %v1296_v13  ;;  %v1114_v30 = vsel %vm1113_vm4, %v1111_v16, %v1108_v41 }
 0x19c   : > { %v1012_v32 = vpop.f32.mrf.mxu1  ;;  %v1234_v19 = vsel %vm1042_vm5, %v8529_v9, %v1114_v30  ;;  %v1120_v20 = vmul.f32 %v6828_v11, %v1119_v17 }
 0x19d   : > { %v8549_v33 = vadd.f32 %v8508_v34, %v1012_v32  ;;  %v1250_v7 = vpack.c.bf16 %v1234_v19, %v1234_v19 }
 0x19f   : > { %v6832_v46 = vpop.eup %6831  ;;  %v1066_v47 = vmul.f32 1.442695, %v8549_v33  ;;  %v1282_v54 = vunpack.c.l.b16 %v1250_v7  ;;  %vm1045_vm11 = vcmp.gt.f32.partialorder %v8549_v33, 20.0 }
 0x1a0   : > { %v6834_v18 = vpop.eup %6833  ;;  %v1124_v12 = vadd.f32 1.0, %v6832_v46  ;;  %v1127_v15 = vmul.f32 -0.5, %v6832_v46  ;;  %v1130_v62 = vand.u32 2147483647, %v6832_v46 }
 0x1a1   : > { %6835 = vpow2.f32 %v1066_v47  ;;  %v1117_v49 = vmul.f32 0.6931472, %v6834_v18 }
 0x1a2   : > { %6837 = vlog2.f32 %v1124_v12  ;;  %v1128_v59 = vadd.f32 1.0, %v1127_v15  ;;  %vm1131_vm8 = vcmp.lt.f32.partialorder %v1130_v62, 0.0004427343 }
 0x1a3   : > { %v1123_v37 = vsel %vm1122_vm6, %v1120_v20, %v1117_v49 }
 0x1a4   : > { %v1015_v52 = vpop.f32.mrf.mxu1  ;;  %v1235_v21 = vsel %vm1043_vm7, %v8537_v24, %v1123_v37  ;;  %v1129_v24 = vmul.f32 %v6832_v46, %v1128_v59  ;;  %1472 = vmatmul.bf16.gmra.mxu2 %v8346_v58 }
 0x1a5   : > { %v8558_v9 = vadd.f32 %v8508_v34, %v1015_v52  ;;  %v1251_v45 = vpack.c.bf16 %v1235_v21, %v1235_v21 }
 0x1a7   : > { %v6836_v53 = vpop.eup %6835  ;;  %v1068_v51 = vmul.f32 1.442695, %v8558_v9  ;;  %v1283_v26 = vunpack.c.l.b16 %v1251_v45  ;;  %vm1046_vm13 = vcmp.gt.f32.partialorder %v8558_v9, 20.0 }
 0x1a8   : > { %v6838_v55 = vpop.eup %6837  ;;  %v1133_v27 = vadd.f32 1.0, %v6836_v53  ;;  %v1136_v29 = vmul.f32 -0.5, %v6836_v53  ;;  %v1139_v5 = vand.u32 2147483647, %v6836_v53 }
 0x1a9   : > { %6839 = vpow2.f32 %v1068_v51  ;;  %v1297_v63 = vpack.c.b16 %v1283_v26, %v1282_v54  ;;  %v1126_v61 = vmul.f32 0.6931472, %v6838_v55  ;;  %v6679_v55 = vld [vmem:[#allocation7 + $0x28] sm:$0xff] }
 0x1aa   : > { %6841 = vlog2.f32 %v1133_v27  ;;  %v1137_v0 = vadd.f32 1.0, %v1136_v29  ;;  %vm1140_vm10 = vcmp.lt.f32.partialorder %v1139_v5, 0.0004427343  ;;  %1828 = vmatpush.bf16.msrb.mxu0 %v6679_v55  ;;  %3207 = vmatpush.bf16.msra.mxu2 %v6679_v55 }
 0x1ab   : > { %1506 = vmatmul.bf16.gmra.mxu3 %v1297_v63  ;;  %v1132_v40 = vsel %vm1131_vm8, %v1129_v24, %v1126_v61 }
 0x1ac   : > { %v1017_v2 = vpop.f32.mrf.mxu1  ;;  %v1236_v44 = vsel %vm1044_vm9, %v8544_v6, %v1132_v40  ;;  %v1138_v23 = vmul.f32 %v6836_v53, %v1137_v0 }
 0x1ad   : > { %v8562_v28 = vadd.f32 %v8508_v34, %v1017_v2  ;;  %v1252_v13 = vpack.c.bf16 %v1236_v44, %v1236_v44 }
 0x1af   : > { %v6840_v10 = vpop.eup %6839  ;;  %v1070_v11 = vmul.f32 1.442695, %v8562_v28  ;;  %v1284_v17 = vunpack.c.l.b16 %v1252_v13  ;;  %vm1047_vm15 = vcmp.gt.f32.partialorder %v8562_v28, 20.0 }
 0x1b0   : > { %v6842_v14 = vpop.eup %6841  ;;  %v1142_v22 = vadd.f32 1.0, %v6840_v10  ;;  %v1145_v41 = vmul.f32 -0.5, %v6840_v10  ;;  %v1148_v18 = vand.u32 2147483647, %v6840_v10 }
 0x1b1   : > { %6843 = vpow2.f32 %v1070_v11  ;;  %v1135_v31 = vmul.f32 0.6931472, %v6842_v14 }
 0x1b2   : > { %6845 = vlog2.f32 %v1142_v22  ;;  %v1146_v46 = vadd.f32 1.0, %v1145_v41  ;;  %vm1149_vm12 = vcmp.lt.f32.partialorder %v1148_v18, 0.0004427343 }
 0x1b3   : > { %v1141_v38 = vsel %vm1140_vm10, %v1138_v23, %v1135_v31 }
 0x1b4   : > { %v1020_v42 = vpop.f32.mrf.mxu1  ;;  %v1237_v16 = vsel %vm1045_vm11, %v8549_v33, %v1141_v38  ;;  %v1147_v33 = vmul.f32 %v6840_v10, %v1146_v46  ;;  %1477 = vmatmul.bf16.gmra.mxu2 %v8349_v1  ;;  %v6678_v46 = vld [vmem:[#allocation7 + $0x20] sm:$0xff] }
 0x1b5   : > { %v8571_v6 = vadd.f32 %v8508_v34, %v1020_v42  ;;  %v1253_v32 = vpack.c.bf16 %v1237_v16, %v1237_v16  ;;  %1829 = vmatpush.bf16.msrb.mxu0 %v6678_v46  ;;  %3208 = vmatpush.bf16.msra.mxu2 %v6678_v46 }
 0x1b7   : > { %v6844_v30 = vpop.eup %6843  ;;  %v1072_v58 = vmul.f32 1.442695, %v8571_v6  ;;  %v1285_v39 = vunpack.c.l.b16 %v1253_v32  ;;  %vm1048_vm1 = vcmp.gt.f32.partialorder %v8571_v6, 20.0 }
 0x1b8   : > { %v6846_v47 = vpop.eup %6845  ;;  %v1151_v19 = vadd.f32 1.0, %v6844_v30  ;;  %v1154_v20 = vmul.f32 -0.5, %v6844_v30  ;;  %v1157_v52 = vand.u32 2147483647, %v6844_v30 }
 0x1b9   : > { %6847 = vpow2.f32 %v1072_v58  ;;  %v1298_v12 = vpack.c.b16 %v1285_v39, %v1284_v17  ;;  %v1144_v49 = vmul.f32 0.6931472, %v6846_v47 }
 0x1ba   : > { %6849 = vlog2.f32 %v1151_v19  ;;  %v1155_v15 = vadd.f32 1.0, %v1154_v20  ;;  %vm1158_vm14 = vcmp.lt.f32.partialorder %v1157_v52, 0.0004427343 }
 0x1bb   : > { %1511 = vmatmul.bf16.gmra.mxu3 %v1298_v12  ;;  %v1150_v7 = vsel %vm1149_vm12, %v1147_v33, %v1144_v49 }
 0x1bc   : > { %v1022_v50 = vpop.f32.mrf.mxu1  ;;  %v1238_v51 = vsel %vm1046_vm13, %v8558_v9, %v1150_v7  ;;  %v1156_v59 = vmul.f32 %v6844_v30, %v1155_v15 }
 0x1bd   : > { %v8575_v37 = vadd.f32 %v8508_v34, %v1022_v50  ;;  %v1254_v27 = vpack.c.bf16 %v1238_v51, %v1238_v51 }
 0x1bf   : > { %v6848_v21 = vpop.eup %6847  ;;  %v1074_v45 = vmul.f32 1.442695, %v8575_v37  ;;  %v1286_v40 = vunpack.c.l.b16 %v1254_v27  ;;  %vm1049_vm3 = vcmp.gt.f32.partialorder %v8575_v37, 20.0 }
 0x1c0   : > { %v6850_v53 = vpop.eup %6849  ;;  %v1160_v54 = vadd.f32 1.0, %v6848_v21  ;;  %v1163_v63 = vmul.f32 -0.5, %v6848_v21  ;;  %v1166_v11 = vand.u32 2147483647, %v6848_v21 }
 0x1c1   : > { %6851 = vpow2.f32 %v1074_v45  ;;  %v1153_v26 = vmul.f32 0.6931472, %v6850_v53 }
 0x1c2   : > { %6853 = vlog2.f32 %v1160_v54  ;;  %v1164_v5 = vadd.f32 1.0, %v1163_v63  ;;  %vm1167_vm0 = vcmp.lt.f32.partialorder %v1166_v11, 0.0004427343 }
 0x1c3   : > { %v1159_v62 = vsel %vm1158_vm14, %v1156_v59, %v1153_v26  ;;  %v6677_v26 = vld [vmem:[#allocation7 + $0x18] sm:$0xff] }
 0x1c4   : > { %v1025_v61 = vpop.f32.mrf.mxu1  ;;  %v1239_v29 = vsel %vm1047_vm15, %v8562_v28, %v1159_v62  ;;  %v1165_v28 = vmul.f32 %v6848_v21, %v1164_v5  ;;  %1482 = vmatmul.bf16.gmra.mxu2 %v8352_v8  ;;  %1830 = vmatpush.bf16.msrb.mxu0 %v6677_v26 }
 0x1c5   : > { %v8584_v9 = vadd.f32 %v8508_v34, %v1025_v61  ;;  %v1255_v24 = vpack.c.bf16 %v1239_v29, %v1239_v29  ;;  %3209 = vmatpush.bf16.msra.mxu2 %v6677_v26 }
 0x1c7   : > { %v6852_v2 = vpop.eup %6851  ;;  %v1076_v1 = vmul.f32 1.442695, %v8584_v9  ;;  %v1287_v0 = vunpack.c.l.b16 %v1255_v24  ;;  %vm1050_vm5 = vcmp.gt.f32.partialorder %v8584_v9, 20.0 }
 0x1c8   : > { %v6854_v10 = vpop.eup %6853  ;;  %v1169_v14 = vadd.f32 1.0, %v6852_v2  ;;  %v1172_v31 = vmul.f32 -0.5, %v6852_v2  ;;  %v1175_v41 = vand.u32 2147483647, %v6852_v2 }
 0x1c9   : > { %6855 = vpow2.f32 %v1076_v1  ;;  %v1299_v44 = vpack.c.b16 %v1287_v0, %v1286_v40  ;;  %v1162_v22 = vmul.f32 0.6931472, %v6854_v10 }
 0x1ca   : > { %6857 = vlog2.f32 %v1169_v14  ;;  %v1173_v13 = vadd.f32 1.0, %v1172_v31  ;;  %vm1176_vm2 = vcmp.lt.f32.partialorder %v1175_v41, 0.0004427343 }
 0x1cb   : > { %1516 = vmatmul.bf16.gmra.mxu3 %v1299_v44  ;;  %v1168_v38 = vsel %vm1167_vm0, %v1165_v28, %v1162_v22 }
 0x1cc   : > { %v1027_v23 = vpop.f32.mrf.mxu1  ;;  %v1240_v30 = vsel %vm1048_vm1, %v8571_v6, %v1168_v38  ;;  %v1174_v39 = vmul.f32 %v6852_v2, %v1173_v13 }
 0x1cd   : > { %v8588_v4 = vadd.f32 %v8508_v34, %v1027_v23  ;;  %v1256_v18 = vpack.c.bf16 %v1240_v30, %v1240_v30 }
 0x1cf   : > { %v6856_v42 = vpop.eup %6855  ;;  %v1078_v16 = vmul.f32 1.442695, %v8588_v4  ;;  %v1288_v50 = vunpack.c.l.b16 %v1256_v18  ;;  %vm1051_vm7 = vcmp.gt.f32.partialorder %v8588_v4, 20.0 }
 0x1d0   : > { %v6858_v32 = vpop.eup %6857  ;;  %v1178_v58 = vadd.f32 1.0, %v6856_v42  ;;  %v1181_v19 = vmul.f32 -0.5, %v6856_v42  ;;  %v1184_v21 = vand.u32 2147483647, %v6856_v42 }
 0x1d1   : > { %6859 = vpow2.f32 %v1078_v16  ;;  %v1171_v17 = vmul.f32 0.6931472, %v6858_v32 }
 0x1d2   : > { %6861 = vlog2.f32 %v1178_v58  ;;  %v1182_v15 = vadd.f32 1.0, %v1181_v19  ;;  %vm1185_vm4 = vcmp.lt.f32.partialorder %v1184_v21, 0.0004427343  ;;  %v6676_v58 = vld [vmem:[#allocation7 + $0x10] sm:$0xff] }
 0x1d3   : > { %v1177_v47 = vsel %vm1176_vm2, %v1174_v39, %v1171_v17  ;;  %1831 = vmatpush.bf16.msrb.mxu0 %v6676_v58  ;;  %3210 = vmatpush.bf16.msra.mxu2 %v6676_v58 }
 0x1d4   : > { %v1030_v12 = vpop.f32.mrf.mxu1  ;;  %v1241_v49 = vsel %vm1049_vm3, %v8575_v37, %v1177_v47  ;;  %v1183_v37 = vmul.f32 %v6856_v42, %v1182_v15  ;;  %1487 = vmatmul.bf16.gmra.mxu2 %v8366_v25 }
 0x1d5   : > { %v8597_v6 = vadd.f32 %v8508_v34, %v1030_v12  ;;  %v1257_v20 = vpack.c.bf16 %v1241_v49, %v1241_v49 }
 0x1d7   : > { %v6860_v33 = vpop.eup %6859  ;;  %v1080_v8 = vmul.f32 1.442695, %v8597_v6  ;;  %v1289_v7 = vunpack.c.l.b16 %v1257_v20  ;;  %vm1052_vm9 = vcmp.gt.f32.partialorder %v8597_v6, 20.0 }
 0x1d8   : > { %v6862_v52 = vpop.eup %6861  ;;  %v1187_v45 = vadd.f32 1.0, %v6860_v33  ;;  %v1190_v54 = vmul.f32 -0.5, %v6860_v33  ;;  %v1193_v63 = vand.u32 2147483647, %v6860_v33 }
 0x1d9   : > { %6863 = vpow2.f32 %v1080_v8  ;;  %v1300_v53 = vpack.c.b16 %v1289_v7, %v1288_v50  ;;  %v1180_v51 = vmul.f32 0.6931472, %v6862_v52 }
 0x1da   : > { %6865 = vlog2.f32 %v1187_v45  ;;  %v1191_v27 = vadd.f32 1.0, %v1190_v54  ;;  %vm1194_vm6 = vcmp.lt.f32.partialorder %v1193_v63, 0.0004427343 }
 0x1db   : > { %1521 = vmatmul.bf16.gmra.mxu3 %v1300_v53  ;;  %v1186_v62 = vsel %vm1185_vm4, %v1183_v37, %v1180_v51 }
 0x1dc   : > { %v1032_v59 = vpop.f32.mrf.mxu1  ;;  %v1242_v2 = vsel %vm1050_vm5, %v8584_v9, %v1186_v62  ;;  %v1192_v0 = vmul.f32 %v6860_v33, %v1191_v27 }
 0x1dd   : > { %v8601_v55 = vadd.f32 %v8508_v34, %v1032_v59  ;;  %v1258_v10 = vpack.c.bf16 %v1242_v2, %v1242_v2 }
 0x1df   : > { %v6864_v61 = vpop.eup %6863  ;;  %v1082_v29 = vmul.f32 1.442695, %v8601_v55  ;;  %v1290_v23 = vunpack.c.l.b16 %v1258_v10  ;;  %vm1053_vm11 = vcmp.gt.f32.partialorder %v8601_v55, 20.0 }
 0x1e0   : > { %v6866_v24 = vpop.eup %6865  ;;  %v1196_v1 = vadd.f32 1.0, %v6864_v61  ;;  %v1199_v11 = vmul.f32 -0.5, %v6864_v61  ;;  %v1202_v41 = vand.u32 2147483647, %v6864_v61 }
 0x1e1   : > { %6867 = vpow2.f32 %v1082_v29  ;;  %v1189_v40 = vmul.f32 0.6931472, %v6866_v24 }
 0x1e2   : > { %6869 = vlog2.f32 %v1196_v1  ;;  %v1200_v25 = vadd.f32 1.0, %v1199_v11  ;;  %vm1203_vm8 = vcmp.lt.f32.partialorder %v1202_v41, 0.0004427343  ;;  %v6675_v11 = vld [vmem:[#allocation7 + $0x8] sm:$0xff] }
 0x1e3   : > { %v1195_v5 = vsel %vm1194_vm6, %v1192_v0, %v1189_v40  ;;  %1832 = vmatpush.bf16.msrb.mxu0 %v6675_v11  ;;  %3211 = vmatpush.bf16.msra.mxu2 %v6675_v11 }
 0x1e4   : > { %v1035_v14 = vpop.f32.mrf.mxu1  ;;  %v1243_v44 = vsel %vm1051_vm7, %v8588_v4, %v1195_v5  ;;  %v1201_v4 = vmul.f32 %v6864_v61, %v1200_v25  ;;  %v6674_v25 = vld [vmem:[#allocation7] sm:$0xff] }
 0x1e5   : > { %v8610_v22 = vadd.f32 %v8508_v34, %v1035_v14  ;;  %v1259_v9 = vpack.c.bf16 %v1243_v44, %v1243_v44 }
 0x1e7   : > { %v6868_v31 = vpop.eup %6867  ;;  %v1084_v28 = vmul.f32 1.442695, %v8610_v22  ;;  %v1291_v38 = vunpack.c.l.b16 %v1259_v9  ;;  %v1453_v61 = vpop.f32.mrf.mxu2  ;;  %vm1054_vm13 = vcmp.gt.f32.partialorder %v8610_v22, 20.0  ;;  %1833 = vmatpush.bf16.msrb.mxu0 %v6674_v25  ;;  %3212 = vmatpush.bf16.msra.mxu2 %v6674_v25 }
 0x1e8   : > { %v6870_v13 = vpop.eup %6869  ;;  %v1205_v42 = vadd.f32 1.0, %v6868_v31  ;;  %v1208_v30 = vmul.f32 -0.5, %v6868_v31  ;;  %v1211_v18 = vand.u32 2147483647, %v6868_v31 }
 0x1e9   : > { %6871 = vpow2.f32 %v1084_v28  ;;  %v1301_v16 = vpack.c.b16 %v1291_v38, %v1290_v23  ;;  %v1198_v32 = vmul.f32 0.6931472, %v6870_v13 }
 0x1ea   : > { %6873 = vlog2.f32 %v1205_v42  ;;  %v1209_v47 = vadd.f32 1.0, %v1208_v30  ;;  %vm1212_vm10 = vcmp.lt.f32.partialorder %v1211_v18, 0.0004427343 }
 0x1eb   : > { %1526 = vmatmul.bf16.gmra.mxu3 %v1301_v16  ;;  %v1204_v46 = vsel %vm1203_vm8, %v1201_v4, %v1198_v32  ;;  %2891 = vmatpush.bf16.msra.mxu0 %v8436_v35 }
 0x1ec   : > { %v1037_v17 = vpop.f32.mrf.mxu1  ;;  %v1244_v20 = vsel %vm1052_vm9, %v8597_v6, %v1204_v46  ;;  %v1210_v50 = vmul.f32 %v6868_v31, %v1209_v47 }
 0x1ed   : > { %v1038_v39 = vadd.f32 %v8508_v34, %v1037_v17  ;;  %v1260_v7 = vpack.c.bf16 %v1244_v20, %v1244_v20 }
 0x1ef   : > { %v6872_v19 = vpop.eup %6871  ;;  %v1086_v12 = vmul.f32 1.442695, %v1038_v39  ;;  %v1292_v53 = vunpack.c.l.b16 %v1260_v7  ;;  %vm1055_vm15 = vcmp.gt.f32.partialorder %v1038_v39, 20.0  ;;  %v1455_v9 = vpop.f32.mrf.mxu2  ;;  %2892 = vmatpush.bf16.msra.mxu0 %v8445_v43 }
 0x1f0   : > { %v6874_v49 = vpop.eup %6873  ;;  %v1214_v33 = vadd.f32 1.0, %v6872_v19  ;;  %v1217_v15 = vmul.f32 -0.5, %v6872_v19  ;;  %v1220_v6 = vand.u32 2147483647, %v6872_v19 }
 0x1f1   : > { %6875 = vpow2.f32 %v1086_v12  ;;  %v1207_v8 = vmul.f32 0.6931472, %v6874_v49 }
 0x1f2   : > { %6877 = vlog2.f32 %v1214_v33  ;;  %v1218_v54 = vadd.f32 1.0, %v1217_v15  ;;  %vm1221_vm12 = vcmp.lt.f32.partialorder %v1220_v6, 0.0004427343 }
 0x1f3   : > { %v1213_v34 = vsel %vm1212_vm10, %v1210_v50, %v1207_v8  ;;  %2893 = vmatpush.bf16.msra.mxu0 %v8451_v48 }
 0x1f4   : > { %v1245_v52 = vsel %vm1053_vm11, %v8601_v55, %v1213_v34  ;;  %v1219_v63 = vmul.f32 %v6872_v19, %v1218_v54 }
 0x1f5   : > { %v1261_v21 = vpack.c.bf16 %v1245_v52, %v1245_v52 }
 0x1f7   : > { %v6876_v45 = vpop.eup %6875  ;;  %v1293_v51 = vunpack.c.l.b16 %v1261_v21  ;;  %v1458_v38 = vpop.f32.mrf.mxu2  ;;  %2894 = vmatpush.bf16.msra.mxu0 %v8460_v57 }
 0x1f8   : > { %v6878_v37 = vpop.eup %6877  ;;  %v1223_v26 = vadd.f32 1.0, %v6876_v45  ;;  %v1226_v27 = vmul.f32 -0.5, %v6876_v45  ;;  %v1229_v2 = vand.u32 2147483647, %v6876_v45 }
 0x1f9   : > { %v1302_v59 = vpack.c.b16 %v1293_v51, %v1292_v53  ;;  %v1216_v62 = vmul.f32 0.6931472, %v6878_v37 }
 0x1fa   : > { %6879 = vlog2.f32 %v1223_v26  ;;  %v1227_v24 = vadd.f32 1.0, %v1226_v27  ;;  %vm1230_vm14 = vcmp.lt.f32.partialorder %v1229_v2, 0.0004427343 }
 0x1fb   : > { %1531 = vmatmul.bf16.gmra.mxu3 %v1302_v59  ;;  %v1222_v29 = vsel %vm1221_vm12, %v1219_v63, %v1216_v62  ;;  %2895 = vmatpush.bf16.msra.mxu0 %v8469_v3 }
 0x1fc   : > { %v1246_v1 = vsel %vm1054_vm13, %v8610_v22, %v1222_v29  ;;  %v1228_v0 = vmul.f32 %v6876_v45, %v1227_v24  ;;  %v8624_v22 = vld [vmem:[%s10124_s7] ss:$0 sm:$0xff] }
 0x1fd   : > { %v1262_v10 = vpack.c.bf16 %v1246_v1, %v1246_v1  ;;  %v1454_v41 = vadd.f32 %v8624_v22, %v1453_v61  ;;  %v1456_v35 = vadd.f32 %v8624_v22, %v1455_v9  ;;  %v1459_v46 = vadd.f32 %v8624_v22, %v1458_v38 }
 0x1ff   : > { %v1294_v31 = vunpack.c.l.b16 %v1262_v10  ;;  %v1460_v13 = vpop.f32.mrf.mxu2  ;;  %2896 = vmatpush.bf16.msra.mxu0 %v8480_v56  ;;  %v6689_v10 = vld [vmem:[#allocation9 + $0x38] sm:$0xff] }
 0x200   : > { %v6880_v55 = vpop.eup %6879  ;;  %v1461_v20 = vadd.f32 %v8624_v22, %v1460_v13  ;;  %2159 = vmatpush.bf16.msrb.mxu1 %v6689_v10  ;;  %3470 = vmatpush.bf16.msra.mxu3 %v6689_v10 }
 0x201   : > { %v1225_v40 = vmul.f32 0.6931472, %v6880_v55 }
 0x203   : > { %v1231_v5 = vsel %vm1230_vm14, %v1228_v0, %v1225_v40  ;;  %2897 = vmatpush.bf16.msra.mxu0 %v8489_v60  ;;  %v7777_v0 = vld [vmem:[%s10119_s2 + $0x38] sm:$0xff] }
 0x204   : > { %v1247_v14 = vsel %vm1055_vm15, %v1038_v39, %v1231_v5 }
 0x205   : > { %v1263_v44 = vpack.c.bf16 %v1247_v14, %v1247_v14 }
 0x207   : > { %v1295_v28 = vunpack.c.l.b16 %v1263_v44  ;;  %v1463_v30 = vpop.f32.mrf.mxu2  ;;  %2898 = vmatpush.bf16.msra.mxu0 %v8498_v36 }
 0x208   : > { %v1464_v51 = vadd.f32 %v8624_v22, %v1463_v30 }
 0x209   : > { %v1303_v23 = vpack.c.b16 %v1295_v28, %v1294_v31  ;;  %v7778_v28 = vld [vmem:[%s10119_s2 + $0x30] sm:$0xff] }
 0x20b   : > { %1536 = vmatmul.bf16.gmra.mxu3 %v1303_v23 }
 0x20f   : > { %v1465_v47 = vpop.f32.mrf.mxu2 }
 0x210   : > { %v1466_v14 = vadd.f32 %v8624_v22, %v1465_v47 }
 0x217   : > { %v1468_v52 = vpop.f32.mrf.mxu2 }
 0x218   : > { %v1469_v30 = vadd.f32 %v8624_v22, %v1468_v52 }
 0x21e   : > { %v1502_v42 = vpop.f32.mrf.mxu3 }
 0x21f   : > { %v1503_v16 = vadd.f32 %v1502_v42, %v1454_v41  ;;  %v1470_v1 = vpop.f32.mrf.mxu2 }
 0x221   : > { %v1558_v32 = vmul.f32 1.442695, %v1503_v16  ;;  %vm1542_vm2 = vcmp.gt.f32.partialorder %v1503_v16, 20.0 }
 0x223   : > { %6881 = vpow2.f32 %v1558_v32 }
 0x226   : > { %v1504_v4 = vpop.f32.mrf.mxu3 }
 0x227   : > { %v1505_v58 = vadd.f32 %v1504_v4, %v1456_v35  ;;  %v7779_v4 = vld [vmem:[%s10119_s2 + $0x28] sm:$0xff] }
 0x229   : > { %v6882_v17 = vpop.eup %6881  ;;  %v1560_v39 = vmul.f32 1.442695, %v1505_v58  ;;  %vm1543_vm3 = vcmp.gt.f32.partialorder %v1505_v58, 20.0 }
 0x22a   : > { %v1590_v43 = vadd.f32 1.0, %v6882_v17  ;;  %v1593_v3 = vmul.f32 -0.5, %v6882_v17  ;;  %v1596_v50 = vand.u32 2147483647, %v6882_v17 }
 0x22b   : > { %6883 = vpow2.f32 %v1560_v39 }
 0x22c   : > { %6885 = vlog2.f32 %v1590_v43  ;;  %v1594_v33 = vadd.f32 1.0, %v1593_v3  ;;  %vm1597_vm0 = vcmp.lt.f32.partialorder %v1596_v50, 0.0004427343  ;;  %v1473_v43 = vpop.f32.mrf.mxu2  ;;  %v6688_v50 = vld [vmem:[#allocation9 + $0x30] sm:$0xff] }
 0x22d   : > { %2160 = vmatpush.bf16.msrb.mxu1 %v6688_v50  ;;  %3471 = vmatpush.bf16.msra.mxu3 %v6688_v50 }
 0x22e   : > { %v1507_v48 = vpop.f32.mrf.mxu3  ;;  %v1595_v53 = vmul.f32 %v6882_v17, %v1594_v33 }
 0x22f   : > { %v8635_v57 = vadd.f32 %v1507_v48, %v1459_v46 }
 0x231   : > { %v6884_v18 = vpop.eup %6883  ;;  %v1562_v19 = vmul.f32 1.442695, %v8635_v57  ;;  %vm1544_vm6 = vcmp.gt.f32.partialorder %v8635_v57, 20.0 }
 0x232   : > { %v1599_v12 = vadd.f32 1.0, %v6884_v18  ;;  %v1602_v49 = vmul.f32 -0.5, %v6884_v18  ;;  %v6886_v56 = vpop.eup %6885  ;;  %v1605_v15 = vand.u32 2147483647, %v6884_v18 }
 0x233   : > { %6887 = vpow2.f32 %v1562_v19  ;;  %v1592_v60 = vmul.f32 0.6931472, %v6886_v56  ;;  %v7780_v19 = vld [vmem:[%s10119_s2 + $0x20] sm:$0xff] }
 0x234   : > { %6889 = vlog2.f32 %v1599_v12  ;;  %v1603_v7 = vadd.f32 1.0, %v1602_v49  ;;  %vm1606_vm1 = vcmp.lt.f32.partialorder %v1605_v15, 0.0004427343  ;;  %v1475_v52 = vpop.f32.mrf.mxu2 }
 0x235   : > { %v1598_v37 = vsel %vm1597_vm0, %v1595_v53, %v1592_v60  ;;  %v1471_v60 = vadd.f32 %v8624_v22, %v1470_v1 }
 0x236   : > { %v1509_v8 = vpop.f32.mrf.mxu3  ;;  %v1604_v26 = vmul.f32 %v6884_v18, %v1603_v7  ;;  %v1734_v27 = vsel %vm1542_vm2, %v1503_v16, %v1598_v37 }
 0x237   : > { %v8640_v34 = vadd.f32 %v1509_v8, %v1461_v20 }
 0x239   : > { %v6888_v21 = vpop.eup %6887  ;;  %v1564_v45 = vmul.f32 1.442695, %v8640_v34  ;;  %vm1545_vm7 = vcmp.gt.f32.partialorder %v8640_v34, 20.0 }
 0x23a   : > { %v6890_v36 = vpop.eup %6889  ;;  %v1608_v54 = vadd.f32 1.0, %v6888_v21  ;;  %v1611_v55 = vmul.f32 -0.5, %v6888_v21  ;;  %v1614_v31 = vand.u32 2147483647, %v6888_v21 }
 0x23b   : > { %6891 = vpow2.f32 %v1564_v45  ;;  %v1601_v6 = vmul.f32 0.6931472, %v6890_v36  ;;  %v7782_v45 = vld [vmem:[%s10119_s2 + $0x10] sm:$0xff] }
 0x23c   : > { %6893 = vlog2.f32 %v1608_v54  ;;  %v1612_v44 = vadd.f32 1.0, %v1611_v55  ;;  %vm1615_vm4 = vcmp.lt.f32.partialorder %v1614_v31, 0.0004427343 }
 0x23d   : > { %v1607_v59 = vsel %vm1606_vm1, %v1604_v26, %v1601_v6 }
 0x23e   : > { %v1512_v62 = vpop.f32.mrf.mxu3  ;;  %v1735_v63 = vsel %vm1543_vm3, %v1505_v58, %v1607_v59  ;;  %v1613_v16 = vmul.f32 %v6888_v21, %v1612_v44 }
 0x23f   : > { %v8644_v61 = vadd.f32 %v1512_v62, %v1464_v51  ;;  %v1750_v29 = vpack.c.bf16 %v1735_v63, %v1734_v27  ;;  %v1474_v62 = vadd.f32 %v8624_v22, %v1473_v43  ;;  %v7783_v63 = vld [vmem:[%s10119_s2 + $0x8] sm:$0xff] }
 0x241   : > { %v6892_v24 = vpop.eup %6891  ;;  %v1566_v2 = vmul.f32 1.442695, %v8644_v61  ;;  %1834 = vmatmul.bf16.vlgmr.msrb.gmra.mxu0 %v1750_v29  ;;  %vm1546_vm10 = vcmp.gt.f32.partialorder %v8644_v61, 20.0 }
 0x242   : > { %v1617_v40 = vadd.f32 1.0, %v6892_v24  ;;  %3632 = vmatpush.bf16.msrb.mxu0 %v7777_v0  ;;  %v1620_v5 = vmul.f32 -0.5, %v6892_v24  ;;  %v6894_v11 = vpop.eup %6893  ;;  %v1623_v13 = vand.u32 2147483647, %v6892_v24 }
 0x243   : > { %6895 = vpow2.f32 %v1566_v2  ;;  %v1610_v38 = vmul.f32 0.6931472, %v6894_v11 }
 0x244   : > { %6897 = vlog2.f32 %v1617_v40  ;;  %v1621_v25 = vadd.f32 1.0, %v1620_v5  ;;  %vm1624_vm5 = vcmp.lt.f32.partialorder %v1623_v13, 0.0004427343  ;;  %v7784_v5 = vld [vmem:[%s10119_s2] sm:$0xff] }
 0x245   : > { %v1616_v58 = vsel %vm1615_vm4, %v1613_v16, %v1610_v38  ;;  %v6687_v38 = vld [vmem:[#allocation9 + $0x28] sm:$0xff] }
 0x246   : > { %v1514_v9 = vpop.f32.mrf.mxu3  ;;  %3633 = vmatpush.bf16.msrb.mxu0 %v7778_v28  ;;  %v1622_v39 = vmul.f32 %v6892_v24, %v1621_v25  ;;  %v1736_v47 = vsel %vm1544_vm6, %v8635_v57, %v1616_v58  ;;  %v7781_v57 = vld [vmem:[%s10119_s2 + $0x18] sm:$0xff]  ;;  %v1476_v25 = vadd.f32 %v8624_v22, %v1475_v52  ;;  %2161 = vmatpush.bf16.msrb.mxu1 %v6687_v38 }
 0x247   : > { %v8654_v23 = vadd.f32 %v1514_v9, %v1466_v14  ;;  %v1478_v14 = vpop.f32.mrf.mxu2  ;;  %3472 = vmatpush.bf16.msra.mxu3 %v6687_v38 }
 0x248   : > { %v1479_v43 = vadd.f32 %v8624_v22, %v1478_v14 }
 0x249   : > { %v6896_v41 = vpop.eup %6895  ;;  %v1568_v42 = vmul.f32 1.442695, %v8654_v23  ;;  %vm1547_vm11 = vcmp.gt.f32.partialorder %v8654_v23, 20.0 }
 0x24a   : > { %v6898_v32 = vpop.eup %6897  ;;  %v1626_v35 = vadd.f32 1.0, %v6896_v41  ;;  %3634 = vmatpush.bf16.msrb.mxu0 %v7779_v4  ;;  %v1629_v20 = vmul.f32 -0.5, %v6896_v41  ;;  %v1632_v21 = vand.u32 2147483647, %v6896_v41 }
 0x24b   : > { %6899 = vpow2.f32 %v1568_v42  ;;  %v1619_v17 = vmul.f32 0.6931472, %v6898_v32 }
 0x24c   : > { %6901 = vlog2.f32 %v1626_v35  ;;  %v1630_v7 = vadd.f32 1.0, %v1629_v20  ;;  %vm1633_vm8 = vcmp.lt.f32.partialorder %v1632_v21, 0.0004427343 }
 0x24d   : > { %v1625_v46 = vsel %vm1624_vm5, %v1622_v39, %v1619_v17 }
 0x24e   : > { %v1517_v48 = vpop.f32.mrf.mxu3  ;;  %v1737_v18 = vsel %vm1545_vm7, %v8640_v34, %v1625_v46  ;;  %3635 = vmatpush.bf16.msrb.mxu0 %v7780_v19  ;;  %v1631_v26 = vmul.f32 %v6896_v41, %v1630_v7 }
 0x24f   : > { %v8668_v3 = vadd.f32 %v1517_v48, %v1469_v30  ;;  %v1751_v12 = vpack.c.bf16 %v1737_v18, %v1736_v47  ;;  %v1480_v46 = vpop.f32.mrf.mxu2 }
 0x251   : > { %v6900_v49 = vpop.eup %6899  ;;  %v1570_v56 = vmul.f32 1.442695, %v8668_v3  ;;  %1839 = vmatmul.bf16.gmra.mxu0 %v1751_v12  ;;  %vm1548_vm14 = vcmp.gt.f32.partialorder %v8668_v3, 20.0 }
 0x252   : > { %v1635_v33 = vadd.f32 1.0, %v6900_v49  ;;  %3636 = vmatpush.bf16.msrb.mxu0 %v7781_v57  ;;  %v1638_v8 = vmul.f32 -0.5, %v6900_v49  ;;  %v6902_v34 = vpop.eup %6901  ;;  %v1641_v54 = vand.u32 2147483647, %v6900_v49 }
 0x253   : > { %6903 = vpow2.f32 %v1570_v56  ;;  %v1628_v36 = vmul.f32 0.6931472, %v6902_v34 }
 0x254   : > { %6905 = vlog2.f32 %v1635_v33  ;;  %v1639_v51 = vadd.f32 1.0, %v1638_v8  ;;  %vm1642_vm9 = vcmp.lt.f32.partialorder %v1641_v54, 0.0004427343 }
 0x255   : > { %v1634_v29 = vsel %vm1633_vm8, %v1631_v26, %v1628_v36 }
 0x256   : > { %v1519_v15 = vpop.f32.mrf.mxu3  ;;  %3637 = vmatpush.bf16.msrb.mxu0 %v7782_v45  ;;  %v1640_v2 = vmul.f32 %v6900_v49, %v1639_v51  ;;  %v1738_v40 = vsel %vm1546_vm10, %v8644_v61, %v1634_v29 }
 0x257   : > { %v8678_v53 = vadd.f32 %v1519_v15, %v1471_v60  ;;  %v6686_v15 = vld [vmem:[#allocation9 + $0x20] sm:$0xff]  ;;  %v1483_v21 = vpop.f32.mrf.mxu2 }
 0x258   : > { %2162 = vmatpush.bf16.msrb.mxu1 %v6686_v15  ;;  %3473 = vmatpush.bf16.msra.mxu3 %v6686_v15 }
 0x259   : > { %v6904_v37 = vpop.eup %6903  ;;  %v1572_v6 = vmul.f32 1.442695, %v8678_v53  ;;  %vm1549_vm15 = vcmp.gt.f32.partialorder %v8678_v53, 20.0 }
 0x25a   : > { %v6906_v59 = vpop.eup %6905  ;;  %v1644_v27 = vadd.f32 1.0, %v6904_v37  ;;  %3638 = vmatpush.bf16.msrb.mxu0 %v7783_v63  ;;  %v1647_v31 = vmul.f32 -0.5, %v6904_v37  ;;  %v1650_v42 = vand.u32 2147483647, %v6904_v37  ;;  %v1484_v63 = vadd.f32 %v8624_v22, %v1483_v21 }
 0x25b   : > { %6907 = vpow2.f32 %v1572_v6  ;;  %v1637_v24 = vmul.f32 0.6931472, %v6906_v59 }
 0x25c   : > { %6909 = vlog2.f32 %v1644_v27  ;;  %v1648_v13 = vadd.f32 1.0, %v1647_v31  ;;  %vm1651_vm12 = vcmp.lt.f32.partialorder %v1650_v42, 0.0004427343 }
 0x25d   : > { %v1643_v55 = vsel %vm1642_vm9, %v1640_v2, %v1637_v24 }
 0x25e   : > { %v1522_v1 = vpop.f32.mrf.mxu3  ;;  %v1739_v0 = vsel %vm1547_vm11, %v8654_v23, %v1643_v55  ;;  %3639 = vmatpush.bf16.msrb.mxu0 %v7784_v5  ;;  %v1649_v17 = vmul.f32 %v6904_v37, %v1648_v13 }
 0x25f   : > { %v8692_v10 = vadd.f32 %v1522_v1, %v1474_v62  ;;  %v1752_v11 = vpack.c.bf16 %v1739_v0, %v1738_v40  ;;  %v1485_v40 = vpop.f32.mrf.mxu2 }
 0x261   : > { %v6908_v44 = vpop.eup %6907  ;;  %v1574_v9 = vmul.f32 1.442695, %v8692_v10  ;;  %1844 = vmatmul.bf16.gmra.mxu0 %v1752_v11  ;;  %vm1550_vm2 = vcmp.gt.f32.partialorder %v8692_v10, 20.0 }
 0x262   : > { %v1653_v28 = vadd.f32 1.0, %v6908_v44  ;;  %v1656_v61 = vmul.f32 -0.5, %v6908_v44  ;;  %v6910_v23 = vpop.eup %6909  ;;  %v1659_v35 = vand.u32 2147483647, %v6908_v44 }
 0x263   : > { %6911 = vpow2.f32 %v1574_v9  ;;  %v1646_v32 = vmul.f32 0.6931472, %v6910_v23 }
 0x264   : > { %6913 = vlog2.f32 %v1653_v28  ;;  %v1657_v30 = vadd.f32 1.0, %v1656_v61  ;;  %vm1660_vm13 = vcmp.lt.f32.partialorder %v1659_v35, 0.0004427343  ;;  %v6685_v61 = vld [vmem:[#allocation9 + $0x18] sm:$0xff] }
 0x265   : > { %v1652_v47 = vsel %vm1651_vm12, %v1649_v17, %v1646_v32  ;;  %2163 = vmatpush.bf16.msrb.mxu1 %v6685_v61  ;;  %3474 = vmatpush.bf16.msra.mxu3 %v6685_v61 }
 0x266   : > { %v1524_v41 = vpop.f32.mrf.mxu3  ;;  %v1658_v19 = vmul.f32 %v6908_v44, %v1657_v30  ;;  %v1740_v56 = vsel %vm1548_vm14, %v8668_v3, %v1652_v47  ;;  %v1481_v3 = vadd.f32 %v8624_v22, %v1480_v46 }
 0x267   : > { %v8696_v16 = vadd.f32 %v1524_v41, %v1476_v25  ;;  %v1488_v35 = vpop.f32.mrf.mxu2 }
 0x268   : > { %v1489_v46 = vadd.f32 %v8624_v22, %v1488_v35 }
 0x269   : > { %v6912_v4 = vpop.eup %6911  ;;  %v1576_v58 = vmul.f32 1.442695, %v8696_v16  ;;  %vm1551_vm3 = vcmp.gt.f32.partialorder %v8696_v16, 20.0 }
 0x26a   : > { %v6914_v39 = vpop.eup %6913  ;;  %v1662_v48 = vadd.f32 1.0, %v6912_v4  ;;  %v1665_v34 = vmul.f32 -0.5, %v6912_v4  ;;  %v1668_v36 = vand.u32 2147483647, %v6912_v4 }
 0x26b   : > { %6915 = vpow2.f32 %v1576_v58  ;;  %v1655_v18 = vmul.f32 0.6931472, %v6914_v39 }
 0x26c   : > { %6917 = vlog2.f32 %v1662_v48  ;;  %v1666_v45 = vadd.f32 1.0, %v1665_v34  ;;  %vm1669_vm0 = vcmp.lt.f32.partialorder %v1668_v36, 0.0004427343 }
 0x26d   : > { %v1661_v12 = vsel %vm1660_vm13, %v1658_v19, %v1655_v18 }
 0x26e   : > { %v1527_v49 = vpop.f32.mrf.mxu3  ;;  %v1741_v20 = vsel %vm1549_vm15, %v8678_v53, %v1661_v12  ;;  %v1667_v62 = vmul.f32 %v6912_v4, %v1666_v45 }
 0x26f   : > { %v8704_v33 = vadd.f32 %v1527_v49, %v1479_v43  ;;  %v1753_v57 = vpack.c.bf16 %v1741_v20, %v1740_v56  ;;  %v1490_v15 = vpop.f32.mrf.mxu2 }
 0x271   : > { %v6916_v8 = vpop.eup %6915  ;;  %v1578_v50 = vmul.f32 1.442695, %v8704_v33  ;;  %1849 = vmatmul.bf16.gmra.mxu0 %v1753_v57  ;;  %vm1552_vm6 = vcmp.gt.f32.partialorder %v8704_v33, 20.0 }
 0x272   : > { %v1671_v60 = vadd.f32 1.0, %v6916_v8  ;;  %v1674_v7 = vmul.f32 -0.5, %v6916_v8  ;;  %v6918_v52 = vpop.eup %6917  ;;  %v1677_v6 = vand.u32 2147483647, %v6916_v8 }
 0x273   : > { %6919 = vpow2.f32 %v1578_v50  ;;  %v1664_v54 = vmul.f32 0.6931472, %v6918_v52 }
 0x274   : > { %6921 = vlog2.f32 %v1671_v60  ;;  %v1675_v37 = vadd.f32 1.0, %v1674_v7  ;;  %vm1678_vm1 = vcmp.lt.f32.partialorder %v1677_v6, 0.0004427343  ;;  %v6684_v7 = vld [vmem:[#allocation9 + $0x10] sm:$0xff] }
 0x275   : > { %v1670_v24 = vsel %vm1669_vm0, %v1667_v62, %v1664_v54  ;;  %2164 = vmatpush.bf16.msrb.mxu1 %v6684_v7  ;;  %3475 = vmatpush.bf16.msra.mxu3 %v6684_v7 }
 0x276   : > { %v1529_v53 = vpop.f32.mrf.mxu3  ;;  %v1676_v55 = vmul.f32 %v6916_v8, %v1675_v37  ;;  %v1742_v5 = vsel %vm1550_vm2, %v8692_v10, %v1670_v24  ;;  %v1486_v10 = vadd.f32 %v8624_v22, %v1485_v40 }
 0x277   : > { %v8708_v51 = vadd.f32 %v1529_v53, %v1481_v3 }
 0x279   : > { %v6920_v26 = vpop.eup %6919  ;;  %v1580_v59 = vmul.f32 1.442695, %v8708_v51  ;;  %vm1553_vm7 = vcmp.gt.f32.partialorder %v8708_v51, 20.0 }
 0x27a   : > { %v6922_v27 = vpop.eup %6921  ;;  %v1680_v29 = vadd.f32 1.0, %v6920_v26  ;;  %v1683_v28 = vmul.f32 -0.5, %v6920_v26  ;;  %v1686_v42 = vand.u32 2147483647, %v6920_v26 }
 0x27b   : > { %6923 = vpow2.f32 %v1580_v59  ;;  %v1673_v2 = vmul.f32 0.6931472, %v6922_v27 }
 0x27c   : > { %6925 = vlog2.f32 %v1680_v29  ;;  %v1684_v13 = vadd.f32 1.0, %v1683_v28  ;;  %vm1687_vm4 = vcmp.lt.f32.partialorder %v1686_v42, 0.0004427343 }
 0x27d   : > { %v1679_v1 = vsel %vm1678_vm1, %v1676_v55, %v1673_v2 }
 0x27e   : > { %v1532_v0 = vpop.f32.mrf.mxu3  ;;  %v1743_v11 = vsel %vm1551_vm3, %v8696_v16, %v1679_v1  ;;  %v1685_v39 = vmul.f32 %v6920_v26, %v1684_v13 }
 0x27f   : > { %v8716_v14 = vadd.f32 %v1532_v0, %v1484_v63  ;;  %v1754_v44 = vpack.c.bf16 %v1743_v11, %v1742_v5 }
 0x281   : > { %v6924_v9 = vpop.eup %6923  ;;  %v1582_v31 = vmul.f32 1.442695, %v8716_v14  ;;  %1854 = vmatmul.bf16.gmra.mxu0 %v1754_v44  ;;  %vm1554_vm10 = vcmp.gt.f32.partialorder %v8716_v14, 20.0 }
 0x282   : > { %v1689_v38 = vadd.f32 1.0, %v6924_v9  ;;  %v1692_v23 = vmul.f32 -0.5, %v6924_v9  ;;  %v6926_v25 = vpop.eup %6925  ;;  %v1695_v4 = vand.u32 2147483647, %v6924_v9 }
 0x283   : > { %6927 = vpow2.f32 %v1582_v31  ;;  %v1682_v32 = vmul.f32 0.6931472, %v6926_v25 }
 0x284   : > { %6929 = vlog2.f32 %v1689_v38  ;;  %v1693_v30 = vadd.f32 1.0, %v1692_v23  ;;  %vm1696_vm5 = vcmp.lt.f32.partialorder %v1695_v4, 0.0004427343  ;;  %v6682_v4 = vld [vmem:[#allocation9] sm:$0xff] }
 0x285   : > { %v1688_v47 = vsel %vm1687_vm4, %v1685_v39, %v1682_v32  ;;  %v8753_v39 = vld [vmem:[%s10126_s9] ss:$0 sm:$0xff] }
 0x286   : > { %v1534_v41 = vpop.f32.mrf.mxu3  ;;  %v1694_v19 = vmul.f32 %v6924_v9, %v1693_v30  ;;  %v1744_v56 = vsel %vm1552_vm6, %v8704_v33, %v1688_v47  ;;  %v1491_v33 = vadd.f32 %v8624_v22, %v1490_v15  ;;  %v6683_v9 = vld [vmem:[#allocation9 + $0x8] sm:$0xff] }
 0x287   : > { %v8720_v16 = vadd.f32 %v1534_v41, %v1486_v10  ;;  %2165 = vmatpush.bf16.msrb.mxu1 %v6683_v9  ;;  %3476 = vmatpush.bf16.msra.mxu3 %v6683_v9 }
 0x289   : > { %v6928_v58 = vpop.eup %6927  ;;  %v1584_v17 = vmul.f32 1.442695, %v8720_v16  ;;  %vm1555_vm11 = vcmp.gt.f32.partialorder %v8720_v16, 20.0 }
 0x28a   : > { %v6930_v43 = vpop.eup %6929  ;;  %v1698_v48 = vadd.f32 1.0, %v6928_v58  ;;  %v1701_v60 = vmul.f32 -0.5, %v6928_v58  ;;  %v1704_v36 = vand.u32 2147483647, %v6928_v58 }
 0x28b   : > { %6931 = vpow2.f32 %v1584_v17  ;;  %v1691_v18 = vmul.f32 0.6931472, %v6930_v43  ;;  %2166 = vmatpush.bf16.msrb.mxu1 %v6682_v4  ;;  %3477 = vmatpush.bf16.msra.mxu3 %v6682_v4  ;;  %v8747_v17 = vld [vmem:[%s10123_s6 + $0x70] sm:$0xff] }
 0x28c   : > { %6933 = vlog2.f32 %v1698_v48  ;;  %v1702_v45 = vadd.f32 1.0, %v1701_v60  ;;  %vm1705_vm8 = vcmp.lt.f32.partialorder %v1704_v36, 0.0004427343 }
 0x28d   : > { %v1697_v12 = vsel %vm1696_vm5, %v1694_v19, %v1691_v18  ;;  %v7788_v18 = vld [vmem:[%s10123_s6 + $0x60] sm:$0xff] }
 0x28e   : > { %v1537_v49 = vpop.f32.mrf.mxu3  ;;  %v1745_v20 = vsel %vm1553_vm7, %v8708_v51, %v1697_v12  ;;  %v1703_v62 = vmul.f32 %v6928_v58, %v1702_v45  ;;  %v8741_v58 = vld [vmem:[%s10123_s6 + $0x78] sm:$0xff] }
 0x28f   : > { %v8728_v57 = vadd.f32 %v1537_v49, %v1489_v46  ;;  %v1755_v8 = vpack.c.bf16 %v1745_v20, %v1744_v56  ;;  %2940 = vmatpush.bf16.msra.mxu1 %v8741_v58  ;;  %v7787_v46 = vld [vmem:[%s10123_s6 + $0x68] sm:$0xff]  ;;  %v7789_v12 = vld [vmem:[%s10123_s6 + $0x58] sm:$0xff] }
 0x291   : > { %v6932_v50 = vpop.eup %6931  ;;  %v1586_v34 = vmul.f32 1.442695, %v8728_v57  ;;  %1859 = vmatmul.bf16.gmra.mxu0 %v1755_v8  ;;  %vm1556_vm14 = vcmp.gt.f32.partialorder %v8728_v57, 20.0  ;;  %v7790_v8 = vld [vmem:[%s10123_s6 + $0x50] sm:$0xff] }
 0x292   : > { %v1707_v52 = vadd.f32 1.0, %v6932_v50  ;;  %v1710_v21 = vmul.f32 -0.5, %v6932_v50  ;;  %v6934_v3 = vpop.eup %6933  ;;  %v1713_v6 = vand.u32 2147483647, %v6932_v50 }
 0x293   : > { %6935 = vpow2.f32 %v1586_v34  ;;  %v1700_v54 = vmul.f32 0.6931472, %v6934_v3  ;;  %2941 = vmatpush.bf16.msra.mxu1 %v8747_v17  ;;  %v7791_v34 = vld [vmem:[%s10123_s6 + $0x48] sm:$0xff]  ;;  %v7792_v3 = vld [vmem:[%s10123_s6 + $0x40] sm:$0xff] }
 0x294   : > { %6937 = vlog2.f32 %v1707_v52  ;;  %v1711_v37 = vadd.f32 1.0, %v1710_v21  ;;  %vm1714_vm9 = vcmp.lt.f32.partialorder %v1713_v6, 0.0004427343 }
 0x295   : > { %v1706_v29 = vsel %vm1705_vm8, %v1703_v62, %v1700_v54 }
 0x296   : > { %v1539_v53 = vpop.f32.mrf.mxu3  ;;  %v1712_v2 = vmul.f32 %v6932_v50, %v1711_v37  ;;  %v1746_v55 = vsel %vm1554_vm10, %v8716_v14, %v1706_v29 }
 0x297   : > { %v1540_v51 = vadd.f32 %v1539_v53, %v1491_v33  ;;  %2942 = vmatpush.bf16.msra.mxu1 %v7787_v46 }
 0x299   : > { %v6936_v26 = vpop.eup %6935  ;;  %v1588_v59 = vmul.f32 1.442695, %v1540_v51  ;;  %vm1557_vm15 = vcmp.gt.f32.partialorder %v1540_v51, 20.0 }
 0x29a   : > { %v6938_v27 = vpop.eup %6937  ;;  %v1716_v63 = vadd.f32 1.0, %v6936_v26  ;;  %v1719_v5 = vmul.f32 -0.5, %v6936_v26  ;;  %v1722_v61 = vand.u32 2147483647, %v6936_v26 }
 0x29b   : > { %6939 = vpow2.f32 %v1588_v59  ;;  %v1709_v24 = vmul.f32 0.6931472, %v6938_v27  ;;  %2943 = vmatpush.bf16.msra.mxu1 %v7788_v18 }
 0x29c   : > { %6941 = vlog2.f32 %v1716_v63  ;;  %v1720_v28 = vadd.f32 1.0, %v1719_v5  ;;  %vm1723_vm12 = vcmp.lt.f32.partialorder %v1722_v61, 0.0004427343  ;;  %v7793_v61 = vld [vmem:[#allocation5 + $0x38] sm:$0xff] }
 0x29d   : > { %v1715_v22 = vsel %vm1714_vm9, %v1712_v2, %v1709_v24 }
 0x29e   : > { %v1747_v1 = vsel %vm1555_vm11, %v8720_v16, %v1715_v22  ;;  %v1721_v14 = vmul.f32 %v6936_v26, %v1720_v28 }
 0x29f   : > { %v1756_v40 = vpack.c.bf16 %v1747_v1, %v1746_v55  ;;  %2944 = vmatpush.bf16.msra.mxu1 %v7789_v12 }
 0x2a1   : > { %v6940_v0 = vpop.eup %6939  ;;  %1864 = vmatmul.bf16.gmra.mxu0 %v1756_v40 }
 0x2a2   : > { %v1725_v11 = vadd.f32 1.0, %v6940_v0  ;;  %v1728_v44 = vmul.f32 -0.5, %v6940_v0  ;;  %v6942_v31 = vpop.eup %6941  ;;  %v1731_v25 = vand.u32 2147483647, %v6940_v0 }
 0x2a3   : > { %v1718_v38 = vmul.f32 0.6931472, %v6942_v31  ;;  %2945 = vmatpush.bf16.msra.mxu1 %v7790_v8 }
 0x2a4   : > { %6943 = vlog2.f32 %v1725_v11  ;;  %v1729_v23 = vadd.f32 1.0, %v1728_v44  ;;  %vm1732_vm13 = vcmp.lt.f32.partialorder %v1731_v25, 0.0004427343 }
 0x2a5   : > { %v1724_v13 = vsel %vm1723_vm12, %v1721_v14, %v1718_v38 }
 0x2a6   : > { %v1730_v42 = vmul.f32 %v6940_v0, %v1729_v23  ;;  %v1748_v32 = vsel %vm1556_vm14, %v8728_v57, %v1724_v13  ;;  %v7794_v13 = vld [vmem:[#allocation5 + $0x30] sm:$0xff] }
 0x2a7   : > { %2946 = vmatpush.bf16.msra.mxu1 %v7791_v34 }
 0x2aa   : > { %v6944_v10 = vpop.eup %6943 }
 0x2ab   : > { %v1727_v41 = vmul.f32 0.6931472, %v6944_v10  ;;  %2947 = vmatpush.bf16.msra.mxu1 %v7792_v3 }
 0x2ad   : > { %v1733_v16 = vsel %vm1732_vm13, %v1730_v42, %v1727_v41 }
 0x2ae   : > { %v1749_v30 = vsel %vm1557_vm15, %v1540_v51, %v1733_v16 }
 0x2af   : > { %v1757_v35 = vpack.c.bf16 %v1749_v30, %v1748_v32 }
 0x2b1   : > { %1869 = vmatmul.bf16.gmra.mxu0 %v1757_v35 }
 0x2be   : > { %v1835_v43 = vpop.f32.mrf.mxu0 }
 0x2bf   : > { %v1836_v48 = vadd.f32 %v8753_v39, %v1835_v43 }
 0x2c1   : > { %v1891_v47 = vmul.f32 1.442695, %v1836_v48  ;;  %vm1875_vm2 = vcmp.gt.f32.partialorder %v1836_v48, 20.0 }
 0x2c3   : > { %6945 = vpow2.f32 %v1891_v47 }
 0x2c6   : > { %v1837_v19 = vpop.f32.mrf.mxu0 }
 0x2c7   : > { %v1838_v49 = vadd.f32 %v8753_v39, %v1837_v19 }
 0x2c9   : > { %v6946_v56 = vpop.eup %6945  ;;  %v1893_v20 = vmul.f32 1.442695, %v1838_v49  ;;  %vm1876_vm3 = vcmp.gt.f32.partialorder %v1838_v49, 20.0 }
 0x2ca   : > { %v1923_v57 = vadd.f32 1.0, %v6946_v56  ;;  %v1926_v52 = vmul.f32 -0.5, %v6946_v56  ;;  %v1929_v51 = vand.u32 2147483647, %v6946_v56 }
 0x2cb   : > { %6947 = vpow2.f32 %v1893_v20 }
 0x2cc   : > { %6949 = vlog2.f32 %v1923_v57  ;;  %v1927_v53 = vadd.f32 1.0, %v1926_v52  ;;  %vm1930_vm0 = vcmp.lt.f32.partialorder %v1929_v51, 0.0004427343  ;;  %v7796_v57 = vld [vmem:[#allocation5 + $0x20] sm:$0xff] }
 0x2ce   : > { %v1840_v50 = vpop.f32.mrf.mxu0  ;;  %v1928_v27 = vmul.f32 %v6946_v56, %v1927_v53 }
 0x2cf   : > { %v8773_v60 = vadd.f32 %v8753_v39, %v1840_v50 }
 0x2d1   : > { %v6948_v7 = vpop.eup %6947  ;;  %v1895_v15 = vmul.f32 1.442695, %v8773_v60  ;;  %vm1877_vm6 = vcmp.gt.f32.partialorder %v8773_v60, 20.0 }
 0x2d2   : > { %v1932_v21 = vadd.f32 1.0, %v6948_v7  ;;  %v1935_v33 = vmul.f32 -0.5, %v6948_v7  ;;  %v6950_v45 = vpop.eup %6949  ;;  %v1938_v26 = vand.u32 2147483647, %v6948_v7 }
 0x2d3   : > { %6951 = vpow2.f32 %v1895_v15  ;;  %v1925_v37 = vmul.f32 0.6931472, %v6950_v45 }
 0x2d4   : > { %6953 = vlog2.f32 %v1932_v21  ;;  %v1936_v6 = vadd.f32 1.0, %v1935_v33  ;;  %vm1939_vm1 = vcmp.lt.f32.partialorder %v1938_v26, 0.0004427343  ;;  %v7797_v21 = vld [vmem:[#allocation5 + $0x18] sm:$0xff] }
 0x2d5   : > { %v1931_v24 = vsel %vm1930_vm0, %v1928_v27, %v1925_v37 }
 0x2d6   : > { %v1842_v36 = vpop.f32.mrf.mxu0  ;;  %v1937_v22 = vmul.f32 %v6948_v7, %v1936_v6  ;;  %v2067_v40 = vsel %vm1875_vm2, %v1836_v48, %v1931_v24  ;;  %v7795_v48 = vld [vmem:[#allocation5 + $0x28] sm:$0xff] }
 0x2d7   : > { %v8780_v54 = vadd.f32 %v8753_v39, %v1842_v36  ;;  %v7798_v36 = vld [vmem:[#allocation5 + $0x10] sm:$0xff] }
 0x2d9   : > { %v6952_v59 = vpop.eup %6951  ;;  %v1897_v62 = vmul.f32 1.442695, %v8780_v54  ;;  %vm1878_vm7 = vcmp.gt.f32.partialorder %v8780_v54, 20.0 }
 0x2da   : > { %v6954_v63 = vpop.eup %6953  ;;  %v1941_v29 = vadd.f32 1.0, %v6952_v59  ;;  %v1944_v31 = vmul.f32 -0.5, %v6952_v59  ;;  %v1947_v10 = vand.u32 2147483647, %v6952_v59 }
 0x2db   : > { %6955 = vpow2.f32 %v1897_v62  ;;  %v1934_v2 = vmul.f32 0.6931472, %v6954_v63 }
 0x2dc   : > { %6957 = vlog2.f32 %v1941_v29  ;;  %v1945_v25 = vadd.f32 1.0, %v1944_v31  ;;  %vm1948_vm4 = vcmp.lt.f32.partialorder %v1947_v10, 0.0004427343  ;;  %v7799_v29 = vld [vmem:[#allocation5 + $0x8] sm:$0xff] }
 0x2dd   : > { %v1940_v55 = vsel %vm1939_vm1, %v1937_v22, %v1934_v2 }
 0x2de   : > { %v1845_v1 = vpop.f32.mrf.mxu0  ;;  %v2068_v0 = vsel %vm1876_vm3, %v1838_v49, %v1940_v55  ;;  %v1946_v4 = vmul.f32 %v6952_v59, %v1945_v25 }
 0x2df   : > { %v8784_v5 = vadd.f32 %v8753_v39, %v1845_v1  ;;  %v2083_v11 = vpack.c.bf16 %v2068_v0, %v2067_v40 }
 0x2e1   : > { %v6956_v44 = vpop.eup %6955  ;;  %v1899_v9 = vmul.f32 1.442695, %v8784_v5  ;;  %2167 = vmatmul.bf16.vlgmr.msrb.gmra.mxu1 %v2083_v11  ;;  %vm1879_vm10 = vcmp.gt.f32.partialorder %v8784_v5, 20.0  ;;  %v7800_v11 = vld [vmem:[#allocation5] sm:$0xff] }
 0x2e2   : > { %v1950_v28 = vadd.f32 1.0, %v6956_v44  ;;  %3897 = vmatpush.bf16.msrb.mxu1 %v7793_v61  ;;  %v1953_v38 = vmul.f32 -0.5, %v6956_v44  ;;  %v6958_v23 = vpop.eup %6957  ;;  %v1956_v32 = vand.u32 2147483647, %v6956_v44 }
 0x2e3   : > { %6959 = vpow2.f32 %v1899_v9  ;;  %v1943_v42 = vmul.f32 0.6931472, %v6958_v23 }
 0x2e4   : > { %6961 = vlog2.f32 %v1950_v28  ;;  %v1954_v16 = vadd.f32 1.0, %v1953_v38  ;;  %vm1957_vm5 = vcmp.lt.f32.partialorder %v1956_v32, 0.0004427343 }
 0x2e5   : > { %v1949_v47 = vsel %vm1948_vm4, %v1946_v4, %v1943_v42 }
 0x2e6   : > { %v1847_v14 = vpop.f32.mrf.mxu0  ;;  %3898 = vmatpush.bf16.msrb.mxu1 %v7794_v13  ;;  %v1955_v19 = vmul.f32 %v6956_v44, %v1954_v16  ;;  %v2069_v56 = vsel %vm1877_vm6, %v8773_v60, %v1949_v47 }
 0x2e7   : > { %v8788_v41 = vadd.f32 %v8753_v39, %v1847_v14 }
 0x2e9   : > { %v6960_v30 = vpop.eup %6959  ;;  %v1901_v35 = vmul.f32 1.442695, %v8788_v41  ;;  %vm1880_vm11 = vcmp.gt.f32.partialorder %v8788_v41, 20.0 }
 0x2ea   : > { %v6962_v43 = vpop.eup %6961  ;;  %v1959_v46 = vadd.f32 1.0, %v6960_v30  ;;  %3899 = vmatpush.bf16.msrb.mxu1 %v7795_v48  ;;  %v1962_v15 = vmul.f32 -0.5, %v6960_v30  ;;  %v1965_v53 = vand.u32 2147483647, %v6960_v30 }
 0x2eb   : > { %6963 = vpow2.f32 %v1901_v35  ;;  %v1952_v18 = vmul.f32 0.6931472, %v6962_v43 }
 0x2ec   : > { %6965 = vlog2.f32 %v1959_v46  ;;  %v1963_v33 = vadd.f32 1.0, %v1962_v15  ;;  %vm1966_vm8 = vcmp.lt.f32.partialorder %v1965_v53, 0.0004427343 }
 0x2ed   : > { %v1958_v12 = vsel %vm1957_vm5, %v1955_v19, %v1952_v18 }
 0x2ee   : > { %v1850_v49 = vpop.f32.mrf.mxu0  ;;  %v2070_v20 = vsel %vm1878_vm7, %v8780_v54, %v1958_v12  ;;  %3900 = vmatpush.bf16.msrb.mxu1 %v7796_v57  ;;  %v1964_v62 = vmul.f32 %v6960_v30, %v1963_v33 }
 0x2ef   : > { %v8796_v8 = vadd.f32 %v8753_v39, %v1850_v49  ;;  %v2084_v50 = vpack.c.bf16 %v2070_v20, %v2069_v56 }
 0x2f1   : > { %v6964_v34 = vpop.eup %6963  ;;  %v1903_v7 = vmul.f32 1.442695, %v8796_v8  ;;  %2172 = vmatmul.bf16.gmra.mxu1 %v2084_v50  ;;  %vm1881_vm14 = vcmp.gt.f32.partialorder %v8796_v8, 20.0 }
 0x2f2   : > { %v1968_v52 = vadd.f32 1.0, %v6964_v34  ;;  %3901 = vmatpush.bf16.msrb.mxu1 %v7797_v21  ;;  %v1971_v3 = vmul.f32 -0.5, %v6964_v34  ;;  %v6966_v60 = vpop.eup %6965  ;;  %v1974_v6 = vand.u32 2147483647, %v6964_v34 }
 0x2f3   : > { %6967 = vpow2.f32 %v1903_v7  ;;  %v1961_v54 = vmul.f32 0.6931472, %v6966_v60 }
 0x2f4   : > { %6969 = vlog2.f32 %v1968_v52  ;;  %v1972_v37 = vadd.f32 1.0, %v1971_v3  ;;  %vm1975_vm9 = vcmp.lt.f32.partialorder %v1974_v6, 0.0004427343 }
 0x2f5   : > { %v1967_v24 = vsel %vm1966_vm8, %v1964_v62, %v1961_v54 }
 0x2f6   : > { %v1852_v45 = vpop.f32.mrf.mxu0  ;;  %3902 = vmatpush.bf16.msrb.mxu1 %v7798_v36  ;;  %v1973_v22 = vmul.f32 %v6964_v34, %v1972_v37  ;;  %v2071_v40 = vsel %vm1879_vm10, %v8784_v5, %v1967_v24 }
 0x2f7   : > { %v1853_v51 = vadd.f32 %v8753_v39, %v1852_v45 }
 0x2f9   : > { %v6968_v26 = vpop.eup %6967  ;;  %v1905_v59 = vmul.f32 1.442695, %v1853_v51  ;;  %vm1882_vm15 = vcmp.gt.f32.partialorder %v1853_v51, 20.0 }
 0x2fa   : > { %v6970_v27 = vpop.eup %6969  ;;  %v1977_v63 = vadd.f32 1.0, %v6968_v26  ;;  %3903 = vmatpush.bf16.msrb.mxu1 %v7799_v29  ;;  %v1980_v61 = vmul.f32 -0.5, %v6968_v26  ;;  %v1983_v10 = vand.u32 2147483647, %v6968_v26 }
 0x2fb   : > { %6971 = vpow2.f32 %v1905_v59  ;;  %v1970_v2 = vmul.f32 0.6931472, %v6970_v27 }
 0x2fc   : > { %6973 = vlog2.f32 %v1977_v63  ;;  %v1981_v5 = vadd.f32 1.0, %v1980_v61  ;;  %vm1984_vm12 = vcmp.lt.f32.partialorder %v1983_v10, 0.0004427343 }
 0x2fd   : > { %v1976_v55 = vsel %vm1975_vm9, %v1973_v22, %v1970_v2 }
 0x2fe   : > { %v1855_v1 = vpop.f32.mrf.mxu0  ;;  %v2072_v0 = vsel %vm1880_vm11, %v8788_v41, %v1976_v55  ;;  %3904 = vmatpush.bf16.msrb.mxu1 %v7800_v11  ;;  %v1982_v35 = vmul.f32 %v6968_v26, %v1981_v5 }
 0x2ff   : > { %v8805_v44 = vadd.f32 %v8753_v39, %v1855_v1  ;;  %v2085_v9 = vpack.c.bf16 %v2072_v0, %v2071_v40 }
 0x301   : > { %v6972_v31 = vpop.eup %6971  ;;  %v1907_v28 = vmul.f32 1.442695, %v8805_v44  ;;  %2177 = vmatmul.bf16.gmra.mxu1 %v2085_v9  ;;  %vm1883_vm2 = vcmp.gt.f32.partialorder %v8805_v44, 20.0 }
 0x302   : > { %v1986_v38 = vadd.f32 1.0, %v6972_v31  ;;  %v1989_v23 = vmul.f32 -0.5, %v6972_v31  ;;  %v6974_v25 = vpop.eup %6973  ;;  %v1992_v16 = vand.u32 2147483647, %v6972_v31 }
 0x303   : > { %6975 = vpow2.f32 %v1907_v28  ;;  %v1979_v41 = vmul.f32 0.6931472, %v6974_v25 }
 0x304   : > { %6977 = vlog2.f32 %v1986_v38  ;;  %v1990_v42 = vadd.f32 1.0, %v1989_v23  ;;  %vm1993_vm13 = vcmp.lt.f32.partialorder %v1992_v16, 0.0004427343 }
 0x305   : > { %v1985_v46 = vsel %vm1984_vm12, %v1982_v35, %v1979_v41 }
 0x306   : > { %v1857_v14 = vpop.f32.mrf.mxu0  ;;  %v1991_v47 = vmul.f32 %v6972_v31, %v1990_v42  ;;  %v2073_v12 = vsel %vm1881_vm14, %v8796_v8, %v1985_v46 }
 0x307   : > { %v1858_v13 = vadd.f32 %v8753_v39, %v1857_v14 }
 0x309   : > { %v6976_v32 = vpop.eup %6975  ;;  %v1909_v30 = vmul.f32 1.442695, %v1858_v13  ;;  %vm1884_vm3 = vcmp.gt.f32.partialorder %v1858_v13, 20.0 }
 0x30a   : > { %v6978_v4 = vpop.eup %6977  ;;  %v1995_v43 = vadd.f32 1.0, %v6976_v32  ;;  %v1998_v34 = vmul.f32 -0.5, %v6976_v32  ;;  %v2001_v60 = vand.u32 2147483647, %v6976_v32 }
 0x30b   : > { %6979 = vpow2.f32 %v1909_v30  ;;  %v1988_v48 = vmul.f32 0.6931472, %v6978_v4 }
 0x30c   : > { %6981 = vlog2.f32 %v1995_v43  ;;  %v1999_v21 = vadd.f32 1.0, %v1998_v34  ;;  %vm2002_vm0 = vcmp.lt.f32.partialorder %v2001_v60, 0.0004427343 }
 0x30d   : > { %v1994_v18 = vsel %vm1993_vm13, %v1991_v47, %v1988_v48 }
 0x30e   : > { %v1860_v19 = vpop.f32.mrf.mxu0  ;;  %v2074_v49 = vsel %vm1882_vm15, %v1853_v51, %v1994_v18  ;;  %v2000_v54 = vmul.f32 %v6976_v32, %v1999_v21 }
 0x30f   : > { %v8812_v56 = vadd.f32 %v8753_v39, %v1860_v19  ;;  %v2086_v20 = vpack.c.bf16 %v2074_v49, %v2073_v12 }
 0x311   : > { %v6980_v57 = vpop.eup %6979  ;;  %v1911_v50 = vmul.f32 1.442695, %v8812_v56  ;;  %2182 = vmatmul.bf16.gmra.mxu1 %v2086_v20  ;;  %vm1885_vm6 = vcmp.gt.f32.partialorder %v8812_v56, 20.0 }
 0x312   : > { %v2004_v7 = vadd.f32 1.0, %v6980_v57  ;;  %v2007_v15 = vmul.f32 -0.5, %v6980_v57  ;;  %v6982_v52 = vpop.eup %6981  ;;  %v2010_v53 = vand.u32 2147483647, %v6980_v57 }
 0x313   : > { %6983 = vpow2.f32 %v1911_v50  ;;  %v1997_v33 = vmul.f32 0.6931472, %v6982_v52 }
 0x314   : > { %6985 = vlog2.f32 %v2004_v7  ;;  %v2008_v45 = vadd.f32 1.0, %v2007_v15  ;;  %vm2011_vm1 = vcmp.lt.f32.partialorder %v2010_v53, 0.0004427343 }
 0x315   : > { %v2003_v26 = vsel %vm2002_vm0, %v2000_v54, %v1997_v33 }
 0x316   : > { %v1862_v3 = vpop.f32.mrf.mxu0  ;;  %v2009_v62 = vmul.f32 %v6980_v57, %v2008_v45  ;;  %v2075_v29 = vsel %vm1883_vm2, %v8805_v44, %v2003_v26 }
 0x317   : > { %v1863_v8 = vadd.f32 %v8753_v39, %v1862_v3 }
 0x319   : > { %v6984_v36 = vpop.eup %6983  ;;  %v1913_v51 = vmul.f32 1.442695, %v1863_v8  ;;  %vm1886_vm7 = vcmp.gt.f32.partialorder %v1863_v8, 20.0 }
 0x31a   : > { %v6986_v37 = vpop.eup %6985  ;;  %v2013_v6 = vadd.f32 1.0, %v6984_v36  ;;  %v2016_v40 = vmul.f32 -0.5, %v6984_v36  ;;  %v2019_v61 = vand.u32 2147483647, %v6984_v36 }
 0x31b   : > { %6987 = vpow2.f32 %v1913_v51  ;;  %v2006_v59 = vmul.f32 0.6931472, %v6986_v37 }
 0x31c   : > { %6989 = vlog2.f32 %v2013_v6  ;;  %v2017_v31 = vadd.f32 1.0, %v2016_v40  ;;  %vm2020_vm4 = vcmp.lt.f32.partialorder %v2019_v61, 0.0004427343 }
 0x31d   : > { %v2012_v27 = vsel %vm2011_vm1, %v2009_v62, %v2006_v59 }
 0x31e   : > { %v1865_v63 = vpop.f32.mrf.mxu0  ;;  %v2076_v24 = vsel %vm1884_vm3, %v1858_v13, %v2012_v27  ;;  %v2018_v10 = vmul.f32 %v6984_v36, %v2017_v31 }
 0x31f   : > { %v8819_v2 = vadd.f32 %v8753_v39, %v1865_v63  ;;  %v2087_v22 = vpack.c.bf16 %v2076_v24, %v2075_v29 }
 0x321   : > { %v6988_v55 = vpop.eup %6987  ;;  %v1915_v1 = vmul.f32 1.442695, %v8819_v2  ;;  %2187 = vmatmul.bf16.gmra.mxu1 %v2087_v22  ;;  %vm1887_vm10 = vcmp.gt.f32.partialorder %v8819_v2, 20.0 }
 0x322   : > { %v2022_v0 = vadd.f32 1.0, %v6988_v55  ;;  %v2025_v11 = vmul.f32 -0.5, %v6988_v55  ;;  %v6990_v9 = vpop.eup %6989  ;;  %v2028_v25 = vand.u32 2147483647, %v6988_v55 }
 0x323   : > { %6991 = vpow2.f32 %v1915_v1  ;;  %v2015_v38 = vmul.f32 0.6931472, %v6990_v9 }
 0x324   : > { %6993 = vlog2.f32 %v2022_v0  ;;  %v2026_v23 = vadd.f32 1.0, %v2025_v11  ;;  %vm2029_vm5 = vcmp.lt.f32.partialorder %v2028_v25, 0.0004427343  ;;  %v8841_v25 = vstv %s524_s15 }
 0x325   : > { %v2021_v42 = vsel %vm2020_vm4, %v2018_v10, %v2015_v38 }
 0x326   : > { %v1867_v28 = vpop.f32.mrf.mxu0  ;;  %v2027_v32 = vmul.f32 %v6988_v55, %v2026_v23  ;;  %v2077_v4 = vsel %vm1885_vm6, %v8812_v56, %v2021_v42 }
 0x327   : > { %v1868_v44 = vadd.f32 %v8753_v39, %v1867_v28 }
 0x329   : > { %v6992_v5 = vpop.eup %6991  ;;  %v1917_v14 = vmul.f32 1.442695, %v1868_v44  ;;  %vm1888_vm11 = vcmp.gt.f32.partialorder %v1868_v44, 20.0 }
 0x32a   : > { %v6994_v13 = vpop.eup %6993  ;;  %v2031_v41 = vadd.f32 1.0, %v6992_v5  ;;  %v2034_v19 = vmul.f32 -0.5, %v6992_v5  ;;  %v2037_v34 = vand.u32 2147483647, %v6992_v5 }
 0x32b   : > { %6995 = vpow2.f32 %v1917_v14  ;;  %v2024_v16 = vmul.f32 0.6931472, %v6994_v13  ;;  %v7801_v13 = vld [vmem:[#allocation2 + $0x30] sm:$0xff] }
 0x32c   : > { %6997 = vlog2.f32 %v2031_v41  ;;  %v2035_v57 = vadd.f32 1.0, %v2034_v19  ;;  %vm2038_vm8 = vcmp.lt.f32.partialorder %v2037_v34, 0.0004427343  ;;  %v7803_v19 = vld [vmem:[%s10123_s6 + $0x38] sm:$0xff]  ;;  %v7806_v34 = vld [vmem:[%s10123_s6 + $0x30] sm:$0xff] }
 0x32d   : > { %v2030_v30 = vsel %vm2029_vm5, %v2027_v32, %v2024_v16  ;;  %v7802_v16 = vld [vmem:[#allocation2] sm:$0xff] }
 0x32e   : > { %v1870_v35 = vpop.f32.mrf.mxu0  ;;  %v2078_v43 = vsel %vm1886_vm7, %v1863_v8, %v2030_v30  ;;  %v2036_v60 = vmul.f32 %v6992_v5, %v2035_v57  ;;  %v7805_v57 = vld [vmem:[#allocation2 + $0x58] sm:$0xff] }
 0x32f   : > { %v1871_v46 = vadd.f32 %v8753_v39, %v1870_v35  ;;  %v2088_v48 = vpack.c.bf16 %v2078_v43, %v2077_v4 }
 0x331   : > { %v6996_v47 = vpop.eup %6995  ;;  %v1919_v18 = vmul.f32 1.442695, %v1871_v46  ;;  %2192 = vmatmul.bf16.gmra.mxu1 %v2088_v48  ;;  %vm1889_vm14 = vcmp.gt.f32.partialorder %v1871_v46, 20.0 }
 0x332   : > { %v2040_v12 = vadd.f32 1.0, %v6996_v47  ;;  %v2043_v49 = vmul.f32 -0.5, %v6996_v47  ;;  %v6998_v20 = vpop.eup %6997  ;;  %v2046_v52 = vand.u32 2147483647, %v6996_v47 }
 0x333   : > { %6999 = vpow2.f32 %v1919_v18  ;;  %v2033_v56 = vmul.f32 0.6931472, %v6998_v20 }
 0x334   : > { %7001 = vlog2.f32 %v2040_v12  ;;  %v2044_v15 = vadd.f32 1.0, %v2043_v49  ;;  %vm2047_vm9 = vcmp.lt.f32.partialorder %v2046_v52, 0.0004427343  ;;  %v7804_v12 = vld [vmem:[#allocation7 + $0x38] sm:$0xff] }
 0x335   : > { %v2039_v45 = vsel %vm2038_vm8, %v2036_v60, %v2033_v56  ;;  %v7810_v60 = vld [vmem:[#allocation7 + $0x28] sm:$0xff] }
 0x336   : > { %v1872_v50 = vpop.f32.mrf.mxu0  ;;  %v2045_v36 = vmul.f32 %v6996_v47, %v2044_v15  ;;  %v7808_v15 = vld [vmem:[#allocation2 + $0x18] sm:$0xff] }
 0x337   : > { %v1873_v7 = vadd.f32 %v8753_v39, %v1872_v50  ;;  %v2079_v39 = vsel %vm1887_vm10, %v8819_v2, %v2039_v45 }
 0x339   : > { %v7000_v21 = vpop.eup %6999  ;;  %v1921_v3 = vmul.f32 1.442695, %v1873_v7  ;;  %vm1890_vm15 = vcmp.gt.f32.partialorder %v1873_v7, 20.0 }
 0x33a   : > { %v7002_v8 = vpop.eup %7001  ;;  %v2049_v33 = vadd.f32 1.0, %v7000_v21  ;;  %v2052_v26 = vmul.f32 -0.5, %v7000_v21  ;;  %v2055_v29 = vand.u32 2147483647, %v7000_v21 }
 0x33b   : > { %7003 = vpow2.f32 %v1921_v3  ;;  %v2042_v53 = vmul.f32 0.6931472, %v7002_v8  ;;  %v7809_v3 = vld [vmem:[%s10123_s6 + $0x28] sm:$0xff] }
 0x33c   : > { %7005 = vlog2.f32 %v2049_v33  ;;  %v2053_v63 = vadd.f32 1.0, %v2052_v26  ;;  %vm2056_vm12 = vcmp.lt.f32.partialorder %v2055_v29, 0.0004427343  ;;  %v7814_v26 = vld [vmem:[#allocation7 + $0x18] sm:$0xff]  ;;  %v7816_v29 = vld [vmem:[%s10123_s6 + $0x10] sm:$0xff] }
 0x33d   : > { %v2048_v51 = vsel %vm2047_vm9, %v2045_v36, %v2042_v53 }
 0x33e   : > { %v2080_v54 = vsel %vm1888_vm11, %v1868_v44, %v2048_v51  ;;  %v2054_v1 = vmul.f32 %v7000_v21, %v2053_v63  ;;  %v8835_v44 = vld [vmem:[%s10128_s11] ss:$0 sm:$0xff] }
 0x33f   : > { %v2089_v37 = vpack.c.bf16 %v2080_v54, %v2079_v39  ;;  %v7811_v51 = vld [vmem:[%s10123_s6 + $0x20] sm:$0xff] }
 0x340   : > { %v7812_v39 = vld [vmem:[#allocation7 + $0x20] sm:$0xff] }
 0x341   : > { %v7004_v6 = vpop.eup %7003  ;;  %2197 = vmatmul.bf16.gmra.mxu1 %v2089_v37 }
 0x342   : > { %v2058_v59 = vadd.f32 1.0, %v7004_v6  ;;  %v2061_v62 = vmul.f32 -0.5, %v7004_v6  ;;  %v7006_v27 = vpop.eup %7005  ;;  %v2064_v55 = vand.u32 2147483647, %v7004_v6 }
 0x343   : > { %v2051_v24 = vmul.f32 0.6931472, %v7006_v27  ;;  %v7815_v27 = vld [vmem:[#allocation2 + $0x50] sm:$0xff] }
 0x344   : > { %7007 = vlog2.f32 %v2058_v59  ;;  %v2062_v22 = vadd.f32 1.0, %v2061_v62  ;;  %vm2065_vm13 = vcmp.lt.f32.partialorder %v2064_v55, 0.0004427343  ;;  %v7818_v55 = vld [vmem:[#allocation2 + $0x68] sm:$0xff] }
 0x345   : > { %v2057_v2 = vsel %vm2056_vm12, %v2054_v1, %v2051_v24  ;;  %v7817_v24 = vld [vmem:[#allocation7 + $0x10] sm:$0xff] }
 0x346   : > { %v2063_v11 = vmul.f32 %v7004_v6, %v2062_v22  ;;  %v2081_v31 = vsel %vm1889_vm14, %v1871_v46, %v2057_v2  ;;  %v7813_v6 = vld [vmem:[%s10123_s6 + $0x18] sm:$0xff]  ;;  %v7819_v2 = vld [vmem:[%s10123_s6 + $0x8] sm:$0xff] }
 0x34a   : > { %v7008_v40 = vpop.eup %7007 }
 0x34b   : > { %v2060_v0 = vmul.f32 0.6931472, %v7008_v40 }
 0x34d   : > { %v2066_v9 = vsel %vm2065_vm13, %v2063_v11, %v2060_v0  ;;  %v7820_v0 = vld [vmem:[#allocation7 + $0x8] sm:$0xff] }
 0x34e   : > { %v2082_v28 = vsel %vm1890_vm15, %v1873_v7, %v2066_v9  ;;  %v7807_v7 = vld [vmem:[#allocation7 + $0x30] sm:$0xff] }
 0x34f   : > { %v2090_v61 = vpack.c.bf16 %v2082_v28, %v2081_v31 }
 0x351   : > { %2202 = vmatmul.bf16.gmra.mxu1 %v2090_v61 }
 0x35e   : > { %v2168_v38 = vpop.f32.mrf.mxu1 }
 0x35f   : > { %v8839_v23 = vadd.f32 %v8835_v44, %v2168_v38  ;;  %v7821_v38 = vld [vmem:[%s10123_s6] sm:$0xff] }
 0x361   : > { %v8845_v5 = vmul.f32 %v8841_v25, %v8839_v23 }
 0x363   : > { %v2225_v41 = vadd.f32 %v7801_v13, %v8845_v5 }
 0x365   : > { %v2241_v30 = vpack.c.bf16 %v2225_v41, %v2225_v41 }
 0x366   : > { %v2170_v14 = vpop.f32.mrf.mxu1 }
 0x367   : > { %v8848_v10 = vadd.f32 %v8835_v44, %v2170_v14  ;;  %v2273_v46 = vunpack.c.l.b16 %v2241_v30  ;;  %v7822_v14 = vld [vmem:[#allocation7] sm:$0xff]  ;;  %v7823_v30 = vld [vmem:[#allocation2 + $0x8] sm:$0xff] }
 0x369   : > { %v8853_v42 = vmul.f32 %v8841_v25, %v8848_v10 }
 0x36b   : > { %v2226_v32 = vadd.f32 %v7802_v16, %v8853_v42 }
 0x36d   : > { %v2242_v35 = vpack.c.bf16 %v2226_v32, %v2226_v32 }
 0x36e   : > { %v2173_v4 = vpop.f32.mrf.mxu1 }
 0x36f   : > { %v8857_v43 = vadd.f32 %v8835_v44, %v2173_v4  ;;  %v2274_v48 = vunpack.c.l.b16 %v2242_v35 }
 0x371   : > { %v2289_v47 = vpack.c.b16 %v2274_v48, %v2273_v46  ;;  %v8861_v18 = vmul.f32 %v8841_v25, %v8857_v43  ;;  %v7824_v46 = vld [vmem:[#allocation2 + $0x48] sm:$0xff] }
 0x373   : > { %2313 = vmatmul.bf16.vlgmr.msrb.gmra.mxu2 %v2289_v47  ;;  %2899 = vmatmul.bf16.vlgmr.msra.gmra.mxu0 %v2289_v47  ;;  %v2227_v50 = vadd.f32 %v7805_v57, %v8861_v18 }
 0x374   : > { %4218 = vmatpush.bf16.msrb.mxu2 %v7803_v19  ;;  %4532 = vmatpush.bf16.msra.mxu0 %v7804_v12 }
 0x375   : > { %v2243_v21 = vpack.c.bf16 %v2227_v50, %v2227_v50 }
 0x376   : > { %v2175_v49 = vpop.f32.mrf.mxu1 }
 0x377   : > { %v8867_v20 = vadd.f32 %v8835_v44, %v2175_v49  ;;  %v2275_v53 = vunpack.c.l.b16 %v2243_v21  ;;  %v7825_v21 = vld [vmem:[#allocation2 + $0x40] sm:$0xff] }
 0x378   : > { %4219 = vmatpush.bf16.msrb.mxu2 %v7806_v34  ;;  %4533 = vmatpush.bf16.msra.mxu0 %v7807_v7 }
 0x379   : > { %v8875_v56 = vmul.f32 %v8841_v25, %v8867_v20 }
 0x37b   : > { %v2228_v52 = vadd.f32 %v7808_v15, %v8875_v56 }
 0x37c   : > { %4220 = vmatpush.bf16.msrb.mxu2 %v7809_v3  ;;  %4534 = vmatpush.bf16.msra.mxu0 %v7810_v60 }
 0x37d   : > { %v2244_v8 = vpack.c.bf16 %v2228_v52, %v2228_v52 }
 0x37e   : > { %v2178_v33 = vpop.f32.mrf.mxu1 }
 0x37f   : > { %v8882_v45 = vadd.f32 %v8835_v44, %v2178_v33  ;;  %v2276_v36 = vunpack.c.l.b16 %v2244_v8  ;;  %v7826_v8 = vld [vmem:[#allocation2 + $0x20] sm:$0xff] }
 0x380   : > { %4221 = vmatpush.bf16.msrb.mxu2 %v7811_v51  ;;  %4535 = vmatpush.bf16.msra.mxu0 %v7812_v39 }
 0x381   : > { %v2290_v54 = vpack.c.b16 %v2276_v36, %v2275_v53  ;;  %v8889_v37 = vmul.f32 %v8841_v25, %v8882_v45 }
 0x383   : > { %2318 = vmatmul.bf16.gmra.mxu2 %v2290_v54  ;;  %2904 = vmatmul.bf16.gmra.mxu0 %v2290_v54  ;;  %v2229_v63 = vadd.f32 %v7815_v27, %v8889_v37 }
 0x384   : > { %4222 = vmatpush.bf16.msrb.mxu2 %v7813_v6  ;;  %4536 = vmatpush.bf16.msra.mxu0 %v7814_v26 }
 0x385   : > { %v2245_v40 = vpack.c.bf16 %v2229_v63, %v2229_v63 }
 0x386   : > { %v2180_v59 = vpop.f32.mrf.mxu1 }
 0x387   : > { %v8895_v62 = vadd.f32 %v8835_v44, %v2180_v59  ;;  %v2277_v28 = vunpack.c.l.b16 %v2245_v40 }
 0x388   : > { %4223 = vmatpush.bf16.msrb.mxu2 %v7816_v29  ;;  %4537 = vmatpush.bf16.msra.mxu0 %v7817_v24  ;;  %v7827_v29 = vld [vmem:[#allocation2 + $0x10] sm:$0xff] }
 0x389   : > { %v8903_v22 = vmul.f32 %v8841_v25, %v8895_v62 }
 0x38b   : > { %v2230_v1 = vadd.f32 %v7818_v55, %v8903_v22 }
 0x38c   : > { %4224 = vmatpush.bf16.msrb.mxu2 %v7819_v2  ;;  %4538 = vmatpush.bf16.msra.mxu0 %v7820_v0 }
 0x38d   : > { %v2246_v11 = vpack.c.bf16 %v2230_v1, %v2230_v1  ;;  %v7828_v1 = vld [vmem:[#allocation2 + $0x38] sm:$0xff] }
 0x38e   : > { %v2183_v9 = vpop.f32.mrf.mxu1 }
 0x38f   : > { %v8910_v31 = vadd.f32 %v8835_v44, %v2183_v9  ;;  %v2278_v61 = vunpack.c.l.b16 %v2246_v11 }
 0x390   : > { %4225 = vmatpush.bf16.msrb.mxu2 %v7821_v38  ;;  %4539 = vmatpush.bf16.msra.mxu0 %v7822_v14 }
 0x391   : > { %v2291_v13 = vpack.c.b16 %v2278_v61, %v2277_v28  ;;  %v8917_v41 = vmul.f32 %v8841_v25, %v8910_v31 }
 0x393   : > { %2323 = vmatmul.bf16.gmra.mxu2 %v2291_v13  ;;  %2909 = vmatmul.bf16.gmra.mxu0 %v2291_v13  ;;  %v2231_v35 = vadd.f32 %v7823_v30, %v8917_v41  ;;  %v7829_v30 = vld [vmem:[#allocation2 + $0x60] sm:$0xff] }
 0x395   : > { %v2247_v47 = vpack.c.bf16 %v2231_v35, %v2231_v35 }
 0x396   : > { %v2185_v16 = vpop.f32.mrf.mxu1 }
 0x397   : > { %v8920_v32 = vadd.f32 %v8835_v44, %v2185_v16  ;;  %v2279_v57 = vunpack.c.l.b16 %v2247_v47 }
 0x399   : > { %v8925_v4 = vmul.f32 %v8841_v25, %v8920_v32 }
 0x39b   : > { %v2232_v48 = vadd.f32 %v7824_v46, %v8925_v4 }
 0x39d   : > { %v2248_v19 = vpack.c.bf16 %v2232_v48, %v2232_v48  ;;  %v7830_v48 = vld [vmem:[#allocation2 + $0x70] sm:$0xff] }
 0x39e   : > { %v2188_v12 = vpop.f32.mrf.mxu1 }
 0x39f   : > { %v8929_v49 = vadd.f32 %v8835_v44, %v2188_v12  ;;  %v2280_v50 = vunpack.c.l.b16 %v2248_v19 }
 0x3a1   : > { %v2292_v34 = vpack.c.b16 %v2280_v50, %v2279_v57  ;;  %v8933_v7 = vmul.f32 %v8841_v25, %v8929_v49 }
 0x3a3   : > { %2328 = vmatmul.bf16.gmra.mxu2 %v2292_v34  ;;  %2914 = vmatmul.bf16.gmra.mxu0 %v2292_v34  ;;  %v2233_v3 = vadd.f32 %v7825_v21, %v8933_v7 }
 0x3a5   : > { %v2249_v53 = vpack.c.bf16 %v2233_v3, %v2233_v3 }
 0x3a6   : > { %v2190_v15 = vpop.f32.mrf.mxu1 }
 0x3a7   : > { %v8936_v52 = vadd.f32 %v8835_v44, %v2190_v15  ;;  %v2281_v54 = vunpack.c.l.b16 %v2249_v53  ;;  %v7831_v53 = vld [vmem:[#allocation2 + $0x78] sm:$0xff] }
 0x3a9   : > { %v8941_v60 = vmul.f32 %v8841_v25, %v8936_v52 }
 0x3ab   : > { %v2234_v33 = vadd.f32 %v7826_v8, %v8941_v60 }
 0x3ad   : > { %v2250_v36 = vpack.c.bf16 %v2234_v33, %v2234_v33 }
 0x3ae   : > { %v2193_v51 = vpop.f32.mrf.mxu1 }
 0x3af   : > { %v8945_v39 = vadd.f32 %v8835_v44, %v2193_v51  ;;  %v2282_v6 = vunpack.c.l.b16 %v2250_v36 }
 0x3b1   : > { %10151 = vst [vmem:[#allocation14_spill] sm:$0xff] %v8945_v39  ;;  %v2293_v26 = vpack.c.b16 %v2282_v6, %v2281_v54  ;;  %v8949_v59 = vmul.f32 %v8841_v25, %v8945_v39  ;;  %v7832_v54 = vld [vmem:[#allocation2 + $0x28] sm:$0xff] }
 0x3b3   : > { %2333 = vmatmul.bf16.gmra.mxu2 %v2293_v26  ;;  %2919 = vmatmul.bf16.gmra.mxu0 %v2293_v26  ;;  %v2235_v24 = vadd.f32 %v7827_v29, %v8949_v59 }
 0x3b5   : > { %v2251_v2 = vpack.c.bf16 %v2235_v24, %v2235_v24 }
 0x3b6   : > { %v2195_v27 = vpop.f32.mrf.mxu1 }
 0x3b7   : > { %v8952_v63 = vadd.f32 %v8835_v44, %v2195_v27  ;;  %v2283_v28 = vunpack.c.l.b16 %v2251_v2 }
 0x3b9   : > { %10152 = vst [vmem:[#allocation15_spill] sm:$0xff] %v8952_v63  ;;  %v8957_v55 = vmul.f32 %v8841_v25, %v8952_v63 }
 0x3bb   : > { %v2236_v40 = vadd.f32 %v7828_v1, %v8957_v55 }
 0x3bd   : > { %v2252_v0 = vpack.c.bf16 %v2236_v40, %v2236_v40 }
 0x3be   : > { %v2198_v11 = vpop.f32.mrf.mxu1 }
 0x3bf   : > { %v8961_v9 = vadd.f32 %v8835_v44, %v2198_v11  ;;  %v2284_v61 = vunpack.c.l.b16 %v2252_v0 }
 0x3c1   : > { %10153 = vst [vmem:[#allocation16_spill] sm:$0xff] %v8961_v9  ;;  %v2294_v38 = vpack.c.b16 %v2284_v61, %v2283_v28  ;;  %v8965_v14 = vmul.f32 %v8841_v25, %v8961_v9 }
 0x3c3   : > { %2338 = vmatmul.bf16.gmra.mxu2 %v2294_v38  ;;  %2924 = vmatmul.bf16.gmra.mxu0 %v2294_v38  ;;  %v2237_v35 = vadd.f32 %v7829_v30, %v8965_v14 }
 0x3c5   : > { %v2253_v19 = vpack.c.bf16 %v2237_v35, %v2237_v35 }
 0x3c6   : > { %v2200_v13 = vpop.f32.mrf.mxu1 }
 0x3c7   : > { %v8968_v16 = vadd.f32 %v8835_v44, %v2200_v13  ;;  %v2285_v34 = vunpack.c.l.b16 %v2253_v19 }
 0x3c9   : > { %10154 = vst [vmem:[#allocation17_spill] sm:$0xff] %v8968_v16  ;;  %v8973_v46 = vmul.f32 %v8841_v25, %v8968_v16 }
 0x3cb   : > { %v2238_v47 = vadd.f32 %v7830_v48, %v8973_v46 }
 0x3cd   : > { %v2254_v12 = vpack.c.bf16 %v2238_v47, %v2238_v47 }
 0x3ce   : > { %v2203_v57 = vpop.f32.mrf.mxu1 }
 0x3cf   : > { %v8977_v50 = vadd.f32 %v8835_v44, %v2203_v57  ;;  %v2286_v15 = vunpack.c.l.b16 %v2254_v12 }
 0x3d1   : > { %10155 = vst [vmem:[#allocation18_spill] sm:$0xff] %v8977_v50  ;;  %v2295_v21 = vpack.c.b16 %v2286_v15, %v2285_v34  ;;  %v8981_v3 = vmul.f32 %v8841_v25, %v8977_v50 }
 0x3d3   : > { %2343 = vmatmul.bf16.gmra.mxu2 %v2295_v21  ;;  %2929 = vmatmul.bf16.gmra.mxu0 %v2295_v21  ;;  %v2239_v36 = vadd.f32 %v7831_v53, %v8981_v3 }
 0x3d5   : > { %v2255_v26 = vpack.c.bf16 %v2239_v36, %v2239_v36 }
 0x3d6   : > { %v2205_v8 = vpop.f32.mrf.mxu1 }
 0x3d7   : > { %v8984_v33 = vadd.f32 %v8835_v44, %v2205_v8  ;;  %v2287_v29 = vunpack.c.l.b16 %v2255_v26  ;;  %v8995_v44 = vld [vmem:[%s10120_s3] ss:$0 sm:$0xff] }
 0x3d9   : > { %10156 = vst [vmem:[#allocation19_spill] sm:$0xff] %v8984_v33  ;;  %v8989_v51 = vmul.f32 %v8841_v25, %v8984_v33 }
 0x3db   : > { %v2240_v6 = vadd.f32 %v7832_v54, %v8989_v51 }
 0x3dd   : > { %v2256_v27 = vpack.c.bf16 %v2240_v6, %v2240_v6 }
 0x3df   : > { %v2288_v24 = vunpack.c.l.b16 %v2256_v27 }
 0x3e1   : > { %v2296_v1 = vpack.c.b16 %v2288_v24, %v2287_v29 }
 0x3e3   : > { %2348 = vmatmul.bf16.gmra.mxu2 %v2296_v1  ;;  %2934 = vmatmul.bf16.gmra.mxu0 %v2296_v1 }
 0x3f6   : > { %v2314_v40 = vpop.f32.mrf.mxu2 }
 0x3f7   : > { %v2315_v2 = vadd.f32 %v8995_v44, %v2314_v40 }
 0x3f9   : > { %v2370_v25 = vmul.f32 1.442695, %v2315_v2  ;;  %vm2354_vm2 = vcmp.gt.f32.partialorder %v2315_v2, 20.0 }
 0x3fb   : > { %7009 = vpow2.f32 %v2370_v25 }
 0x3fe   : > { %v2316_v0 = vpop.f32.mrf.mxu2 }
 0x3ff   : > { %v2317_v11 = vadd.f32 %v8995_v44, %v2316_v0 }
 0x401   : > { %v7010_v28 = vpop.eup %7009  ;;  %v2372_v61 = vmul.f32 1.442695, %v2317_v11  ;;  %vm2355_vm3 = vcmp.gt.f32.partialorder %v2317_v11, 20.0 }
 0x402   : > { %v2402_v38 = vadd.f32 1.0, %v7010_v28  ;;  %v2405_v47 = vmul.f32 -0.5, %v7010_v28  ;;  %v2408_v21 = vand.u32 2147483647, %v7010_v28 }
 0x403   : > { %7011 = vpow2.f32 %v2372_v61 }
 0x404   : > { %7013 = vlog2.f32 %v2402_v38  ;;  %v2406_v34 = vadd.f32 1.0, %v2405_v47  ;;  %vm2409_vm0 = vcmp.lt.f32.partialorder %v2408_v21, 0.0004427343 }
 0x406   : > { %v2319_v13 = vpop.f32.mrf.mxu2  ;;  %v2407_v27 = vmul.f32 %v7010_v28, %v2406_v34 }
 0x407   : > { %v9000_v30 = vadd.f32 %v8995_v44, %v2319_v13 }
 0x409   : > { %v7012_v35 = vpop.eup %7011  ;;  %v2374_v48 = vmul.f32 1.442695, %v9000_v30  ;;  %vm2356_vm6 = vcmp.gt.f32.partialorder %v9000_v30, 20.0 }
 0x40a   : > { %v2411_v19 = vadd.f32 1.0, %v7012_v35  ;;  %v2414_v12 = vmul.f32 -0.5, %v7012_v35  ;;  %v7014_v57 = vpop.eup %7013  ;;  %v2417_v54 = vand.u32 2147483647, %v7012_v35 }
 0x40b   : > { %7015 = vpow2.f32 %v2374_v48  ;;  %v2404_v53 = vmul.f32 0.6931472, %v7014_v57 }
 0x40c   : > { %7017 = vlog2.f32 %v2411_v19  ;;  %v2415_v36 = vadd.f32 1.0, %v2414_v12  ;;  %vm2418_vm1 = vcmp.lt.f32.partialorder %v2417_v54, 0.0004427343 }
 0x40d   : > { %v2410_v1 = vsel %vm2409_vm0, %v2407_v27, %v2404_v53 }
 0x40e   : > { %v2321_v15 = vpop.f32.mrf.mxu2  ;;  %v2416_v25 = vmul.f32 %v7012_v35, %v2415_v36  ;;  %v2546_v38 = vsel %vm2354_vm2, %v2315_v2, %v2410_v1  ;;  %v7834_v1 = vld [vmem:[%s10123_s6 + $0x68] sm:$0xff] }
 0x40f   : > { %v2322_v8 = vadd.f32 %v8995_v44, %v2321_v15 }
 0x411   : > { %v7016_v6 = vpop.eup %7015  ;;  %v2376_v26 = vmul.f32 1.442695, %v2322_v8  ;;  %vm2357_vm7 = vcmp.gt.f32.partialorder %v2322_v8, 20.0 }
 0x412   : > { %v7018_v29 = vpop.eup %7017  ;;  %v2420_v24 = vadd.f32 1.0, %v7016_v6  ;;  %v2423_v12 = vmul.f32 -0.5, %v7016_v6 }
 0x413   : > { %7019 = vpow2.f32 %v2376_v26  ;;  %v2413_v40 = vmul.f32 0.6931472, %v7018_v29 }
 0x414   : > { %7021 = vlog2.f32 %v2420_v24  ;;  %v2424_v15 = vadd.f32 1.0, %v2423_v12 }
 0x415   : > { %v2419_v0 = vsel %vm2418_vm1, %v2416_v25, %v2413_v40 }
 0x416   : > { %v2324_v61 = vpop.f32.mrf.mxu2  ;;  %v2547_v13 = vsel %vm2355_vm3, %v2317_v11, %v2419_v0  ;;  %v2426_v11 = vand.u32 2147483647, %v7016_v6  ;;  %v2425_v29 = vmul.f32 %v7016_v6, %v2424_v15 }
 0x417   : > { %v9005_v48 = vadd.f32 %v8995_v44, %v2324_v61  ;;  %v2562_v47 = vpack.c.bf16 %v2547_v13, %v2546_v38  ;;  %v7835_v13 = vld [vmem:[%s10123_s6 + $0x60] sm:$0xff] }
 0x418   : > { %vm2427_vm4 = vcmp.lt.f32.partialorder %v2426_v11, 0.0004427343 }
 0x419   : > { %v7020_v28 = vpop.eup %7019  ;;  %v2378_v19 = vmul.f32 1.442695, %v9005_v48  ;;  %2578 = vmatmul.bf16.vlgmr.msrb.gmra.mxu3 %v2562_v47  ;;  %vm2358_vm10 = vcmp.gt.f32.partialorder %v9005_v48, 20.0 }
 0x41a   : > { %v2429_v57 = vadd.f32 1.0, %v7020_v28  ;;  %4267 = vmatpush.bf16.msrb.mxu3 %v8741_v58  ;;  %v2432_v35 = vmul.f32 -0.5, %v7020_v28  ;;  %v7022_v34 = vpop.eup %7021  ;;  %v2435_v54 = vand.u32 2147483647, %v7020_v28 }
 0x41b   : > { %7023 = vpow2.f32 %v2378_v19  ;;  %v2422_v53 = vmul.f32 0.6931472, %v7022_v34 }
 0x41c   : > { %7025 = vlog2.f32 %v2429_v57  ;;  %v2433_v36 = vadd.f32 1.0, %v2432_v35  ;;  %vm2436_vm5 = vcmp.lt.f32.partialorder %v2435_v54, 0.0004427343 }
 0x41e   : > { %v2326_v2 = vpop.f32.mrf.mxu2  ;;  %4268 = vmatpush.bf16.msrb.mxu3 %v8747_v17  ;;  %v2428_v17 = vsel %vm2427_vm4, %v2425_v29, %v2422_v53  ;;  %v2434_v25 = vmul.f32 %v7020_v28, %v2433_v36  ;;  %v7837_v53 = vld [vmem:[%s10123_s6 + $0x50] sm:$0xff] }
 0x41f   : > { %v9011_v21 = vadd.f32 %v8995_v44, %v2326_v2  ;;  %v2548_v6 = vsel %vm2356_vm6, %v9000_v30, %v2428_v17  ;;  %v7836_v30 = vld [vmem:[%s10123_s6 + $0x58] sm:$0xff] }
 0x421   : > { %v7024_v26 = vpop.eup %7023  ;;  %v2380_v27 = vmul.f32 1.442695, %v9011_v21  ;;  %vm2359_vm11 = vcmp.gt.f32.partialorder %v9011_v21, 20.0 }
 0x422   : > { %v7026_v58 = vpop.eup %7025  ;;  %v2438_v24 = vadd.f32 1.0, %v7024_v26  ;;  %4269 = vmatpush.bf16.msrb.mxu3 %v7834_v1  ;;  %v2441_v57 = vmul.f32 -0.5, %v7024_v26  ;;  %v2444_v11 = vand.u32 2147483647, %v7024_v26 }
 0x423   : > { %7027 = vpow2.f32 %v2380_v27  ;;  %v2431_v40 = vmul.f32 0.6931472, %v7026_v58 }
 0x424   : > { %7029 = vlog2.f32 %v2438_v24  ;;  %v2442_v15 = vadd.f32 1.0, %v2441_v57  ;;  %vm2445_vm8 = vcmp.lt.f32.partialorder %v2444_v11, 0.0004427343 }
 0x425   : > { %v2437_v0 = vsel %vm2436_vm5, %v2434_v25, %v2431_v40  ;;  %v7838_v25 = vld [vmem:[%s10123_s6 + $0x48] sm:$0xff] }
 0x426   : > { %v2329_v61 = vpop.f32.mrf.mxu2  ;;  %v2549_v38 = vsel %vm2357_vm7, %v2322_v8, %v2437_v0  ;;  %4270 = vmatpush.bf16.msrb.mxu3 %v7835_v13  ;;  %v2443_v1 = vmul.f32 %v7024_v26, %v2442_v15 }
 0x427   : > { %v9023_v47 = vadd.f32 %v8995_v44, %v2329_v61  ;;  %v2563_v19 = vpack.c.bf16 %v2549_v38, %v2548_v6 }
 0x429   : > { %v7028_v28 = vpop.eup %7027  ;;  %v2382_v12 = vmul.f32 1.442695, %v9023_v47  ;;  %2583 = vmatmul.bf16.gmra.mxu3 %v2563_v19  ;;  %vm2360_vm14 = vcmp.gt.f32.partialorder %v9023_v47, 20.0 }
 0x42a   : > { %v2447_v35 = vadd.f32 1.0, %v7028_v28  ;;  %4271 = vmatpush.bf16.msrb.mxu3 %v7836_v30  ;;  %v2450_v8 = vmul.f32 -0.5, %v7028_v28  ;;  %v7030_v34 = vpop.eup %7029  ;;  %v2453_v29 = vand.u32 2147483647, %v7028_v28 }
 0x42b   : > { %7031 = vpow2.f32 %v2382_v12  ;;  %v2440_v54 = vmul.f32 0.6931472, %v7030_v34  ;;  %v7839_v12 = vld [vmem:[%s10123_s6 + $0x40] sm:$0xff] }
 0x42c   : > { %7033 = vlog2.f32 %v2447_v35  ;;  %v2451_v27 = vadd.f32 1.0, %v2450_v8  ;;  %vm2454_vm9 = vcmp.lt.f32.partialorder %v2453_v29, 0.0004427343 }
 0x42d   : > { %v2446_v0 = vsel %vm2445_vm8, %v2443_v1, %v2440_v54 }
 0x42e   : > { %v2331_v2 = vpop.f32.mrf.mxu2  ;;  %4272 = vmatpush.bf16.msrb.mxu3 %v7837_v53  ;;  %v2452_v6 = vmul.f32 %v7028_v28, %v2451_v27  ;;  %v2550_v26 = vsel %vm2358_vm10, %v9005_v48, %v2446_v0 }
 0x42f   : > { %v2332_v36 = vadd.f32 %v8995_v44, %v2331_v2 }
 0x431   : > { %v7032_v58 = vpop.eup %7031  ;;  %v2384_v24 = vmul.f32 1.442695, %v2332_v36  ;;  %vm2361_vm15 = vcmp.gt.f32.partialorder %v2332_v36, 20.0 }
 0x432   : > { %v7034_v17 = vpop.eup %7033  ;;  %v2456_v40 = vadd.f32 1.0, %v7032_v58  ;;  %4273 = vmatpush.bf16.msrb.mxu3 %v7838_v25  ;;  %v2459_v8 = vmul.f32 -0.5, %v7032_v58  ;;  %v2462_v11 = vand.u32 2147483647, %v7032_v58 }
 0x433   : > { %7035 = vpow2.f32 %v2384_v24  ;;  %v2449_v61 = vmul.f32 0.6931472, %v7034_v17 }
 0x434   : > { %7037 = vlog2.f32 %v2456_v40  ;;  %vm2463_vm12 = vcmp.lt.f32.partialorder %v2462_v11, 0.0004427343 }
 0x435   : > { %v2455_v38 = vsel %vm2454_vm9, %v2452_v6, %v2449_v61 }
 0x436   : > { %v2334_v13 = vpop.f32.mrf.mxu2  ;;  %v2551_v19 = vsel %vm2359_vm11, %v9011_v21, %v2455_v38  ;;  %4274 = vmatpush.bf16.msrb.mxu3 %v7839_v12  ;;  %v2460_v21 = vadd.f32 1.0, %v2459_v8 }
 0x437   : > { %v9044_v57 = vadd.f32 %v8995_v44, %v2334_v13  ;;  %v2564_v28 = vpack.c.bf16 %v2551_v19, %v2550_v26 }
 0x438   : > { %v2461_v17 = vmul.f32 %v7032_v58, %v2460_v21 }
 0x439   : > { %v7036_v35 = vpop.eup %7035  ;;  %v2386_v30 = vmul.f32 1.442695, %v9044_v57  ;;  %2588 = vmatmul.bf16.gmra.mxu3 %v2564_v28  ;;  %vm2362_vm2 = vcmp.gt.f32.partialorder %v9044_v57, 20.0 }
 0x43a   : > { %v2465_v34 = vadd.f32 1.0, %v7036_v35  ;;  %v2468_v48 = vmul.f32 -0.5, %v7036_v35  ;;  %v7038_v15 = vpop.eup %7037  ;;  %v2471_v29 = vand.u32 2147483647, %v7036_v35 }
 0x43b   : > { %7039 = vpow2.f32 %v2386_v30  ;;  %v2458_v54 = vmul.f32 0.6931472, %v7038_v15 }
 0x43c   : > { %7041 = vlog2.f32 %v2465_v34  ;;  %v2469_v27 = vadd.f32 1.0, %v2468_v48  ;;  %vm2472_vm13 = vcmp.lt.f32.partialorder %v2471_v29, 0.0004427343 }
 0x43d   : > { %v2464_v0 = vsel %vm2463_vm12, %v2461_v17, %v2458_v54 }
 0x43e   : > { %v2336_v2 = vpop.f32.mrf.mxu2  ;;  %v2470_v6 = vmul.f32 %v7036_v35, %v2469_v27  ;;  %v2552_v26 = vsel %vm2360_vm14, %v9023_v47, %v2464_v0 }
 0x43f   : > { %v2337_v53 = vadd.f32 %v8995_v44, %v2336_v2 }
 0x441   : > { %v7040_v24 = vpop.eup %7039  ;;  %v2388_v1 = vmul.f32 1.442695, %v2337_v53  ;;  %vm2363_vm3 = vcmp.gt.f32.partialorder %v2337_v53, 20.0 }
 0x442   : > { %v7042_v40 = vpop.eup %7041  ;;  %v2474_v25 = vadd.f32 1.0, %v7040_v24  ;;  %v2477_v8 = vmul.f32 -0.5, %v7040_v24  ;;  %v2480_v2 = vand.u32 2147483647, %v7040_v24 }
 0x443   : > { %7043 = vpow2.f32 %v2388_v1  ;;  %v2467_v61 = vmul.f32 0.6931472, %v7042_v40 }
 0x444   : > { %7045 = vlog2.f32 %v2474_v25  ;;  %v2478_v15 = vadd.f32 1.0, %v2477_v8  ;;  %vm2481_vm0 = vcmp.lt.f32.partialorder %v2480_v2, 0.0004427343 }
 0x445   : > { %v2473_v38 = vsel %vm2472_vm13, %v2470_v6, %v2467_v61 }
 0x446   : > { %v2339_v13 = vpop.f32.mrf.mxu2  ;;  %v2553_v19 = vsel %vm2361_vm15, %v2332_v36, %v2473_v38  ;;  %v2479_v1 = vmul.f32 %v7040_v24, %v2478_v15 }
 0x447   : > { %v9051_v12 = vadd.f32 %v8995_v44, %v2339_v13  ;;  %v2565_v58 = vpack.c.bf16 %v2553_v19, %v2552_v26 }
 0x449   : > { %v7044_v28 = vpop.eup %7043  ;;  %v2390_v30 = vmul.f32 1.442695, %v9051_v12  ;;  %2593 = vmatmul.bf16.gmra.mxu3 %v2565_v58  ;;  %vm2364_vm6 = vcmp.gt.f32.partialorder %v9051_v12, 20.0 }
 0x44a   : > { %v2483_v35 = vadd.f32 1.0, %v7044_v28  ;;  %v2486_v34 = vmul.f32 -0.5, %v7044_v28  ;;  %v7046_v48 = vpop.eup %7045  ;;  %v2489_v54 = vand.u32 2147483647, %v7044_v28 }
 0x44b   : > { %7047 = vpow2.f32 %v2390_v30  ;;  %v2476_v36 = vmul.f32 0.6931472, %v7046_v48 }
 0x44c   : > { %7049 = vlog2.f32 %v2483_v35  ;;  %v2487_v11 = vadd.f32 1.0, %v2486_v34  ;;  %vm2490_vm1 = vcmp.lt.f32.partialorder %v2489_v54, 0.0004427343 }
 0x44d   : > { %v2482_v25 = vsel %vm2481_vm0, %v2479_v1, %v2476_v36 }
 0x44e   : > { %v2341_v21 = vpop.f32.mrf.mxu2  ;;  %v2488_v61 = vmul.f32 %v7044_v28, %v2487_v11  ;;  %v2554_v13 = vsel %vm2362_vm2, %v9044_v57, %v2482_v25 }
 0x44f   : > { %v2342_v47 = vadd.f32 %v8995_v44, %v2341_v21 }
 0x451   : > { %v7048_v27 = vpop.eup %7047  ;;  %v2392_v29 = vmul.f32 1.442695, %v2342_v47  ;;  %vm2365_vm7 = vcmp.gt.f32.partialorder %v2342_v47, 20.0 }
 0x452   : > { %v7050_v17 = vpop.eup %7049  ;;  %v2492_v40 = vadd.f32 1.0, %v7048_v27  ;;  %v2495_v8 = vmul.f32 -0.5, %v7048_v27  ;;  %v2498_v21 = vand.u32 2147483647, %v7048_v27 }
 0x453   : > { %7051 = vpow2.f32 %v2392_v29  ;;  %v2485_v0 = vmul.f32 0.6931472, %v7050_v17 }
 0x454   : > { %7053 = vlog2.f32 %v2492_v40  ;;  %v2496_v48 = vadd.f32 1.0, %v2495_v8  ;;  %vm2499_vm4 = vcmp.lt.f32.partialorder %v2498_v21, 0.0004427343 }
 0x455   : > { %v2491_v6 = vsel %vm2490_vm1, %v2488_v61, %v2485_v0 }
 0x456   : > { %v2344_v38 = vpop.f32.mrf.mxu2  ;;  %v2555_v26 = vsel %vm2363_vm3, %v2337_v53, %v2491_v6  ;;  %v2497_v29 = vmul.f32 %v7048_v27, %v2496_v48 }
 0x457   : > { %v9058_v19 = vadd.f32 %v8995_v44, %v2344_v38  ;;  %v2566_v24 = vpack.c.bf16 %v2555_v26, %v2554_v13 }
 0x459   : > { %v7052_v58 = vpop.eup %7051  ;;  %v2394_v30 = vmul.f32 1.442695, %v9058_v19  ;;  %2598 = vmatmul.bf16.gmra.mxu3 %v2566_v24  ;;  %vm2366_vm10 = vcmp.gt.f32.partialorder %v9058_v19, 20.0 }
 0x45a   : > { %v2501_v28 = vadd.f32 1.0, %v7052_v58  ;;  %v2504_v35 = vmul.f32 -0.5, %v7052_v58  ;;  %v7054_v34 = vpop.eup %7053  ;;  %v2507_v36 = vand.u32 2147483647, %v7052_v58 }
 0x45b   : > { %7055 = vpow2.f32 %v2394_v30  ;;  %v2494_v53 = vmul.f32 0.6931472, %v7054_v34 }
 0x45c   : > { %7057 = vlog2.f32 %v2501_v28  ;;  %v2505_v2 = vadd.f32 1.0, %v2504_v35  ;;  %vm2508_vm5 = vcmp.lt.f32.partialorder %v2507_v36, 0.0004427343 }
 0x45d   : > { %v2500_v40 = vsel %vm2499_vm4, %v2497_v29, %v2494_v53 }
 0x45e   : > { %v2346_v15 = vpop.f32.mrf.mxu2  ;;  %v2506_v0 = vmul.f32 %v7052_v58, %v2505_v2  ;;  %v2556_v38 = vsel %vm2364_vm6, %v9051_v12, %v2500_v40 }
 0x45f   : > { %v2347_v57 = vadd.f32 %v8995_v44, %v2346_v15 }
 0x461   : > { %v7056_v11 = vpop.eup %7055  ;;  %v2396_v54 = vmul.f32 1.442695, %v2347_v57  ;;  %vm2367_vm11 = vcmp.gt.f32.partialorder %v2347_v57, 20.0 }
 0x462   : > { %v7058_v1 = vpop.eup %7057  ;;  %v2510_v17 = vadd.f32 1.0, %v7056_v11  ;;  %v2513_v8 = vmul.f32 -0.5, %v7056_v11  ;;  %v2516_v15 = vand.u32 2147483647, %v7056_v11 }
 0x463   : > { %7059 = vpow2.f32 %v2396_v54  ;;  %v2503_v25 = vmul.f32 0.6931472, %v7058_v1 }
 0x464   : > { %7061 = vlog2.f32 %v2510_v17  ;;  %v2514_v34 = vadd.f32 1.0, %v2513_v8  ;;  %vm2517_vm8 = vcmp.lt.f32.partialorder %v2516_v15, 0.0004427343 }
 0x465   : > { %v2509_v61 = vsel %vm2508_vm5, %v2506_v0, %v2503_v25 }
 0x466   : > { %v2349_v6 = vpop.f32.mrf.mxu2  ;;  %v2557_v13 = vsel %vm2365_vm7, %v2342_v47, %v2509_v61  ;;  %v2515_v54 = vmul.f32 %v7056_v11, %v2514_v34 }
 0x467   : > { %v2350_v26 = vadd.f32 %v8995_v44, %v2349_v6  ;;  %v2567_v27 = vpack.c.bf16 %v2557_v13, %v2556_v38 }
 0x469   : > { %v7060_v24 = vpop.eup %7059  ;;  %v2398_v30 = vmul.f32 1.442695, %v2350_v26  ;;  %2603 = vmatmul.bf16.gmra.mxu3 %v2567_v27  ;;  %vm2368_vm14 = vcmp.gt.f32.partialorder %v2350_v26, 20.0 }
 0x46a   : > { %v2519_v28 = vadd.f32 1.0, %v7060_v24  ;;  %v2522_v58 = vmul.f32 -0.5, %v7060_v24  ;;  %v7062_v35 = vpop.eup %7061  ;;  %v2525_v53 = vand.u32 2147483647, %v7060_v24 }
 0x46b   : > { %7063 = vpow2.f32 %v2398_v30  ;;  %v2512_v12 = vmul.f32 0.6931472, %v7062_v35 }
 0x46c   : > { %7065 = vlog2.f32 %v2519_v28  ;;  %v2523_v47 = vadd.f32 1.0, %v2522_v58  ;;  %vm2526_vm9 = vcmp.lt.f32.partialorder %v2525_v53, 0.0004427343 }
 0x46d   : > { %v2518_v17 = vsel %vm2517_vm8, %v2515_v54, %v2512_v12 }
 0x46e   : > { %v2351_v48 = vpop.f32.mrf.mxu2  ;;  %v2524_v25 = vmul.f32 %v7060_v24, %v2523_v47 }
 0x46f   : > { %v2352_v21 = vadd.f32 %v8995_v44, %v2351_v48  ;;  %v2558_v44 = vsel %vm2366_vm10, %v9058_v19, %v2518_v17 }
 0x471   : > { %v7064_v2 = vpop.eup %7063  ;;  %v2400_v36 = vmul.f32 1.442695, %v2352_v21  ;;  %vm2369_vm15 = vcmp.gt.f32.partialorder %v2352_v21, 20.0 }
 0x472   : > { %v7066_v29 = vpop.eup %7065  ;;  %v2528_v1 = vadd.f32 1.0, %v7064_v2  ;;  %v2531_v11 = vmul.f32 -0.5, %v7064_v2  ;;  %v2534_v28 = vand.u32 2147483647, %v7064_v2 }
 0x473   : > { %7067 = vpow2.f32 %v2400_v36  ;;  %v2521_v40 = vmul.f32 0.6931472, %v7066_v29  ;;  %v9071_v29 = vld [vmem:[%s10122_s5] ss:$0 sm:$0xff] }
 0x474   : > { %7069 = vlog2.f32 %v2528_v1  ;;  %v2532_v8 = vadd.f32 1.0, %v2531_v11  ;;  %vm2535_vm12 = vcmp.lt.f32.partialorder %v2534_v28, 0.0004427343 }
 0x475   : > { %v2527_v0 = vsel %vm2526_vm9, %v2524_v25, %v2521_v40 }
 0x476   : > { %v2559_v61 = vsel %vm2367_vm11, %v2347_v57, %v2527_v0  ;;  %v2533_v34 = vmul.f32 %v7064_v2, %v2532_v8 }
 0x477   : > { %v2568_v6 = vpack.c.bf16 %v2559_v61, %v2558_v44 }
 0x479   : > { %v7068_v38 = vpop.eup %7067  ;;  %2608 = vmatmul.bf16.gmra.mxu3 %v2568_v6 }
 0x47a   : > { %v2537_v13 = vadd.f32 1.0, %v7068_v38  ;;  %v2540_v27 = vmul.f32 -0.5, %v7068_v38  ;;  %v7070_v30 = vpop.eup %7069  ;;  %v2543_v35 = vand.u32 2147483647, %v7068_v38 }
 0x47b   : > { %v2530_v24 = vmul.f32 0.6931472, %v7070_v30 }
 0x47c   : > { %7071 = vlog2.f32 %v2537_v13  ;;  %v2541_v58 = vadd.f32 1.0, %v2540_v27  ;;  %vm2544_vm13 = vcmp.lt.f32.partialorder %v2543_v35, 0.0004427343 }
 0x47d   : > { %v2536_v15 = vsel %vm2535_vm12, %v2533_v34, %v2530_v24 }
 0x47e   : > { %v2542_v57 = vmul.f32 %v7068_v38, %v2541_v58  ;;  %v2560_v47 = vsel %vm2368_vm14, %v2350_v26, %v2536_v15 }
 0x482   : > { %v7072_v48 = vpop.eup %7071 }
 0x483   : > { %v2539_v19 = vmul.f32 0.6931472, %v7072_v48 }
 0x485   : > { %v2545_v12 = vsel %vm2544_vm13, %v2542_v57, %v2539_v19 }
 0x486   : > { %v2561_v53 = vsel %vm2369_vm15, %v2352_v21, %v2545_v12 }
 0x487   : > { %v2569_v36 = vpack.c.bf16 %v2561_v53, %v2560_v47 }
 0x489   : > { %2613 = vmatmul.bf16.gmra.mxu3 %v2569_v36 }
 0x49c   : > { %v2579_v54 = vpop.f32.mrf.mxu3 }
 0x49d   : > { %v2580_v2 = vadd.f32 %v9071_v29, %v2579_v54 }
 0x49f   : > { %v2635_v1 = vmul.f32 1.442695, %v2580_v2  ;;  %vm2619_vm1 = vcmp.gt.f32.partialorder %v2580_v2, 20.0 }
 0x4a1   : > { %7073 = vpow2.f32 %v2635_v1 }
 0x4a4   : > { %v2581_v17 = vpop.f32.mrf.mxu3 }
 0x4a5   : > { %v2582_v40 = vadd.f32 %v9071_v29, %v2581_v17 }
 0x4a7   : > { %v7074_v25 = vpop.eup %7073  ;;  %v2637_v0 = vmul.f32 1.442695, %v2582_v40  ;;  %vm2620_vm3 = vcmp.gt.f32.partialorder %v2582_v40, 20.0 }
 0x4a8   : > { %v2667_v44 = vadd.f32 1.0, %v7074_v25  ;;  %v2670_v26 = vmul.f32 -0.5, %v7074_v25  ;;  %v2673_v27 = vand.u32 2147483647, %v7074_v25 }
 0x4a9   : > { %7075 = vpow2.f32 %v2637_v0 }
 0x4aa   : > { %7077 = vlog2.f32 %v2667_v44  ;;  %v2671_v38 = vadd.f32 1.0, %v2670_v26  ;;  %vm2674_vm0 = vcmp.lt.f32.partialorder %v2673_v27, 0.0004427343 }
 0x4ac   : > { %v2584_v21 = vpop.f32.mrf.mxu3  ;;  %v2672_v24 = vmul.f32 %v7074_v25, %v2671_v38 }
 0x4ad   : > { %v9076_v61 = vadd.f32 %v9071_v29, %v2584_v21 }
 0x4af   : > { %v7076_v6 = vpop.eup %7075  ;;  %v2639_v11 = vmul.f32 1.442695, %v9076_v61  ;;  %vm2621_vm5 = vcmp.gt.f32.partialorder %v9076_v61, 20.0 }
 0x4b0   : > { %v7078_v13 = vpop.eup %7077  ;;  %v2676_v30 = vadd.f32 1.0, %v7076_v6  ;;  %v2679_v28 = vmul.f32 -0.5, %v7076_v6  ;;  %v2682_v15 = vand.u32 2147483647, %v7076_v6 }
 0x4b1   : > { %v2669_v8 = vmul.f32 0.6931472, %v7078_v13  ;;  %7079 = vpow2.f32 %v2639_v11 }
 0x4b2   : > { %7081 = vlog2.f32 %v2676_v30  ;;  %v2680_v34 = vadd.f32 1.0, %v2679_v28  ;;  %vm2683_vm2 = vcmp.lt.f32.partialorder %v2682_v15, 0.0004427343 }
 0x4b3   : > { %v2675_v35 = vsel %vm2674_vm0, %v2672_v24, %v2669_v8 }
 0x4b4   : > { %v2586_v58 = vpop.f32.mrf.mxu3  ;;  %v2811_v47 = vsel %vm2619_vm1, %v2580_v2, %v2675_v35  ;;  %v2681_v54 = vmul.f32 %v7076_v6, %v2680_v34  ;;  %v7841_v34 = vld [vmem:[#allocation9 + $0x38] sm:$0xff] }
 0x4b5   : > { %v2587_v48 = vadd.f32 %v9071_v29, %v2586_v58  ;;  %v2827_v1 = vpack.c.bf16 %v2811_v47, %v2811_v47 }
 0x4b7   : > { %v7080_v19 = vpop.eup %7079  ;;  %v2641_v57 = vmul.f32 1.442695, %v2587_v48  ;;  %v2859_v11 = vunpack.c.l.b16 %v2827_v1  ;;  %vm2622_vm7 = vcmp.gt.f32.partialorder %v2587_v48, 20.0 }
 0x4b8   : > { %v7082_v12 = vpop.eup %7081  ;;  %v2685_v53 = vadd.f32 1.0, %v7080_v19  ;;  %v2688_v25 = vmul.f32 -0.5, %v7080_v19  ;;  %v2691_v30 = vand.u32 2147483647, %v7080_v19 }
 0x4b9   : > { %v2678_v36 = vmul.f32 0.6931472, %v7082_v12  ;;  %7083 = vpow2.f32 %v2641_v57 }
 0x4ba   : > { %7085 = vlog2.f32 %v2685_v53  ;;  %v2689_v2 = vadd.f32 1.0, %v2688_v25  ;;  %vm2692_vm4 = vcmp.lt.f32.partialorder %v2691_v30, 0.0004427343 }
 0x4bb   : > { %v2684_v17 = vsel %vm2683_vm2, %v2681_v54, %v2678_v36 }
 0x4bc   : > { %v2812_v0 = vsel %vm2620_vm3, %v2582_v40, %v2684_v17  ;;  %v2589_v44 = vpop.f32.mrf.mxu3  ;;  %v2690_v40 = vmul.f32 %v7080_v19, %v2689_v2  ;;  %v7842_v17 = vld [vmem:[#allocation9 + $0x30] sm:$0xff] }
 0x4bd   : > { %v2828_v26 = vpack.c.bf16 %v2812_v0, %v2812_v0  ;;  %v9081_v21 = vadd.f32 %v9071_v29, %v2589_v44 }
 0x4bf   : > { %v7084_v38 = vpop.eup %7083  ;;  %v2860_v13 = vunpack.c.l.b16 %v2828_v26  ;;  %v2643_v27 = vmul.f32 1.442695, %v9081_v21  ;;  %vm2623_vm9 = vcmp.gt.f32.partialorder %v9081_v21, 20.0 }
 0x4c0   : > { %v7086_v6 = vpop.eup %7085  ;;  %v2694_v8 = vadd.f32 1.0, %v7084_v38  ;;  %v2697_v58 = vmul.f32 -0.5, %v7084_v38  ;;  %v2700_v47 = vand.u32 2147483647, %v7084_v38 }
 0x4c1   : > { %v2875_v28 = vpack.c.b16 %v2860_v13, %v2859_v11  ;;  %v2687_v24 = vmul.f32 0.6931472, %v7086_v6  ;;  %7087 = vpow2.f32 %v2643_v27  ;;  %v7843_v27 = vld [vmem:[#allocation9 + $0x28] sm:$0xff] }
 0x4c2   : > { %7089 = vlog2.f32 %v2694_v8  ;;  %v2698_v57 = vadd.f32 1.0, %v2697_v58  ;;  %vm2701_vm6 = vcmp.lt.f32.partialorder %v2700_v47, 0.0004427343 }
 0x4c3   : > { %2948 = vmatmul.bf16.vlgmr.msra.gmra.mxu1 %v2875_v28  ;;  %v2693_v15 = vsel %vm2692_vm4, %v2690_v40, %v2687_v24 }
 0x4c4   : > { %v2591_v35 = vpop.f32.mrf.mxu3  ;;  %4797 = vmatpush.bf16.msra.mxu1 %v7841_v34  ;;  %v2813_v1 = vsel %vm2621_vm5, %v9076_v61, %v2693_v15  ;;  %v2699_v0 = vmul.f32 %v7084_v38, %v2698_v57  ;;  %v7844_v34 = vld [vmem:[#allocation9 + $0x20] sm:$0xff] }
 0x4c5   : > { %v9085_v12 = vadd.f32 %v9071_v29, %v2591_v35  ;;  %v2829_v44 = vpack.c.bf16 %v2813_v1, %v2813_v1 }
 0x4c7   : > { %v7088_v53 = vpop.eup %7087  ;;  %v2645_v36 = vmul.f32 1.442695, %v9085_v12  ;;  %v2861_v8 = vunpack.c.l.b16 %v2829_v44  ;;  %vm2624_vm11 = vcmp.gt.f32.partialorder %v9085_v12, 20.0 }
 0x4c8   : > { %v7090_v54 = vpop.eup %7089  ;;  %v2703_v19 = vadd.f32 1.0, %v7088_v53  ;;  %4798 = vmatpush.bf16.msra.mxu1 %v7842_v17  ;;  %v2706_v11 = vmul.f32 -0.5, %v7088_v53  ;;  %v2709_v40 = vand.u32 2147483647, %v7088_v53 }
 0x4c9   : > { %v2696_v25 = vmul.f32 0.6931472, %v7090_v54  ;;  %7091 = vpow2.f32 %v2645_v36  ;;  %v7845_v54 = vld [vmem:[#allocation9 + $0x18] sm:$0xff] }
 0x4ca   : > { %7093 = vlog2.f32 %v2703_v19  ;;  %v2707_v28 = vadd.f32 1.0, %v2706_v11  ;;  %vm2710_vm8 = vcmp.lt.f32.partialorder %v2709_v40, 0.0004427343 }
 0x4cb   : > { %v2702_v26 = vsel %vm2701_vm6, %v2699_v0, %v2696_v25 }
 0x4cc   : > { %v2814_v13 = vsel %vm2622_vm7, %v2587_v48, %v2702_v26  ;;  %v2594_v2 = vpop.f32.mrf.mxu3  ;;  %4799 = vmatpush.bf16.msra.mxu1 %v7843_v27  ;;  %v2708_v47 = vmul.f32 %v7088_v53, %v2707_v28 }
 0x4cd   : > { %v9091_v6 = vadd.f32 %v9071_v29, %v2594_v2  ;;  %v2830_v61 = vpack.c.bf16 %v2814_v13, %v2814_v13  ;;  %v7846_v13 = vld [vmem:[#allocation9 + $0x10] sm:$0xff] }
 0x4cf   : > { %v7092_v30 = vpop.eup %7091  ;;  %v2647_v38 = vmul.f32 1.442695, %v9091_v6  ;;  %v2862_v24 = vunpack.c.l.b16 %v2830_v61  ;;  %vm2625_vm13 = vcmp.gt.f32.partialorder %v9091_v6, 20.0 }
 0x4d0   : > { %v7094_v58 = vpop.eup %7093  ;;  %v2712_v35 = vadd.f32 1.0, %v7092_v30  ;;  %4800 = vmatpush.bf16.msra.mxu1 %v7844_v34  ;;  %v2715_v48 = vmul.f32 -0.5, %v7092_v30  ;;  %v2718_v25 = vand.u32 2147483647, %v7092_v30 }
 0x4d1   : > { %v2705_v15 = vmul.f32 0.6931472, %v7094_v58  ;;  %7095 = vpow2.f32 %v2647_v38  ;;  %v2876_v57 = vpack.c.b16 %v2862_v24, %v2861_v8  ;;  %v7847_v58 = vld [vmem:[#allocation9 + $0x8] sm:$0xff] }
 0x4d2   : > { %7097 = vlog2.f32 %v2712_v35  ;;  %v2716_v19 = vadd.f32 1.0, %v2715_v48  ;;  %vm2719_vm10 = vcmp.lt.f32.partialorder %v2718_v25, 0.0004427343 }
 0x4d3   : > { %2953 = vmatmul.bf16.gmra.mxu1 %v2876_v57  ;;  %v2711_v1 = vsel %vm2710_vm8, %v2708_v47, %v2705_v15 }
 0x4d4   : > { %v2596_v36 = vpop.f32.mrf.mxu3  ;;  %4801 = vmatpush.bf16.msra.mxu1 %v7845_v54  ;;  %v2815_v11 = vsel %vm2623_vm9, %v9081_v21, %v2711_v1  ;;  %v2717_v27 = vmul.f32 %v7092_v30, %v2716_v19  ;;  %v7848_v54 = vld [vmem:[#allocation9] sm:$0xff] }
 0x4d5   : > { %v9095_v17 = vadd.f32 %v9071_v29, %v2596_v36  ;;  %v2831_v61 = vpack.c.bf16 %v2815_v11, %v2815_v11 }
 0x4d7   : > { %v7096_v0 = vpop.eup %7095  ;;  %v2649_v44 = vmul.f32 1.442695, %v9095_v17  ;;  %v2863_v34 = vunpack.c.l.b16 %v2831_v61  ;;  %vm2626_vm15 = vcmp.gt.f32.partialorder %v9095_v17, 20.0 }
 0x4d8   : > { %v7098_v26 = vpop.eup %7097  ;;  %v2721_v53 = vadd.f32 1.0, %v7096_v0  ;;  %4802 = vmatpush.bf16.msra.mxu1 %v7846_v13  ;;  %v2724_v28 = vmul.f32 -0.5, %v7096_v0  ;;  %v2727_v47 = vand.u32 2147483647, %v7096_v0 }
 0x4d9   : > { %v2714_v2 = vmul.f32 0.6931472, %v7098_v26  ;;  %7099 = vpow2.f32 %v2649_v44 }
 0x4da   : > { %7101 = vlog2.f32 %v2721_v53  ;;  %v2725_v30 = vadd.f32 1.0, %v2724_v28  ;;  %vm2728_vm12 = vcmp.lt.f32.partialorder %v2727_v47, 0.0004427343 }
 0x4db   : > { %v2720_v8 = vsel %vm2719_vm10, %v2717_v27, %v2714_v2 }
 0x4dc   : > { %v2816_v38 = vsel %vm2624_vm11, %v9085_v12, %v2720_v8  ;;  %v2599_v24 = vpop.f32.mrf.mxu3  ;;  %4803 = vmatpush.bf16.msra.mxu1 %v7847_v58  ;;  %v2726_v25 = vmul.f32 %v7096_v0, %v2725_v30 }
 0x4dd   : > { %v9103_v21 = vadd.f32 %v9071_v29, %v2599_v24  ;;  %v2832_v40 = vpack.c.bf16 %v2816_v38, %v2816_v38 }
 0x4df   : > { %v7100_v35 = vpop.eup %7099  ;;  %v2651_v15 = vmul.f32 1.442695, %v9103_v21  ;;  %v2864_v48 = vunpack.c.l.b16 %v2832_v40  ;;  %vm2627_vm1 = vcmp.gt.f32.partialorder %v9103_v21, 20.0 }
 0x4e0   : > { %v7102_v57 = vpop.eup %7101  ;;  %v2730_v36 = vadd.f32 1.0, %v7100_v35  ;;  %4804 = vmatpush.bf16.msra.mxu1 %v7848_v54  ;;  %v2733_v12 = vmul.f32 -0.5, %v7100_v35  ;;  %v2736_v13 = vand.u32 2147483647, %v7100_v35 }
 0x4e1   : > { %v2723_v1 = vmul.f32 0.6931472, %v7102_v57  ;;  %7103 = vpow2.f32 %v2651_v15  ;;  %v2877_v19 = vpack.c.b16 %v2864_v48, %v2863_v34 }
 0x4e2   : > { %7105 = vlog2.f32 %v2730_v36  ;;  %v2734_v11 = vadd.f32 1.0, %v2733_v12  ;;  %vm2737_vm14 = vcmp.lt.f32.partialorder %v2736_v13, 0.0004427343 }
 0x4e3   : > { %2958 = vmatmul.bf16.gmra.mxu1 %v2877_v19  ;;  %v2729_v26 = vsel %vm2728_vm12, %v2726_v25, %v2723_v1 }
 0x4e4   : > { %v2601_v44 = vpop.f32.mrf.mxu3  ;;  %v2817_v8 = vsel %vm2625_vm13, %v9091_v6, %v2729_v26  ;;  %v2735_v24 = vmul.f32 %v7100_v35, %v2734_v11 }
 0x4e5   : > { %v2602_v53 = vadd.f32 %v9071_v29, %v2601_v44  ;;  %v2833_v0 = vpack.c.bf16 %v2817_v8, %v2817_v8 }
 0x4e7   : > { %v7104_v2 = vpop.eup %7103  ;;  %v2653_v27 = vmul.f32 1.442695, %v2602_v53  ;;  %v2865_v6 = vunpack.c.l.b16 %v2833_v0  ;;  %vm2628_vm3 = vcmp.gt.f32.partialorder %v2602_v53, 20.0 }
 0x4e8   : > { %v7106_v61 = vpop.eup %7105  ;;  %v2739_v28 = vadd.f32 1.0, %v7104_v2  ;;  %v2742_v40 = vmul.f32 -0.5, %v7104_v2  ;;  %v2745_v1 = vand.u32 2147483647, %v7104_v2 }
 0x4e9   : > { %v2732_v38 = vmul.f32 0.6931472, %v7106_v61  ;;  %7107 = vpow2.f32 %v2653_v27 }
 0x4ea   : > { %7109 = vlog2.f32 %v2739_v28  ;;  %v2743_v47 = vadd.f32 1.0, %v2742_v40  ;;  %vm2746_vm0 = vcmp.lt.f32.partialorder %v2745_v1, 0.0004427343 }
 0x4eb   : > { %v2738_v58 = vsel %vm2737_vm14, %v2735_v24, %v2732_v38 }
 0x4ec   : > { %v2818_v34 = vsel %vm2626_vm15, %v9095_v17, %v2738_v58  ;;  %v2604_v30 = vpop.f32.mrf.mxu3  ;;  %v2744_v17 = vmul.f32 %v7104_v2, %v2743_v47 }
 0x4ed   : > { %v9112_v15 = vadd.f32 %v9071_v29, %v2604_v30  ;;  %v2834_v48 = vpack.c.bf16 %v2818_v34, %v2818_v34 }
 0x4ef   : > { %v7108_v57 = vpop.eup %7107  ;;  %v2655_v35 = vmul.f32 1.442695, %v9112_v15  ;;  %v2866_v36 = vunpack.c.l.b16 %v2834_v48  ;;  %vm2629_vm5 = vcmp.gt.f32.partialorder %v9112_v15, 20.0 }
 0x4f0   : > { %v7110_v54 = vpop.eup %7109  ;;  %v2748_v12 = vadd.f32 1.0, %v7108_v57  ;;  %v2751_v25 = vmul.f32 -0.5, %v7108_v57  ;;  %v2754_v61 = vand.u32 2147483647, %v7108_v57 }
 0x4f1   : > { %v2741_v19 = vmul.f32 0.6931472, %v7110_v54  ;;  %7111 = vpow2.f32 %v2655_v35  ;;  %v2878_v44 = vpack.c.b16 %v2866_v36, %v2865_v6 }
 0x4f2   : > { %7113 = vlog2.f32 %v2748_v12  ;;  %v2752_v13 = vadd.f32 1.0, %v2751_v25  ;;  %vm2755_vm2 = vcmp.lt.f32.partialorder %v2754_v61, 0.0004427343 }
 0x4f3   : > { %2963 = vmatmul.bf16.gmra.mxu1 %v2878_v44  ;;  %v2747_v11 = vsel %vm2746_vm0, %v2744_v17, %v2741_v19 }
 0x4f4   : > { %v2606_v26 = vpop.f32.mrf.mxu3  ;;  %v2819_v24 = vsel %vm2627_vm1, %v9103_v21, %v2747_v11  ;;  %v2753_v40 = vmul.f32 %v7108_v57, %v2752_v13 }
 0x4f5   : > { %v2607_v27 = vadd.f32 %v9071_v29, %v2606_v26  ;;  %v2835_v2 = vpack.c.bf16 %v2819_v24, %v2819_v24 }
 0x4f7   : > { %v7112_v8 = vpop.eup %7111  ;;  %v2657_v28 = vmul.f32 1.442695, %v2607_v27  ;;  %v2867_v54 = vunpack.c.l.b16 %v2835_v2  ;;  %vm2630_vm7 = vcmp.gt.f32.partialorder %v2607_v27, 20.0 }
 0x4f8   : > { %v7114_v38 = vpop.eup %7113  ;;  %v2757_v0 = vadd.f32 1.0, %v7112_v8  ;;  %v2760_v30 = vmul.f32 -0.5, %v7112_v8  ;;  %v2763_v19 = vand.u32 2147483647, %v7112_v8 }
 0x4f9   : > { %v2750_v58 = vmul.f32 0.6931472, %v7114_v38  ;;  %7115 = vpow2.f32 %v2657_v28 }
 0x4fa   : > { %7117 = vlog2.f32 %v2757_v0  ;;  %v2761_v1 = vadd.f32 1.0, %v2760_v30  ;;  %vm2764_vm4 = vcmp.lt.f32.partialorder %v2763_v19, 0.0004427343 }
 0x4fb   : > { %v2756_v34 = vsel %vm2755_vm2, %v2753_v40, %v2750_v58 }
 0x4fc   : > { %v2820_v48 = vsel %vm2628_vm3, %v2602_v53, %v2756_v34  ;;  %v2609_v6 = vpop.f32.mrf.mxu3  ;;  %v2762_v53 = vmul.f32 %v7112_v8, %v2761_v1 }
 0x4fd   : > { %v9119_v47 = vadd.f32 %v9071_v29, %v2609_v6  ;;  %v2836_v35 = vpack.c.bf16 %v2820_v48, %v2820_v48 }
 0x4ff   : > { %v7116_v36 = vpop.eup %7115  ;;  %v2659_v21 = vmul.f32 1.442695, %v9119_v47  ;;  %v2868_v12 = vunpack.c.l.b16 %v2836_v35  ;;  %vm2631_vm9 = vcmp.gt.f32.partialorder %v9119_v47, 20.0 }
 0x500   : > { %v7118_v57 = vpop.eup %7117  ;;  %v2766_v25 = vadd.f32 1.0, %v7116_v36  ;;  %v2769_v17 = vmul.f32 -0.5, %v7116_v36  ;;  %v2772_v38 = vand.u32 2147483647, %v7116_v36 }
 0x501   : > { %v2759_v44 = vmul.f32 0.6931472, %v7118_v57  ;;  %7119 = vpow2.f32 %v2659_v21  ;;  %v2879_v26 = vpack.c.b16 %v2868_v12, %v2867_v54 }
 0x502   : > { %7121 = vlog2.f32 %v2766_v25  ;;  %v2770_v61 = vadd.f32 1.0, %v2769_v17  ;;  %vm2773_vm6 = vcmp.lt.f32.partialorder %v2772_v38, 0.0004427343 }
 0x503   : > { %2968 = vmatmul.bf16.gmra.mxu1 %v2879_v26  ;;  %v2765_v13 = vsel %vm2764_vm4, %v2762_v53, %v2759_v44 }
 0x504   : > { %v2611_v11 = vpop.f32.mrf.mxu3  ;;  %v2821_v40 = vsel %vm2629_vm5, %v9112_v15, %v2765_v13  ;;  %v2771_v30 = vmul.f32 %v7116_v36, %v2770_v61 }
 0x505   : > { %v2612_v28 = vadd.f32 %v9071_v29, %v2611_v11  ;;  %v2837_v8 = vpack.c.bf16 %v2821_v40, %v2821_v40 }
 0x507   : > { %v7120_v24 = vpop.eup %7119  ;;  %v2661_v0 = vmul.f32 1.442695, %v2612_v28  ;;  %v2869_v57 = vunpack.c.l.b16 %v2837_v8  ;;  %vm2632_vm11 = vcmp.gt.f32.partialorder %v2612_v28, 20.0 }
 0x508   : > { %v7122_v58 = vpop.eup %7121  ;;  %v2775_v2 = vadd.f32 1.0, %v7120_v24  ;;  %v2778_v6 = vmul.f32 -0.5, %v7120_v24  ;;  %v2781_v17 = vand.u32 2147483647, %v7120_v24 }
 0x509   : > { %v2768_v34 = vmul.f32 0.6931472, %v7122_v58  ;;  %7123 = vpow2.f32 %v2661_v0 }
 0x50a   : > { %7125 = vlog2.f32 %v2775_v2  ;;  %v2779_v19 = vadd.f32 1.0, %v2778_v6  ;;  %vm2782_vm8 = vcmp.lt.f32.partialorder %v2781_v17, 0.0004427343 }
 0x50b   : > { %v2774_v48 = vsel %vm2773_vm6, %v2771_v30, %v2768_v34 }
 0x50c   : > { %v2822_v35 = vsel %vm2630_vm7, %v2607_v27, %v2774_v48  ;;  %v2614_v54 = vpop.f32.mrf.mxu3  ;;  %v2780_v13 = vmul.f32 %v7120_v24, %v2779_v19 }
 0x50d   : > { %v2615_v1 = vadd.f32 %v9071_v29, %v2614_v54  ;;  %v2838_v21 = vpack.c.bf16 %v2822_v35, %v2822_v35 }
 0x50f   : > { %v7124_v12 = vpop.eup %7123  ;;  %v2663_v25 = vmul.f32 1.442695, %v2615_v1  ;;  %v2870_v15 = vunpack.c.l.b16 %v2838_v21  ;;  %vm2633_vm13 = vcmp.gt.f32.partialorder %v2615_v1, 20.0 }
 0x510   : > { %v7126_v44 = vpop.eup %7125  ;;  %v2784_v36 = vadd.f32 1.0, %v7124_v12  ;;  %v2787_v53 = vmul.f32 -0.5, %v7124_v12  ;;  %v2790_v58 = vand.u32 2147483647, %v7124_v12 }
 0x511   : > { %v2777_v26 = vmul.f32 0.6931472, %v7126_v44  ;;  %7127 = vpow2.f32 %v2663_v25  ;;  %v2880_v11 = vpack.c.b16 %v2870_v15, %v2869_v57  ;;  %v2900_v57 = vpop.f32.mrf.mxu0 }
 0x512   : > { %7129 = vlog2.f32 %v2784_v36  ;;  %v2788_v38 = vadd.f32 1.0, %v2787_v53  ;;  %vm2791_vm10 = vcmp.lt.f32.partialorder %v2790_v58, 0.0004427343 }
 0x513   : > { %2973 = vmatmul.bf16.gmra.mxu1 %v2880_v11  ;;  %v2783_v61 = vsel %vm2782_vm8, %v2780_v13, %v2777_v26 }
 0x514   : > { %v2616_v27 = vpop.f32.mrf.mxu3  ;;  %v2823_v30 = vsel %vm2631_vm9, %v9119_v47, %v2783_v61  ;;  %v2789_v6 = vmul.f32 %v7124_v12, %v2788_v38 }
 0x515   : > { %v2617_v0 = vadd.f32 %v9071_v29, %v2616_v27  ;;  %v2839_v24 = vpack.c.bf16 %v2823_v30, %v2823_v30 }
 0x517   : > { %v7128_v40 = vpop.eup %7127  ;;  %v2665_v2 = vmul.f32 1.442695, %v2617_v0  ;;  %v2871_v25 = vunpack.c.l.b16 %v2839_v24  ;;  %vm2634_vm15 = vcmp.gt.f32.partialorder %v2617_v0, 20.0 }
 0x518   : > { %v7130_v34 = vpop.eup %7129  ;;  %v2793_v8 = vadd.f32 1.0, %v7128_v40  ;;  %v2796_v54 = vmul.f32 -0.5, %v7128_v40  ;;  %v2799_v36 = vand.u32 2147483647, %v7128_v40 }
 0x519   : > { %v2786_v48 = vmul.f32 0.6931472, %v7130_v34  ;;  %7131 = vpow2.f32 %v2665_v2  ;;  %v2902_v38 = vpop.f32.mrf.mxu0 }
 0x51a   : > { %7133 = vlog2.f32 %v2793_v8  ;;  %v2797_v15 = vadd.f32 1.0, %v2796_v54  ;;  %vm2800_vm12 = vcmp.lt.f32.partialorder %v2799_v36, 0.0004427343 }
 0x51b   : > { %v2792_v35 = vsel %vm2791_vm10, %v2789_v6, %v2786_v48 }
 0x51c   : > { %v2824_v21 = vsel %vm2632_vm11, %v2612_v28, %v2792_v35  ;;  %v2798_v11 = vmul.f32 %v7128_v40, %v2797_v15 }
 0x51d   : > { %v2840_v29 = vpack.c.bf16 %v2824_v21, %v2824_v21 }
 0x51f   : > { %v7132_v19 = vpop.eup %7131  ;;  %v2872_v44 = vunpack.c.l.b16 %v2840_v29  ;;  %v9132_v29 = vld [vmem:[%s10124_s7] ss:$0 sm:$0xff] }
 0x520   : > { %v7134_v17 = vpop.eup %7133  ;;  %v2802_v47 = vadd.f32 1.0, %v7132_v19  ;;  %v2805_v53 = vmul.f32 -0.5, %v7132_v19  ;;  %v2808_v61 = vand.u32 2147483647, %v7132_v19 }
 0x521   : > { %v2795_v26 = vmul.f32 0.6931472, %v7134_v17  ;;  %v2881_v12 = vpack.c.b16 %v2872_v44, %v2871_v25  ;;  %v2905_v54 = vpop.f32.mrf.mxu0 }
 0x522   : > { %7135 = vlog2.f32 %v2802_v47  ;;  %v2806_v27 = vadd.f32 1.0, %v2805_v53  ;;  %vm2809_vm14 = vcmp.lt.f32.partialorder %v2808_v61, 0.0004427343 }
 0x523   : > { %2978 = vmatmul.bf16.gmra.mxu1 %v2881_v12  ;;  %v2801_v13 = vsel %vm2800_vm12, %v2798_v11, %v2795_v26  ;;  %v2906_v12 = vadd.f32 %v9132_v29, %v2905_v54 }
 0x524   : > { %v2825_v58 = vsel %vm2633_vm13, %v2615_v1, %v2801_v13  ;;  %v2807_v34 = vmul.f32 %v7132_v19, %v2806_v27  ;;  %v2901_v1 = vadd.f32 %v9132_v29, %v2900_v57 }
 0x525   : > { %v2841_v30 = vpack.c.bf16 %v2825_v58, %v2825_v58 }
 0x527   : > { %v2873_v24 = vunpack.c.l.b16 %v2841_v30 }
 0x528   : > { %v7136_v28 = vpop.eup %7135 }
 0x529   : > { %v2804_v2 = vmul.f32 0.6931472, %v7136_v28  ;;  %v2907_v21 = vpop.f32.mrf.mxu0 }
 0x52b   : > { %v2810_v8 = vsel %vm2809_vm14, %v2807_v34, %v2804_v2  ;;  %v2908_v34 = vadd.f32 %v9132_v29, %v2907_v21 }
 0x52c   : > { %v2826_v48 = vsel %vm2634_vm15, %v2617_v0, %v2810_v8  ;;  %v2903_v0 = vadd.f32 %v9132_v29, %v2902_v38 }
 0x52d   : > { %v2842_v6 = vpack.c.bf16 %v2826_v48, %v2826_v48 }
 0x52f   : > { %v2874_v35 = vunpack.c.l.b16 %v2842_v6 }
 0x531   : > { %v2882_v40 = vpack.c.b16 %v2874_v35, %v2873_v24  ;;  %v2910_v44 = vpop.f32.mrf.mxu0 }
 0x532   : > { %v2911_v21 = vadd.f32 %v9132_v29, %v2910_v44  ;;  %v7850_v44 = vld [vmem:[%s10119_s2 + $0x38] sm:$0xff] }
 0x533   : > { %2983 = vmatmul.bf16.gmra.mxu1 %v2882_v40 }
 0x539   : > { %v2912_v11 = vpop.f32.mrf.mxu0 }
 0x540   : > { %v2949_v19 = vpop.f32.mrf.mxu1 }
 0x541   : > { %v2950_v25 = vadd.f32 %v2949_v19, %v2901_v1  ;;  %v2915_v40 = vpop.f32.mrf.mxu0 }
 0x543   : > { %v3005_v15 = vmul.f32 1.442695, %v2950_v25  ;;  %vm2989_vm2 = vcmp.gt.f32.partialorder %v2950_v25, 20.0 }
 0x545   : > { %7137 = vpow2.f32 %v3005_v15 }
 0x548   : > { %v2951_v17 = vpop.f32.mrf.mxu1 }
 0x549   : > { %v2952_v36 = vadd.f32 %v2951_v17, %v2903_v0 }
 0x54b   : > { %v7138_v47 = vpop.eup %7137  ;;  %v3007_v26 = vmul.f32 1.442695, %v2952_v36  ;;  %vm2990_vm3 = vcmp.gt.f32.partialorder %v2952_v36, 20.0 }
 0x54c   : > { %v3037_v53 = vadd.f32 1.0, %v7138_v47  ;;  %v3040_v61 = vmul.f32 -0.5, %v7138_v47  ;;  %v3043_v8 = vand.u32 2147483647, %v7138_v47 }
 0x54d   : > { %7139 = vpow2.f32 %v3007_v26 }
 0x54e   : > { %7141 = vlog2.f32 %v3037_v53  ;;  %v3041_v30 = vadd.f32 1.0, %v3040_v61  ;;  %vm3044_vm0 = vcmp.lt.f32.partialorder %v3043_v8, 0.0004427343 }
 0x550   : > { %v2954_v13 = vpop.f32.mrf.mxu1  ;;  %v3042_v19 = vmul.f32 %v7138_v47, %v3041_v30 }
 0x551   : > { %v9137_v27 = vadd.f32 %v2954_v13, %v2906_v12 }
 0x553   : > { %v7140_v57 = vpop.eup %7139  ;;  %v3009_v28 = vmul.f32 1.442695, %v9137_v27  ;;  %vm2991_vm6 = vcmp.gt.f32.partialorder %v9137_v27, 20.0 }
 0x554   : > { %v3046_v58 = vadd.f32 1.0, %v7140_v57  ;;  %v3049_v2 = vmul.f32 -0.5, %v7140_v57  ;;  %v7142_v38 = vpop.eup %7141  ;;  %v3052_v54 = vand.u32 2147483647, %v7140_v57 }
 0x555   : > { %7143 = vpow2.f32 %v3009_v28  ;;  %v3039_v6 = vmul.f32 0.6931472, %v7142_v38 }
 0x556   : > { %7145 = vlog2.f32 %v3046_v58  ;;  %v3050_v24 = vadd.f32 1.0, %v3049_v2  ;;  %vm3053_vm1 = vcmp.lt.f32.partialorder %v3052_v54, 0.0004427343 }
 0x557   : > { %v3045_v26 = vsel %vm3044_vm0, %v3042_v19, %v3039_v6  ;;  %v7851_v19 = vld [vmem:[%s10119_s2 + $0x30] sm:$0xff] }
 0x558   : > { %v2956_v48 = vpop.f32.mrf.mxu1  ;;  %v3051_v12 = vmul.f32 %v7140_v57, %v3050_v24  ;;  %v3181_v61 = vsel %vm2989_vm2, %v2950_v25, %v3045_v26  ;;  %v2917_v57 = vpop.f32.mrf.mxu0 }
 0x559   : > { %v9141_v35 = vadd.f32 %v2956_v48, %v2908_v34  ;;  %v2913_v48 = vadd.f32 %v9132_v29, %v2912_v11  ;;  %v7855_v11 = vld [vmem:[%s10119_s2 + $0x10] sm:$0xff] }
 0x55b   : > { %v7144_v1 = vpop.eup %7143  ;;  %v3011_v15 = vmul.f32 1.442695, %v9141_v35  ;;  %vm2992_vm7 = vcmp.gt.f32.partialorder %v9141_v35, 20.0 }
 0x55c   : > { %v7146_v0 = vpop.eup %7145  ;;  %v3055_v17 = vadd.f32 1.0, %v7144_v1  ;;  %v3058_v30 = vmul.f32 -0.5, %v7144_v1  ;;  %v3061_v54 = vand.u32 2147483647, %v7144_v1 }
 0x55d   : > { %v3048_v53 = vmul.f32 0.6931472, %v7146_v0  ;;  %7147 = vpow2.f32 %v3011_v15 }
 0x55e   : > { %7149 = vlog2.f32 %v3055_v17  ;;  %v3059_v6 = vadd.f32 1.0, %v3058_v30  ;;  %vm9158_vm4 = vcmp.lt.f32.partialorder %v3061_v54, 0.0004427343 }
 0x55f   : > { %v3054_v13 = vsel %vm3053_vm1, %v3051_v12, %v3048_v53 }
 0x560   : > { %v3182_v28 = vsel %vm2990_vm3, %v2952_v36, %v3054_v13  ;;  %v2959_v58 = vpop.f32.mrf.mxu1  ;;  %v2920_v30 = vpop.f32.mrf.mxu0 }
 0x561   : > { %v3197_v47 = vpack.c.bf16 %v3182_v28, %v3181_v61  ;;  %v9145_v2 = vadd.f32 %v2959_v58, %v2911_v21  ;;  %v3060_v21 = vmul.f32 %v7144_v1, %v3059_v6  ;;  %v7852_v28 = vld [vmem:[%s10119_s2 + $0x28] sm:$0xff]  ;;  %v2916_v1 = vadd.f32 %v9132_v29, %v2915_v40 }
 0x563   : > { %v7148_v38 = vpop.eup %7147  ;;  %v3013_v34 = vmul.f32 1.442695, %v9145_v2  ;;  %3213 = vmatmul.bf16.vlgmr.msra.gmra.mxu2 %v3197_v47  ;;  %vm2993_vm10 = vcmp.gt.f32.partialorder %v9145_v2, 20.0 }
 0x564   : > { %v3064_v8 = vadd.f32 1.0, %v7148_v38  ;;  %4974 = vmatpush.bf16.msra.mxu2 %v7850_v44  ;;  %v3067_v25 = vmul.f32 -0.5, %v7148_v38  ;;  %v7150_v36 = vpop.eup %7149  ;;  %v3070_v26 = vand.u32 2147483647, %v7148_v38 }
 0x565   : > { %7151 = vpow2.f32 %v3013_v34  ;;  %v3057_v0 = vmul.f32 0.6931472, %v7150_v36 }
 0x566   : > { %7153 = vlog2.f32 %v3064_v8  ;;  %v3068_v17 = vadd.f32 1.0, %v3067_v25  ;;  %vm3071_vm5 = vcmp.lt.f32.partialorder %v3070_v26, 0.0004427343 }
 0x567   : > { %v3063_v58 = vsel %vm9158_vm4, %v3060_v21, %v3057_v0 }
 0x568   : > { %v2961_v24 = vpop.f32.mrf.mxu1  ;;  %4975 = vmatpush.bf16.msra.mxu2 %v7851_v19  ;;  %v3069_v34 = vmul.f32 %v7148_v38, %v3068_v17  ;;  %v3183_v25 = vsel %vm2991_vm6, %v9137_v27, %v3063_v58  ;;  %v7854_v27 = vld [vmem:[%s10119_s2 + $0x18] sm:$0xff]  ;;  %v2918_v17 = vadd.f32 %v9132_v29, %v2917_v57 }
 0x569   : > { %v9155_v15 = vadd.f32 %v2961_v24, %v2913_v48  ;;  %v7853_v48 = vld [vmem:[%s10119_s2 + $0x20] sm:$0xff] }
 0x56b   : > { %v7152_v53 = vpop.eup %7151  ;;  %v3015_v12 = vmul.f32 1.442695, %v9155_v15  ;;  %vm2994_vm11 = vcmp.gt.f32.partialorder %v9155_v15, 20.0 }
 0x56c   : > { %v7154_v13 = vpop.eup %7153  ;;  %v3073_v61 = vadd.f32 1.0, %v7152_v53  ;;  %4976 = vmatpush.bf16.msra.mxu2 %v7852_v28  ;;  %v3076_v54 = vmul.f32 -0.5, %v7152_v53 }
 0x56d   : > { %7155 = vpow2.f32 %v3015_v12  ;;  %v3066_v47 = vmul.f32 0.6931472, %v7154_v13  ;;  %v2922_v12 = vpop.f32.mrf.mxu0  ;;  %v3079_v13 = vand.u32 2147483647, %v7152_v53 }
 0x56e   : > { %7157 = vlog2.f32 %v3073_v61  ;;  %v3077_v26 = vadd.f32 1.0, %v3076_v54 }
 0x56f   : > { %v3072_v8 = vsel %vm3071_vm5, %v3069_v34, %v3066_v47  ;;  %vm3080_vm8 = vcmp.lt.f32.partialorder %v3079_v13, 0.0004427343 }
 0x570   : > { %v2964_v44 = vpop.f32.mrf.mxu1  ;;  %v3184_v36 = vsel %vm2992_vm7, %v9141_v35, %v3072_v8  ;;  %4977 = vmatpush.bf16.msra.mxu2 %v7853_v48  ;;  %v3078_v8 = vmul.f32 %v7152_v53, %v3077_v26 }
 0x571   : > { %v9175_v38 = vadd.f32 %v2964_v44, %v2916_v1  ;;  %v3198_v6 = vpack.c.bf16 %v3184_v36, %v3183_v25  ;;  %v7856_v25 = vld [vmem:[%s10119_s2 + $0x8] sm:$0xff] }
 0x573   : > { %v7156_v40 = vpop.eup %7155  ;;  %v3017_v24 = vmul.f32 1.442695, %v9175_v38  ;;  %3218 = vmatmul.bf16.gmra.mxu2 %v3198_v6  ;;  %vm2995_vm14 = vcmp.gt.f32.partialorder %v9175_v38, 20.0 }
 0x574   : > { %v3082_v19 = vadd.f32 1.0, %v7156_v40  ;;  %4978 = vmatpush.bf16.msra.mxu2 %v7854_v27  ;;  %v3085_v35 = vmul.f32 -0.5, %v7156_v40  ;;  %v7158_v0 = vpop.eup %7157  ;;  %v3088_v47 = vand.u32 2147483647, %v7156_v40 }
 0x575   : > { %7159 = vpow2.f32 %v3017_v24  ;;  %v3075_v28 = vmul.f32 0.6931472, %v7158_v0  ;;  %v2921_v24 = vadd.f32 %v9132_v29, %v2920_v30  ;;  %v2925_v30 = vpop.f32.mrf.mxu0 }
 0x576   : > { %7161 = vlog2.f32 %v3082_v19  ;;  %v3086_v58 = vadd.f32 1.0, %v3085_v35  ;;  %vm3089_vm9 = vcmp.lt.f32.partialorder %v3088_v47, 0.0004427343  ;;  %v7857_v35 = vld [vmem:[%s10119_s2] sm:$0xff] }
 0x577   : > { %v3081_v36 = vsel %vm3080_vm8, %v3078_v8, %v3075_v28 }
 0x578   : > { %v2966_v21 = vpop.f32.mrf.mxu1  ;;  %4979 = vmatpush.bf16.msra.mxu2 %v7855_v11  ;;  %v3087_v6 = vmul.f32 %v7156_v40, %v3086_v58  ;;  %v3185_v19 = vsel %vm2993_vm10, %v9145_v2, %v3081_v36 }
 0x579   : > { %v9185_v61 = vadd.f32 %v2966_v21, %v2918_v17 }
 0x57b   : > { %v7160_v34 = vpop.eup %7159  ;;  %v3019_v1 = vmul.f32 1.442695, %v9185_v61  ;;  %vm2996_vm15 = vcmp.gt.f32.partialorder %v9185_v61, 20.0 }
 0x57c   : > { %v7162_v44 = vpop.eup %7161  ;;  %v3091_v57 = vadd.f32 1.0, %v7160_v34  ;;  %4980 = vmatpush.bf16.msra.mxu2 %v7856_v25  ;;  %v3094_v21 = vmul.f32 -0.5, %v7160_v34  ;;  %v3097_v47 = vand.u32 2147483647, %v7160_v34 }
 0x57d   : > { %7163 = vpow2.f32 %v3019_v1  ;;  %v3084_v48 = vmul.f32 0.6931472, %v7162_v44 }
 0x57e   : > { %7165 = vlog2.f32 %v3091_v57  ;;  %v3095_v28 = vadd.f32 1.0, %v3094_v21  ;;  %vm3098_vm12 = vcmp.lt.f32.partialorder %v3097_v47, 0.0004427343 }
 0x57f   : > { %v3090_v53 = vsel %vm3089_vm9, %v3087_v6, %v3084_v48 }
 0x580   : > { %v2969_v54 = vpop.f32.mrf.mxu1  ;;  %v3186_v27 = vsel %vm2994_vm11, %v9155_v15, %v3090_v53  ;;  %4981 = vmatpush.bf16.msra.mxu2 %v7857_v35  ;;  %v2923_v15 = vadd.f32 %v9132_v29, %v2922_v12  ;;  %v3096_v48 = vmul.f32 %v7160_v34, %v3095_v28 }
 0x581   : > { %v9199_v40 = vadd.f32 %v2969_v54, %v2921_v24  ;;  %v3199_v0 = vpack.c.bf16 %v3186_v27, %v3185_v19  ;;  %v2927_v24 = vpop.f32.mrf.mxu0  ;;  %v2926_v27 = vadd.f32 %v9132_v29, %v2925_v30 }
 0x582   : > { %v2928_v47 = vadd.f32 %v9132_v29, %v2927_v24 }
 0x583   : > { %v7164_v17 = vpop.eup %7163  ;;  %v3021_v26 = vmul.f32 1.442695, %v9199_v40  ;;  %3223 = vmatmul.bf16.gmra.mxu2 %v3199_v0  ;;  %vm2997_vm2 = vcmp.gt.f32.partialorder %v9199_v40, 20.0 }
 0x584   : > { %v3100_v13 = vadd.f32 1.0, %v7164_v17  ;;  %v3103_v2 = vmul.f32 -0.5, %v7164_v17  ;;  %v7166_v11 = vpop.eup %7165  ;;  %v3106_v57 = vand.u32 2147483647, %v7164_v17 }
 0x585   : > { %7167 = vpow2.f32 %v3021_v26  ;;  %v3093_v8 = vmul.f32 0.6931472, %v7166_v11 }
 0x586   : > { %7169 = vlog2.f32 %v3100_v13  ;;  %v3104_v44 = vadd.f32 1.0, %v3103_v2  ;;  %vm3107_vm13 = vcmp.lt.f32.partialorder %v3106_v57, 0.0004427343 }
 0x587   : > { %v3099_v54 = vsel %vm3098_vm12, %v3096_v48, %v3093_v8 }
 0x588   : > { %v2971_v58 = vpop.f32.mrf.mxu1  ;;  %v3105_v12 = vmul.f32 %v7164_v17, %v3104_v44  ;;  %v3187_v26 = vsel %vm2995_vm14, %v9175_v38, %v3099_v54 }
 0x589   : > { %v9203_v1 = vadd.f32 %v2971_v58, %v2923_v15  ;;  %v2930_v58 = vpop.f32.mrf.mxu0 }
 0x58a   : > { %v2931_v24 = vadd.f32 %v9132_v29, %v2930_v58 }
 0x58b   : > { %v7168_v25 = vpop.eup %7167  ;;  %v3023_v36 = vmul.f32 1.442695, %v9203_v1  ;;  %vm2998_vm3 = vcmp.gt.f32.partialorder %v9203_v1, 20.0 }
 0x58c   : > { %v7170_v6 = vpop.eup %7169  ;;  %v3109_v53 = vadd.f32 1.0, %v7168_v25  ;;  %v3112_v11 = vmul.f32 -0.5, %v7168_v25 }
 0x58d   : > { %7171 = vpow2.f32 %v3023_v36  ;;  %v3102_v19 = vmul.f32 0.6931472, %v7170_v6 }
 0x58e   : > { %7173 = vlog2.f32 %v3109_v53  ;;  %v3113_v38 = vadd.f32 1.0, %v3112_v11 }
 0x58f   : > { %v3108_v35 = vsel %vm3107_vm13, %v3105_v12, %v3102_v19 }
 0x590   : > { %v2974_v0 = vpop.f32.mrf.mxu1  ;;  %v3188_v34 = vsel %vm2996_vm15, %v9185_v61, %v3108_v35  ;;  %v3115_v61 = vand.u32 2147483647, %v7168_v25  ;;  %v3114_v54 = vmul.f32 %v7168_v25, %v3113_v38 }
 0x591   : > { %v9211_v21 = vadd.f32 %v2974_v0, %v2926_v27  ;;  %v3200_v13 = vpack.c.bf16 %v3188_v34, %v3187_v26  ;;  %v2932_v34 = vpop.f32.mrf.mxu0 }
 0x592   : > { %vm3116_vm0 = vcmp.lt.f32.partialorder %v3115_v61, 0.0004427343 }
 0x593   : > { %v7172_v2 = vpop.eup %7171  ;;  %v3025_v17 = vmul.f32 1.442695, %v9211_v21  ;;  %3228 = vmatmul.bf16.gmra.mxu2 %v3200_v13  ;;  %vm2999_vm6 = vcmp.gt.f32.partialorder %v9211_v21, 20.0 }
 0x594   : > { %v3118_v30 = vadd.f32 1.0, %v7172_v2  ;;  %v3121_v15 = vmul.f32 -0.5, %v7172_v2  ;;  %v7174_v28 = vpop.eup %7173  ;;  %v3124_v48 = vand.u32 2147483647, %v7172_v2 }
 0x595   : > { %7175 = vpow2.f32 %v3025_v17  ;;  %v3111_v57 = vmul.f32 0.6931472, %v7174_v28 }
 0x596   : > { %7177 = vlog2.f32 %v3118_v30  ;;  %v3122_v36 = vadd.f32 1.0, %v3121_v15  ;;  %vm3125_vm1 = vcmp.lt.f32.partialorder %v3124_v48, 0.0004427343 }
 0x597   : > { %v3117_v27 = vsel %vm3116_vm0, %v3114_v54, %v3111_v57 }
 0x598   : > { %v2976_v8 = vpop.f32.mrf.mxu1  ;;  %v3123_v0 = vmul.f32 %v7172_v2, %v3122_v36  ;;  %v3189_v17 = vsel %vm2997_vm2, %v9199_v40, %v3117_v27 }
 0x599   : > { %v2977_v44 = vadd.f32 %v2976_v8, %v2928_v47  ;;  %v2933_v8 = vadd.f32 %v9132_v29, %v2932_v34 }
 0x59b   : > { %v7176_v6 = vpop.eup %7175  ;;  %v3027_v53 = vmul.f32 1.442695, %v2977_v44  ;;  %vm3000_vm7 = vcmp.gt.f32.partialorder %v2977_v44, 20.0 }
 0x59c   : > { %v7178_v19 = vpop.eup %7177  ;;  %v3127_v12 = vadd.f32 1.0, %v7176_v6  ;;  %v3130_v28 = vmul.f32 -0.5, %v7176_v6  ;;  %v3133_v57 = vand.u32 2147483647, %v7176_v6 }
 0x59d   : > { %7179 = vpow2.f32 %v3027_v53  ;;  %v3120_v35 = vmul.f32 0.6931472, %v7178_v19  ;;  %v2935_v53 = vpop.f32.mrf.mxu0 }
 0x59e   : > { %7181 = vlog2.f32 %v3127_v12  ;;  %v3131_v61 = vadd.f32 1.0, %v3130_v28  ;;  %vm3134_vm4 = vcmp.lt.f32.partialorder %v3133_v57, 0.0004427343  ;;  %v2936_v34 = vadd.f32 %v9132_v29, %v2935_v53 }
 0x59f   : > { %v3126_v26 = vsel %vm3125_vm1, %v3123_v0, %v3120_v35 }
 0x5a0   : > { %v2979_v13 = vpop.f32.mrf.mxu1  ;;  %v3190_v25 = vsel %vm2998_vm3, %v9203_v1, %v3126_v26  ;;  %v3132_v27 = vmul.f32 %v7176_v6, %v3131_v61 }
 0x5a1   : > { %v9220_v11 = vadd.f32 %v2979_v13, %v2931_v24  ;;  %v3201_v30 = vpack.c.bf16 %v3190_v25, %v3189_v17 }
 0x5a3   : > { %v7180_v15 = vpop.eup %7179  ;;  %v3029_v2 = vmul.f32 1.442695, %v9220_v11  ;;  %3233 = vmatmul.bf16.gmra.mxu2 %v3201_v30  ;;  %vm3001_vm10 = vcmp.gt.f32.partialorder %v9220_v11, 20.0 }
 0x5a4   : > { %v3136_v58 = vadd.f32 1.0, %v7180_v15  ;;  %v3139_v47 = vmul.f32 -0.5, %v7180_v15  ;;  %v7182_v38 = vpop.eup %7181  ;;  %v3142_v54 = vand.u32 2147483647, %v7180_v15 }
 0x5a5   : > { %7183 = vpow2.f32 %v3029_v2  ;;  %v3129_v36 = vmul.f32 0.6931472, %v7182_v38 }
 0x5a6   : > { %7185 = vlog2.f32 %v3136_v58  ;;  %v3140_v48 = vadd.f32 1.0, %v3139_v47  ;;  %vm3143_vm5 = vcmp.lt.f32.partialorder %v3142_v54, 0.0004427343 }
 0x5a7   : > { %v3135_v24 = vsel %vm3134_vm4, %v3132_v27, %v3129_v36 }
 0x5a8   : > { %v2981_v40 = vpop.f32.mrf.mxu1  ;;  %v3141_v13 = vmul.f32 %v7180_v15, %v3140_v48  ;;  %v3191_v30 = vsel %vm2999_vm6, %v9211_v21, %v3135_v24 }
 0x5a9   : > { %v2982_v1 = vadd.f32 %v2981_v40, %v2933_v8  ;;  %v2937_v8 = vpop.f32.mrf.mxu0 }
 0x5aa   : > { %v2938_v57 = vadd.f32 %v9132_v29, %v2937_v8 }
 0x5ab   : > { %v7184_v19 = vpop.eup %7183  ;;  %v3031_v12 = vmul.f32 1.442695, %v2982_v1  ;;  %vm3002_vm11 = vcmp.gt.f32.partialorder %v2982_v1, 20.0 }
 0x5ac   : > { %v7186_v35 = vpop.eup %7185  ;;  %v3145_v0 = vadd.f32 1.0, %v7184_v19  ;;  %v3148_v38 = vmul.f32 -0.5, %v7184_v19  ;;  %v3151_v53 = vand.u32 2147483647, %v7184_v19 }
 0x5ad   : > { %7187 = vpow2.f32 %v3031_v12  ;;  %v3138_v26 = vmul.f32 0.6931472, %v7186_v35 }
 0x5ae   : > { %7189 = vlog2.f32 %v3145_v0  ;;  %v3149_v36 = vadd.f32 1.0, %v3148_v38  ;;  %vm3152_vm8 = vcmp.lt.f32.partialorder %v3151_v53, 0.0004427343 }
 0x5af   : > { %v3144_v17 = vsel %vm3143_vm5, %v3141_v13, %v3138_v26 }
 0x5b0   : > { %v2984_v25 = vpop.f32.mrf.mxu1  ;;  %v3192_v2 = vsel %vm3000_vm7, %v2977_v44, %v3144_v17  ;;  %v3150_v0 = vmul.f32 %v7184_v19, %v3149_v36 }
 0x5b1   : > { %v2985_v6 = vadd.f32 %v2984_v25, %v2936_v34  ;;  %v3202_v28 = vpack.c.bf16 %v3192_v2, %v3191_v30 }
 0x5b3   : > { %v7188_v58 = vpop.eup %7187  ;;  %v3033_v47 = vmul.f32 1.442695, %v2985_v6  ;;  %3238 = vmatmul.bf16.gmra.mxu2 %v3202_v28  ;;  %vm3003_vm14 = vcmp.gt.f32.partialorder %v2985_v6, 20.0 }
 0x5b4   : > { %v3154_v15 = vadd.f32 1.0, %v7188_v58  ;;  %v3157_v61 = vmul.f32 -0.5, %v7188_v58  ;;  %v7190_v40 = vpop.eup %7189  ;;  %v3160_v12 = vand.u32 2147483647, %v7188_v58 }
 0x5b5   : > { %7191 = vpow2.f32 %v3033_v47  ;;  %v3147_v44 = vmul.f32 0.6931472, %v7190_v40 }
 0x5b6   : > { %7193 = vlog2.f32 %v3154_v15  ;;  %v3158_v54 = vadd.f32 1.0, %v3157_v61  ;;  %vm3161_vm9 = vcmp.lt.f32.partialorder %v3160_v12, 0.0004427343 }
 0x5b7   : > { %v3153_v13 = vsel %vm3152_vm8, %v3150_v0, %v3147_v44 }
 0x5b8   : > { %v2986_v48 = vpop.f32.mrf.mxu1  ;;  %v3159_v17 = vmul.f32 %v7188_v58, %v3158_v54  ;;  %v3193_v25 = vsel %vm3001_vm10, %v9220_v11, %v3153_v13 }
 0x5b9   : > { %v2987_v21 = vadd.f32 %v2986_v48, %v2938_v57 }
 0x5bb   : > { %v7192_v27 = vpop.eup %7191  ;;  %v3035_v35 = vmul.f32 1.442695, %v2987_v21  ;;  %vm3004_vm15 = vcmp.gt.f32.partialorder %v2987_v21, 20.0 }
 0x5bc   : > { %v7194_v24 = vpop.eup %7193  ;;  %v3163_v26 = vadd.f32 1.0, %v7192_v27  ;;  %v3166_v19 = vmul.f32 -0.5, %v7192_v27  ;;  %v3169_v61 = vand.u32 2147483647, %v7192_v27 }
 0x5bd   : > { %7195 = vpow2.f32 %v3035_v35  ;;  %v3156_v34 = vmul.f32 0.6931472, %v7194_v24  ;;  %v9233_v24 = vld [vmem:[%s10126_s9] ss:$0 sm:$0xff] }
 0x5be   : > { %7197 = vlog2.f32 %v3163_v26  ;;  %v3167_v15 = vadd.f32 1.0, %v3166_v19  ;;  %vm3170_vm12 = vcmp.lt.f32.partialorder %v3169_v61, 0.0004427343 }
 0x5bf   : > { %v3162_v29 = vsel %vm3161_vm9, %v3159_v17, %v3156_v34 }
 0x5c0   : > { %v3194_v30 = vsel %vm3002_vm11, %v2982_v1, %v3162_v29  ;;  %v3168_v36 = vmul.f32 %v7192_v27, %v3167_v15 }
 0x5c1   : > { %v3203_v2 = vpack.c.bf16 %v3194_v30, %v3193_v25 }
 0x5c3   : > { %v7196_v28 = vpop.eup %7195  ;;  %3243 = vmatmul.bf16.gmra.mxu2 %v3203_v2 }
 0x5c4   : > { %v3172_v47 = vadd.f32 1.0, %v7196_v28  ;;  %v3175_v38 = vmul.f32 -0.5, %v7196_v28  ;;  %v7198_v8 = vpop.eup %7197  ;;  %v3178_v57 = vand.u32 2147483647, %v7196_v28 }
 0x5c5   : > { %v3165_v58 = vmul.f32 0.6931472, %v7198_v8 }
 0x5c6   : > { %7199 = vlog2.f32 %v3172_v47  ;;  %v3176_v40 = vadd.f32 1.0, %v3175_v38  ;;  %vm3179_vm13 = vcmp.lt.f32.partialorder %v3178_v57, 0.0004427343 }
 0x5c7   : > { %v3171_v53 = vsel %vm3170_vm12, %v3168_v36, %v3165_v58 }
 0x5c8   : > { %v3177_v1 = vmul.f32 %v7196_v28, %v3176_v40  ;;  %v3195_v54 = vsel %vm3003_vm14, %v2985_v6, %v3171_v53 }
 0x5cc   : > { %v7200_v48 = vpop.eup %7199 }
 0x5cd   : > { %v3174_v11 = vmul.f32 0.6931472, %v7200_v48 }
 0x5cf   : > { %v3180_v44 = vsel %vm3179_vm13, %v3177_v1, %v3174_v11 }
 0x5d0   : > { %v3196_v12 = vsel %vm3004_vm15, %v2987_v21, %v3180_v44 }
 0x5d1   : > { %v3204_v35 = vpack.c.bf16 %v3196_v12, %v3195_v54 }
 0x5d3   : > { %3248 = vmatmul.bf16.gmra.mxu2 %v3204_v35 }
 0x5e6   : > { %v3214_v0 = vpop.f32.mrf.mxu2 }
 0x5e7   : > { %v3215_v27 = vadd.f32 %v9233_v24, %v3214_v0 }
 0x5e9   : > { %v3270_v26 = vmul.f32 1.442695, %v3215_v27  ;;  %vm3254_vm2 = vcmp.gt.f32.partialorder %v3215_v27, 20.0 }
 0x5eb   : > { %7201 = vpow2.f32 %v3270_v26 }
 0x5ee   : > { %v3216_v13 = vpop.f32.mrf.mxu2 }
 0x5ef   : > { %v3217_v34 = vadd.f32 %v9233_v24, %v3216_v13 }
 0x5f1   : > { %v7202_v17 = vpop.eup %7201  ;;  %v3272_v29 = vmul.f32 1.442695, %v3217_v34  ;;  %vm3255_vm3 = vcmp.gt.f32.partialorder %v3217_v34, 20.0 }
 0x5f2   : > { %v3302_v25 = vadd.f32 1.0, %v7202_v17  ;;  %v3305_v2 = vmul.f32 -0.5, %v7202_v17  ;;  %v3308_v15 = vand.u32 2147483647, %v7202_v17 }
 0x5f3   : > { %7203 = vpow2.f32 %v3272_v29 }
 0x5f4   : > { %7205 = vlog2.f32 %v3302_v25  ;;  %v3306_v8 = vadd.f32 1.0, %v3305_v2  ;;  %vm3309_vm0 = vcmp.lt.f32.partialorder %v3308_v15, 0.0004427343  ;;  %v7860_v15 = vld [vmem:[#allocation5 + $0x30] sm:$0xff] }
 0x5f6   : > { %v3219_v6 = vpop.f32.mrf.mxu2  ;;  %v3307_v53 = vmul.f32 %v7202_v17, %v3306_v8 }
 0x5f7   : > { %v9238_v21 = vadd.f32 %v9233_v24, %v3219_v6 }
 0x5f9   : > { %v7204_v30 = vpop.eup %7203  ;;  %v3274_v28 = vmul.f32 1.442695, %v9238_v21  ;;  %vm3256_vm6 = vcmp.gt.f32.partialorder %v9238_v21, 20.0 }
 0x5fa   : > { %v3311_v19 = vadd.f32 1.0, %v7204_v30  ;;  %v3314_v47 = vmul.f32 -0.5, %v7204_v30  ;;  %v7206_v38 = vpop.eup %7205  ;;  %v3317_v36 = vand.u32 2147483647, %v7204_v30 }
 0x5fb   : > { %7207 = vpow2.f32 %v3274_v28  ;;  %v3304_v58 = vmul.f32 0.6931472, %v7206_v38 }
 0x5fc   : > { %7209 = vlog2.f32 %v3311_v19  ;;  %v3315_v40 = vadd.f32 1.0, %v3314_v47  ;;  %vm3318_vm1 = vcmp.lt.f32.partialorder %v3317_v36, 0.0004427343 }
 0x5fd   : > { %v3310_v54 = vsel %vm3309_vm0, %v3307_v53, %v3304_v58 }
 0x5fe   : > { %v3221_v61 = vpop.f32.mrf.mxu2  ;;  %v3316_v35 = vmul.f32 %v7204_v30, %v3315_v40  ;;  %v3446_v26 = vsel %vm3254_vm2, %v3215_v27, %v3310_v54  ;;  %v7859_v30 = vld [vmem:[#allocation5 + $0x38] sm:$0xff] }
 0x5ff   : > { %v3222_v57 = vadd.f32 %v9233_v24, %v3221_v61 }
 0x601   : > { %v7208_v48 = vpop.eup %7207  ;;  %v3276_v11 = vmul.f32 1.442695, %v3222_v57  ;;  %vm3257_vm7 = vcmp.gt.f32.partialorder %v3222_v57, 20.0 }
 0x602   : > { %v7210_v1 = vpop.eup %7209  ;;  %v3320_v44 = vadd.f32 1.0, %v7208_v48  ;;  %v3323_v28 = vmul.f32 -0.5, %v7208_v48  ;;  %v3326_v8 = vand.u32 2147483647, %v7208_v48 }
 0x603   : > { %v3313_v12 = vmul.f32 0.6931472, %v7210_v1  ;;  %7211 = vpow2.f32 %v3276_v11 }
 0x604   : > { %7213 = vlog2.f32 %v3320_v44  ;;  %v3324_v27 = vadd.f32 1.0, %v3323_v28  ;;  %vm3327_vm4 = vcmp.lt.f32.partialorder %v3326_v8, 0.0004427343 }
 0x605   : > { %v3319_v0 = vsel %vm3318_vm1, %v3316_v35, %v3313_v12  ;;  %v7861_v12 = vld [vmem:[#allocation5 + $0x28] sm:$0xff] }
 0x606   : > { %v3447_v13 = vsel %vm3255_vm3, %v3217_v34, %v3319_v0  ;;  %v3224_v29 = vpop.f32.mrf.mxu2  ;;  %v3325_v1 = vmul.f32 %v7208_v48, %v3324_v27  ;;  %v7862_v48 = vld [vmem:[#allocation5 + $0x20] sm:$0xff]  ;;  %v7863_v27 = vld [vmem:[#allocation5 + $0x18] sm:$0xff] }
 0x607   : > { %v3462_v25 = vpack.c.bf16 %v3447_v13, %v3446_v26  ;;  %v9243_v6 = vadd.f32 %v9233_v24, %v3224_v29 }
 0x609   : > { %v7212_v17 = vpop.eup %7211  ;;  %v3278_v2 = vmul.f32 1.442695, %v9243_v6  ;;  %3478 = vmatmul.bf16.vlgmr.msra.gmra.mxu3 %v3462_v25  ;;  %vm3258_vm10 = vcmp.gt.f32.partialorder %v9243_v6, 20.0 }
 0x60a   : > { %v3329_v19 = vadd.f32 1.0, %v7212_v17  ;;  %5239 = vmatpush.bf16.msra.mxu3 %v7859_v30  ;;  %v3332_v47 = vmul.f32 -0.5, %v7212_v17  ;;  %v7214_v38 = vpop.eup %7213  ;;  %v3335_v36 = vand.u32 2147483647, %v7212_v17 }
 0x60b   : > { %7215 = vpow2.f32 %v3278_v2  ;;  %v3322_v58 = vmul.f32 0.6931472, %v7214_v38 }
 0x60c   : > { %7217 = vlog2.f32 %v3329_v19  ;;  %v3333_v40 = vadd.f32 1.0, %v3332_v47  ;;  %vm3336_vm5 = vcmp.lt.f32.partialorder %v3335_v36, 0.0004427343 }
 0x60d   : > { %v3328_v35 = vsel %vm3327_vm4, %v3325_v1, %v3322_v58  ;;  %v7864_v58 = vld [vmem:[#allocation5 + $0x10] sm:$0xff] }
 0x60e   : > { %v3226_v34 = vpop.f32.mrf.mxu2  ;;  %5240 = vmatpush.bf16.msra.mxu3 %v7860_v15  ;;  %v3334_v26 = vmul.f32 %v7212_v17, %v3333_v40  ;;  %v3448_v25 = vsel %vm3256_vm6, %v9238_v21, %v3328_v35 }
 0x60f   : > { %v9247_v61 = vadd.f32 %v9233_v24, %v3226_v34 }
 0x611   : > { %v7216_v53 = vpop.eup %7215  ;;  %v3280_v11 = vmul.f32 1.442695, %v9247_v61  ;;  %vm3259_vm11 = vcmp.gt.f32.partialorder %v9247_v61, 20.0 }
 0x612   : > { %v7218_v44 = vpop.eup %7217  ;;  %v3338_v54 = vadd.f32 1.0, %v7216_v53  ;;  %5241 = vmatpush.bf16.msra.mxu3 %v7861_v12  ;;  %v3341_v17 = vmul.f32 -0.5, %v7216_v53  ;;  %v3344_v15 = vand.u32 2147483647, %v7216_v53 }
 0x613   : > { %7219 = vpow2.f32 %v3280_v11  ;;  %v3331_v0 = vmul.f32 0.6931472, %v7218_v44 }
 0x614   : > { %7221 = vlog2.f32 %v3338_v54  ;;  %v3342_v21 = vadd.f32 1.0, %v3341_v17  ;;  %vm3345_vm8 = vcmp.lt.f32.partialorder %v3344_v15, 0.0004427343 }
 0x615   : > { %v3337_v13 = vsel %vm3336_vm5, %v3334_v26, %v3331_v0  ;;  %v7865_v26 = vld [vmem:[#allocation5 + $0x8] sm:$0xff] }
 0x616   : > { %v3229_v29 = vpop.f32.mrf.mxu2  ;;  %v3449_v2 = vsel %vm3257_vm7, %v3222_v57, %v3337_v13  ;;  %5242 = vmatpush.bf16.msra.mxu3 %v7862_v48  ;;  %v3343_v12 = vmul.f32 %v7216_v53, %v3342_v21 }
 0x617   : > { %v9253_v28 = vadd.f32 %v9233_v24, %v3229_v29  ;;  %v3463_v19 = vpack.c.bf16 %v3449_v2, %v3448_v25 }
 0x619   : > { %v7220_v30 = vpop.eup %7219  ;;  %v3282_v47 = vmul.f32 1.442695, %v9253_v28  ;;  %3483 = vmatmul.bf16.gmra.mxu3 %v3463_v19  ;;  %vm3260_vm14 = vcmp.gt.f32.partialorder %v9253_v28, 20.0 }
 0x61a   : > { %v3347_v38 = vadd.f32 1.0, %v7220_v30  ;;  %5243 = vmatpush.bf16.msra.mxu3 %v7863_v27  ;;  %v3350_v34 = vmul.f32 -0.5, %v7220_v30  ;;  %v7222_v8 = vpop.eup %7221  ;;  %v3353_v1 = vand.u32 2147483647, %v7220_v30 }
 0x61b   : > { %7223 = vpow2.f32 %v3282_v47  ;;  %v3340_v36 = vmul.f32 0.6931472, %v7222_v8  ;;  %v7866_v47 = vld [vmem:[#allocation5] sm:$0xff] }
 0x61c   : > { %7225 = vlog2.f32 %v3347_v38  ;;  %v3351_v11 = vadd.f32 1.0, %v3350_v34  ;;  %vm3354_vm9 = vcmp.lt.f32.partialorder %v3353_v1, 0.0004427343 }
 0x61d   : > { %v3346_v13 = vsel %vm3345_vm8, %v3343_v12, %v3340_v36 }
 0x61e   : > { %v3231_v57 = vpop.f32.mrf.mxu2  ;;  %5244 = vmatpush.bf16.msra.mxu3 %v7864_v58  ;;  %v3352_v25 = vmul.f32 %v7220_v30, %v3351_v11  ;;  %v3450_v19 = vsel %vm3258_vm10, %v9243_v6, %v3346_v13 }
 0x61f   : > { %v3232_v40 = vadd.f32 %v9233_v24, %v3231_v57 }
 0x621   : > { %v7224_v44 = vpop.eup %7223  ;;  %v3284_v54 = vmul.f32 1.442695, %v3232_v40  ;;  %vm3261_vm15 = vcmp.gt.f32.partialorder %v3232_v40, 20.0 }
 0x622   : > { %v7226_v35 = vpop.eup %7225  ;;  %v3356_v0 = vadd.f32 1.0, %v7224_v44  ;;  %5245 = vmatpush.bf16.msra.mxu3 %v7865_v26  ;;  %v3359_v34 = vmul.f32 -0.5, %v7224_v44 }
 0x623   : > { %7227 = vpow2.f32 %v3284_v54  ;;  %v3349_v29 = vmul.f32 0.6931472, %v7226_v35 }
 0x624   : > { %7229 = vlog2.f32 %v3356_v0  ;;  %v3360_v6 = vadd.f32 1.0, %v3359_v34 }
 0x625   : > { %v3355_v2 = vsel %vm3354_vm9, %v3352_v25, %v3349_v29 }
 0x626   : > { %v3234_v48 = vpop.f32.mrf.mxu2  ;;  %v3451_v53 = vsel %vm3259_vm11, %v9247_v61, %v3355_v2  ;;  %5246 = vmatpush.bf16.msra.mxu3 %v7866_v47  ;;  %v3362_v61 = vand.u32 2147483647, %v7224_v44  ;;  %v3361_v35 = vmul.f32 %v7224_v44, %v3360_v6 }
 0x627   : > { %v9262_v17 = vadd.f32 %v9233_v24, %v3234_v48  ;;  %v3464_v38 = vpack.c.bf16 %v3451_v53, %v3450_v19 }
 0x628   : > { %vm3363_vm12 = vcmp.lt.f32.partialorder %v3362_v61, 0.0004427343 }
 0x629   : > { %v7228_v27 = vpop.eup %7227  ;;  %v3286_v30 = vmul.f32 1.442695, %v9262_v17  ;;  %3488 = vmatmul.bf16.gmra.mxu3 %v3464_v38  ;;  %vm3262_vm2 = vcmp.gt.f32.partialorder %v9262_v17, 20.0 }
 0x62a   : > { %v3365_v8 = vadd.f32 1.0, %v7228_v27  ;;  %v3368_v21 = vmul.f32 -0.5, %v7228_v27  ;;  %v7230_v57 = vpop.eup %7229  ;;  %v3371_v1 = vand.u32 2147483647, %v7228_v27 }
 0x62b   : > { %7231 = vpow2.f32 %v3286_v30  ;;  %v3358_v36 = vmul.f32 0.6931472, %v7230_v57 }
 0x62c   : > { %7233 = vlog2.f32 %v3365_v8  ;;  %v3369_v11 = vadd.f32 1.0, %v3368_v21  ;;  %vm3372_vm13 = vcmp.lt.f32.partialorder %v3371_v1, 0.0004427343 }
 0x62d   : > { %v3364_v13 = vsel %vm3363_vm12, %v3361_v35, %v3358_v36 }
 0x62e   : > { %v3236_v15 = vpop.f32.mrf.mxu2  ;;  %v3370_v25 = vmul.f32 %v7228_v27, %v3369_v11  ;;  %v3452_v19 = vsel %vm3260_vm14, %v9253_v28, %v3364_v13 }
 0x62f   : > { %v3237_v58 = vadd.f32 %v9233_v24, %v3236_v15 }
 0x631   : > { %v7232_v54 = vpop.eup %7231  ;;  %v3288_v12 = vmul.f32 1.442695, %v3237_v58  ;;  %vm3263_vm3 = vcmp.gt.f32.partialorder %v3237_v58, 20.0 }
 0x632   : > { %v7234_v0 = vpop.eup %7233  ;;  %v3374_v26 = vadd.f32 1.0, %v7232_v54  ;;  %v3377_v34 = vmul.f32 -0.5, %v7232_v54  ;;  %v3380_v15 = vand.u32 2147483647, %v7232_v54 }
 0x633   : > { %7235 = vpow2.f32 %v3288_v12  ;;  %v3367_v29 = vmul.f32 0.6931472, %v7234_v0 }
 0x634   : > { %7237 = vlog2.f32 %v3374_v26  ;;  %v3378_v57 = vadd.f32 1.0, %v3377_v34  ;;  %vm3381_vm0 = vcmp.lt.f32.partialorder %v3380_v15, 0.0004427343 }
 0x635   : > { %v3373_v2 = vsel %vm3372_vm13, %v3370_v25, %v3367_v29 }
 0x636   : > { %v3239_v48 = vpop.f32.mrf.mxu2  ;;  %v3453_v53 = vsel %vm3261_vm15, %v3232_v40, %v3373_v2  ;;  %v3379_v12 = vmul.f32 %v7232_v54, %v3378_v57 }
 0x637   : > { %v9269_v47 = vadd.f32 %v9233_v24, %v3239_v48  ;;  %v3465_v44 = vpack.c.bf16 %v3453_v53, %v3452_v19 }
 0x639   : > { %v7236_v38 = vpop.eup %7235  ;;  %v3290_v30 = vmul.f32 1.442695, %v9269_v47  ;;  %3493 = vmatmul.bf16.gmra.mxu3 %v3465_v44  ;;  %vm3264_vm6 = vcmp.gt.f32.partialorder %v9269_v47, 20.0 }
 0x63a   : > { %v3383_v27 = vadd.f32 1.0, %v7236_v38  ;;  %v3386_v8 = vmul.f32 -0.5, %v7236_v38  ;;  %v7238_v21 = vpop.eup %7237  ;;  %v3389_v36 = vand.u32 2147483647, %v7236_v38 }
 0x63b   : > { %7239 = vpow2.f32 %v3290_v30  ;;  %v3376_v40 = vmul.f32 0.6931472, %v7238_v21 }
 0x63c   : > { %7241 = vlog2.f32 %v3383_v27  ;;  %v3387_v61 = vadd.f32 1.0, %v3386_v8  ;;  %vm3390_vm1 = vcmp.lt.f32.partialorder %v3389_v36, 0.0004427343 }
 0x63d   : > { %v3382_v26 = vsel %vm3381_vm0, %v3379_v12, %v3376_v40 }
 0x63e   : > { %v3241_v6 = vpop.f32.mrf.mxu2  ;;  %v3388_v29 = vmul.f32 %v7236_v38, %v3387_v61  ;;  %v3454_v48 = vsel %vm3262_vm2, %v9262_v17, %v3382_v26 }
 0x63f   : > { %v3242_v28 = vadd.f32 %v9233_v24, %v3241_v6 }
 0x641   : > { %v7240_v11 = vpop.eup %7239  ;;  %v3292_v1 = vmul.f32 1.442695, %v3242_v28  ;;  %vm3265_vm7 = vcmp.gt.f32.partialorder %v3242_v28, 20.0 }
 0x642   : > { %v7242_v35 = vpop.eup %7241  ;;  %v3392_v0 = vadd.f32 1.0, %v7240_v11  ;;  %v3395_v34 = vmul.f32 -0.5, %v7240_v11  ;;  %v3398_v6 = vand.u32 2147483647, %v7240_v11 }
 0x643   : > { %7243 = vpow2.f32 %v3292_v1  ;;  %v3385_v13 = vmul.f32 0.6931472, %v7242_v35 }
 0x644   : > { %7245 = vlog2.f32 %v3392_v0  ;;  %v3396_v21 = vadd.f32 1.0, %v3395_v34  ;;  %vm3399_vm4 = vcmp.lt.f32.partialorder %v3398_v6, 0.0004427343 }
 0x645   : > { %v3391_v25 = vsel %vm3390_vm1, %v3388_v29, %v3385_v13 }
 0x646   : > { %v3244_v2 = vpop.f32.mrf.mxu2  ;;  %v3455_v19 = vsel %vm3263_vm3, %v3237_v58, %v3391_v25  ;;  %v3397_v1 = vmul.f32 %v7240_v11, %v3396_v21 }
 0x647   : > { %v9276_v53 = vadd.f32 %v9233_v24, %v3244_v2  ;;  %v3466_v54 = vpack.c.bf16 %v3455_v19, %v3454_v48 }
 0x649   : > { %v7244_v44 = vpop.eup %7243  ;;  %v3294_v30 = vmul.f32 1.442695, %v9276_v53  ;;  %3498 = vmatmul.bf16.gmra.mxu3 %v3466_v54  ;;  %vm3266_vm10 = vcmp.gt.f32.partialorder %v9276_v53, 20.0 }
 0x64a   : > { %v3401_v38 = vadd.f32 1.0, %v7244_v44  ;;  %v3404_v27 = vmul.f32 -0.5, %v7244_v44  ;;  %v7246_v8 = vpop.eup %7245  ;;  %v3407_v40 = vand.u32 2147483647, %v7244_v44 }
 0x64b   : > { %7247 = vpow2.f32 %v3294_v30  ;;  %v3394_v58 = vmul.f32 0.6931472, %v7246_v8 }
 0x64c   : > { %7249 = vlog2.f32 %v3401_v38  ;;  %v3405_v15 = vadd.f32 1.0, %v3404_v27  ;;  %vm3408_vm5 = vcmp.lt.f32.partialorder %v3407_v40, 0.0004427343 }
 0x64d   : > { %v3400_v0 = vsel %vm3399_vm4, %v3397_v1, %v3394_v58 }
 0x64e   : > { %v3246_v57 = vpop.f32.mrf.mxu2  ;;  %v3406_v13 = vmul.f32 %v7244_v44, %v3405_v15  ;;  %v3456_v2 = vsel %vm3264_vm6, %v9269_v47, %v3400_v0 }
 0x64f   : > { %v3247_v17 = vadd.f32 %v9233_v24, %v3246_v57 }
 0x651   : > { %v7248_v61 = vpop.eup %7247  ;;  %v3296_v36 = vmul.f32 1.442695, %v3247_v17  ;;  %vm3267_vm11 = vcmp.gt.f32.partialorder %v3247_v17, 20.0 }
 0x652   : > { %v7250_v12 = vpop.eup %7249  ;;  %v3410_v35 = vadd.f32 1.0, %v7248_v61  ;;  %v3413_v34 = vmul.f32 -0.5, %v7248_v61  ;;  %v3416_v57 = vand.u32 2147483647, %v7248_v61 }
 0x653   : > { %7251 = vpow2.f32 %v3296_v36  ;;  %v3403_v26 = vmul.f32 0.6931472, %v7250_v12 }
 0x654   : > { %7253 = vlog2.f32 %v3410_v35  ;;  %v3414_v8 = vadd.f32 1.0, %v3413_v34  ;;  %vm3417_vm8 = vcmp.lt.f32.partialorder %v3416_v57, 0.0004427343 }
 0x655   : > { %v3409_v29 = vsel %vm3408_vm5, %v3406_v13, %v3403_v26 }
 0x656   : > { %v3249_v25 = vpop.f32.mrf.mxu2  ;;  %v3457_v48 = vsel %vm3265_vm7, %v3242_v28, %v3409_v29  ;;  %v3415_v36 = vmul.f32 %v7248_v61, %v3414_v8 }
 0x657   : > { %v3250_v19 = vadd.f32 %v9233_v24, %v3249_v25  ;;  %v3467_v11 = vpack.c.bf16 %v3457_v48, %v3456_v2 }
 0x659   : > { %v7252_v54 = vpop.eup %7251  ;;  %v3298_v30 = vmul.f32 1.442695, %v3250_v19  ;;  %3503 = vmatmul.bf16.gmra.mxu3 %v3467_v11  ;;  %vm3268_vm14 = vcmp.gt.f32.partialorder %v3250_v19, 20.0 }
 0x65a   : > { %v3419_v38 = vadd.f32 1.0, %v7252_v54  ;;  %v3422_v44 = vmul.f32 -0.5, %v7252_v54  ;;  %v7254_v27 = vpop.eup %7253  ;;  %v3425_v58 = vand.u32 2147483647, %v7252_v54 }
 0x65b   : > { %7255 = vpow2.f32 %v3298_v30  ;;  %v3412_v47 = vmul.f32 0.6931472, %v7254_v27 }
 0x65c   : > { %7257 = vlog2.f32 %v3419_v38  ;;  %v3423_v28 = vadd.f32 1.0, %v3422_v44  ;;  %vm3426_vm9 = vcmp.lt.f32.partialorder %v3425_v58, 0.0004427343 }
 0x65d   : > { %v3418_v35 = vsel %vm3417_vm8, %v3415_v36, %v3412_v47  ;;  %v9287_v36 = vstv %s8830_s0 }
 0x65e   : > { %v3251_v21 = vpop.f32.mrf.mxu2  ;;  %v3424_v26 = vmul.f32 %v7252_v54, %v3423_v28 }
 0x65f   : > { %v3252_v6 = vadd.f32 %v9233_v24, %v3251_v21  ;;  %v3458_v24 = vsel %vm3266_vm10, %v9276_v53, %v3418_v35 }
 0x661   : > { %v7256_v15 = vpop.eup %7255  ;;  %v3300_v40 = vmul.f32 1.442695, %v3252_v6  ;;  %vm3269_vm15 = vcmp.gt.f32.partialorder %v3252_v6, 20.0 }
 0x662   : > { %v7258_v1 = vpop.eup %7257  ;;  %v3428_v12 = vadd.f32 1.0, %v7256_v15  ;;  %v3431_v61 = vmul.f32 -0.5, %v7256_v15  ;;  %v3434_v38 = vand.u32 2147483647, %v7256_v15 }
 0x663   : > { %7259 = vpow2.f32 %v3300_v40  ;;  %v3421_v0 = vmul.f32 0.6931472, %v7258_v1 }
 0x664   : > { %7261 = vlog2.f32 %v3428_v12  ;;  %v3432_v34 = vadd.f32 1.0, %v3431_v61  ;;  %vm3435_vm12 = vcmp.lt.f32.partialorder %v3434_v38, 0.0004427343 }
 0x665   : > { %v3427_v13 = vsel %vm3426_vm9, %v3424_v26, %v3421_v0  ;;  %v7868_v0 = vld [vmem:[#allocation2 + $0x30] sm:$0xff] }
 0x666   : > { %v3459_v29 = vsel %vm3267_vm11, %v3247_v17, %v3427_v13  ;;  %v3433_v8 = vmul.f32 %v7256_v15, %v3432_v34  ;;  %v9292_v15 = vld [vmem:[%s10128_s11] ss:$0 sm:$0xff] }
 0x667   : > { %v3468_v25 = vpack.c.bf16 %v3459_v29, %v3458_v24  ;;  %v7869_v29 = vld [vmem:[#allocation2] sm:$0xff] }
 0x669   : > { %v7260_v2 = vpop.eup %7259  ;;  %3508 = vmatmul.bf16.gmra.mxu3 %v3468_v25 }
 0x66a   : > { %v3437_v48 = vadd.f32 1.0, %v7260_v2  ;;  %v3440_v11 = vmul.f32 -0.5, %v7260_v2  ;;  %v7262_v30 = vpop.eup %7261  ;;  %v3443_v27 = vand.u32 2147483647, %v7260_v2 }
 0x66b   : > { %v3430_v54 = vmul.f32 0.6931472, %v7262_v30 }
 0x66c   : > { %7263 = vlog2.f32 %v3437_v48  ;;  %v3441_v44 = vadd.f32 1.0, %v3440_v11  ;;  %vm3444_vm13 = vcmp.lt.f32.partialorder %v3443_v27, 0.0004427343 }
 0x66d   : > { %v3436_v53 = vsel %vm3435_vm12, %v3433_v8, %v3430_v54 }
 0x66e   : > { %v3442_v57 = vmul.f32 %v7260_v2, %v3441_v44  ;;  %v3460_v28 = vsel %vm3268_vm14, %v3250_v19, %v3436_v53 }
 0x672   : > { %v7264_v21 = vpop.eup %7263 }
 0x673   : > { %v3439_v17 = vmul.f32 0.6931472, %v7264_v21  ;;  %v7872_v21 = vld [vmem:[#allocation7 + $0x38] sm:$0xff] }
 0x675   : > { %v3445_v47 = vsel %vm3444_vm13, %v3442_v57, %v3439_v17 }
 0x676   : > { %v3461_v58 = vsel %vm3269_vm15, %v3252_v6, %v3445_v47  ;;  %v7873_v47 = vld [vmem:[%s10123_s6 + $0x30] sm:$0xff] }
 0x677   : > { %v3469_v40 = vpack.c.bf16 %v3461_v58, %v3460_v28  ;;  %v7874_v28 = vld [vmem:[#allocation7 + $0x30] sm:$0xff]  ;;  %v7875_v58 = vld [vmem:[#allocation2 + $0x18] sm:$0xff] }
 0x679   : > { %3513 = vmatmul.bf16.gmra.mxu3 %v3469_v40 }
 0x68c   : > { %v3479_v1 = vpop.f32.mrf.mxu3 }
 0x68d   : > { %v9295_v12 = vadd.f32 %v9292_v15, %v3479_v1 }
 0x68f   : > { %v3520_v35 = vmul.f32 %v9287_v36, %v9295_v12 }
 0x691   : > { %v3536_v26 = vadd.f32 %v7868_v0, %v3520_v35 }
 0x693   : > { %v3552_v13 = vsub.f32 %v3536_v26, %v8845_v5  ;;  %v7870_v5 = vld [vmem:[#allocation2 + $0x58] sm:$0xff]  ;;  %v7876_v26 = vld [vmem:[%s10123_s6 + $0x28] sm:$0xff] }
 0x694   : > { %v3481_v19 = vpop.f32.mrf.mxu3 }
 0x695   : > { %v9300_v6 = vadd.f32 %v9292_v15, %v3481_v19  ;;  %v3568_v2 = vpack.c.bf16 %v3552_v13, %v3552_v13  ;;  %v7877_v19 = vld [vmem:[#allocation7 + $0x28] sm:$0xff] }
 0x697   : > { %v3521_v24 = vmul.f32 %v9287_v36, %v9300_v6  ;;  %v3600_v34 = vunpack.c.l.b16 %v3568_v2  ;;  %v7879_v2 = vld [vmem:[#allocation7 + $0x20] sm:$0xff] }
 0x699   : > { %v3537_v25 = vadd.f32 %v7869_v29, %v3521_v24 }
 0x69b   : > { %v3553_v61 = vsub.f32 %v3537_v25, %v8853_v42  ;;  %v7871_v42 = vld [vmem:[%s10123_s6 + $0x38] sm:$0xff] }
 0x69c   : > { %v3484_v48 = vpop.f32.mrf.mxu3 }
 0x69d   : > { %v3569_v11 = vpack.c.bf16 %v3553_v61, %v3553_v61  ;;  %v9307_v30 = vadd.f32 %v9292_v15, %v3484_v48  ;;  %v7880_v48 = vld [vmem:[#allocation2 + $0x50] sm:$0xff] }
 0x69f   : > { %v3601_v38 = vunpack.c.l.b16 %v3569_v11  ;;  %v3522_v54 = vmul.f32 %v9287_v36, %v9307_v30 }
 0x6a1   : > { %v3616_v44 = vpack.c.b16 %v3601_v38, %v3600_v34  ;;  %v3538_v27 = vadd.f32 %v7870_v5, %v3522_v54  ;;  %v7881_v38 = vld [vmem:[%s10123_s6 + $0x18] sm:$0xff] }
 0x6a2   : > { %v7882_v54 = vld [vmem:[#allocation7 + $0x18] sm:$0xff] }
 0x6a3   : > { %3640 = vmatmul.bf16.vlgmr.msrb.gmra.mxu0 %v3616_v44  ;;  %4226 = vmatmul.bf16.vlgmr.msrb.gmra.mxu2 %v3616_v44  ;;  %v3554_v57 = vsub.f32 %v3538_v27, %v8861_v18 }
 0x6a4   : > { %v3486_v8 = vpop.f32.mrf.mxu3  ;;  %5560 = vmatpush.bf16.msrb.mxu0 %v7871_v42  ;;  %5874 = vmatpush.bf16.msrb.mxu2 %v7872_v21  ;;  %v7884_v42 = vld [vmem:[#allocation7 + $0x10] sm:$0xff]  ;;  %v7885_v21 = vld [vmem:[#allocation2 + $0x68] sm:$0xff] }
 0x6a5   : > { %v9315_v53 = vadd.f32 %v9292_v15, %v3486_v8  ;;  %v3570_v35 = vpack.c.bf16 %v3554_v57, %v3554_v57  ;;  %v7883_v8 = vld [vmem:[%s10123_s6 + $0x10] sm:$0xff] }
 0x6a7   : > { %v3523_v17 = vmul.f32 %v9287_v36, %v9315_v53  ;;  %v3602_v29 = vunpack.c.l.b16 %v3570_v35 }
 0x6a8   : > { %5561 = vmatpush.bf16.msrb.mxu0 %v7873_v47  ;;  %5875 = vmatpush.bf16.msrb.mxu2 %v7874_v28 }
 0x6a9   : > { %v3539_v40 = vadd.f32 %v7875_v58, %v3523_v17  ;;  %v7886_v58 = vld [vmem:[%s10123_s6 + $0x8] sm:$0xff] }
 0x6ab   : > { %v3555_v1 = vsub.f32 %v3539_v40, %v8875_v56  ;;  %v7878_v56 = vld [vmem:[%s10123_s6 + $0x20] sm:$0xff]  ;;  %v7887_v40 = vld [vmem:[#allocation7 + $0x8] sm:$0xff] }
 0x6ac   : > { %v3489_v0 = vpop.f32.mrf.mxu3  ;;  %5562 = vmatpush.bf16.msrb.mxu0 %v7876_v26  ;;  %5876 = vmatpush.bf16.msrb.mxu2 %v7877_v19  ;;  %v7889_v19 = vld [vmem:[#allocation7] sm:$0xff] }
 0x6ad   : > { %v9328_v18 = vadd.f32 %v9292_v15, %v3489_v0  ;;  %v3571_v13 = vpack.c.bf16 %v3555_v1, %v3555_v1 }
 0x6af   : > { %v3524_v24 = vmul.f32 %v9287_v36, %v9328_v18  ;;  %v3603_v25 = vunpack.c.l.b16 %v3571_v13 }
 0x6b0   : > { %5563 = vmatpush.bf16.msrb.mxu0 %v7878_v56  ;;  %5877 = vmatpush.bf16.msrb.mxu2 %v7879_v2 }
 0x6b1   : > { %v3617_v61 = vpack.c.b16 %v3603_v25, %v3602_v29  ;;  %v3540_v11 = vadd.f32 %v7880_v48, %v3524_v24  ;;  %v7890_v24 = vld [vmem:[#allocation2 + $0x8] sm:$0xff] }
 0x6b2   : > { %v7891_v48 = vld [vmem:[#allocation2 + $0x48] sm:$0xff] }
 0x6b3   : > { %3645 = vmatmul.bf16.gmra.mxu0 %v3617_v61  ;;  %4231 = vmatmul.bf16.gmra.mxu2 %v3617_v61  ;;  %v3556_v27 = vsub.f32 %v3540_v11, %v8889_v37 }
 0x6b4   : > { %v3491_v34 = vpop.f32.mrf.mxu3  ;;  %5564 = vmatpush.bf16.msrb.mxu0 %v7881_v38  ;;  %5878 = vmatpush.bf16.msrb.mxu2 %v7882_v54 }
 0x6b5   : > { %v9339_v44 = vadd.f32 %v9292_v15, %v3491_v34  ;;  %v3572_v47 = vpack.c.bf16 %v3556_v27, %v3556_v27 }
 0x6b7   : > { %v3525_v5 = vmul.f32 %v9287_v36, %v9339_v44  ;;  %v3604_v0 = vunpack.c.l.b16 %v3572_v47 }
 0x6b8   : > { %5565 = vmatpush.bf16.msrb.mxu0 %v7883_v8  ;;  %5879 = vmatpush.bf16.msrb.mxu2 %v7884_v42 }
 0x6b9   : > { %v3541_v17 = vadd.f32 %v7885_v21, %v3525_v5 }
 0x6bb   : > { %v3557_v57 = vsub.f32 %v3541_v17, %v8903_v22  ;;  %v7888_v22 = vld [vmem:[%s10123_s6] sm:$0xff] }
 0x6bc   : > { %v3494_v28 = vpop.f32.mrf.mxu3  ;;  %5566 = vmatpush.bf16.msrb.mxu0 %v7886_v58  ;;  %5880 = vmatpush.bf16.msrb.mxu2 %v7887_v40  ;;  %v7893_v40 = vld [vmem:[#allocation2 + $0x20] sm:$0xff] }
 0x6bd   : > { %v9352_v37 = vadd.f32 %v9292_v15, %v3494_v28  ;;  %v3573_v1 = vpack.c.bf16 %v3557_v57, %v3557_v57  ;;  %v7892_v57 = vld [vmem:[#allocation2 + $0x40] sm:$0xff] }
 0x6bf   : > { %v3526_v35 = vmul.f32 %v9287_v36, %v9352_v37  ;;  %v3605_v26 = vunpack.c.l.b16 %v3573_v1 }
 0x6c0   : > { %5567 = vmatpush.bf16.msrb.mxu0 %v7888_v22  ;;  %5881 = vmatpush.bf16.msrb.mxu2 %v7889_v19 }
 0x6c1   : > { %v3618_v13 = vpack.c.b16 %v3605_v26, %v3604_v0  ;;  %v3542_v29 = vadd.f32 %v7890_v24, %v3526_v35 }
 0x6c3   : > { %3650 = vmatmul.bf16.gmra.mxu0 %v3618_v13  ;;  %4236 = vmatmul.bf16.gmra.mxu2 %v3618_v13  ;;  %v3558_v61 = vsub.f32 %v3542_v29, %v8917_v41 }
 0x6c4   : > { %v3496_v25 = vpop.f32.mrf.mxu3 }
 0x6c5   : > { %v9360_v56 = vadd.f32 %v9292_v15, %v3496_v25  ;;  %v3574_v38 = vpack.c.bf16 %v3558_v61, %v3558_v61 }
 0x6c7   : > { %v3527_v2 = vmul.f32 %v9287_v36, %v9360_v56  ;;  %v3606_v42 = vunpack.c.l.b16 %v3574_v38 }
 0x6c9   : > { %v3543_v11 = vadd.f32 %v7891_v48, %v3527_v2  ;;  %v7894_v2 = vld [vmem:[#allocation2 + $0x10] sm:$0xff] }
 0x6cb   : > { %v3559_v34 = vsub.f32 %v3543_v11, %v8925_v4 }
 0x6cc   : > { %v3499_v54 = vpop.f32.mrf.mxu3 }
 0x6cd   : > { %v9367_v5 = vadd.f32 %v9292_v15, %v3499_v54  ;;  %v3575_v27 = vpack.c.bf16 %v3559_v34, %v3559_v34  ;;  %v7895_v34 = vld [vmem:[#allocation2 + $0x38] sm:$0xff] }
 0x6cf   : > { %v3528_v8 = vmul.f32 %v9287_v36, %v9367_v5  ;;  %v3607_v21 = vunpack.c.l.b16 %v3575_v27 }
 0x6d1   : > { %v3619_v17 = vpack.c.b16 %v3607_v21, %v3606_v42  ;;  %v3544_v47 = vadd.f32 %v7892_v57, %v3528_v8 }
 0x6d3   : > { %3655 = vmatmul.bf16.gmra.mxu0 %v3619_v17  ;;  %4241 = vmatmul.bf16.gmra.mxu2 %v3619_v17  ;;  %v3560_v58 = vsub.f32 %v3544_v47, %v8933_v7 }
 0x6d4   : > { %v3501_v41 = vpop.f32.mrf.mxu3 }
 0x6d5   : > { %v9372_v28 = vadd.f32 %v9292_v15, %v3501_v41  ;;  %v3576_v0 = vpack.c.bf16 %v3560_v58, %v3560_v58 }
 0x6d7   : > { %v3529_v4 = vmul.f32 %v9287_v36, %v9372_v28  ;;  %v3608_v24 = vunpack.c.l.b16 %v3576_v0 }
 0x6d9   : > { %v3545_v1 = vadd.f32 %v7893_v40, %v3529_v4  ;;  %v7896_v4 = vld [vmem:[#allocation2 + $0x60] sm:$0xff] }
 0x6db   : > { %v3561_v35 = vsub.f32 %v3545_v1, %v8941_v60 }
 0x6dc   : > { %v3504_v26 = vpop.f32.mrf.mxu3 }
 0x6dd   : > { %v9379_v22 = vadd.f32 %v9292_v15, %v3504_v26  ;;  %v3577_v19 = vpack.c.bf16 %v3561_v35, %v3561_v35  ;;  %v7897_v35 = vld [vmem:[#allocation2 + $0x70] sm:$0xff] }
 0x6df   : > { %v3530_v13 = vmul.f32 %v9287_v36, %v9379_v22  ;;  %v3609_v29 = vunpack.c.l.b16 %v3577_v19 }
 0x6e1   : > { %v3620_v25 = vpack.c.b16 %v3609_v29, %v3608_v24  ;;  %v3546_v61 = vadd.f32 %v7894_v2, %v3530_v13 }
 0x6e3   : > { %3660 = vmatmul.bf16.gmra.mxu0 %v3620_v25  ;;  %4246 = vmatmul.bf16.gmra.mxu2 %v3620_v25  ;;  %v3562_v11 = vsub.f32 %v3546_v61, %v8949_v59 }
 0x6e4   : > { %v3506_v7 = vpop.f32.mrf.mxu3 }
 0x6e5   : > { %v9384_v48 = vadd.f32 %v9292_v15, %v3506_v7  ;;  %v3578_v27 = vpack.c.bf16 %v3562_v11, %v3562_v11 }
 0x6e7   : > { %v3531_v60 = vmul.f32 %v9287_v36, %v9384_v48  ;;  %v3610_v57 = vunpack.c.l.b16 %v3578_v27 }
 0x6e9   : > { %v3547_v38 = vadd.f32 %v7895_v34, %v3531_v60  ;;  %v7898_v60 = vld [vmem:[#allocation2 + $0x78] sm:$0xff] }
 0x6eb   : > { %v3563_v54 = vsub.f32 %v3547_v38, %v8957_v55 }
 0x6ec   : > { %v3509_v8 = vpop.f32.mrf.mxu3 }
 0x6ed   : > { %v9391_v42 = vadd.f32 %v9292_v15, %v3509_v8  ;;  %v3579_v21 = vpack.c.bf16 %v3563_v54, %v3563_v54  ;;  %v7899_v54 = vld [vmem:[#allocation2 + $0x28] sm:$0xff] }
 0x6ef   : > { %10159 = vst [vmem:[#allocation20_spill] sm:$0xff] %v9391_v42  ;;  %v3532_v17 = vmul.f32 %v9287_v36, %v9391_v42  ;;  %v3611_v47 = vunpack.c.l.b16 %v3579_v21 }
 0x6f1   : > { %v3621_v41 = vpack.c.b16 %v3611_v47, %v3610_v57  ;;  %v3548_v58 = vadd.f32 %v7896_v4, %v3532_v17 }
 0x6f3   : > { %3665 = vmatmul.bf16.gmra.mxu0 %v3621_v41  ;;  %4251 = vmatmul.bf16.gmra.mxu2 %v3621_v41  ;;  %v3564_v1 = vsub.f32 %v3548_v58, %v8965_v14 }
 0x6f4   : > { %v3511_v59 = vpop.f32.mrf.mxu3 }
 0x6f5   : > { %v9396_v40 = vadd.f32 %v9292_v15, %v3511_v59  ;;  %v3580_v19 = vpack.c.bf16 %v3564_v1, %v3564_v1 }
 0x6f7   : > { %10160 = vst [vmem:[#allocation21_spill] sm:$0xff] %v9396_v40  ;;  %v3533_v55 = vmul.f32 %v9287_v36, %v9396_v40  ;;  %v3612_v2 = vunpack.c.l.b16 %v3580_v19 }
 0x6f9   : > { %v3549_v0 = vadd.f32 %v7897_v35, %v3533_v55 }
 0x6fb   : > { %v3565_v26 = vsub.f32 %v3549_v0, %v8973_v46 }
 0x6fc   : > { %v3514_v13 = vpop.f32.mrf.mxu3 }
 0x6fd   : > { %v9403_v24 = vadd.f32 %v9292_v15, %v3514_v13  ;;  %v3581_v29 = vpack.c.bf16 %v3565_v26, %v3565_v26 }
 0x6ff   : > { %10161 = vst [vmem:[#allocation22_spill] sm:$0xff] %v9403_v24  ;;  %v3534_v25 = vmul.f32 %v9287_v36, %v9403_v24  ;;  %v3613_v61 = vunpack.c.l.b16 %v3581_v29 }
 0x701   : > { %v3622_v7 = vpack.c.b16 %v3613_v61, %v3612_v2  ;;  %v3550_v11 = vadd.f32 %v7898_v60, %v3534_v25 }
 0x703   : > { %3670 = vmatmul.bf16.gmra.mxu0 %v3622_v7  ;;  %4256 = vmatmul.bf16.gmra.mxu2 %v3622_v7  ;;  %v3566_v38 = vsub.f32 %v3550_v11, %v8981_v3 }
 0x704   : > { %v3516_v14 = vpop.f32.mrf.mxu3 }
 0x705   : > { %v9408_v34 = vadd.f32 %v9292_v15, %v3516_v14  ;;  %v3582_v21 = vpack.c.bf16 %v3566_v38, %v3566_v38  ;;  %v9417_v15 = vld [vmem:[%s10120_s3] ss:$0 sm:$0xff] }
 0x707   : > { %10162 = vst [vmem:[#allocation23_spill] sm:$0xff] %v9408_v34  ;;  %v3535_v46 = vmul.f32 %v9287_v36, %v9408_v34  ;;  %v3614_v57 = vunpack.c.l.b16 %v3582_v21 }
 0x709   : > { %v3551_v27 = vadd.f32 %v7899_v54, %v3535_v46 }
 0x70b   : > { %v3567_v8 = vsub.f32 %v3551_v27, %v8989_v51 }
 0x70d   : > { %v3583_v17 = vpack.c.bf16 %v3567_v8, %v3567_v8 }
 0x70f   : > { %v3615_v47 = vunpack.c.l.b16 %v3583_v17 }
 0x711   : > { %v3623_v41 = vpack.c.b16 %v3615_v47, %v3614_v57 }
 0x713   : > { %3675 = vmatmul.bf16.gmra.mxu0 %v3623_v41  ;;  %4261 = vmatmul.bf16.gmra.mxu2 %v3623_v41 }
 0x720   : > { %v3641_v4 = vpop.f32.mrf.mxu0 }
 0x721   : > { %v3642_v58 = vadd.f32 %v9417_v15, %v3641_v4 }
 0x723   : > { %v3697_v3 = vmul.f32 1.442695, %v3642_v58  ;;  %vm3681_vm2 = vcmp.gt.f32.partialorder %v3642_v58, 20.0 }
 0x725   : > { %7265 = vpow2.f32 %v3697_v3 }
 0x728   : > { %v3643_v59 = vpop.f32.mrf.mxu0 }
 0x729   : > { %v3644_v51 = vadd.f32 %v9417_v15, %v3643_v59 }
 0x72b   : > { %v7266_v55 = vpop.eup %7265  ;;  %v3699_v1 = vmul.f32 1.442695, %v3644_v51  ;;  %vm3682_vm3 = vcmp.gt.f32.partialorder %v3644_v51, 20.0 }
 0x72c   : > { %v3729_v35 = vadd.f32 1.0, %v7266_v55  ;;  %v3732_v13 = vmul.f32 -0.5, %v7266_v55  ;;  %v3735_v60 = vand.u32 2147483647, %v7266_v55 }
 0x72d   : > { %7267 = vpow2.f32 %v3699_v1 }
 0x72e   : > { %7269 = vlog2.f32 %v3729_v35  ;;  %v3733_v7 = vadd.f32 1.0, %v3732_v13  ;;  %vm3736_vm0 = vcmp.lt.f32.partialorder %v3735_v60, 0.0004427343 }
 0x730   : > { %v3646_v0 = vpop.f32.mrf.mxu0  ;;  %v3734_v8 = vmul.f32 %v7266_v55, %v3733_v7 }
 0x731   : > { %v9422_v26 = vadd.f32 %v9417_v15, %v3646_v0 }
 0x733   : > { %v7268_v19 = vpop.eup %7267  ;;  %v3701_v29 = vmul.f32 1.442695, %v9422_v26  ;;  %vm3683_vm6 = vcmp.gt.f32.partialorder %v9422_v26, 20.0 }
 0x734   : > { %v3738_v25 = vadd.f32 1.0, %v7268_v19  ;;  %v3741_v2 = vmul.f32 -0.5, %v7268_v19  ;;  %v7270_v61 = vpop.eup %7269  ;;  %v3744_v54 = vand.u32 2147483647, %v7268_v19 }
 0x735   : > { %7271 = vpow2.f32 %v3701_v29  ;;  %v3731_v14 = vmul.f32 0.6931472, %v7270_v61 }
 0x736   : > { %7273 = vlog2.f32 %v3738_v25  ;;  %v3742_v46 = vadd.f32 1.0, %v3741_v2  ;;  %vm3745_vm1 = vcmp.lt.f32.partialorder %v3744_v54, 0.0004427343 }
 0x737   : > { %v3737_v47 = vsel %vm3736_vm0, %v3734_v8, %v3731_v14 }
 0x738   : > { %v3648_v11 = vpop.f32.mrf.mxu0  ;;  %v3743_v4 = vmul.f32 %v7268_v19, %v3742_v46  ;;  %v3873_v59 = vsel %vm3681_vm2, %v3642_v58, %v3737_v47  ;;  %v7901_v19 = vld [vmem:[%s10123_s6 + $0x78] sm:$0xff] }
 0x739   : > { %v3649_v38 = vadd.f32 %v9417_v15, %v3648_v11  ;;  %v7902_v11 = vld [vmem:[%s10123_s6 + $0x70] sm:$0xff] }
 0x73b   : > { %v7272_v27 = vpop.eup %7271  ;;  %v3703_v21 = vmul.f32 1.442695, %v3649_v38  ;;  %vm3684_vm7 = vcmp.gt.f32.partialorder %v3649_v38, 20.0 }
 0x73c   : > { %v7274_v17 = vpop.eup %7273  ;;  %v3747_v57 = vadd.f32 1.0, %v7272_v27  ;;  %v3750_v25 = vmul.f32 -0.5, %v7272_v27  ;;  %v3753_v60 = vand.u32 2147483647, %v7272_v27 }
 0x73d   : > { %v3740_v41 = vmul.f32 0.6931472, %v7274_v17  ;;  %7275 = vpow2.f32 %v3703_v21 }
 0x73e   : > { %7277 = vlog2.f32 %v3747_v57  ;;  %v3751_v61 = vadd.f32 1.0, %v3750_v25  ;;  %vm3754_vm4 = vcmp.lt.f32.partialorder %v3753_v60, 0.0004427343  ;;  %v7904_v25 = vld [vmem:[%s10123_s6 + $0x60] sm:$0xff] }
 0x73f   : > { %v3746_v3 = vsel %vm3745_vm1, %v3743_v4, %v3740_v41  ;;  %v7903_v4 = vld [vmem:[%s10123_s6 + $0x68] sm:$0xff] }
 0x740   : > { %v3874_v1 = vsel %vm3682_vm3, %v3644_v51, %v3746_v3  ;;  %v3651_v35 = vpop.f32.mrf.mxu0  ;;  %v3752_v57 = vmul.f32 %v7272_v27, %v3751_v61 }
 0x741   : > { %v3889_v0 = vpack.c.bf16 %v3874_v1, %v3873_v59  ;;  %v9427_v13 = vadd.f32 %v9417_v15, %v3651_v35 }
 0x743   : > { %v7276_v55 = vpop.eup %7275  ;;  %v3705_v29 = vmul.f32 1.442695, %v9427_v13  ;;  %3905 = vmatmul.bf16.vlgmr.msrb.gmra.mxu1 %v3889_v0  ;;  %vm3685_vm10 = vcmp.gt.f32.partialorder %v9427_v13, 20.0 }
 0x744   : > { %v3756_v2 = vadd.f32 1.0, %v7276_v55  ;;  %5609 = vmatpush.bf16.msrb.mxu1 %v7901_v19  ;;  %v3759_v58 = vmul.f32 -0.5, %v7276_v55  ;;  %v7278_v51 = vpop.eup %7277  ;;  %v3762_v8 = vand.u32 2147483647, %v7276_v55 }
 0x745   : > { %7279 = vpow2.f32 %v3705_v29  ;;  %v3749_v46 = vmul.f32 0.6931472, %v7278_v51 }
 0x746   : > { %7281 = vlog2.f32 %v3756_v2  ;;  %v3760_v54 = vadd.f32 1.0, %v3759_v58  ;;  %vm3763_vm5 = vcmp.lt.f32.partialorder %v3762_v8, 0.0004427343 }
 0x747   : > { %v3755_v3 = vsel %vm3754_vm4, %v3752_v57, %v3749_v46 }
 0x748   : > { %v3653_v7 = vpop.f32.mrf.mxu0  ;;  %5610 = vmatpush.bf16.msrb.mxu1 %v7902_v11  ;;  %v3761_v1 = vmul.f32 %v7276_v55, %v3760_v54  ;;  %v3875_v27 = vsel %vm3683_vm6, %v9422_v26, %v3755_v3  ;;  %v7905_v26 = vld [vmem:[%s10123_s6 + $0x58] sm:$0xff]  ;;  %v7906_v54 = vld [vmem:[%s10123_s6 + $0x50] sm:$0xff] }
 0x749   : > { %v9437_v14 = vadd.f32 %v9417_v15, %v3653_v7 }
 0x74b   : > { %v7280_v21 = vpop.eup %7279  ;;  %v3707_v17 = vmul.f32 1.442695, %v9437_v14  ;;  %vm3686_vm11 = vcmp.gt.f32.partialorder %v9437_v14, 20.0 }
 0x74c   : > { %v7282_v47 = vpop.eup %7281  ;;  %v3765_v41 = vadd.f32 1.0, %v7280_v21  ;;  %5611 = vmatpush.bf16.msrb.mxu1 %v7903_v4  ;;  %v3768_v51 = vmul.f32 -0.5, %v7280_v21  ;;  %v3771_v46 = vand.u32 2147483647, %v7280_v21 }
 0x74d   : > { %7283 = vpow2.f32 %v3707_v17  ;;  %v3758_v59 = vmul.f32 0.6931472, %v7282_v47 }
 0x74e   : > { %7285 = vlog2.f32 %v3765_v41  ;;  %v3769_v60 = vadd.f32 1.0, %v3768_v51  ;;  %vm3772_vm8 = vcmp.lt.f32.partialorder %v3771_v46, 0.0004427343  ;;  %v7908_v51 = vld [vmem:[%s10123_s6 + $0x40] sm:$0xff] }
 0x74f   : > { %v3764_v35 = vsel %vm3763_vm5, %v3761_v1, %v3758_v59 }
 0x750   : > { %v3656_v0 = vpop.f32.mrf.mxu0  ;;  %v3876_v29 = vsel %vm3684_vm7, %v3649_v38, %v3764_v35  ;;  %5612 = vmatpush.bf16.msrb.mxu1 %v7904_v25  ;;  %v3770_v3 = vmul.f32 %v7280_v21, %v3769_v60  ;;  %v7907_v35 = vld [vmem:[%s10123_s6 + $0x48] sm:$0xff] }
 0x751   : > { %v9449_v2 = vadd.f32 %v9417_v15, %v3656_v0  ;;  %v3890_v19 = vpack.c.bf16 %v3876_v29, %v3875_v27 }
 0x753   : > { %v7284_v55 = vpop.eup %7283  ;;  %v3709_v58 = vmul.f32 1.442695, %v9449_v2  ;;  %3910 = vmatmul.bf16.gmra.mxu1 %v3890_v19  ;;  %vm3687_vm14 = vcmp.gt.f32.partialorder %v9449_v2, 20.0 }
 0x754   : > { %v3774_v61 = vadd.f32 1.0, %v7284_v55  ;;  %5613 = vmatpush.bf16.msrb.mxu1 %v7905_v26  ;;  %v3777_v38 = vmul.f32 -0.5, %v7284_v55  ;;  %v7286_v7 = vpop.eup %7285  ;;  %v3780_v47 = vand.u32 2147483647, %v7284_v55 }
 0x755   : > { %7287 = vpow2.f32 %v3709_v58  ;;  %v3767_v17 = vmul.f32 0.6931472, %v7286_v7 }
 0x756   : > { %7289 = vlog2.f32 %v3774_v61  ;;  %v3778_v57 = vadd.f32 1.0, %v3777_v38  ;;  %vm3781_vm9 = vcmp.lt.f32.partialorder %v3780_v47, 0.0004427343 }
 0x757   : > { %v3773_v0 = vsel %vm3772_vm8, %v3770_v3, %v3767_v17 }
 0x758   : > { %v3658_v11 = vpop.f32.mrf.mxu0  ;;  %5614 = vmatpush.bf16.msrb.mxu1 %v7906_v54  ;;  %v3779_v29 = vmul.f32 %v7284_v55, %v3778_v57  ;;  %v3877_v21 = vsel %vm3685_vm10, %v9427_v13, %v3773_v0 }
 0x759   : > { %v3659_v8 = vadd.f32 %v9417_v15, %v3658_v11 }
 0x75b   : > { %v7288_v41 = vpop.eup %7287  ;;  %v3711_v4 = vmul.f32 1.442695, %v3659_v8  ;;  %vm3688_vm15 = vcmp.gt.f32.partialorder %v3659_v8, 20.0 }
 0x75c   : > { %v7290_v59 = vpop.eup %7289  ;;  %v3783_v1 = vadd.f32 1.0, %v7288_v41  ;;  %5615 = vmatpush.bf16.msrb.mxu1 %v7907_v35  ;;  %v3786_v7 = vmul.f32 -0.5, %v7288_v41  ;;  %v3789_v54 = vand.u32 2147483647, %v7288_v41 }
 0x75d   : > { %7291 = vpow2.f32 %v3711_v4  ;;  %v3776_v27 = vmul.f32 0.6931472, %v7290_v59 }
 0x75e   : > { %7293 = vlog2.f32 %v3783_v1  ;;  %vm3790_vm12 = vcmp.lt.f32.partialorder %v3789_v54, 0.0004427343 }
 0x75f   : > { %v3782_v25 = vsel %vm3781_vm9, %v3779_v29, %v3776_v27 }
 0x760   : > { %v3661_v19 = vpop.f32.mrf.mxu0  ;;  %v3878_v58 = vsel %vm3686_vm11, %v9437_v14, %v3782_v25  ;;  %5616 = vmatpush.bf16.msrb.mxu1 %v7908_v51  ;;  %v3787_v14 = vadd.f32 1.0, %v3786_v7 }
 0x761   : > { %v9470_v61 = vadd.f32 %v9417_v15, %v3661_v19  ;;  %v3891_v55 = vpack.c.bf16 %v3878_v58, %v3877_v21 }
 0x762   : > { %v3788_v1 = vmul.f32 %v7288_v41, %v3787_v14 }
 0x763   : > { %v7292_v26 = vpop.eup %7291  ;;  %v3713_v38 = vmul.f32 1.442695, %v9470_v61  ;;  %3915 = vmatmul.bf16.gmra.mxu1 %v3891_v55  ;;  %vm3689_vm2 = vcmp.gt.f32.partialorder %v9470_v61, 20.0 }
 0x764   : > { %v3792_v60 = vadd.f32 1.0, %v7292_v26  ;;  %v3795_v13 = vmul.f32 -0.5, %v7292_v26  ;;  %v7294_v11 = vpop.eup %7293  ;;  %v3798_v4 = vand.u32 2147483647, %v7292_v26 }
 0x765   : > { %7295 = vpow2.f32 %v3713_v38  ;;  %v3785_v57 = vmul.f32 0.6931472, %v7294_v11 }
 0x766   : > { %7297 = vlog2.f32 %v3792_v60  ;;  %v3796_v47 = vadd.f32 1.0, %v3795_v13  ;;  %vm3799_vm13 = vcmp.lt.f32.partialorder %v3798_v4, 0.0004427343 }
 0x767   : > { %v3791_v27 = vsel %vm3790_vm12, %v3788_v1, %v3785_v57 }
 0x768   : > { %v3663_v46 = vpop.f32.mrf.mxu0  ;;  %v3797_v25 = vmul.f32 %v7292_v26, %v3796_v47  ;;  %v3879_v58 = vsel %vm3687_vm14, %v9449_v2, %v3791_v27 }
 0x769   : > { %v3664_v17 = vadd.f32 %v9417_v15, %v3663_v46 }
 0x76b   : > { %v7296_v3 = vpop.eup %7295  ;;  %v3715_v59 = vmul.f32 1.442695, %v3664_v17  ;;  %vm3690_vm3 = vcmp.gt.f32.partialorder %v3664_v17, 20.0 }
 0x76c   : > { %v7298_v35 = vpop.eup %7297  ;;  %v3801_v0 = vadd.f32 1.0, %v7296_v3  ;;  %v3804_v60 = vmul.f32 -0.5, %v7296_v3  ;;  %v3807_v54 = vand.u32 2147483647, %v7296_v3 }
 0x76d   : > { %7299 = vpow2.f32 %v3715_v59  ;;  %v3794_v29 = vmul.f32 0.6931472, %v7298_v35 }
 0x76e   : > { %7301 = vlog2.f32 %v3801_v0  ;;  %v3805_v14 = vadd.f32 1.0, %v3804_v60  ;;  %vm3808_vm0 = vcmp.lt.f32.partialorder %v3807_v54, 0.0004427343 }
 0x76f   : > { %v3800_v19 = vsel %vm3799_vm13, %v3797_v25, %v3794_v29 }
 0x770   : > { %v3666_v21 = vpop.f32.mrf.mxu0  ;;  %v3880_v51 = vsel %vm3688_vm15, %v3659_v8, %v3800_v19  ;;  %v3806_v1 = vmul.f32 %v7296_v3, %v3805_v14 }
 0x771   : > { %v9477_v55 = vadd.f32 %v9417_v15, %v3666_v21  ;;  %v3892_v41 = vpack.c.bf16 %v3880_v51, %v3879_v58 }
 0x773   : > { %v7300_v38 = vpop.eup %7299  ;;  %v3717_v7 = vmul.f32 1.442695, %v9477_v55  ;;  %3920 = vmatmul.bf16.gmra.mxu1 %v3892_v41  ;;  %vm3691_vm6 = vcmp.gt.f32.partialorder %v9477_v55, 20.0 }
 0x774   : > { %v3810_v26 = vadd.f32 1.0, %v7300_v38  ;;  %v3813_v13 = vmul.f32 -0.5, %v7300_v38  ;;  %v7302_v11 = vpop.eup %7301  ;;  %v3816_v47 = vand.u32 2147483647, %v7300_v38 }
 0x775   : > { %7303 = vpow2.f32 %v3717_v7  ;;  %v3803_v8 = vmul.f32 0.6931472, %v7302_v11 }
 0x776   : > { %7305 = vlog2.f32 %v3810_v26  ;;  %v3814_v57 = vadd.f32 1.0, %v3813_v13  ;;  %vm3817_vm1 = vcmp.lt.f32.partialorder %v3816_v47, 0.0004427343 }
 0x777   : > { %v3809_v27 = vsel %vm3808_vm0, %v3806_v1, %v3803_v8 }
 0x778   : > { %v3668_v46 = vpop.f32.mrf.mxu0  ;;  %v3815_v25 = vmul.f32 %v7300_v38, %v3814_v57  ;;  %v3881_v58 = vsel %vm3689_vm2, %v9470_v61, %v3809_v27 }
 0x779   : > { %v3669_v2 = vadd.f32 %v9417_v15, %v3668_v46 }
 0x77b   : > { %v7304_v4 = vpop.eup %7303  ;;  %v3719_v59 = vmul.f32 1.442695, %v3669_v2  ;;  %vm3692_vm7 = vcmp.gt.f32.partialorder %v3669_v2, 20.0 }
 0x77c   : > { %v7306_v35 = vpop.eup %7305  ;;  %v3819_v0 = vadd.f32 1.0, %v7304_v4  ;;  %v3822_v26 = vmul.f32 -0.5, %v7304_v4  ;;  %v3825_v54 = vand.u32 2147483647, %v7304_v4 }
 0x77d   : > { %7307 = vpow2.f32 %v3719_v59  ;;  %v3812_v29 = vmul.f32 0.6931472, %v7306_v35 }
 0x77e   : > { %7309 = vlog2.f32 %v3819_v0  ;;  %v3823_v14 = vadd.f32 1.0, %v3822_v26  ;;  %vm3826_vm4 = vcmp.lt.f32.partialorder %v3825_v54, 0.0004427343 }
 0x77f   : > { %v3818_v19 = vsel %vm3817_vm1, %v3815_v25, %v3812_v29 }
 0x780   : > { %v3671_v21 = vpop.f32.mrf.mxu0  ;;  %v3882_v51 = vsel %vm3690_vm3, %v3664_v17, %v3818_v19  ;;  %v3824_v1 = vmul.f32 %v7304_v4, %v3823_v14 }
 0x781   : > { %v9484_v41 = vadd.f32 %v9417_v15, %v3671_v21  ;;  %v3893_v3 = vpack.c.bf16 %v3882_v51, %v3881_v58 }
 0x783   : > { %v7308_v7 = vpop.eup %7307  ;;  %v3721_v60 = vmul.f32 1.442695, %v9484_v41  ;;  %3925 = vmatmul.bf16.gmra.mxu1 %v3893_v3  ;;  %vm3693_vm10 = vcmp.gt.f32.partialorder %v9484_v41, 20.0 }
 0x784   : > { %v3828_v38 = vadd.f32 1.0, %v7308_v7  ;;  %v3831_v13 = vmul.f32 -0.5, %v7308_v7  ;;  %v7310_v11 = vpop.eup %7309  ;;  %v3834_v57 = vand.u32 2147483647, %v7308_v7 }
 0x785   : > { %7311 = vpow2.f32 %v3721_v60  ;;  %v3821_v17 = vmul.f32 0.6931472, %v7310_v11 }
 0x786   : > { %7313 = vlog2.f32 %v3828_v38  ;;  %v3832_v8 = vadd.f32 1.0, %v3831_v13  ;;  %vm3835_vm5 = vcmp.lt.f32.partialorder %v3834_v57, 0.0004427343 }
 0x787   : > { %v3827_v27 = vsel %vm3826_vm4, %v3824_v1, %v3821_v17 }
 0x788   : > { %v3673_v46 = vpop.f32.mrf.mxu0  ;;  %v3833_v25 = vmul.f32 %v7308_v7, %v3832_v8  ;;  %v3883_v58 = vsel %vm3691_vm6, %v9477_v55, %v3827_v27 }
 0x789   : > { %v3674_v61 = vadd.f32 %v9417_v15, %v3673_v46 }
 0x78b   : > { %v7312_v47 = vpop.eup %7311  ;;  %v3723_v59 = vmul.f32 1.442695, %v3674_v61  ;;  %vm3694_vm11 = vcmp.gt.f32.partialorder %v3674_v61, 20.0 }
 0x78c   : > { %v7314_v35 = vpop.eup %7313  ;;  %v3837_v0 = vadd.f32 1.0, %v7312_v47  ;;  %v3840_v38 = vmul.f32 -0.5, %v7312_v47  ;;  %v3843_v54 = vand.u32 2147483647, %v7312_v47 }
 0x78d   : > { %7315 = vpow2.f32 %v3723_v59  ;;  %v3830_v29 = vmul.f32 0.6931472, %v7314_v35 }
 0x78e   : > { %7317 = vlog2.f32 %v3837_v0  ;;  %v3841_v14 = vadd.f32 1.0, %v3840_v38  ;;  %vm3844_vm8 = vcmp.lt.f32.partialorder %v3843_v54, 0.0004427343 }
 0x78f   : > { %v3836_v19 = vsel %vm3835_vm5, %v3833_v25, %v3830_v29 }
 0x790   : > { %v3676_v21 = vpop.f32.mrf.mxu0  ;;  %v3884_v51 = vsel %vm3692_vm7, %v3669_v2, %v3836_v19  ;;  %v3842_v1 = vmul.f32 %v7312_v47, %v3841_v14 }
 0x791   : > { %v3677_v3 = vadd.f32 %v9417_v15, %v3676_v21  ;;  %v3894_v4 = vpack.c.bf16 %v3884_v51, %v3883_v58 }
 0x793   : > { %v7316_v60 = vpop.eup %7315  ;;  %v3725_v26 = vmul.f32 1.442695, %v3677_v3  ;;  %3930 = vmatmul.bf16.gmra.mxu1 %v3894_v4  ;;  %vm3695_vm14 = vcmp.gt.f32.partialorder %v3677_v3, 20.0 }
 0x794   : > { %v3846_v13 = vadd.f32 1.0, %v7316_v60  ;;  %v3849_v7 = vmul.f32 -0.5, %v7316_v60  ;;  %v7318_v11 = vpop.eup %7317  ;;  %v3852_v8 = vand.u32 2147483647, %v7316_v60 }
 0x795   : > { %7319 = vpow2.f32 %v3725_v26  ;;  %v3839_v55 = vmul.f32 0.6931472, %v7318_v11 }
 0x796   : > { %7321 = vlog2.f32 %v3846_v13  ;;  %v3850_v2 = vadd.f32 1.0, %v3849_v7  ;;  %vm3853_vm9 = vcmp.lt.f32.partialorder %v3852_v8, 0.0004427343 }
 0x797   : > { %v3845_v27 = vsel %vm3844_vm8, %v3842_v1, %v3839_v55 }
 0x798   : > { %v3678_v46 = vpop.f32.mrf.mxu0  ;;  %v3851_v25 = vmul.f32 %v7316_v60, %v3850_v2 }
 0x799   : > { %v3679_v17 = vadd.f32 %v9417_v15, %v3678_v46  ;;  %v3885_v15 = vsel %vm3693_vm10, %v9484_v41, %v3845_v27 }
 0x79b   : > { %v7320_v57 = vpop.eup %7319  ;;  %v3727_v59 = vmul.f32 1.442695, %v3679_v17  ;;  %vm3696_vm15 = vcmp.gt.f32.partialorder %v3679_v17, 20.0 }
 0x79c   : > { %v7322_v35 = vpop.eup %7321  ;;  %v3855_v0 = vadd.f32 1.0, %v7320_v57  ;;  %v3858_v47 = vmul.f32 -0.5, %v7320_v57  ;;  %v3861_v7 = vand.u32 2147483647, %v7320_v57 }
 0x79d   : > { %7323 = vpow2.f32 %v3727_v59  ;;  %v3848_v29 = vmul.f32 0.6931472, %v7322_v35 }
 0x79e   : > { %7325 = vlog2.f32 %v3855_v0  ;;  %v3859_v13 = vadd.f32 1.0, %v3858_v47  ;;  %vm3862_vm12 = vcmp.lt.f32.partialorder %v3861_v7, 0.0004427343  ;;  %v9497_v0 = vld [vmem:[%s10122_s5] ss:$0 sm:$0xff] }
 0x79f   : > { %v3854_v19 = vsel %vm3853_vm9, %v3851_v25, %v3848_v29 }
 0x7a0   : > { %v3886_v21 = vsel %vm3694_vm11, %v3674_v61, %v3854_v19  ;;  %v3860_v46 = vmul.f32 %v7320_v57, %v3859_v13 }
 0x7a1   : > { %v3895_v58 = vpack.c.bf16 %v3886_v21, %v3885_v15 }
 0x7a3   : > { %v7324_v51 = vpop.eup %7323  ;;  %3935 = vmatmul.bf16.gmra.mxu1 %v3895_v58 }
 0x7a4   : > { %v3864_v4 = vadd.f32 1.0, %v7324_v51  ;;  %v3867_v26 = vmul.f32 -0.5, %v7324_v51  ;;  %v7326_v38 = vpop.eup %7325  ;;  %v3870_v14 = vand.u32 2147483647, %v7324_v51 }
 0x7a5   : > { %v3857_v60 = vmul.f32 0.6931472, %v7326_v38 }
 0x7a6   : > { %7327 = vlog2.f32 %v3864_v4  ;;  %v3868_v11 = vadd.f32 1.0, %v3867_v26  ;;  %vm3871_vm13 = vcmp.lt.f32.partialorder %v3870_v14, 0.0004427343 }
 0x7a7   : > { %v3863_v55 = vsel %vm3862_vm12, %v3860_v46, %v3857_v60 }
 0x7a8   : > { %v3869_v61 = vmul.f32 %v7324_v51, %v3868_v11  ;;  %v3887_v8 = vsel %vm3695_vm14, %v3677_v3, %v3863_v55 }
 0x7ac   : > { %v7328_v54 = vpop.eup %7327 }
 0x7ad   : > { %v3866_v41 = vmul.f32 0.6931472, %v7328_v54 }
 0x7af   : > { %v3872_v2 = vsel %vm3871_vm13, %v3869_v61, %v3866_v41 }
 0x7b0   : > { %v3888_v59 = vsel %vm3696_vm15, %v3679_v17, %v3872_v2 }
 0x7b1   : > { %v3896_v1 = vpack.c.bf16 %v3888_v59, %v3887_v8 }
 0x7b3   : > { %3940 = vmatmul.bf16.gmra.mxu1 %v3896_v1 }
 0x7c0   : > { %v3906_v35 = vpop.f32.mrf.mxu1 }
 0x7c1   : > { %v3907_v57 = vadd.f32 %v9497_v0, %v3906_v35 }
 0x7c3   : > { %v3962_v27 = vmul.f32 1.442695, %v3907_v57  ;;  %vm3946_vm1 = vcmp.gt.f32.partialorder %v3907_v57, 20.0 }
 0x7c5   : > { %7329 = vpow2.f32 %v3962_v27 }
 0x7c8   : > { %v3908_v29 = vpop.f32.mrf.mxu1 }
 0x7c9   : > { %v3909_v25 = vadd.f32 %v9497_v0, %v3908_v29 }
 0x7cb   : > { %v7330_v19 = vpop.eup %7329  ;;  %v3964_v15 = vmul.f32 1.442695, %v3909_v25  ;;  %vm3947_vm3 = vcmp.gt.f32.partialorder %v3909_v25, 20.0 }
 0x7cc   : > { %v3994_v21 = vadd.f32 1.0, %v7330_v19  ;;  %v3997_v3 = vmul.f32 -0.5, %v7330_v19  ;;  %v4000_v38 = vand.u32 2147483647, %v7330_v19 }
 0x7cd   : > { %7331 = vpow2.f32 %v3964_v15 }
 0x7ce   : > { %7333 = vlog2.f32 %v3994_v21  ;;  %v3998_v47 = vadd.f32 1.0, %v3997_v3  ;;  %vm4001_vm0 = vcmp.lt.f32.partialorder %v4000_v38, 0.0004427343 }
 0x7d0   : > { %v3911_v17 = vpop.f32.mrf.mxu1  ;;  %v3999_v11 = vmul.f32 %v7330_v19, %v3998_v47 }
 0x7d1   : > { %v9502_v58 = vadd.f32 %v9497_v0, %v3911_v17 }
 0x7d3   : > { %v7332_v51 = vpop.eup %7331  ;;  %v3966_v4 = vmul.f32 1.442695, %v9502_v58  ;;  %vm3948_vm5 = vcmp.gt.f32.partialorder %v9502_v58, 20.0 }
 0x7d4   : > { %v7334_v26 = vpop.eup %7333  ;;  %v4003_v13 = vadd.f32 1.0, %v7332_v51  ;;  %v4006_v60 = vmul.f32 -0.5, %v7332_v51  ;;  %v4009_v41 = vand.u32 2147483647, %v7332_v51 }
 0x7d5   : > { %v3996_v7 = vmul.f32 0.6931472, %v7334_v26  ;;  %7335 = vpow2.f32 %v3966_v4 }
 0x7d6   : > { %7337 = vlog2.f32 %v4003_v13  ;;  %v4007_v54 = vadd.f32 1.0, %v4006_v60  ;;  %vm4010_vm2 = vcmp.lt.f32.partialorder %v4009_v41, 0.0004427343  ;;  %v7910_v41 = vld [vmem:[#allocation9 + $0x38] sm:$0xff] }
 0x7d7   : > { %v4002_v46 = vsel %vm4001_vm0, %v3999_v11, %v3996_v7 }
 0x7d8   : > { %v3913_v14 = vpop.f32.mrf.mxu1  ;;  %v4138_v59 = vsel %vm3946_vm1, %v3907_v57, %v4002_v46  ;;  %v4008_v27 = vmul.f32 %v7332_v51, %v4007_v54 }
 0x7d9   : > { %v3914_v55 = vadd.f32 %v9497_v0, %v3913_v14  ;;  %v4154_v29 = vpack.c.bf16 %v4138_v59, %v4138_v59 }
 0x7db   : > { %v7336_v61 = vpop.eup %7335  ;;  %v3968_v2 = vmul.f32 1.442695, %v3914_v55  ;;  %v4186_v26 = vunpack.c.l.b16 %v4154_v29  ;;  %vm3949_vm7 = vcmp.gt.f32.partialorder %v3914_v55, 20.0 }
 0x7dc   : > { %v7338_v8 = vpop.eup %7337  ;;  %v4012_v1 = vadd.f32 1.0, %v7336_v61  ;;  %v4015_v15 = vmul.f32 -0.5, %v7336_v61  ;;  %v4018_v7 = vand.u32 2147483647, %v7336_v61 }
 0x7dd   : > { %v4005_v35 = vmul.f32 0.6931472, %v7338_v8  ;;  %7339 = vpow2.f32 %v3968_v2 }
 0x7de   : > { %7341 = vlog2.f32 %v4012_v1  ;;  %v4016_v57 = vadd.f32 1.0, %v4015_v15  ;;  %vm4019_vm4 = vcmp.lt.f32.partialorder %v4018_v7, 0.0004427343  ;;  %v7911_v15 = vld [vmem:[#allocation9 + $0x30] sm:$0xff] }
 0x7df   : > { %v4011_v19 = vsel %vm4010_vm2, %v4008_v27, %v4005_v35 }
 0x7e0   : > { %v4139_v21 = vsel %vm3947_vm3, %v3909_v25, %v4011_v19  ;;  %v3916_v3 = vpop.f32.mrf.mxu1  ;;  %v4017_v25 = vmul.f32 %v7336_v61, %v4016_v57 }
 0x7e1   : > { %v4155_v17 = vpack.c.bf16 %v4139_v21, %v4139_v21  ;;  %v9507_v47 = vadd.f32 %v9497_v0, %v3916_v3 }
 0x7e3   : > { %v7340_v4 = vpop.eup %7339  ;;  %v4187_v38 = vunpack.c.l.b16 %v4155_v17  ;;  %v3970_v13 = vmul.f32 1.442695, %v9507_v47  ;;  %vm3950_vm9 = vcmp.gt.f32.partialorder %v9507_v47, 20.0 }
 0x7e4   : > { %v7342_v51 = vpop.eup %7341  ;;  %v4021_v60 = vadd.f32 1.0, %v7340_v4  ;;  %v4024_v46 = vmul.f32 -0.5, %v7340_v4  ;;  %v4027_v1 = vand.u32 2147483647, %v7340_v4 }
 0x7e5   : > { %v4202_v11 = vpack.c.b16 %v4187_v38, %v4186_v26  ;;  %v4014_v14 = vmul.f32 0.6931472, %v7342_v51  ;;  %7343 = vpow2.f32 %v3970_v13  ;;  %v7912_v51 = vld [vmem:[#allocation9 + $0x28] sm:$0xff] }
 0x7e6   : > { %7345 = vlog2.f32 %v4021_v60  ;;  %v4025_v8 = vadd.f32 1.0, %v4024_v46  ;;  %vm4028_vm6 = vcmp.lt.f32.partialorder %v4027_v1, 0.0004427343 }
 0x7e7   : > { %4275 = vmatmul.bf16.vlgmr.msrb.gmra.mxu3 %v4202_v11  ;;  %v4020_v2 = vsel %vm4019_vm4, %v4017_v25, %v4014_v14 }
 0x7e8   : > { %v3918_v54 = vpop.f32.mrf.mxu1  ;;  %6139 = vmatpush.bf16.msrb.mxu3 %v7910_v41  ;;  %v4140_v19 = vsel %vm3948_vm5, %v9502_v58, %v4020_v2  ;;  %v4026_v3 = vmul.f32 %v7340_v4, %v4025_v8  ;;  %v7913_v2 = vld [vmem:[#allocation9 + $0x20] sm:$0xff] }
 0x7e9   : > { %v9511_v59 = vadd.f32 %v9497_v0, %v3918_v54  ;;  %v4156_v17 = vpack.c.bf16 %v4140_v19, %v4140_v19  ;;  %v7914_v19 = vld [vmem:[#allocation9 + $0x18] sm:$0xff] }
 0x7eb   : > { %v7344_v35 = vpop.eup %7343  ;;  %v3972_v27 = vmul.f32 1.442695, %v9511_v59  ;;  %v4188_v11 = vunpack.c.l.b16 %v4156_v17  ;;  %vm3951_vm11 = vcmp.gt.f32.partialorder %v9511_v59, 20.0 }
 0x7ec   : > { %v7346_v29 = vpop.eup %7345  ;;  %v4030_v61 = vadd.f32 1.0, %v7344_v35  ;;  %6140 = vmatpush.bf16.msrb.mxu3 %v7911_v15  ;;  %v4033_v38 = vmul.f32 -0.5, %v7344_v35  ;;  %v4036_v54 = vand.u32 2147483647, %v7344_v35 }
 0x7ed   : > { %v4023_v21 = vmul.f32 0.6931472, %v7346_v29  ;;  %7347 = vpow2.f32 %v3972_v27 }
 0x7ee   : > { %7349 = vlog2.f32 %v4030_v61  ;;  %v4034_v14 = vadd.f32 1.0, %v4033_v38  ;;  %vm4037_vm8 = vcmp.lt.f32.partialorder %v4036_v54, 0.0004427343  ;;  %v7916_v54 = vld [vmem:[#allocation9 + $0x8] sm:$0xff] }
 0x7ef   : > { %v4029_v26 = vsel %vm4028_vm6, %v4026_v3, %v4023_v21 }
 0x7f0   : > { %v4141_v57 = vsel %vm3949_vm7, %v3914_v55, %v4029_v26  ;;  %v3921_v13 = vpop.f32.mrf.mxu1  ;;  %6141 = vmatpush.bf16.msrb.mxu3 %v7912_v51  ;;  %v4035_v27 = vmul.f32 %v7344_v35, %v4034_v14 }
 0x7f1   : > { %v9517_v7 = vadd.f32 %v9497_v0, %v3921_v13  ;;  %v4157_v58 = vpack.c.bf16 %v4141_v57, %v4141_v57  ;;  %v7915_v13 = vld [vmem:[#allocation9 + $0x10] sm:$0xff] }
 0x7f3   : > { %v7348_v60 = vpop.eup %7347  ;;  %v3974_v4 = vmul.f32 1.442695, %v9517_v7  ;;  %v4189_v46 = vunpack.c.l.b16 %v4157_v58  ;;  %vm3952_vm13 = vcmp.gt.f32.partialorder %v9517_v7, 20.0 }
 0x7f4   : > { %v7350_v25 = vpop.eup %7349  ;;  %v4039_v41 = vadd.f32 1.0, %v7348_v60  ;;  %6142 = vmatpush.bf16.msrb.mxu3 %v7913_v2  ;;  %v4042_v55 = vmul.f32 -0.5, %v7348_v60  ;;  %v4045_v3 = vand.u32 2147483647, %v7348_v60 }
 0x7f5   : > { %v4032_v8 = vmul.f32 0.6931472, %v7350_v25  ;;  %7351 = vpow2.f32 %v3974_v4  ;;  %v4203_v1 = vpack.c.b16 %v4189_v46, %v4188_v11 }
 0x7f6   : > { %7353 = vlog2.f32 %v4039_v41  ;;  %v4043_v15 = vadd.f32 1.0, %v4042_v55  ;;  %vm4046_vm10 = vcmp.lt.f32.partialorder %v4045_v3, 0.0004427343 }
 0x7f7   : > { %4280 = vmatmul.bf16.gmra.mxu3 %v4203_v1  ;;  %v4038_v61 = vsel %vm4037_vm8, %v4035_v27, %v4032_v8 }
 0x7f8   : > { %v3923_v29 = vpop.f32.mrf.mxu1  ;;  %6143 = vmatpush.bf16.msrb.mxu3 %v7914_v19  ;;  %v4142_v57 = vsel %vm3950_vm9, %v9507_v47, %v4038_v61  ;;  %v4044_v58 = vmul.f32 %v7348_v60, %v4043_v15  ;;  %v7917_v61 = vld [vmem:[#allocation9] sm:$0xff] }
 0x7f9   : > { %v9521_v21 = vadd.f32 %v9497_v0, %v3923_v29  ;;  %v4158_v11 = vpack.c.bf16 %v4142_v57, %v4142_v57 }
 0x7fb   : > { %v7352_v17 = vpop.eup %7351  ;;  %v3976_v26 = vmul.f32 1.442695, %v9521_v21  ;;  %v4190_v8 = vunpack.c.l.b16 %v4158_v11  ;;  %vm3953_vm15 = vcmp.gt.f32.partialorder %v9521_v21, 20.0 }
 0x7fc   : > { %v7354_v38 = vpop.eup %7353  ;;  %v4048_v35 = vadd.f32 1.0, %v7352_v17  ;;  %6144 = vmatpush.bf16.msrb.mxu3 %v7915_v13  ;;  %v4051_v4 = vmul.f32 -0.5, %v7352_v17  ;;  %v4054_v29 = vand.u32 2147483647, %v7352_v17 }
 0x7fd   : > { %v4041_v51 = vmul.f32 0.6931472, %v7354_v38  ;;  %7355 = vpow2.f32 %v3976_v26 }
 0x7fe   : > { %7357 = vlog2.f32 %v4048_v35  ;;  %v4052_v60 = vadd.f32 1.0, %v4051_v4  ;;  %vm4055_vm12 = vcmp.lt.f32.partialorder %v4054_v29, 0.0004427343 }
 0x7ff   : > { %v4047_v14 = vsel %vm4046_vm10, %v4044_v58, %v4041_v51 }
 0x800   : > { %v4143_v46 = vsel %vm3951_vm11, %v9511_v59, %v4047_v14  ;;  %v3926_v25 = vpop.f32.mrf.mxu1  ;;  %6145 = vmatpush.bf16.msrb.mxu3 %v7916_v54  ;;  %v4053_v26 = vmul.f32 %v7352_v17, %v4052_v60 }
 0x801   : > { %v9529_v47 = vadd.f32 %v9497_v0, %v3926_v25  ;;  %v4159_v41 = vpack.c.bf16 %v4143_v46, %v4143_v46 }
 0x803   : > { %v7356_v2 = vpop.eup %7355  ;;  %v3978_v55 = vmul.f32 1.442695, %v9529_v47  ;;  %v4191_v1 = vunpack.c.l.b16 %v4159_v41  ;;  %vm3954_vm1 = vcmp.gt.f32.partialorder %v9529_v47, 20.0 }
 0x804   : > { %v7358_v27 = vpop.eup %7357  ;;  %v4057_v19 = vadd.f32 1.0, %v7356_v2  ;;  %6146 = vmatpush.bf16.msrb.mxu3 %v7917_v61  ;;  %v4060_v59 = vmul.f32 -0.5, %v7356_v2  ;;  %v4063_v51 = vand.u32 2147483647, %v7356_v2 }
 0x805   : > { %v4050_v15 = vmul.f32 0.6931472, %v7358_v27  ;;  %7359 = vpow2.f32 %v3978_v55  ;;  %v4204_v3 = vpack.c.b16 %v4191_v1, %v4190_v8 }
 0x806   : > { %7361 = vlog2.f32 %v4057_v19  ;;  %v4061_v35 = vadd.f32 1.0, %v4060_v59  ;;  %vm4064_vm14 = vcmp.lt.f32.partialorder %v4063_v51, 0.0004427343 }
 0x807   : > { %4285 = vmatmul.bf16.gmra.mxu3 %v4204_v3  ;;  %v4056_v57 = vsel %vm4055_vm12, %v4053_v26, %v4050_v15 }
 0x808   : > { %v3928_v38 = vpop.f32.mrf.mxu1  ;;  %v4144_v4 = vsel %vm3952_vm13, %v9517_v7, %v4056_v57  ;;  %v4062_v54 = vmul.f32 %v7356_v2, %v4061_v35 }
 0x809   : > { %v3929_v13 = vadd.f32 %v9497_v0, %v3928_v38  ;;  %v4160_v17 = vpack.c.bf16 %v4144_v4, %v4144_v4 }
 0x80b   : > { %v7360_v58 = vpop.eup %7359  ;;  %v3980_v11 = vmul.f32 1.442695, %v3929_v13  ;;  %v4192_v7 = vunpack.c.l.b16 %v4160_v17  ;;  %vm3955_vm3 = vcmp.gt.f32.partialorder %v3929_v13, 20.0 }
 0x80c   : > { %v7362_v14 = vpop.eup %7361  ;;  %v4066_v46 = vadd.f32 1.0, %v7360_v58  ;;  %v4069_v8 = vmul.f32 -0.5, %v7360_v58  ;;  %v4072_v59 = vand.u32 2147483647, %v7360_v58 }
 0x80d   : > { %v4059_v25 = vmul.f32 0.6931472, %v7362_v14  ;;  %7363 = vpow2.f32 %v3980_v11 }
 0x80e   : > { %7365 = vlog2.f32 %v4066_v46  ;;  %v4070_v19 = vadd.f32 1.0, %v4069_v8  ;;  %vm4073_vm0 = vcmp.lt.f32.partialorder %v4072_v59, 0.0004427343 }
 0x80f   : > { %v4065_v41 = vsel %vm4064_vm14, %v4062_v54, %v4059_v25 }
 0x810   : > { %v4145_v60 = vsel %vm3953_vm15, %v9521_v21, %v4065_v41  ;;  %v3931_v55 = vpop.f32.mrf.mxu1  ;;  %v4071_v21 = vmul.f32 %v7360_v58, %v4070_v19 }
 0x811   : > { %v9538_v1 = vadd.f32 %v9497_v0, %v3931_v55  ;;  %v4161_v27 = vpack.c.bf16 %v4145_v60, %v4145_v60 }
 0x813   : > { %v7364_v29 = vpop.eup %7363  ;;  %v3982_v2 = vmul.f32 1.442695, %v9538_v1  ;;  %v4193_v61 = vunpack.c.l.b16 %v4161_v27  ;;  %vm3956_vm5 = vcmp.gt.f32.partialorder %v9538_v1, 20.0 }
 0x814   : > { %v7366_v15 = vpop.eup %7365  ;;  %v4075_v3 = vadd.f32 1.0, %v7364_v29  ;;  %v4078_v38 = vmul.f32 -0.5, %v7364_v29  ;;  %v4081_v4 = vand.u32 2147483647, %v7364_v29 }
 0x815   : > { %v4068_v26 = vmul.f32 0.6931472, %v7366_v15  ;;  %7367 = vpow2.f32 %v3982_v2  ;;  %v4205_v57 = vpack.c.b16 %v4193_v61, %v4192_v7 }
 0x816   : > { %7369 = vlog2.f32 %v4075_v3  ;;  %v4079_v11 = vadd.f32 1.0, %v4078_v38  ;;  %vm4082_vm2 = vcmp.lt.f32.partialorder %v4081_v4, 0.0004427343 }
 0x817   : > { %4290 = vmatmul.bf16.gmra.mxu3 %v4205_v57  ;;  %v4074_v51 = vsel %vm4073_vm0, %v4071_v21, %v4068_v26 }
 0x818   : > { %v3933_v35 = vpop.f32.mrf.mxu1  ;;  %v4146_v17 = vsel %vm3954_vm1, %v9529_v47, %v4074_v51  ;;  %v4080_v60 = vmul.f32 %v7364_v29, %v4079_v11 }
 0x819   : > { %v3934_v14 = vadd.f32 %v9497_v0, %v3933_v35  ;;  %v4162_v58 = vpack.c.bf16 %v4146_v17, %v4146_v17 }
 0x81b   : > { %v7368_v46 = vpop.eup %7367  ;;  %v3984_v25 = vmul.f32 1.442695, %v3934_v14  ;;  %v4194_v59 = vunpack.c.l.b16 %v4162_v58  ;;  %vm3957_vm7 = vcmp.gt.f32.partialorder %v3934_v14, 20.0 }
 0x81c   : > { %v7370_v54 = vpop.eup %7369  ;;  %v4084_v41 = vadd.f32 1.0, %v7368_v46  ;;  %v4087_v27 = vmul.f32 -0.5, %v7368_v46  ;;  %v4090_v38 = vand.u32 2147483647, %v7368_v46 }
 0x81d   : > { %v4077_v8 = vmul.f32 0.6931472, %v7370_v54  ;;  %7371 = vpow2.f32 %v3984_v25 }
 0x81e   : > { %7373 = vlog2.f32 %v4084_v41  ;;  %v4088_v3 = vadd.f32 1.0, %v4087_v27  ;;  %vm4091_vm4 = vcmp.lt.f32.partialorder %v4090_v38, 0.0004427343 }
 0x81f   : > { %v4083_v55 = vsel %vm4082_vm2, %v4080_v60, %v4077_v8 }
 0x820   : > { %v4147_v7 = vsel %vm3955_vm3, %v3929_v13, %v4083_v55  ;;  %v3936_v19 = vpop.f32.mrf.mxu1  ;;  %v4089_v13 = vmul.f32 %v7368_v46, %v4088_v3 }
 0x821   : > { %v9545_v2 = vadd.f32 %v9497_v0, %v3936_v19  ;;  %v4163_v61 = vpack.c.bf16 %v4147_v7, %v4147_v7 }
 0x823   : > { %v7372_v15 = vpop.eup %7371  ;;  %v3986_v47 = vmul.f32 1.442695, %v9545_v2  ;;  %v4195_v26 = vunpack.c.l.b16 %v4163_v61  ;;  %vm3958_vm9 = vcmp.gt.f32.partialorder %v9545_v2, 20.0 }
 0x824   : > { %v7374_v29 = vpop.eup %7373  ;;  %v4093_v57 = vadd.f32 1.0, %v7372_v15  ;;  %v4096_v35 = vmul.f32 -0.5, %v7372_v15  ;;  %v4099_v17 = vand.u32 2147483647, %v7372_v15 }
 0x825   : > { %v4086_v21 = vmul.f32 0.6931472, %v7374_v29  ;;  %7375 = vpow2.f32 %v3986_v47  ;;  %v4206_v51 = vpack.c.b16 %v4195_v26, %v4194_v59 }
 0x826   : > { %7377 = vlog2.f32 %v4093_v57  ;;  %v4097_v25 = vadd.f32 1.0, %v4096_v35  ;;  %vm4100_vm6 = vcmp.lt.f32.partialorder %v4099_v17, 0.0004427343 }
 0x827   : > { %4295 = vmatmul.bf16.gmra.mxu3 %v4206_v51  ;;  %v4092_v4 = vsel %vm4091_vm4, %v4089_v13, %v4086_v21 }
 0x828   : > { %v3938_v11 = vpop.f32.mrf.mxu1  ;;  %v4148_v58 = vsel %vm3956_vm5, %v9538_v1, %v4092_v4  ;;  %v4098_v7 = vmul.f32 %v7372_v15, %v4097_v25 }
 0x829   : > { %v3939_v54 = vadd.f32 %v9497_v0, %v3938_v11  ;;  %v4164_v46 = vpack.c.bf16 %v4148_v58, %v4148_v58 }
 0x82b   : > { %v7376_v41 = vpop.eup %7375  ;;  %v3988_v8 = vmul.f32 1.442695, %v3939_v54  ;;  %v4196_v38 = vunpack.c.l.b16 %v4164_v46  ;;  %vm3959_vm11 = vcmp.gt.f32.partialorder %v3939_v54, 20.0 }
 0x82c   : > { %v7378_v60 = vpop.eup %7377  ;;  %v4102_v55 = vadd.f32 1.0, %v7376_v41  ;;  %v4105_v61 = vmul.f32 -0.5, %v7376_v41  ;;  %v4108_v51 = vand.u32 2147483647, %v7376_v41 }
 0x82d   : > { %v4095_v27 = vmul.f32 0.6931472, %v7378_v60  ;;  %7379 = vpow2.f32 %v3988_v8 }
 0x82e   : > { %7381 = vlog2.f32 %v4102_v55  ;;  %v4106_v57 = vadd.f32 1.0, %v4105_v61  ;;  %vm4109_vm8 = vcmp.lt.f32.partialorder %v4108_v51, 0.0004427343 }
 0x82f   : > { %v4101_v19 = vsel %vm4100_vm6, %v4098_v7, %v4095_v27 }
 0x830   : > { %v4149_v59 = vsel %vm3957_vm7, %v3934_v14, %v4101_v19  ;;  %v3941_v3 = vpop.f32.mrf.mxu1  ;;  %v4107_v25 = vmul.f32 %v7376_v41, %v4106_v57 }
 0x831   : > { %v3942_v47 = vadd.f32 %v9497_v0, %v3941_v3  ;;  %v4165_v26 = vpack.c.bf16 %v4149_v59, %v4149_v59 }
 0x833   : > { %v7380_v29 = vpop.eup %7379  ;;  %v3990_v21 = vmul.f32 1.442695, %v3942_v47  ;;  %v4197_v1 = vunpack.c.l.b16 %v4165_v26  ;;  %vm3960_vm13 = vcmp.gt.f32.partialorder %v3942_v47, 20.0 }
 0x834   : > { %v7382_v35 = vpop.eup %7381  ;;  %v4111_v15 = vadd.f32 1.0, %v7380_v29  ;;  %v4114_v11 = vmul.f32 -0.5, %v7380_v29  ;;  %v4117_v58 = vand.u32 2147483647, %v7380_v29 }
 0x835   : > { %v4104_v13 = vmul.f32 0.6931472, %v7382_v35  ;;  %7383 = vpow2.f32 %v3990_v21  ;;  %v4207_v4 = vpack.c.b16 %v4197_v1, %v4196_v38 }
 0x836   : > { %7385 = vlog2.f32 %v4111_v15  ;;  %v4115_v8 = vadd.f32 1.0, %v4114_v11  ;;  %vm4118_vm10 = vcmp.lt.f32.partialorder %v4117_v58, 0.0004427343 }
 0x837   : > { %4300 = vmatmul.bf16.gmra.mxu3 %v4207_v4  ;;  %v4110_v17 = vsel %vm4109_vm8, %v4107_v25, %v4104_v13  ;;  %v4227_v25 = vpop.f32.mrf.mxu2 }
 0x838   : > { %v3943_v14 = vpop.f32.mrf.mxu1  ;;  %v4150_v46 = vsel %vm3958_vm9, %v9545_v2, %v4110_v17  ;;  %v4116_v59 = vmul.f32 %v7380_v29, %v4115_v8 }
 0x839   : > { %v3944_v60 = vadd.f32 %v9497_v0, %v3943_v14  ;;  %v4166_v41 = vpack.c.bf16 %v4150_v46, %v4150_v46 }
 0x83b   : > { %v7384_v55 = vpop.eup %7383  ;;  %v3992_v27 = vmul.f32 1.442695, %v3944_v60  ;;  %v4198_v21 = vunpack.c.l.b16 %v4166_v41  ;;  %vm3961_vm15 = vcmp.gt.f32.partialorder %v3944_v60, 20.0 }
 0x83c   : > { %v7386_v7 = vpop.eup %7385  ;;  %v4120_v19 = vadd.f32 1.0, %v7384_v55  ;;  %v4123_v26 = vmul.f32 -0.5, %v7384_v55  ;;  %v4126_v15 = vand.u32 2147483647, %v7384_v55 }
 0x83d   : > { %v4113_v61 = vmul.f32 0.6931472, %v7386_v7  ;;  %7387 = vpow2.f32 %v3992_v27 }
 0x83e   : > { %7389 = vlog2.f32 %v4120_v19  ;;  %v4124_v1 = vadd.f32 1.0, %v4123_v26  ;;  %vm4127_vm12 = vcmp.lt.f32.partialorder %v4126_v15, 0.0004427343 }
 0x83f   : > { %v4119_v3 = vsel %vm4118_vm10, %v4116_v59, %v4113_v61  ;;  %v4229_v41 = vpop.f32.mrf.mxu2 }
 0x840   : > { %v4151_v38 = vsel %vm3959_vm11, %v3939_v54, %v4119_v3  ;;  %v4125_v29 = vmul.f32 %v7384_v55, %v4124_v1 }
 0x841   : > { %v4167_v0 = vpack.c.bf16 %v4151_v38, %v4151_v38 }
 0x843   : > { %v7388_v57 = vpop.eup %7387  ;;  %v4199_v35 = vunpack.c.l.b16 %v4167_v0 }
 0x844   : > { %v7390_v51 = vpop.eup %7389  ;;  %v4129_v13 = vadd.f32 1.0, %v7388_v57  ;;  %v4132_v11 = vmul.f32 -0.5, %v7388_v57  ;;  %v4135_v8 = vand.u32 2147483647, %v7388_v57 }
 0x845   : > { %v4122_v2 = vmul.f32 0.6931472, %v7390_v51  ;;  %v4208_v4 = vpack.c.b16 %v4199_v35, %v4198_v21  ;;  %v9558_v21 = vld [vmem:[%s10124_s7] ss:$0 sm:$0xff] }
 0x846   : > { %7391 = vlog2.f32 %v4129_v13  ;;  %v4133_v17 = vadd.f32 1.0, %v4132_v11  ;;  %vm4136_vm14 = vcmp.lt.f32.partialorder %v4135_v8, 0.0004427343  ;;  %v4230_v51 = vadd.f32 %v9558_v21, %v4229_v41 }
 0x847   : > { %4305 = vmatmul.bf16.gmra.mxu3 %v4208_v4  ;;  %v4128_v14 = vsel %vm4127_vm12, %v4125_v29, %v4122_v2  ;;  %v4232_v38 = vpop.f32.mrf.mxu2 }
 0x848   : > { %v4152_v58 = vsel %vm3960_vm13, %v3942_v47, %v4128_v14  ;;  %v4134_v7 = vmul.f32 %v7388_v57, %v4133_v17  ;;  %v4228_v47 = vadd.f32 %v9558_v21, %v4227_v25  ;;  %v4233_v29 = vadd.f32 %v9558_v21, %v4232_v38 }
 0x849   : > { %v4168_v46 = vpack.c.bf16 %v4152_v58, %v4152_v58 }
 0x84b   : > { %v4200_v3 = vunpack.c.l.b16 %v4168_v46 }
 0x84c   : > { %v7392_v54 = vpop.eup %7391 }
 0x84d   : > { %v4131_v27 = vmul.f32 0.6931472, %v7392_v54 }
 0x84f   : > { %v4137_v19 = vsel %vm4136_vm14, %v4134_v7, %v4131_v27  ;;  %v4234_v0 = vpop.f32.mrf.mxu2 }
 0x850   : > { %v4153_v61 = vsel %vm3961_vm15, %v3944_v60, %v4137_v19  ;;  %v4235_v19 = vadd.f32 %v9558_v21, %v4234_v0 }
 0x851   : > { %v4169_v59 = vpack.c.bf16 %v4153_v61, %v4153_v61 }
 0x853   : > { %v4201_v55 = vunpack.c.l.b16 %v4169_v59 }
 0x855   : > { %v4209_v26 = vpack.c.b16 %v4201_v55, %v4200_v3 }
 0x857   : > { %4310 = vmatmul.bf16.gmra.mxu3 %v4209_v26  ;;  %v4237_v60 = vpop.f32.mrf.mxu2 }
 0x858   : > { %v4238_v0 = vadd.f32 %v9558_v21, %v4237_v60 }
 0x85f   : > { %v4239_v14 = vpop.f32.mrf.mxu2 }
 0x867   : > { %v4242_v38 = vpop.f32.mrf.mxu2 }
 0x86a   : > { %v4276_v57 = vpop.f32.mrf.mxu3 }
 0x86b   : > { %v4277_v1 = vadd.f32 %v4276_v57, %v4228_v47 }
 0x86d   : > { %v4332_v35 = vmul.f32 1.442695, %v4277_v1  ;;  %vm4316_vm2 = vcmp.gt.f32.partialorder %v4277_v1, 20.0 }
 0x86f   : > { %7393 = vpow2.f32 %v4332_v35 }
 0x872   : > { %v4278_v15 = vpop.f32.mrf.mxu3 }
 0x873   : > { %v4279_v13 = vadd.f32 %v4278_v15, %v4230_v51 }
 0x875   : > { %v7394_v2 = vpop.eup %7393  ;;  %v4334_v11 = vmul.f32 1.442695, %v4279_v13  ;;  %vm4317_vm3 = vcmp.gt.f32.partialorder %v4279_v13, 20.0 }
 0x876   : > { %v4364_v4 = vadd.f32 1.0, %v7394_v2  ;;  %v4367_v54 = vmul.f32 -0.5, %v7394_v2  ;;  %v4370_v59 = vand.u32 2147483647, %v7394_v2 }
 0x877   : > { %7395 = vpow2.f32 %v4334_v11 }
 0x878   : > { %7397 = vlog2.f32 %v4364_v4  ;;  %v4368_v61 = vadd.f32 1.0, %v4367_v54  ;;  %vm4371_vm0 = vcmp.lt.f32.partialorder %v4370_v59, 0.0004427343 }
 0x87a   : > { %v4281_v17 = vpop.f32.mrf.mxu3  ;;  %v4369_v35 = vmul.f32 %v7394_v2, %v4368_v61 }
 0x87b   : > { %v9563_v8 = vadd.f32 %v4281_v17, %v4233_v29 }
 0x87d   : > { %v7396_v25 = vpop.eup %7395  ;;  %v4336_v58 = vmul.f32 1.442695, %v9563_v8  ;;  %vm4318_vm6 = vcmp.gt.f32.partialorder %v9563_v8, 20.0 }
 0x87e   : > { %v4373_v27 = vadd.f32 1.0, %v7396_v25  ;;  %v4376_v7 = vmul.f32 -0.5, %v7396_v25  ;;  %v7398_v46 = vpop.eup %7397  ;;  %v4379_v47 = vand.u32 2147483647, %v7396_v25 }
 0x87f   : > { %7399 = vpow2.f32 %v4336_v58  ;;  %v4366_v3 = vmul.f32 0.6931472, %v7398_v46 }
 0x880   : > { %7401 = vlog2.f32 %v4373_v27  ;;  %v4377_v55 = vadd.f32 1.0, %v4376_v7  ;;  %vm4380_vm1 = vcmp.lt.f32.partialorder %v4379_v47, 0.0004427343 }
 0x881   : > { %v4372_v4 = vsel %vm4371_vm0, %v4369_v35, %v4366_v3 }
 0x882   : > { %v4283_v41 = vpop.f32.mrf.mxu3  ;;  %v4378_v17 = vmul.f32 %v7396_v25, %v4377_v55  ;;  %v4508_v58 = vsel %vm4316_vm2, %v4277_v1, %v4372_v4  ;;  %v4244_v25 = vpop.f32.mrf.mxu2  ;;  %v4240_v55 = vadd.f32 %v9558_v21, %v4239_v14  ;;  %v4243_v14 = vadd.f32 %v9558_v21, %v4242_v38 }
 0x883   : > { %v4284_v26 = vadd.f32 %v4283_v41, %v4235_v19 }
 0x885   : > { %v7400_v57 = vpop.eup %7399  ;;  %v4338_v51 = vmul.f32 1.442695, %v4284_v26  ;;  %vm4319_vm7 = vcmp.gt.f32.partialorder %v4284_v26, 20.0 }
 0x886   : > { %v7402_v15 = vpop.eup %7401  ;;  %v4382_v11 = vadd.f32 1.0, %v7400_v57  ;;  %v4385_v59 = vmul.f32 -0.5, %v7400_v57  ;;  %v4388_v47 = vand.u32 2147483647, %v7400_v57 }
 0x887   : > { %v4375_v29 = vmul.f32 0.6931472, %v7402_v15  ;;  %7403 = vpow2.f32 %v4338_v51 }
 0x888   : > { %7405 = vlog2.f32 %v4382_v11  ;;  %v4386_v1 = vadd.f32 1.0, %v4385_v59  ;;  %vm4389_vm4 = vcmp.lt.f32.partialorder %v4388_v47, 0.0004427343 }
 0x889   : > { %v4381_v54 = vsel %vm4380_vm1, %v4378_v17, %v4375_v29 }
 0x88a   : > { %v4509_v27 = vsel %vm4317_vm3, %v4279_v13, %v4381_v54  ;;  %v4286_v7 = vpop.f32.mrf.mxu3  ;;  %v4387_v17 = vmul.f32 %v7400_v57, %v4386_v1 }
 0x88b   : > { %v4524_v46 = vpack.c.bf16 %v4509_v27, %v4508_v58  ;;  %v9568_v2 = vadd.f32 %v4286_v7, %v4238_v0 }
 0x88d   : > { %v7404_v19 = vpop.eup %7403  ;;  %v4340_v61 = vmul.f32 1.442695, %v9568_v2  ;;  %4540 = vmatmul.bf16.vlgmr.msra.gmra.mxu0 %v4524_v46  ;;  %v4247_v46 = vpop.f32.mrf.mxu2  ;;  %vm4320_vm10 = vcmp.gt.f32.partialorder %v9568_v2, 20.0 }
 0x88e   : > { %v4391_v41 = vadd.f32 1.0, %v7404_v19  ;;  %v4394_v3 = vmul.f32 -0.5, %v7404_v19  ;;  %v7406_v60 = vpop.eup %7405  ;;  %v4397_v11 = vand.u32 2147483647, %v7404_v19 }
 0x88f   : > { %7407 = vpow2.f32 %v4340_v61  ;;  %v4384_v51 = vmul.f32 0.6931472, %v7406_v60 }
 0x890   : > { %7409 = vlog2.f32 %v4391_v41  ;;  %v4395_v15 = vadd.f32 1.0, %v4394_v3  ;;  %vm4398_vm5 = vcmp.lt.f32.partialorder %v4397_v11, 0.0004427343 }
 0x891   : > { %v4390_v58 = vsel %vm4389_vm4, %v4387_v17, %v4384_v51  ;;  %v4245_v51 = vadd.f32 %v9558_v21, %v4244_v25  ;;  %v4248_v25 = vadd.f32 %v9558_v21, %v4247_v46 }
 0x892   : > { %v4288_v13 = vpop.f32.mrf.mxu3  ;;  %v4396_v7 = vmul.f32 %v7404_v19, %v4395_v15  ;;  %v4510_v41 = vsel %vm4318_vm6, %v9563_v8, %v4390_v58 }
 0x893   : > { %v4289_v35 = vadd.f32 %v4288_v13, %v4240_v55 }
 0x895   : > { %v7408_v4 = vpop.eup %7407  ;;  %v4342_v29 = vmul.f32 1.442695, %v4289_v35  ;;  %v4249_v11 = vpop.f32.mrf.mxu2  ;;  %vm4321_vm11 = vcmp.gt.f32.partialorder %v4289_v35, 20.0 }
 0x896   : > { %v7410_v0 = vpop.eup %7409  ;;  %v4400_v54 = vadd.f32 1.0, %v7408_v4  ;;  %v4403_v19 = vmul.f32 -0.5, %v7408_v4 }
 0x897   : > { %7411 = vpow2.f32 %v4342_v29  ;;  %v4393_v27 = vmul.f32 0.6931472, %v7410_v0 }
 0x898   : > { %7413 = vlog2.f32 %v4400_v54  ;;  %v4404_v15 = vadd.f32 1.0, %v4403_v19 }
 0x899   : > { %v4399_v61 = vsel %vm4398_vm5, %v4396_v7, %v4393_v27 }
 0x89a   : > { %v4291_v59 = vpop.f32.mrf.mxu3  ;;  %v4511_v3 = vsel %vm4319_vm7, %v4284_v26, %v4399_v61  ;;  %v4406_v26 = vand.u32 2147483647, %v7408_v4  ;;  %v4405_v7 = vmul.f32 %v7408_v4, %v4404_v15 }
 0x89b   : > { %v9575_v57 = vadd.f32 %v4291_v59, %v4243_v14  ;;  %v4525_v60 = vpack.c.bf16 %v4511_v3, %v4510_v41 }
 0x89c   : > { %vm4407_vm8 = vcmp.lt.f32.partialorder %v4406_v26, 0.0004427343 }
 0x89d   : > { %v7412_v55 = vpop.eup %7411  ;;  %v4344_v1 = vmul.f32 1.442695, %v9575_v57  ;;  %4545 = vmatmul.bf16.gmra.mxu0 %v4525_v60  ;;  %vm4322_vm14 = vcmp.gt.f32.partialorder %v9575_v57, 20.0 }
 0x89e   : > { %v4409_v13 = vadd.f32 1.0, %v7412_v55  ;;  %v4412_v38 = vmul.f32 -0.5, %v7412_v55  ;;  %v7414_v47 = vpop.eup %7413  ;;  %v4415_v54 = vand.u32 2147483647, %v7412_v55 }
 0x89f   : > { %7415 = vpow2.f32 %v4344_v1  ;;  %v4402_v17 = vmul.f32 0.6931472, %v7414_v47  ;;  %v4252_v47 = vpop.f32.mrf.mxu2 }
 0x8a0   : > { %7417 = vlog2.f32 %v4409_v13  ;;  %v4413_v0 = vadd.f32 1.0, %v4412_v38  ;;  %vm4416_vm9 = vcmp.lt.f32.partialorder %v4415_v54, 0.0004427343 }
 0x8a1   : > { %v4408_v59 = vsel %vm4407_vm8, %v4405_v7, %v4402_v17  ;;  %v4250_v17 = vadd.f32 %v9558_v21, %v4249_v11 }
 0x8a2   : > { %v4293_v8 = vpop.f32.mrf.mxu3  ;;  %v4414_v3 = vmul.f32 %v7412_v55, %v4413_v0  ;;  %v4512_v19 = vsel %vm4320_vm10, %v9568_v2, %v4408_v59 }
 0x8a3   : > { %v4294_v29 = vadd.f32 %v4293_v8, %v4245_v51 }
 0x8a5   : > { %v7416_v58 = vpop.eup %7415  ;;  %v4346_v27 = vmul.f32 1.442695, %v4294_v29  ;;  %vm4323_vm15 = vcmp.gt.f32.partialorder %v4294_v29, 20.0 }
 0x8a6   : > { %v7418_v14 = vpop.eup %7417  ;;  %v4418_v61 = vadd.f32 1.0, %v7416_v58  ;;  %v4421_v55 = vmul.f32 -0.5, %v7416_v58 }
 0x8a7   : > { %7419 = vpow2.f32 %v4346_v27  ;;  %v4411_v41 = vmul.f32 0.6931472, %v7418_v14 }
 0x8a8   : > { %7421 = vlog2.f32 %v4418_v61  ;;  %v4422_v0 = vadd.f32 1.0, %v4421_v55 }
 0x8a9   : > { %v4417_v60 = vsel %vm4416_vm9, %v4414_v3, %v4411_v41 }
 0x8aa   : > { %v4296_v1 = vpop.f32.mrf.mxu3  ;;  %v4513_v13 = vsel %vm4321_vm11, %v4289_v35, %v4417_v60  ;;  %v4424_v35 = vand.u32 2147483647, %v7416_v58  ;;  %v4423_v41 = vmul.f32 %v7416_v58, %v4422_v0 }
 0x8ab   : > { %v9582_v4 = vadd.f32 %v4296_v1, %v4248_v25  ;;  %v4526_v38 = vpack.c.bf16 %v4513_v13, %v4512_v19  ;;  %v4254_v25 = vpop.f32.mrf.mxu2  ;;  %v4253_v13 = vadd.f32 %v9558_v21, %v4252_v47 }
 0x8ac   : > { %vm4425_vm12 = vcmp.lt.f32.partialorder %v4424_v35, 0.0004427343 }
 0x8ad   : > { %v7420_v51 = vpop.eup %7419  ;;  %v4348_v15 = vmul.f32 1.442695, %v9582_v4  ;;  %4550 = vmatmul.bf16.gmra.mxu0 %v4526_v38  ;;  %vm4324_vm2 = vcmp.gt.f32.partialorder %v9582_v4, 20.0 }
 0x8ae   : > { %v4427_v8 = vadd.f32 1.0, %v7420_v51  ;;  %v4430_v46 = vmul.f32 -0.5, %v7420_v51  ;;  %v7422_v26 = vpop.eup %7421  ;;  %v4433_v14 = vand.u32 2147483647, %v7420_v51 }
 0x8af   : > { %7423 = vpow2.f32 %v4348_v15  ;;  %v4420_v27 = vmul.f32 0.6931472, %v7422_v26 }
 0x8b0   : > { %7425 = vlog2.f32 %v4427_v8  ;;  %v4431_v7 = vadd.f32 1.0, %v4430_v46  ;;  %vm4434_vm13 = vcmp.lt.f32.partialorder %v4433_v14, 0.0004427343 }
 0x8b1   : > { %v4426_v1 = vsel %vm4425_vm12, %v4423_v41, %v4420_v27  ;;  %v4255_v27 = vadd.f32 %v9558_v21, %v4254_v25 }
 0x8b2   : > { %v4298_v2 = vpop.f32.mrf.mxu3  ;;  %v4432_v11 = vmul.f32 %v7420_v51, %v4431_v7  ;;  %v4514_v55 = vsel %vm4322_vm14, %v9575_v57, %v4426_v1 }
 0x8b3   : > { %v9586_v54 = vadd.f32 %v4298_v2, %v4250_v17  ;;  %v4257_v35 = vpop.f32.mrf.mxu2 }
 0x8b4   : > { %v4258_v25 = vadd.f32 %v9558_v21, %v4257_v35 }
 0x8b5   : > { %v7424_v61 = vpop.eup %7423  ;;  %v4350_v59 = vmul.f32 1.442695, %v9586_v54  ;;  %vm4325_vm3 = vcmp.gt.f32.partialorder %v9586_v54, 20.0 }
 0x8b6   : > { %v7426_v3 = vpop.eup %7425  ;;  %v4436_v60 = vadd.f32 1.0, %v7424_v61  ;;  %v4439_v51 = vmul.f32 -0.5, %v7424_v61 }
 0x8b7   : > { %7427 = vpow2.f32 %v4350_v59  ;;  %v4429_v19 = vmul.f32 0.6931472, %v7426_v3 }
 0x8b8   : > { %7429 = vlog2.f32 %v4436_v60  ;;  %v4440_v7 = vadd.f32 1.0, %v4439_v51 }
 0x8b9   : > { %v4435_v38 = vsel %vm4434_vm13, %v4432_v11, %v4429_v19 }
 0x8ba   : > { %v4301_v15 = vpop.f32.mrf.mxu3  ;;  %v4515_v8 = vsel %vm4323_vm15, %v4294_v29, %v4435_v38  ;;  %v4442_v29 = vand.u32 2147483647, %v7424_v61  ;;  %v4441_v19 = vmul.f32 %v7424_v61, %v4440_v7 }
 0x8bb   : > { %v9592_v58 = vadd.f32 %v4301_v15, %v4253_v13  ;;  %v4527_v46 = vpack.c.bf16 %v4515_v8, %v4514_v55 }
 0x8bc   : > { %vm4443_vm0 = vcmp.lt.f32.partialorder %v4442_v29, 0.0004427343 }
 0x8bd   : > { %v7428_v26 = vpop.eup %7427  ;;  %v4352_v17 = vmul.f32 1.442695, %v9592_v58  ;;  %4555 = vmatmul.bf16.gmra.mxu0 %v4527_v46  ;;  %v4259_v46 = vpop.f32.mrf.mxu2  ;;  %vm4326_vm6 = vcmp.gt.f32.partialorder %v9592_v58, 20.0 }
 0x8be   : > { %v4445_v0 = vadd.f32 1.0, %v7428_v26  ;;  %v4448_v47 = vmul.f32 -0.5, %v7428_v26  ;;  %v7430_v2 = vpop.eup %7429  ;;  %v4451_v3 = vand.u32 2147483647, %v7428_v26  ;;  %v4260_v29 = vadd.f32 %v9558_v21, %v4259_v46 }
 0x8bf   : > { %7431 = vpow2.f32 %v4352_v17  ;;  %v4438_v59 = vmul.f32 0.6931472, %v7430_v2 }
 0x8c0   : > { %7433 = vlog2.f32 %v4445_v0  ;;  %v4449_v41 = vadd.f32 1.0, %v4448_v47  ;;  %vm4452_vm1 = vcmp.lt.f32.partialorder %v4451_v3, 0.0004427343 }
 0x8c1   : > { %v4444_v38 = vsel %vm4443_vm0, %v4441_v19, %v4438_v59 }
 0x8c2   : > { %v4303_v57 = vpop.f32.mrf.mxu3  ;;  %v4450_v55 = vmul.f32 %v7428_v26, %v4449_v41  ;;  %v4516_v51 = vsel %vm4324_vm2, %v9582_v4, %v4444_v38 }
 0x8c3   : > { %v4304_v14 = vadd.f32 %v4303_v57, %v4255_v27 }
 0x8c5   : > { %v7432_v60 = vpop.eup %7431  ;;  %v4354_v1 = vmul.f32 1.442695, %v4304_v14  ;;  %v4262_v19 = vpop.f32.mrf.mxu2  ;;  %vm4327_vm7 = vcmp.gt.f32.partialorder %v4304_v14, 20.0 }
 0x8c6   : > { %v7434_v11 = vpop.eup %7433  ;;  %v4454_v13 = vadd.f32 1.0, %v7432_v60  ;;  %v4457_v35 = vmul.f32 -0.5, %v7432_v60  ;;  %v4460_v41 = vand.u32 2147483647, %v7432_v60  ;;  %v4263_v46 = vadd.f32 %v9558_v21, %v4262_v19 }
 0x8c7   : > { %7435 = vpow2.f32 %v4354_v1  ;;  %v4447_v15 = vmul.f32 0.6931472, %v7434_v11 }
 0x8c8   : > { %7437 = vlog2.f32 %v4454_v13  ;;  %v4458_v59 = vadd.f32 1.0, %v4457_v35  ;;  %vm4461_vm4 = vcmp.lt.f32.partialorder %v4460_v41, 0.0004427343 }
 0x8c9   : > { %v4453_v8 = vsel %vm4452_vm1, %v4450_v55, %v4447_v15 }
 0x8ca   : > { %v4306_v17 = vpop.f32.mrf.mxu3  ;;  %v4517_v61 = vsel %vm4325_vm3, %v9586_v54, %v4453_v8  ;;  %v4459_v15 = vmul.f32 %v7432_v60, %v4458_v59 }
 0x8cb   : > { %v9601_v0 = vadd.f32 %v4306_v17, %v4258_v25  ;;  %v4528_v47 = vpack.c.bf16 %v4517_v61, %v4516_v51 }
 0x8cd   : > { %v7436_v2 = vpop.eup %7435  ;;  %v4356_v26 = vmul.f32 1.442695, %v9601_v0  ;;  %4560 = vmatmul.bf16.gmra.mxu0 %v4528_v47  ;;  %v4264_v59 = vpop.f32.mrf.mxu2  ;;  %vm4328_vm10 = vcmp.gt.f32.partialorder %v9601_v0, 20.0 }
 0x8ce   : > { %v4463_v27 = vadd.f32 1.0, %v7436_v2  ;;  %v4466_v7 = vmul.f32 -0.5, %v7436_v2  ;;  %v7438_v57 = vpop.eup %7437  ;;  %v4469_v11 = vand.u32 2147483647, %v7436_v2 }
 0x8cf   : > { %7439 = vpow2.f32 %v4356_v26  ;;  %v4456_v3 = vmul.f32 0.6931472, %v7438_v57 }
 0x8d0   : > { %7441 = vlog2.f32 %v4463_v27  ;;  %v4467_v1 = vadd.f32 1.0, %v4466_v7  ;;  %vm4470_vm5 = vcmp.lt.f32.partialorder %v4469_v11, 0.0004427343 }
 0x8d1   : > { %v4462_v8 = vsel %vm4461_vm4, %v4459_v15, %v4456_v3  ;;  %v4265_v3 = vadd.f32 %v9558_v21, %v4264_v59 }
 0x8d2   : > { %v4308_v4 = vpop.f32.mrf.mxu3  ;;  %v4468_v51 = vmul.f32 %v7436_v2, %v4467_v1  ;;  %v4518_v26 = vsel %vm4326_vm6, %v9592_v58, %v4462_v8 }
 0x8d3   : > { %v4309_v54 = vadd.f32 %v4308_v4, %v4260_v29 }
 0x8d5   : > { %v7440_v13 = vpop.eup %7439  ;;  %v4358_v38 = vmul.f32 1.442695, %v4309_v54  ;;  %vm4329_vm11 = vcmp.gt.f32.partialorder %v4309_v54, 20.0 }
 0x8d6   : > { %v7442_v55 = vpop.eup %7441  ;;  %v4472_v25 = vadd.f32 1.0, %v7440_v13  ;;  %v4475_v29 = vmul.f32 -0.5, %v7440_v13  ;;  %v4478_v11 = vand.u32 2147483647, %v7440_v13 }
 0x8d7   : > { %7443 = vpow2.f32 %v4358_v38  ;;  %v4465_v17 = vmul.f32 0.6931472, %v7442_v55 }
 0x8d8   : > { %7445 = vlog2.f32 %v4472_v25  ;;  %v4476_v1 = vadd.f32 1.0, %v4475_v29  ;;  %vm4479_vm8 = vcmp.lt.f32.partialorder %v4478_v11, 0.0004427343 }
 0x8d9   : > { %v4471_v61 = vsel %vm4470_vm5, %v4468_v51, %v4465_v17 }
 0x8da   : > { %v4311_v47 = vpop.f32.mrf.mxu3  ;;  %v4519_v35 = vsel %vm4327_vm7, %v4304_v14, %v4471_v61  ;;  %v4477_v8 = vmul.f32 %v7440_v13, %v4476_v1 }
 0x8db   : > { %v4312_v60 = vadd.f32 %v4311_v47, %v4263_v46  ;;  %v4529_v27 = vpack.c.bf16 %v4519_v35, %v4518_v26 }
 0x8dd   : > { %v7444_v7 = vpop.eup %7443  ;;  %v4360_v57 = vmul.f32 1.442695, %v4312_v60  ;;  %4565 = vmatmul.bf16.gmra.mxu0 %v4529_v27  ;;  %vm4330_vm14 = vcmp.gt.f32.partialorder %v4312_v60, 20.0 }
 0x8de   : > { %v4481_v2 = vadd.f32 1.0, %v7444_v7  ;;  %v4484_v4 = vmul.f32 -0.5, %v7444_v7  ;;  %v7446_v41 = vpop.eup %7445  ;;  %v4487_v15 = vand.u32 2147483647, %v7444_v7 }
 0x8df   : > { %7447 = vpow2.f32 %v4360_v57  ;;  %v4474_v14 = vmul.f32 0.6931472, %v7446_v41 }
 0x8e0   : > { %7449 = vlog2.f32 %v4481_v2  ;;  %v4485_v38 = vadd.f32 1.0, %v4484_v4  ;;  %vm4488_vm9 = vcmp.lt.f32.partialorder %v4487_v15, 0.0004427343 }
 0x8e1   : > { %v4480_v46 = vsel %vm4479_vm8, %v4477_v8, %v4474_v14 }
 0x8e2   : > { %v4313_v19 = vpop.f32.mrf.mxu3  ;;  %v4486_v47 = vmul.f32 %v7444_v7, %v4485_v38  ;;  %v4520_v26 = vsel %vm4328_vm10, %v9601_v0, %v4480_v46 }
 0x8e3   : > { %v4314_v58 = vadd.f32 %v4313_v19, %v4265_v3 }
 0x8e5   : > { %v7448_v55 = vpop.eup %7447  ;;  %v4362_v25 = vmul.f32 1.442695, %v4314_v58  ;;  %vm4331_vm15 = vcmp.gt.f32.partialorder %v4314_v58, 20.0 }
 0x8e6   : > { %v7450_v17 = vpop.eup %7449  ;;  %v4490_v51 = vadd.f32 1.0, %v7448_v55  ;;  %v4493_v13 = vmul.f32 -0.5, %v7448_v55  ;;  %v4496_v41 = vand.u32 2147483647, %v7448_v55 }
 0x8e7   : > { %7451 = vpow2.f32 %v4362_v25  ;;  %v4483_v61 = vmul.f32 0.6931472, %v7450_v17 }
 0x8e8   : > { %7453 = vlog2.f32 %v4490_v51  ;;  %v4494_v4 = vadd.f32 1.0, %v4493_v13  ;;  %vm4497_vm12 = vcmp.lt.f32.partialorder %v4496_v41, 0.0004427343  ;;  %v9614_v51 = vld [vmem:[%s10126_s9] ss:$0 sm:$0xff] }
 0x8e9   : > { %v4489_v21 = vsel %vm4488_vm9, %v4486_v47, %v4483_v61 }
 0x8ea   : > { %v4521_v35 = vsel %vm4329_vm11, %v4309_v54, %v4489_v21  ;;  %v4495_v19 = vmul.f32 %v7448_v55, %v4494_v4 }
 0x8eb   : > { %v4530_v27 = vpack.c.bf16 %v4521_v35, %v4520_v26 }
 0x8ed   : > { %v7452_v57 = vpop.eup %7451  ;;  %4570 = vmatmul.bf16.gmra.mxu0 %v4530_v27 }
 0x8ee   : > { %v4499_v29 = vadd.f32 1.0, %v7452_v57  ;;  %v4502_v59 = vmul.f32 -0.5, %v7452_v57  ;;  %v7454_v2 = vpop.eup %7453  ;;  %v4505_v1 = vand.u32 2147483647, %v7452_v57 }
 0x8ef   : > { %v4492_v7 = vmul.f32 0.6931472, %v7454_v2 }
 0x8f0   : > { %7455 = vlog2.f32 %v4499_v29  ;;  %v4503_v3 = vadd.f32 1.0, %v4502_v59  ;;  %vm4506_vm13 = vcmp.lt.f32.partialorder %v4505_v1, 0.0004427343 }
 0x8f1   : > { %v4498_v14 = vsel %vm4497_vm12, %v4495_v19, %v4492_v7 }
 0x8f2   : > { %v4504_v54 = vmul.f32 %v7452_v57, %v4503_v3  ;;  %v4522_v15 = vsel %vm4330_vm14, %v4312_v60, %v4498_v14 }
 0x8f6   : > { %v7456_v11 = vpop.eup %7455 }
 0x8f7   : > { %v4501_v0 = vmul.f32 0.6931472, %v7456_v11 }
 0x8f9   : > { %v4507_v38 = vsel %vm4506_vm13, %v4504_v54, %v4501_v0 }
 0x8fa   : > { %v4523_v25 = vsel %vm4331_vm15, %v4314_v58, %v4507_v38 }
 0x8fb   : > { %v4531_v8 = vpack.c.bf16 %v4523_v25, %v4522_v15 }
 0x8fd   : > { %4575 = vmatmul.bf16.gmra.mxu0 %v4531_v8 }
 0x90a   : > { %v4541_v17 = vpop.f32.mrf.mxu0 }
 0x90b   : > { %v4542_v55 = vadd.f32 %v9614_v51, %v4541_v17 }
 0x90d   : > { %v4597_v46 = vmul.f32 1.442695, %v4542_v55  ;;  %vm4581_vm2 = vcmp.gt.f32.partialorder %v4542_v55, 20.0 }
 0x90f   : > { %7457 = vpow2.f32 %v4597_v46 }
 0x912   : > { %v4543_v61 = vpop.f32.mrf.mxu0 }
 0x913   : > { %v4544_v47 = vadd.f32 %v9614_v51, %v4543_v61 }
 0x915   : > { %v7458_v21 = vpop.eup %7457  ;;  %v4599_v26 = vmul.f32 1.442695, %v4544_v47  ;;  %vm4582_vm3 = vcmp.gt.f32.partialorder %v4544_v47, 20.0 }
 0x916   : > { %v4629_v35 = vadd.f32 1.0, %v7458_v21  ;;  %v4632_v57 = vmul.f32 -0.5, %v7458_v21  ;;  %v4635_v41 = vand.u32 2147483647, %v7458_v21 }
 0x917   : > { %7459 = vpow2.f32 %v4599_v26 }
 0x918   : > { %7461 = vlog2.f32 %v4629_v35  ;;  %v4633_v4 = vadd.f32 1.0, %v4632_v57  ;;  %vm4636_vm0 = vcmp.lt.f32.partialorder %v4635_v41, 0.0004427343 }
 0x91a   : > { %v4546_v60 = vpop.f32.mrf.mxu0  ;;  %v4634_v0 = vmul.f32 %v7458_v21, %v4633_v4 }
 0x91b   : > { %v9619_v58 = vadd.f32 %v9614_v51, %v4546_v60 }
 0x91d   : > { %v7460_v27 = vpop.eup %7459  ;;  %v4601_v13 = vmul.f32 1.442695, %v9619_v58  ;;  %vm4583_vm6 = vcmp.gt.f32.partialorder %v9619_v58, 20.0 }
 0x91e   : > { %v4638_v29 = vadd.f32 1.0, %v7460_v27  ;;  %v4641_v59 = vmul.f32 -0.5, %v7460_v27  ;;  %v7462_v2 = vpop.eup %7461  ;;  %v4644_v11 = vand.u32 2147483647, %v7460_v27 }
 0x91f   : > { %7463 = vpow2.f32 %v4601_v13  ;;  %v4631_v3 = vmul.f32 0.6931472, %v7462_v2 }
 0x920   : > { %7465 = vlog2.f32 %v4638_v29  ;;  %v4642_v1 = vadd.f32 1.0, %v4641_v59  ;;  %vm4645_vm1 = vcmp.lt.f32.partialorder %v4644_v11, 0.0004427343 }
 0x921   : > { %v4637_v25 = vsel %vm4636_vm0, %v4634_v0, %v4631_v3 }
 0x922   : > { %v4548_v7 = vpop.f32.mrf.mxu0  ;;  %v4643_v17 = vmul.f32 %v7460_v27, %v4642_v1  ;;  %v4773_v61 = vsel %vm4581_vm2, %v4542_v55, %v4637_v25 }
 0x923   : > { %v4549_v19 = vadd.f32 %v9614_v51, %v4548_v7 }
 0x925   : > { %v7464_v14 = vpop.eup %7463  ;;  %v4603_v54 = vmul.f32 1.442695, %v4549_v19  ;;  %vm4584_vm7 = vcmp.gt.f32.partialorder %v4549_v19, 20.0 }
 0x926   : > { %v7466_v38 = vpop.eup %7465  ;;  %v4647_v15 = vadd.f32 1.0, %v7464_v14  ;;  %v4650_v29 = vmul.f32 -0.5, %v7464_v14  ;;  %v4653_v55 = vand.u32 2147483647, %v7464_v14 }
 0x927   : > { %v4640_v8 = vmul.f32 0.6931472, %v7466_v38  ;;  %7467 = vpow2.f32 %v4603_v54 }
 0x928   : > { %7469 = vlog2.f32 %v4647_v15  ;;  %v4651_v4 = vadd.f32 1.0, %v4650_v29  ;;  %vm4654_vm4 = vcmp.lt.f32.partialorder %v4653_v55, 0.0004427343 }
 0x929   : > { %v4646_v46 = vsel %vm4645_vm1, %v4643_v17, %v4640_v8 }
 0x92a   : > { %v4774_v26 = vsel %vm4582_vm3, %v4544_v47, %v4646_v46  ;;  %v4551_v35 = vpop.f32.mrf.mxu0  ;;  %v4652_v54 = vmul.f32 %v7464_v14, %v4651_v4 }
 0x92b   : > { %v4789_v60 = vpack.c.bf16 %v4774_v26, %v4773_v61  ;;  %v9624_v57 = vadd.f32 %v9614_v51, %v4551_v35 }
 0x92d   : > { %v7468_v21 = vpop.eup %7467  ;;  %v4605_v13 = vmul.f32 1.442695, %v9624_v57  ;;  %4805 = vmatmul.bf16.vlgmr.msra.gmra.mxu1 %v4789_v60  ;;  %vm4585_vm10 = vcmp.gt.f32.partialorder %v9624_v57, 20.0 }
 0x92e   : > { %v4656_v59 = vadd.f32 1.0, %v7468_v21  ;;  %v4659_v27 = vmul.f32 -0.5, %v7468_v21  ;;  %v7470_v2 = vpop.eup %7469  ;;  %v4662_v1 = vand.u32 2147483647, %v7468_v21 }
 0x92f   : > { %7471 = vpow2.f32 %v4605_v13  ;;  %v4649_v7 = vmul.f32 0.6931472, %v7470_v2 }
 0x930   : > { %7473 = vlog2.f32 %v4656_v59  ;;  %v4660_v3 = vadd.f32 1.0, %v4659_v27  ;;  %vm4663_vm5 = vcmp.lt.f32.partialorder %v4662_v1, 0.0004427343 }
 0x931   : > { %v4655_v25 = vsel %vm4654_vm4, %v4652_v54, %v4649_v7 }
 0x932   : > { %v4553_v41 = vpop.f32.mrf.mxu0  ;;  %v4661_v17 = vmul.f32 %v7468_v21, %v4660_v3  ;;  %v4775_v26 = vsel %vm4583_vm6, %v9619_v58, %v4655_v25 }
 0x933   : > { %v4554_v47 = vadd.f32 %v9614_v51, %v4553_v41 }
 0x935   : > { %v7472_v11 = vpop.eup %7471  ;;  %v4607_v0 = vmul.f32 1.442695, %v4554_v47  ;;  %vm4586_vm11 = vcmp.gt.f32.partialorder %v4554_v47, 20.0 }
 0x936   : > { %v7474_v38 = vpop.eup %7473  ;;  %v4665_v15 = vadd.f32 1.0, %v7472_v11  ;;  %v4668_v59 = vmul.f32 -0.5, %v7472_v11  ;;  %v4671_v55 = vand.u32 2147483647, %v7472_v11 }
 0x937   : > { %7475 = vpow2.f32 %v4607_v0  ;;  %v4658_v8 = vmul.f32 0.6931472, %v7474_v38 }
 0x938   : > { %7477 = vlog2.f32 %v4665_v15  ;;  %v4669_v4 = vadd.f32 1.0, %v4668_v59  ;;  %vm4672_vm8 = vcmp.lt.f32.partialorder %v4671_v55, 0.0004427343 }
 0x939   : > { %v4664_v46 = vsel %vm4663_vm5, %v4661_v17, %v4658_v8 }
 0x93a   : > { %v4556_v61 = vpop.f32.mrf.mxu0  ;;  %v4776_v35 = vsel %vm4584_vm7, %v4549_v19, %v4664_v46  ;;  %v4670_v54 = vmul.f32 %v7472_v11, %v4669_v4 }
 0x93b   : > { %v9631_v60 = vadd.f32 %v9614_v51, %v4556_v61  ;;  %v4790_v14 = vpack.c.bf16 %v4776_v35, %v4775_v26 }
 0x93d   : > { %v7476_v13 = vpop.eup %7475  ;;  %v4609_v29 = vmul.f32 1.442695, %v9631_v60  ;;  %4810 = vmatmul.bf16.gmra.mxu1 %v4790_v14  ;;  %vm4587_vm14 = vcmp.gt.f32.partialorder %v9631_v60, 20.0 }
 0x93e   : > { %v4674_v21 = vadd.f32 1.0, %v7476_v13  ;;  %v4677_v27 = vmul.f32 -0.5, %v7476_v13  ;;  %v7478_v2 = vpop.eup %7477  ;;  %v4680_v3 = vand.u32 2147483647, %v7476_v13 }
 0x93f   : > { %7479 = vpow2.f32 %v4609_v29  ;;  %v4667_v19 = vmul.f32 0.6931472, %v7478_v2 }
 0x940   : > { %7481 = vlog2.f32 %v4674_v21  ;;  %v4678_v7 = vadd.f32 1.0, %v4677_v27  ;;  %vm4681_vm9 = vcmp.lt.f32.partialorder %v4680_v3, 0.0004427343 }
 0x941   : > { %v4673_v25 = vsel %vm4672_vm8, %v4670_v54, %v4667_v19 }
 0x942   : > { %v4558_v41 = vpop.f32.mrf.mxu0  ;;  %v4679_v17 = vmul.f32 %v7476_v13, %v4678_v7  ;;  %v4777_v26 = vsel %vm4585_vm10, %v9624_v57, %v4673_v25 }
 0x943   : > { %v4559_v58 = vadd.f32 %v9614_v51, %v4558_v41 }
 0x945   : > { %v7480_v1 = vpop.eup %7479  ;;  %v4611_v0 = vmul.f32 1.442695, %v4559_v58  ;;  %vm4588_vm15 = vcmp.gt.f32.partialorder %v4559_v58, 20.0 }
 0x946   : > { %v7482_v38 = vpop.eup %7481  ;;  %v4683_v15 = vadd.f32 1.0, %v7480_v1  ;;  %v4686_v21 = vmul.f32 -0.5, %v7480_v1  ;;  %v4689_v55 = vand.u32 2147483647, %v7480_v1 }
 0x947   : > { %7483 = vpow2.f32 %v4611_v0  ;;  %v4676_v8 = vmul.f32 0.6931472, %v7482_v38 }
 0x948   : > { %7485 = vlog2.f32 %v4683_v15  ;;  %v4687_v4 = vadd.f32 1.0, %v4686_v21  ;;  %vm4690_vm12 = vcmp.lt.f32.partialorder %v4689_v55, 0.0004427343 }
 0x949   : > { %v4682_v46 = vsel %vm4681_vm9, %v4679_v17, %v4676_v8 }
 0x94a   : > { %v4561_v61 = vpop.f32.mrf.mxu0  ;;  %v4778_v35 = vsel %vm4586_vm11, %v4554_v47, %v4682_v46  ;;  %v4688_v54 = vmul.f32 %v7480_v1, %v4687_v4 }
 0x94b   : > { %v9638_v14 = vadd.f32 %v9614_v51, %v4561_v61  ;;  %v4791_v11 = vpack.c.bf16 %v4778_v35, %v4777_v26 }
 0x94d   : > { %v7484_v29 = vpop.eup %7483  ;;  %v4613_v59 = vmul.f32 1.442695, %v9638_v14  ;;  %4815 = vmatmul.bf16.gmra.mxu1 %v4791_v11  ;;  %vm4589_vm2 = vcmp.gt.f32.partialorder %v9638_v14, 20.0 }
 0x94e   : > { %v4692_v13 = vadd.f32 1.0, %v7484_v29  ;;  %v4695_v27 = vmul.f32 -0.5, %v7484_v29  ;;  %v7486_v2 = vpop.eup %7485  ;;  %v4698_v7 = vand.u32 2147483647, %v7484_v29 }
 0x94f   : > { %7487 = vpow2.f32 %v4613_v59  ;;  %v4685_v47 = vmul.f32 0.6931472, %v7486_v2 }
 0x950   : > { %7489 = vlog2.f32 %v4692_v13  ;;  %v4696_v19 = vadd.f32 1.0, %v4695_v27  ;;  %vm4699_vm13 = vcmp.lt.f32.partialorder %v4698_v7, 0.0004427343 }
 0x951   : > { %v4691_v25 = vsel %vm4690_vm12, %v4688_v54, %v4685_v47 }
 0x952   : > { %v4563_v41 = vpop.f32.mrf.mxu0  ;;  %v4697_v17 = vmul.f32 %v7484_v29, %v4696_v19  ;;  %v4779_v26 = vsel %vm4587_vm14, %v9631_v60, %v4691_v25 }
 0x953   : > { %v4564_v57 = vadd.f32 %v9614_v51, %v4563_v41 }
 0x955   : > { %v7488_v3 = vpop.eup %7487  ;;  %v4615_v0 = vmul.f32 1.442695, %v4564_v57  ;;  %vm4590_vm3 = vcmp.gt.f32.partialorder %v4564_v57, 20.0 }
 0x956   : > { %v7490_v38 = vpop.eup %7489  ;;  %v4701_v15 = vadd.f32 1.0, %v7488_v3  ;;  %v4704_v13 = vmul.f32 -0.5, %v7488_v3  ;;  %v4707_v55 = vand.u32 2147483647, %v7488_v3 }
 0x957   : > { %7491 = vpow2.f32 %v4615_v0  ;;  %v4694_v8 = vmul.f32 0.6931472, %v7490_v38 }
 0x958   : > { %7493 = vlog2.f32 %v4701_v15  ;;  %v4705_v4 = vadd.f32 1.0, %v4704_v13  ;;  %vm4708_vm0 = vcmp.lt.f32.partialorder %v4707_v55, 0.0004427343 }
 0x959   : > { %v4700_v46 = vsel %vm4699_vm13, %v4697_v17, %v4694_v8 }
 0x95a   : > { %v4566_v61 = vpop.f32.mrf.mxu0  ;;  %v4780_v35 = vsel %vm4588_vm15, %v4559_v58, %v4700_v46  ;;  %v4706_v54 = vmul.f32 %v7488_v3, %v4705_v4 }
 0x95b   : > { %v9645_v11 = vadd.f32 %v9614_v51, %v4566_v61  ;;  %v4792_v1 = vpack.c.bf16 %v4780_v35, %v4779_v26 }
 0x95d   : > { %v7492_v59 = vpop.eup %7491  ;;  %v4617_v21 = vmul.f32 1.442695, %v9645_v11  ;;  %4820 = vmatmul.bf16.gmra.mxu1 %v4792_v1  ;;  %vm4591_vm6 = vcmp.gt.f32.partialorder %v9645_v11, 20.0 }
 0x95e   : > { %v4710_v29 = vadd.f32 1.0, %v7492_v59  ;;  %v4713_v27 = vmul.f32 -0.5, %v7492_v59  ;;  %v7494_v2 = vpop.eup %7493  ;;  %v4716_v19 = vand.u32 2147483647, %v7492_v59 }
 0x95f   : > { %7495 = vpow2.f32 %v4617_v21  ;;  %v4703_v58 = vmul.f32 0.6931472, %v7494_v2 }
 0x960   : > { %7497 = vlog2.f32 %v4710_v29  ;;  %v4714_v47 = vadd.f32 1.0, %v4713_v27  ;;  %vm4717_vm1 = vcmp.lt.f32.partialorder %v4716_v19, 0.0004427343 }
 0x961   : > { %v4709_v25 = vsel %vm4708_vm0, %v4706_v54, %v4703_v58 }
 0x962   : > { %v4568_v41 = vpop.f32.mrf.mxu0  ;;  %v4715_v17 = vmul.f32 %v7492_v59, %v4714_v47  ;;  %v4781_v26 = vsel %vm4589_vm2, %v9638_v14, %v4709_v25 }
 0x963   : > { %v4569_v60 = vadd.f32 %v9614_v51, %v4568_v41 }
 0x965   : > { %v7496_v7 = vpop.eup %7495  ;;  %v4619_v0 = vmul.f32 1.442695, %v4569_v60  ;;  %vm4592_vm7 = vcmp.gt.f32.partialorder %v4569_v60, 20.0 }
 0x966   : > { %v7498_v38 = vpop.eup %7497  ;;  %v4719_v15 = vadd.f32 1.0, %v7496_v7  ;;  %v4722_v29 = vmul.f32 -0.5, %v7496_v7  ;;  %v4725_v55 = vand.u32 2147483647, %v7496_v7 }
 0x967   : > { %7499 = vpow2.f32 %v4619_v0  ;;  %v4712_v8 = vmul.f32 0.6931472, %v7498_v38 }
 0x968   : > { %7501 = vlog2.f32 %v4719_v15  ;;  %v4723_v4 = vadd.f32 1.0, %v4722_v29  ;;  %vm4726_vm4 = vcmp.lt.f32.partialorder %v4725_v55, 0.0004427343 }
 0x969   : > { %v4718_v46 = vsel %vm4717_vm1, %v4715_v17, %v4712_v8 }
 0x96a   : > { %v4571_v61 = vpop.f32.mrf.mxu0  ;;  %v4782_v35 = vsel %vm4590_vm3, %v4564_v57, %v4718_v46  ;;  %v4724_v54 = vmul.f32 %v7496_v7, %v4723_v4 }
 0x96b   : > { %v9652_v1 = vadd.f32 %v9614_v51, %v4571_v61  ;;  %v4793_v3 = vpack.c.bf16 %v4782_v35, %v4781_v26 }
 0x96d   : > { %v7500_v21 = vpop.eup %7499  ;;  %v4621_v13 = vmul.f32 1.442695, %v9652_v1  ;;  %4825 = vmatmul.bf16.gmra.mxu1 %v4793_v3  ;;  %vm4593_vm10 = vcmp.gt.f32.partialorder %v9652_v1, 20.0 }
 0x96e   : > { %v4728_v59 = vadd.f32 1.0, %v7500_v21  ;;  %v4731_v27 = vmul.f32 -0.5, %v7500_v21  ;;  %v7502_v2 = vpop.eup %7501  ;;  %v4734_v47 = vand.u32 2147483647, %v7500_v21 }
 0x96f   : > { %7503 = vpow2.f32 %v4621_v13  ;;  %v4721_v57 = vmul.f32 0.6931472, %v7502_v2 }
 0x970   : > { %7505 = vlog2.f32 %v4728_v59  ;;  %v4732_v58 = vadd.f32 1.0, %v4731_v27  ;;  %vm4735_vm5 = vcmp.lt.f32.partialorder %v4734_v47, 0.0004427343 }
 0x971   : > { %v4727_v25 = vsel %vm4726_vm4, %v4724_v54, %v4721_v57 }
 0x972   : > { %v4573_v41 = vpop.f32.mrf.mxu0  ;;  %v4733_v17 = vmul.f32 %v7500_v21, %v4732_v58  ;;  %v4783_v26 = vsel %vm4591_vm6, %v9645_v11, %v4727_v25 }
 0x973   : > { %v4574_v14 = vadd.f32 %v9614_v51, %v4573_v41 }
 0x975   : > { %v7504_v19 = vpop.eup %7503  ;;  %v4623_v0 = vmul.f32 1.442695, %v4574_v14  ;;  %vm4594_vm11 = vcmp.gt.f32.partialorder %v4574_v14, 20.0 }
 0x976   : > { %v7506_v38 = vpop.eup %7505  ;;  %v4737_v15 = vadd.f32 1.0, %v7504_v19  ;;  %v4740_v59 = vmul.f32 -0.5, %v7504_v19  ;;  %v4743_v55 = vand.u32 2147483647, %v7504_v19 }
 0x977   : > { %7507 = vpow2.f32 %v4623_v0  ;;  %v4730_v8 = vmul.f32 0.6931472, %v7506_v38 }
 0x978   : > { %7509 = vlog2.f32 %v4737_v15  ;;  %v4741_v4 = vadd.f32 1.0, %v4740_v59  ;;  %vm4744_vm8 = vcmp.lt.f32.partialorder %v4743_v55, 0.0004427343 }
 0x979   : > { %v4736_v46 = vsel %vm4735_vm5, %v4733_v17, %v4730_v8 }
 0x97a   : > { %v4576_v61 = vpop.f32.mrf.mxu0  ;;  %v4784_v35 = vsel %vm4592_vm7, %v4569_v60, %v4736_v46  ;;  %v4742_v54 = vmul.f32 %v7504_v19, %v4741_v4 }
 0x97b   : > { %v4577_v3 = vadd.f32 %v9614_v51, %v4576_v61  ;;  %v4794_v7 = vpack.c.bf16 %v4784_v35, %v4783_v26 }
 0x97d   : > { %v7508_v13 = vpop.eup %7507  ;;  %v4625_v29 = vmul.f32 1.442695, %v4577_v3  ;;  %4830 = vmatmul.bf16.gmra.mxu1 %v4794_v7  ;;  %vm4595_vm14 = vcmp.gt.f32.partialorder %v4577_v3, 20.0 }
 0x97e   : > { %v4746_v27 = vadd.f32 1.0, %v7508_v13  ;;  %v4749_v21 = vmul.f32 -0.5, %v7508_v13  ;;  %v7510_v2 = vpop.eup %7509  ;;  %v4752_v58 = vand.u32 2147483647, %v7508_v13 }
 0x97f   : > { %7511 = vpow2.f32 %v4625_v29  ;;  %v4739_v11 = vmul.f32 0.6931472, %v7510_v2 }
 0x980   : > { %7513 = vlog2.f32 %v4746_v27  ;;  %v4750_v60 = vadd.f32 1.0, %v4749_v21  ;;  %vm4753_vm9 = vcmp.lt.f32.partialorder %v4752_v58, 0.0004427343 }
 0x981   : > { %v4745_v25 = vsel %vm4744_vm8, %v4742_v54, %v4739_v11 }
 0x982   : > { %v4578_v41 = vpop.f32.mrf.mxu0  ;;  %v4751_v17 = vmul.f32 %v7508_v13, %v4750_v60 }
 0x983   : > { %v4579_v57 = vadd.f32 %v9614_v51, %v4578_v41  ;;  %v4785_v51 = vsel %vm4593_vm10, %v9652_v1, %v4745_v25  ;;  %v4846_v25 = vsub.f32 %v8839_v23, %v9295_v12 }
 0x985   : > { %v7512_v47 = vpop.eup %7511  ;;  %v4627_v0 = vmul.f32 1.442695, %v4579_v57  ;;  %vm4596_vm15 = vcmp.gt.f32.partialorder %v4579_v57, 20.0 }
 0x986   : > { %v7514_v38 = vpop.eup %7513  ;;  %v4755_v15 = vadd.f32 1.0, %v7512_v47  ;;  %v4758_v19 = vmul.f32 -0.5, %v7512_v47  ;;  %v4761_v21 = vand.u32 2147483647, %v7512_v47 }
 0x987   : > { %7515 = vpow2.f32 %v4627_v0  ;;  %v4748_v8 = vmul.f32 0.6931472, %v7514_v38 }
 0x988   : > { %7517 = vlog2.f32 %v4755_v15  ;;  %v4759_v27 = vadd.f32 1.0, %v4758_v19  ;;  %vm4762_vm12 = vcmp.lt.f32.partialorder %v4761_v21, 0.0004427343  ;;  %v9665_v15 = vld [vmem:[%s10128_s11] ss:$0 sm:$0xff] }
 0x989   : > { %v4754_v46 = vsel %vm4753_vm9, %v4751_v17, %v4748_v8 }
 0x98a   : > { %v4786_v61 = vsel %vm4594_vm11, %v4574_v14, %v4754_v46  ;;  %v4760_v41 = vmul.f32 %v7512_v47, %v4759_v27  ;;  %v4847_v46 = vsub.f32 %v8848_v10, %v9300_v6 }
 0x98b   : > { %v4795_v26 = vpack.c.bf16 %v4786_v61, %v4785_v51  ;;  %v7921_v51 = vld [vmem:[#allocation2 + $0x30] sm:$0xff] }
 0x98d   : > { %v7516_v35 = vpop.eup %7515  ;;  %4835 = vmatmul.bf16.gmra.mxu1 %v4795_v26 }
 0x98e   : > { %v4764_v7 = vadd.f32 1.0, %v7516_v35  ;;  %v4767_v29 = vmul.f32 -0.5, %v7516_v35  ;;  %v7518_v59 = vpop.eup %7517  ;;  %v4770_v4 = vand.u32 2147483647, %v7516_v35 }
 0x98f   : > { %v4757_v13 = vmul.f32 0.6931472, %v7518_v59 }
 0x990   : > { %7519 = vlog2.f32 %v4764_v7  ;;  %v4768_v2 = vadd.f32 1.0, %v4767_v29  ;;  %vm4771_vm13 = vcmp.lt.f32.partialorder %v4770_v4, 0.0004427343  ;;  %v7922_v7 = vld [vmem:[#allocation2] sm:$0xff] }
 0x991   : > { %v4763_v11 = vsel %vm4762_vm12, %v4760_v41, %v4757_v13  ;;  %v4848_v13 = vsub.f32 %v8857_v43, %v9307_v30 }
 0x992   : > { %v4769_v14 = vmul.f32 %v7516_v35, %v4768_v2  ;;  %v4787_v58 = vsel %vm4595_vm14, %v4577_v3, %v4763_v11 }
 0x996   : > { %v7520_v55 = vpop.eup %7519 }
 0x997   : > { %v4766_v1 = vmul.f32 0.6931472, %v7520_v55 }
 0x999   : > { %v4772_v60 = vsel %vm4771_vm13, %v4769_v14, %v4766_v1 }
 0x99a   : > { %v4788_v0 = vsel %vm4596_vm15, %v4579_v57, %v4772_v60  ;;  %v4849_v60 = vsub.f32 %v8867_v20, %v9315_v53 }
 0x99b   : > { %v4796_v54 = vpack.c.bf16 %v4788_v0, %v4787_v58  ;;  %v7923_v58 = vld [vmem:[#allocation2 + $0x58] sm:$0xff] }
 0x99d   : > { %4840 = vmatmul.bf16.gmra.mxu1 %v4796_v54 }
 0x9aa   : > { %v4806_v38 = vpop.f32.mrf.mxu1 }
 0x9ab   : > { %v9668_v47 = vadd.f32 %v9665_v15, %v4806_v38 }
 0x9ad   : > { %v4862_v8 = vadd.f32 %v4846_v25, %v9668_v47  ;;  %v7924_v25 = vld [vmem:[#allocation2 + $0x18] sm:$0xff] }
 0x9af   : > { %v4878_v17 = vmul.f32 %v4862_v8, %v9287_v36 }
 0x9b1   : > { %v4894_v61 = vadd.f32 %v7921_v51, %v4878_v17  ;;  %v4850_v51 = vsub.f32 %v8882_v45, %v9328_v18 }
 0x9b2   : > { %v4808_v3 = vpop.f32.mrf.mxu1 }
 0x9b3   : > { %v9675_v57 = vadd.f32 %v9665_v15, %v4808_v3  ;;  %v4910_v19 = vpack.c.bf16 %v4894_v61, %v4894_v61 }
 0x9b5   : > { %v4863_v26 = vadd.f32 %v4847_v46, %v9675_v57  ;;  %v4942_v2 = vunpack.c.l.b16 %v4910_v19 }
 0x9b7   : > { %v4879_v35 = vmul.f32 %v4863_v26, %v9287_v36 }
 0x9b9   : > { %v4895_v29 = vadd.f32 %v7922_v7, %v4879_v35 }
 0x9ba   : > { %v4811_v59 = vpop.f32.mrf.mxu1 }
 0x9bb   : > { %v4911_v27 = vpack.c.bf16 %v4895_v29, %v4895_v29  ;;  %v9682_v21 = vadd.f32 %v9665_v15, %v4811_v59 }
 0x9bd   : > { %v4943_v4 = vunpack.c.l.b16 %v4911_v27  ;;  %v4864_v41 = vadd.f32 %v4848_v13, %v9682_v21  ;;  %v4851_v13 = vsub.f32 %v8895_v62, %v9339_v44 }
 0x9bf   : > { %v4958_v55 = vpack.c.b16 %v4943_v4, %v4942_v2  ;;  %v4880_v11 = vmul.f32 %v4864_v41, %v9287_v36  ;;  %v7925_v2 = vld [vmem:[#allocation2 + $0x50] sm:$0xff] }
 0x9c1   : > { %4982 = vmatmul.bf16.vlgmr.msra.gmra.mxu2 %v4958_v55  ;;  %5568 = vmatmul.bf16.vlgmr.msrb.gmra.mxu0 %v4958_v55  ;;  %v4896_v0 = vadd.f32 %v7923_v58, %v4880_v11  ;;  %v7926_v11 = vld [vmem:[#allocation2 + $0x68] sm:$0xff] }
 0x9c2   : > { %v4813_v1 = vpop.f32.mrf.mxu1 }
 0x9c3   : > { %v9689_v14 = vadd.f32 %v9665_v15, %v4813_v1  ;;  %v4912_v17 = vpack.c.bf16 %v4896_v0, %v4896_v0 }
 0x9c5   : > { %v4865_v54 = vadd.f32 %v4849_v60, %v9689_v14  ;;  %v4944_v35 = vunpack.c.l.b16 %v4912_v17 }
 0x9c7   : > { %v4881_v38 = vmul.f32 %v4865_v54, %v9287_v36  ;;  %v4852_v54 = vsub.f32 %v8910_v31, %v9352_v37 }
 0x9c9   : > { %v4897_v8 = vadd.f32 %v7924_v25, %v4881_v38 }
 0x9ca   : > { %v4816_v3 = vpop.f32.mrf.mxu1 }
 0x9cb   : > { %v9696_v46 = vadd.f32 %v9665_v15, %v4816_v3  ;;  %v4913_v61 = vpack.c.bf16 %v4897_v8, %v4897_v8 }
 0x9cd   : > { %v4866_v26 = vadd.f32 %v4850_v51, %v9696_v46  ;;  %v4945_v19 = vunpack.c.l.b16 %v4913_v61 }
 0x9cf   : > { %v4959_v7 = vpack.c.b16 %v4945_v19, %v4944_v35  ;;  %v4882_v29 = vmul.f32 %v4866_v26, %v9287_v36  ;;  %v4853_v35 = vsub.f32 %v8920_v32, %v9360_v56  ;;  %v7927_v19 = vld [vmem:[#allocation2 + $0x8] sm:$0xff] }
 0x9d1   : > { %4987 = vmatmul.bf16.gmra.mxu2 %v4959_v7  ;;  %5573 = vmatmul.bf16.gmra.mxu0 %v4959_v7  ;;  %v4898_v4 = vadd.f32 %v7925_v2, %v4882_v29 }
 0x9d2   : > { %v4818_v59 = vpop.f32.mrf.mxu1 }
 0x9d3   : > { %v9703_v27 = vadd.f32 %v9665_v15, %v4818_v59  ;;  %v4914_v60 = vpack.c.bf16 %v4898_v4, %v4898_v4 }
 0x9d5   : > { %v4867_v41 = vadd.f32 %v4851_v13, %v9703_v27  ;;  %v4946_v8 = vunpack.c.l.b16 %v4914_v60  ;;  %v7928_v13 = vld [vmem:[#allocation2 + $0x48] sm:$0xff] }
 0x9d7   : > { %v4883_v55 = vmul.f32 %v4867_v41, %v9287_v36 }
 0x9d9   : > { %v4899_v1 = vadd.f32 %v7926_v11, %v4883_v55  ;;  %v4854_v11 = vsub.f32 %v8929_v49, %v9367_v5 }
 0x9da   : > { %v4821_v58 = vpop.f32.mrf.mxu1 }
 0x9db   : > { %v9710_v0 = vadd.f32 %v9665_v15, %v4821_v58  ;;  %v4915_v38 = vpack.c.bf16 %v4899_v1, %v4899_v1 }
 0x9dd   : > { %v4868_v25 = vadd.f32 %v4852_v54, %v9710_v0  ;;  %v4947_v17 = vunpack.c.l.b16 %v4915_v38 }
 0x9df   : > { %v4960_v3 = vpack.c.b16 %v4947_v17, %v4946_v8  ;;  %v4884_v51 = vmul.f32 %v4868_v25, %v9287_v36 }
 0x9e1   : > { %4992 = vmatmul.bf16.gmra.mxu2 %v4960_v3  ;;  %5578 = vmatmul.bf16.gmra.mxu0 %v4960_v3  ;;  %v4900_v7 = vadd.f32 %v7927_v19, %v4884_v51  ;;  %v4855_v3 = vsub.f32 %v8936_v52, %v9372_v28  ;;  %v7929_v51 = vld [vmem:[#allocation2 + $0x40] sm:$0xff] }
 0x9e2   : > { %v4823_v61 = vpop.f32.mrf.mxu1 }
 0x9e3   : > { %v9717_v26 = vadd.f32 %v9665_v15, %v4823_v61  ;;  %v4916_v4 = vpack.c.bf16 %v4900_v7, %v4900_v7  ;;  %v7930_v7 = vld [vmem:[#allocation2 + $0x20] sm:$0xff] }
 0x9e5   : > { %v4869_v29 = vadd.f32 %v4853_v35, %v9717_v26  ;;  %v4948_v58 = vunpack.c.l.b16 %v4916_v4  ;;  %v4856_v4 = vsub.f32 %v8945_v39, %v9379_v22 }
 0x9e7   : > { %v4885_v59 = vmul.f32 %v4869_v29, %v9287_v36 }
 0x9e9   : > { %v4901_v2 = vadd.f32 %v7928_v13, %v4885_v59 }
 0x9ea   : > { %v4826_v41 = vpop.f32.mrf.mxu1 }
 0x9eb   : > { %v9724_v55 = vadd.f32 %v9665_v15, %v4826_v41  ;;  %v4917_v1 = vpack.c.bf16 %v4901_v2, %v4901_v2 }
 0x9ed   : > { %v4870_v60 = vadd.f32 %v4854_v11, %v9724_v55  ;;  %v4949_v54 = vunpack.c.l.b16 %v4917_v1 }
 0x9ef   : > { %v4961_v38 = vpack.c.b16 %v4949_v54, %v4948_v58  ;;  %v4886_v25 = vmul.f32 %v4870_v60, %v9287_v36 }
 0x9f1   : > { %4997 = vmatmul.bf16.gmra.mxu2 %v4961_v38  ;;  %5583 = vmatmul.bf16.gmra.mxu0 %v4961_v38  ;;  %v4902_v61 = vadd.f32 %v7929_v51, %v4886_v25 }
 0x9f2   : > { %v4828_v8 = vpop.f32.mrf.mxu1 }
 0x9f3   : > { %v9731_v17 = vadd.f32 %v9665_v15, %v4828_v8  ;;  %v4918_v59 = vpack.c.bf16 %v4902_v61, %v4902_v61  ;;  %v4857_v8 = vsub.f32 %v8952_v63, %v9384_v48 }
 0x9f5   : > { %v4871_v35 = vadd.f32 %v4855_v3, %v9731_v17  ;;  %v4950_v1 = vunpack.c.l.b16 %v4918_v59  ;;  %v7931_v3 = vld [vmem:[#allocation2 + $0x10] sm:$0xff] }
 0x9f7   : > { %v4887_v19 = vmul.f32 %v4871_v35, %v9287_v36 }
 0x9f9   : > { %v4903_v29 = vadd.f32 %v7930_v7, %v4887_v19  ;;  %v7932_v19 = vld [vmem:[#allocation2 + $0x38] sm:$0xff] }
 0x9fa   : > { %v4831_v13 = vpop.f32.mrf.mxu1 }
 0x9fb   : > { %v9738_v2 = vadd.f32 %v9665_v15, %v4831_v13  ;;  %v4919_v41 = vpack.c.bf16 %v4903_v29, %v4903_v29 }
 0x9fd   : > { %v4872_v11 = vadd.f32 %v4856_v4, %v9738_v2  ;;  %v4951_v60 = vunpack.c.l.b16 %v4919_v41  ;;  %v4858_v4 = vsub.f32 %v8961_v9, %v9391_v42 }
 0x9ff   : > { %v4962_v58 = vpack.c.b16 %v4951_v60, %v4950_v1  ;;  %v4888_v54 = vmul.f32 %v4872_v11, %v9287_v36 }
 0xa01   : > { %5002 = vmatmul.bf16.gmra.mxu2 %v4962_v58  ;;  %5588 = vmatmul.bf16.gmra.mxu0 %v4962_v58  ;;  %v4904_v51 = vadd.f32 %v7931_v3, %v4888_v54  ;;  %v4859_v3 = vsub.f32 %v8968_v16, %v9396_v40 }
 0xa02   : > { %v4833_v38 = vpop.f32.mrf.mxu1 }
 0xa03   : > { %v9745_v25 = vadd.f32 %v9665_v15, %v4833_v38  ;;  %v4920_v29 = vpack.c.bf16 %v4904_v51, %v4904_v51  ;;  %v7933_v51 = vld [vmem:[#allocation2 + $0x60] sm:$0xff] }
 0xa05   : > { %v4873_v61 = vadd.f32 %v4857_v8, %v9745_v25  ;;  %v4952_v1 = vunpack.c.l.b16 %v4920_v29 }
 0xa07   : > { %v4889_v35 = vmul.f32 %v4873_v61, %v9287_v36 }
 0xa09   : > { %v4905_v7 = vadd.f32 %v7932_v19, %v4889_v35 }
 0xa0a   : > { %v4836_v59 = vpop.f32.mrf.mxu1 }
 0xa0b   : > { %v9752_v13 = vadd.f32 %v9665_v15, %v4836_v59  ;;  %v4921_v41 = vpack.c.bf16 %v4905_v7, %v4905_v7  ;;  %v7934_v7 = vld [vmem:[#allocation2 + $0x70] sm:$0xff] }
 0xa0d   : > { %10163 = vst [vmem:[#allocation24_spill] sm:$0xff] %v9752_v13  ;;  %v4874_v11 = vadd.f32 %v4858_v4, %v9752_v13  ;;  %v4953_v60 = vunpack.c.l.b16 %v4921_v41 }
 0xa0f   : > { %v4963_v58 = vpack.c.b16 %v4953_v60, %v4952_v1  ;;  %v4890_v54 = vmul.f32 %v4874_v11, %v9287_v36  ;;  %v4860_v11 = vsub.f32 %v8977_v50, %v9403_v24 }
 0xa11   : > { %5007 = vmatmul.bf16.gmra.mxu2 %v4963_v58  ;;  %5593 = vmatmul.bf16.gmra.mxu0 %v4963_v58  ;;  %v4906_v61 = vadd.f32 %v7933_v51, %v4890_v54 }
 0xa12   : > { %v4838_v38 = vpop.f32.mrf.mxu1 }
 0xa13   : > { %v9759_v8 = vadd.f32 %v9665_v15, %v4838_v38  ;;  %v4922_v59 = vpack.c.bf16 %v4906_v61, %v4906_v61 }
 0xa15   : > { %10164 = vst [vmem:[#allocation25_spill] sm:$0xff] %v9759_v8  ;;  %v4875_v35 = vadd.f32 %v4859_v3, %v9759_v8  ;;  %v4954_v58 = vunpack.c.l.b16 %v4922_v59  ;;  %v7936_v59 = vld [vmem:[#allocation2 + $0x28] sm:$0xff] }
 0xa17   : > { %v4891_v19 = vmul.f32 %v4875_v35, %v9287_v36  ;;  %v4861_v35 = vsub.f32 %v8984_v33, %v9408_v34 }
 0xa19   : > { %v4907_v29 = vadd.f32 %v7934_v7, %v4891_v19  ;;  %v7935_v19 = vld [vmem:[#allocation2 + $0x78] sm:$0xff] }
 0xa1a   : > { %v4841_v4 = vpop.f32.mrf.mxu1 }
 0xa1b   : > { %v9766_v41 = vadd.f32 %v9665_v15, %v4841_v4  ;;  %v4923_v1 = vpack.c.bf16 %v4907_v29, %v4907_v29 }
 0xa1d   : > { %10165 = vst [vmem:[#allocation26_spill] sm:$0xff] %v9766_v41  ;;  %v4876_v60 = vadd.f32 %v4860_v11, %v9766_v41  ;;  %v4955_v38 = vunpack.c.l.b16 %v4923_v1 }
 0xa1f   : > { %v4964_v54 = vpack.c.b16 %v4955_v38, %v4954_v58  ;;  %v4892_v3 = vmul.f32 %v4876_v60, %v9287_v36 }
 0xa21   : > { %5012 = vmatmul.bf16.gmra.mxu2 %v4964_v54  ;;  %5598 = vmatmul.bf16.gmra.mxu0 %v4964_v54  ;;  %v4908_v7 = vadd.f32 %v7935_v19, %v4892_v3 }
 0xa22   : > { %v4843_v51 = vpop.f32.mrf.mxu1 }
 0xa23   : > { %v9773_v61 = vadd.f32 %v9665_v15, %v4843_v51  ;;  %v4924_v1 = vpack.c.bf16 %v4908_v7, %v4908_v7  ;;  %v9782_v51 = vld [vmem:[%s10120_s3] ss:$0 sm:$0xff] }
 0xa25   : > { %10166 = vst [vmem:[#allocation27_spill] sm:$0xff] %v9773_v61  ;;  %v4877_v29 = vadd.f32 %v4861_v35, %v9773_v61  ;;  %v4956_v60 = vunpack.c.l.b16 %v4924_v1 }
 0xa27   : > { %v4893_v4 = vmul.f32 %v4877_v29, %v9287_v36 }
 0xa29   : > { %v4909_v11 = vadd.f32 %v7936_v59, %v4893_v4 }
 0xa2b   : > { %v4925_v58 = vpack.c.bf16 %v4909_v11, %v4909_v11 }
 0xa2d   : > { %v4957_v38 = vunpack.c.l.b16 %v4925_v58 }
 0xa2f   : > { %v4965_v54 = vpack.c.b16 %v4957_v38, %v4956_v60 }
 0xa31   : > { %5017 = vmatmul.bf16.gmra.mxu2 %v4965_v54  ;;  %5603 = vmatmul.bf16.gmra.mxu0 %v4965_v54 }
 0xa44   : > { %v4983_v15 = vpop.f32.mrf.mxu2 }
 0xa45   : > { %v4984_v3 = vadd.f32 %v9782_v51, %v4983_v15 }
 0xa47   : > { %v5039_v35 = vmul.f32 1.442695, %v4984_v3  ;;  %vm5023_vm2 = vcmp.gt.f32.partialorder %v4984_v3, 20.0 }
 0xa49   : > { %7521 = vpow2.f32 %v5039_v35 }
 0xa4c   : > { %v4985_v36 = vpop.f32.mrf.mxu2 }
 0xa4d   : > { %v4986_v19 = vadd.f32 %v9782_v51, %v4985_v36 }
 0xa4f   : > { %v7522_v7 = vpop.eup %7521  ;;  %v5041_v29 = vmul.f32 1.442695, %v4986_v19  ;;  %vm5024_vm3 = vcmp.gt.f32.partialorder %v4986_v19, 20.0 }
 0xa50   : > { %v5071_v4 = vadd.f32 1.0, %v7522_v7  ;;  %v5074_v58 = vmul.f32 -0.5, %v7522_v7  ;;  %v5077_v36 = vand.u32 2147483647, %v7522_v7 }
 0xa51   : > { %7523 = vpow2.f32 %v5041_v29 }
 0xa52   : > { %7525 = vlog2.f32 %v5071_v4  ;;  %v5075_v35 = vadd.f32 1.0, %v5074_v58  ;;  %vm5078_vm0 = vcmp.lt.f32.partialorder %v5077_v36, 0.0004427343 }
 0xa54   : > { %v4988_v59 = vpop.f32.mrf.mxu2 }
 0xa55   : > { %v9787_v11 = vadd.f32 %v9782_v51, %v4988_v59  ;;  %v5076_v59 = vmul.f32 %v7522_v7, %v5075_v35 }
 0xa57   : > { %v7524_v1 = vpop.eup %7523  ;;  %v5043_v60 = vmul.f32 1.442695, %v9787_v11  ;;  %vm5025_vm6 = vcmp.gt.f32.partialorder %v9787_v11, 20.0 }
 0xa58   : > { %v5080_v38 = vadd.f32 1.0, %v7524_v1  ;;  %v5083_v54 = vmul.f32 -0.5, %v7524_v1  ;;  %v7526_v15 = vpop.eup %7525  ;;  %v5086_v4 = vand.u32 2147483647, %v7524_v1 }
 0xa59   : > { %7527 = vpow2.f32 %v5043_v60  ;;  %v5073_v50 = vmul.f32 0.6931472, %v7526_v15 }
 0xa5a   : > { %7529 = vlog2.f32 %v5080_v38  ;;  %v5084_v61 = vadd.f32 1.0, %v5083_v54  ;;  %vm5087_vm1 = vcmp.lt.f32.partialorder %v5086_v4, 0.0004427343 }
 0xa5b   : > { %v5079_v9 = vsel %vm5078_vm0, %v5076_v59, %v5073_v50 }
 0xa5c   : > { %v4990_v33 = vpop.f32.mrf.mxu2  ;;  %v5085_v40 = vmul.f32 %v7524_v1, %v5084_v61  ;;  %v5215_v60 = vsel %vm5023_vm2, %v4984_v3, %v5079_v9 }
 0xa5d   : > { %v4991_v29 = vadd.f32 %v9782_v51, %v4990_v33 }
 0xa5f   : > { %v7528_v34 = vpop.eup %7527  ;;  %v5045_v16 = vmul.f32 1.442695, %v4991_v29  ;;  %vm5026_vm7 = vcmp.gt.f32.partialorder %v4991_v29, 20.0 }
 0xa60   : > { %v7530_v41 = vpop.eup %7529  ;;  %v5089_v24 = vadd.f32 1.0, %v7528_v34  ;;  %v5092_v50 = vmul.f32 -0.5, %v7528_v34  ;;  %v5095_v9 = vand.u32 2147483647, %v7528_v34 }
 0xa61   : > { %v5082_v8 = vmul.f32 0.6931472, %v7530_v41  ;;  %7531 = vpow2.f32 %v5045_v16 }
 0xa62   : > { %7533 = vlog2.f32 %v5089_v24  ;;  %v5093_v1 = vadd.f32 1.0, %v5092_v50  ;;  %vm5096_vm4 = vcmp.lt.f32.partialorder %v5095_v9, 0.0004427343 }
 0xa63   : > { %v5088_v58 = vsel %vm5087_vm1, %v5085_v40, %v5082_v8 }
 0xa64   : > { %v5216_v38 = vsel %vm5024_vm3, %v4986_v19, %v5088_v58  ;;  %v4993_v54 = vpop.f32.mrf.mxu2  ;;  %v5094_v59 = vmul.f32 %v7528_v34, %v5093_v1 }
 0xa65   : > { %v5231_v33 = vpack.c.bf16 %v5216_v38, %v5215_v60  ;;  %v9792_v15 = vadd.f32 %v9782_v51, %v4993_v54 }
 0xa67   : > { %v7532_v7 = vpop.eup %7531  ;;  %v5047_v35 = vmul.f32 1.442695, %v9792_v15  ;;  %5247 = vmatmul.bf16.vlgmr.msra.gmra.mxu3 %v5231_v33  ;;  %vm5027_vm10 = vcmp.gt.f32.partialorder %v9792_v15, 20.0 }
 0xa68   : > { %v5098_v41 = vadd.f32 1.0, %v7532_v7  ;;  %v5101_v16 = vmul.f32 -0.5, %v7532_v7  ;;  %v7534_v61 = vpop.eup %7533  ;;  %v5104_v19 = vand.u32 2147483647, %v7532_v7 }
 0xa69   : > { %7535 = vpow2.f32 %v5047_v35  ;;  %v5091_v24 = vmul.f32 0.6931472, %v7534_v61 }
 0xa6a   : > { %7537 = vlog2.f32 %v5098_v41  ;;  %v5102_v3 = vadd.f32 1.0, %v5101_v16  ;;  %vm5105_vm5 = vcmp.lt.f32.partialorder %v5104_v19, 0.0004427343 }
 0xa6b   : > { %v5097_v38 = vsel %vm5096_vm4, %v5094_v59, %v5091_v24 }
 0xa6c   : > { %v4995_v40 = vpop.f32.mrf.mxu2  ;;  %v5103_v33 = vmul.f32 %v7532_v7, %v5102_v3  ;;  %v5217_v41 = vsel %vm5025_vm6, %v9787_v11, %v5097_v38 }
 0xa6d   : > { %v4996_v8 = vadd.f32 %v9782_v51, %v4995_v40 }
 0xa6f   : > { %v7536_v36 = vpop.eup %7535  ;;  %v5049_v4 = vmul.f32 1.442695, %v4996_v8  ;;  %vm5028_vm11 = vcmp.gt.f32.partialorder %v4996_v8, 20.0 }
 0xa70   : > { %v7538_v58 = vpop.eup %7537  ;;  %v5107_v60 = vadd.f32 1.0, %v7536_v36  ;;  %v5110_v9 = vmul.f32 -0.5, %v7536_v36  ;;  %v5113_v59 = vand.u32 2147483647, %v7536_v36 }
 0xa71   : > { %7539 = vpow2.f32 %v5049_v4  ;;  %v5100_v54 = vmul.f32 0.6931472, %v7538_v58 }
 0xa72   : > { %7541 = vlog2.f32 %v5107_v60  ;;  %v5111_v19 = vadd.f32 1.0, %v5110_v9  ;;  %vm5114_vm8 = vcmp.lt.f32.partialorder %v5113_v59, 0.0004427343 }
 0xa73   : > { %v5106_v35 = vsel %vm5105_vm5, %v5103_v33, %v5100_v54 }
 0xa74   : > { %v4998_v50 = vpop.f32.mrf.mxu2  ;;  %v5218_v16 = vsel %vm5026_vm7, %v4991_v29, %v5106_v35  ;;  %v5112_v33 = vmul.f32 %v7536_v36, %v5111_v19 }
 0xa75   : > { %v9799_v61 = vadd.f32 %v9782_v51, %v4998_v50  ;;  %v5232_v34 = vpack.c.bf16 %v5218_v16, %v5217_v41 }
 0xa77   : > { %v7540_v1 = vpop.eup %7539  ;;  %v5051_v40 = vmul.f32 1.442695, %v9799_v61  ;;  %5252 = vmatmul.bf16.gmra.mxu3 %v5232_v34  ;;  %vm5029_vm14 = vcmp.gt.f32.partialorder %v9799_v61, 20.0 }
 0xa78   : > { %v5116_v7 = vadd.f32 1.0, %v7540_v1  ;;  %v5119_v24 = vmul.f32 -0.5, %v7540_v1  ;;  %v7542_v3 = vpop.eup %7541  ;;  %v5122_v60 = vand.u32 2147483647, %v7540_v1 }
 0xa79   : > { %7543 = vpow2.f32 %v5051_v40  ;;  %v5109_v29 = vmul.f32 0.6931472, %v7542_v3 }
 0xa7a   : > { %7545 = vlog2.f32 %v5116_v7  ;;  %v5120_v58 = vadd.f32 1.0, %v5119_v24  ;;  %vm5123_vm9 = vcmp.lt.f32.partialorder %v5122_v60, 0.0004427343 }
 0xa7b   : > { %v5115_v41 = vsel %vm5114_vm8, %v5112_v33, %v5109_v29 }
 0xa7c   : > { %v5000_v4 = vpop.f32.mrf.mxu2  ;;  %v5121_v34 = vmul.f32 %v7540_v1, %v5120_v58  ;;  %v5219_v7 = vsel %vm5027_vm10, %v9792_v15, %v5115_v41 }
 0xa7d   : > { %v5001_v11 = vadd.f32 %v9782_v51, %v5000_v4 }
 0xa7f   : > { %v7544_v38 = vpop.eup %7543  ;;  %v5053_v54 = vmul.f32 1.442695, %v5001_v11  ;;  %vm5030_vm15 = vcmp.gt.f32.partialorder %v5001_v11, 20.0 }
 0xa80   : > { %v7546_v35 = vpop.eup %7545  ;;  %v5125_v50 = vadd.f32 1.0, %v7544_v38  ;;  %v5128_v59 = vmul.f32 -0.5, %v7544_v38  ;;  %v5131_v33 = vand.u32 2147483647, %v7544_v38 }
 0xa81   : > { %7547 = vpow2.f32 %v5053_v54  ;;  %v5118_v16 = vmul.f32 0.6931472, %v7546_v35 }
 0xa82   : > { %7549 = vlog2.f32 %v5125_v50  ;;  %v5129_v60 = vadd.f32 1.0, %v5128_v59  ;;  %vm5132_vm12 = vcmp.lt.f32.partialorder %v5131_v33, 0.0004427343 }
 0xa83   : > { %v5124_v40 = vsel %vm5123_vm9, %v5121_v34, %v5118_v16 }
 0xa84   : > { %v5003_v9 = vpop.f32.mrf.mxu2  ;;  %v5220_v24 = vsel %vm5028_vm11, %v4996_v8, %v5124_v40  ;;  %v5130_v34 = vmul.f32 %v7544_v38, %v5129_v60 }
 0xa85   : > { %v9806_v3 = vadd.f32 %v9782_v51, %v5003_v9  ;;  %v5233_v36 = vpack.c.bf16 %v5220_v24, %v5219_v7 }
 0xa87   : > { %v7548_v19 = vpop.eup %7547  ;;  %v5055_v4 = vmul.f32 1.442695, %v9806_v3  ;;  %5257 = vmatmul.bf16.gmra.mxu3 %v5233_v36  ;;  %vm5031_vm2 = vcmp.gt.f32.partialorder %v9806_v3, 20.0 }
 0xa88   : > { %v5134_v1 = vadd.f32 1.0, %v7548_v19  ;;  %v5137_v29 = vmul.f32 -0.5, %v7548_v19  ;;  %v7550_v58 = vpop.eup %7549  ;;  %v5140_v50 = vand.u32 2147483647, %v7548_v19 }
 0xa89   : > { %7551 = vpow2.f32 %v5055_v4  ;;  %v5127_v8 = vmul.f32 0.6931472, %v7550_v58 }
 0xa8a   : > { %7553 = vlog2.f32 %v5134_v1  ;;  %v5138_v35 = vadd.f32 1.0, %v5137_v29  ;;  %vm5141_vm13 = vcmp.lt.f32.partialorder %v5140_v50, 0.0004427343 }
 0xa8b   : > { %v5133_v7 = vsel %vm5132_vm12, %v5130_v34, %v5127_v8 }
 0xa8c   : > { %v5005_v54 = vpop.f32.mrf.mxu2  ;;  %v5139_v36 = vmul.f32 %v7548_v19, %v5138_v35  ;;  %v5221_v1 = vsel %vm5029_vm14, %v9799_v61, %v5133_v7 }
 0xa8d   : > { %v5006_v15 = vadd.f32 %v9782_v51, %v5005_v54 }
 0xa8f   : > { %v7552_v41 = vpop.eup %7551  ;;  %v5057_v16 = vmul.f32 1.442695, %v5006_v15  ;;  %vm5032_vm3 = vcmp.gt.f32.partialorder %v5006_v15, 20.0 }
 0xa90   : > { %v7554_v40 = vpop.eup %7553  ;;  %v5143_v9 = vadd.f32 1.0, %v7552_v41  ;;  %v5146_v33 = vmul.f32 -0.5, %v7552_v41  ;;  %v5149_v34 = vand.u32 2147483647, %v7552_v41 }
 0xa91   : > { %7555 = vpow2.f32 %v5057_v16  ;;  %v5136_v24 = vmul.f32 0.6931472, %v7554_v40 }
 0xa92   : > { %7557 = vlog2.f32 %v5143_v9  ;;  %v5147_v50 = vadd.f32 1.0, %v5146_v33  ;;  %vm5150_vm0 = vcmp.lt.f32.partialorder %v5149_v34, 0.0004427343 }
 0xa93   : > { %v5142_v4 = vsel %vm5141_vm13, %v5139_v36, %v5136_v24 }
 0xa94   : > { %v5008_v59 = vpop.f32.mrf.mxu2  ;;  %v5222_v29 = vsel %vm5030_vm15, %v5001_v11, %v5142_v4  ;;  %v5148_v36 = vmul.f32 %v7552_v41, %v5147_v50 }
 0xa95   : > { %v9813_v58 = vadd.f32 %v9782_v51, %v5008_v59  ;;  %v5234_v38 = vpack.c.bf16 %v5222_v29, %v5221_v1 }
 0xa97   : > { %v7556_v60 = vpop.eup %7555  ;;  %v5059_v54 = vmul.f32 1.442695, %v9813_v58  ;;  %5262 = vmatmul.bf16.gmra.mxu3 %v5234_v38  ;;  %vm5033_vm6 = vcmp.gt.f32.partialorder %v9813_v58, 20.0 }
 0xa98   : > { %v5152_v19 = vadd.f32 1.0, %v7556_v60  ;;  %v5155_v8 = vmul.f32 -0.5, %v7556_v60  ;;  %v7558_v35 = vpop.eup %7557  ;;  %v5158_v9 = vand.u32 2147483647, %v7556_v60 }
 0xa99   : > { %7559 = vpow2.f32 %v5059_v54  ;;  %v5145_v11 = vmul.f32 0.6931472, %v7558_v35 }
 0xa9a   : > { %7561 = vlog2.f32 %v5152_v19  ;;  %v5156_v40 = vadd.f32 1.0, %v5155_v8  ;;  %vm5159_vm1 = vcmp.lt.f32.partialorder %v5158_v9, 0.0004427343 }
 0xa9b   : > { %v5151_v1 = vsel %vm5150_vm0, %v5148_v36, %v5145_v11 }
 0xa9c   : > { %v5010_v16 = vpop.f32.mrf.mxu2  ;;  %v5157_v38 = vmul.f32 %v7556_v60, %v5156_v40  ;;  %v5223_v19 = vsel %vm5031_vm2, %v9806_v3, %v5151_v1 }
 0xa9d   : > { %v5011_v61 = vadd.f32 %v9782_v51, %v5010_v16 }
 0xa9f   : > { %v7560_v7 = vpop.eup %7559  ;;  %v5061_v24 = vmul.f32 1.442695, %v5011_v61  ;;  %vm5034_vm7 = vcmp.gt.f32.partialorder %v5011_v61, 20.0 }
 0xaa0   : > { %v7562_v4 = vpop.eup %7561  ;;  %v5161_v59 = vadd.f32 1.0, %v7560_v7  ;;  %v5164_v34 = vmul.f32 -0.5, %v7560_v7  ;;  %v5167_v36 = vand.u32 2147483647, %v7560_v7 }
 0xaa1   : > { %7563 = vpow2.f32 %v5061_v24  ;;  %v5154_v29 = vmul.f32 0.6931472, %v7562_v4 }
 0xaa2   : > { %7565 = vlog2.f32 %v5161_v59  ;;  %v5165_v9 = vadd.f32 1.0, %v5164_v34  ;;  %vm5168_vm4 = vcmp.lt.f32.partialorder %v5167_v36, 0.0004427343 }
 0xaa3   : > { %v5160_v54 = vsel %vm5159_vm1, %v5157_v38, %v5154_v29 }
 0xaa4   : > { %v5013_v33 = vpop.f32.mrf.mxu2  ;;  %v5224_v8 = vsel %vm5032_vm3, %v5006_v15, %v5160_v54  ;;  %v5166_v38 = vmul.f32 %v7560_v7, %v5165_v9 }
 0xaa5   : > { %v9820_v35 = vadd.f32 %v9782_v51, %v5013_v33  ;;  %v5235_v41 = vpack.c.bf16 %v5224_v8, %v5223_v19 }
 0xaa7   : > { %v7564_v50 = vpop.eup %7563  ;;  %v5063_v16 = vmul.f32 1.442695, %v9820_v35  ;;  %5267 = vmatmul.bf16.gmra.mxu3 %v5235_v41  ;;  %vm5035_vm10 = vcmp.gt.f32.partialorder %v9820_v35, 20.0 }
 0xaa8   : > { %v5170_v60 = vadd.f32 1.0, %v7564_v50  ;;  %v5173_v11 = vmul.f32 -0.5, %v7564_v50  ;;  %v7566_v40 = vpop.eup %7565  ;;  %v5176_v59 = vand.u32 2147483647, %v7564_v50 }
 0xaa9   : > { %7567 = vpow2.f32 %v5063_v16  ;;  %v5163_v15 = vmul.f32 0.6931472, %v7566_v40 }
 0xaaa   : > { %7569 = vlog2.f32 %v5170_v60  ;;  %v5174_v4 = vadd.f32 1.0, %v5173_v11  ;;  %vm5177_vm5 = vcmp.lt.f32.partialorder %v5176_v59, 0.0004427343 }
 0xaab   : > { %v5169_v19 = vsel %vm5168_vm4, %v5166_v38, %v5163_v15 }
 0xaac   : > { %v5015_v24 = vpop.f32.mrf.mxu2  ;;  %v5175_v41 = vmul.f32 %v7564_v50, %v5174_v4  ;;  %v5225_v60 = vsel %vm5033_vm6, %v9813_v58, %v5169_v19 }
 0xaad   : > { %v5016_v3 = vadd.f32 %v9782_v51, %v5015_v24 }
 0xaaf   : > { %v7568_v1 = vpop.eup %7567  ;;  %v5065_v29 = vmul.f32 1.442695, %v5016_v3  ;;  %vm5036_vm11 = vcmp.gt.f32.partialorder %v5016_v3, 20.0 }
 0xab0   : > { %v7570_v54 = vpop.eup %7569  ;;  %v5179_v33 = vadd.f32 1.0, %v7568_v1  ;;  %v5182_v36 = vmul.f32 -0.5, %v7568_v1  ;;  %v5185_v38 = vand.u32 2147483647, %v7568_v1 }
 0xab1   : > { %7571 = vpow2.f32 %v5065_v29  ;;  %v5172_v8 = vmul.f32 0.6931472, %v7570_v54 }
 0xab2   : > { %7573 = vlog2.f32 %v5179_v33  ;;  %v5183_v59 = vadd.f32 1.0, %v5182_v36  ;;  %vm5186_vm8 = vcmp.lt.f32.partialorder %v5185_v38, 0.0004427343 }
 0xab3   : > { %v5178_v16 = vsel %vm5177_vm5, %v5175_v41, %v5172_v8 }
 0xab4   : > { %v5018_v34 = vpop.f32.mrf.mxu2  ;;  %v5226_v11 = vsel %vm5034_vm7, %v5011_v61, %v5178_v16  ;;  %v5184_v41 = vmul.f32 %v7568_v1, %v5183_v59 }
 0xab5   : > { %v5019_v40 = vadd.f32 %v9782_v51, %v5018_v34  ;;  %v5236_v7 = vpack.c.bf16 %v5226_v11, %v5225_v60 }
 0xab7   : > { %v7572_v9 = vpop.eup %7571  ;;  %v5067_v24 = vmul.f32 1.442695, %v5019_v40  ;;  %5272 = vmatmul.bf16.gmra.mxu3 %v5236_v7  ;;  %vm5037_vm14 = vcmp.gt.f32.partialorder %v5019_v40, 20.0 }
 0xab8   : > { %v5188_v15 = vadd.f32 1.0, %v7572_v9  ;;  %v5191_v50 = vmul.f32 -0.5, %v7572_v9  ;;  %v7574_v4 = vpop.eup %7573  ;;  %v5194_v33 = vand.u32 2147483647, %v7572_v9 }
 0xab9   : > { %7575 = vpow2.f32 %v5067_v24  ;;  %v5181_v58 = vmul.f32 0.6931472, %v7574_v4 }
 0xaba   : > { %7577 = vlog2.f32 %v5188_v15  ;;  %v5192_v61 = vadd.f32 1.0, %v5191_v50  ;;  %vm5195_vm9 = vcmp.lt.f32.partialorder %v5194_v33, 0.0004427343 }
 0xabb   : > { %v5187_v60 = vsel %vm5186_vm8, %v5184_v41, %v5181_v58 }
 0xabc   : > { %v5020_v29 = vpop.f32.mrf.mxu2  ;;  %v5193_v7 = vmul.f32 %v7572_v9, %v5192_v61 }
 0xabd   : > { %v5021_v54 = vadd.f32 %v9782_v51, %v5020_v29  ;;  %v5227_v51 = vsel %vm5035_vm10, %v9820_v35, %v5187_v60 }
 0xabf   : > { %v7576_v19 = vpop.eup %7575  ;;  %v5069_v8 = vmul.f32 1.442695, %v5021_v54  ;;  %vm5038_vm15 = vcmp.gt.f32.partialorder %v5021_v54, 20.0 }
 0xac0   : > { %v7578_v16 = vpop.eup %7577  ;;  %v5197_v34 = vadd.f32 1.0, %v7576_v19  ;;  %v5200_v1 = vmul.f32 -0.5, %v7576_v19  ;;  %v5203_v58 = vand.u32 2147483647, %v7576_v19 }
 0xac1   : > { %7579 = vpow2.f32 %v5069_v8  ;;  %v5190_v11 = vmul.f32 0.6931472, %v7578_v16 }
 0xac2   : > { %7581 = vlog2.f32 %v5197_v34  ;;  %v5201_v38 = vadd.f32 1.0, %v5200_v1  ;;  %vm5204_vm12 = vcmp.lt.f32.partialorder %v5203_v58, 0.0004427343 }
 0xac3   : > { %v5196_v24 = vsel %vm5195_vm9, %v5193_v7, %v5190_v11 }
 0xac4   : > { %v5228_v36 = vsel %vm5036_vm11, %v5016_v3, %v5196_v24  ;;  %v5202_v8 = vmul.f32 %v7576_v19, %v5201_v38 }
 0xac5   : > { %v5237_v15 = vpack.c.bf16 %v5228_v36, %v5227_v51  ;;  %v9833_v51 = vld [vmem:[%s10122_s5] ss:$0 sm:$0xff] }
 0xac7   : > { %v7580_v50 = vpop.eup %7579  ;;  %5277 = vmatmul.bf16.gmra.mxu3 %v5237_v15 }
 0xac8   : > { %v5206_v4 = vadd.f32 1.0, %v7580_v50  ;;  %v5209_v59 = vmul.f32 -0.5, %v7580_v50  ;;  %v7582_v29 = vpop.eup %7581  ;;  %v5212_v33 = vand.u32 2147483647, %v7580_v50 }
 0xac9   : > { %v5199_v9 = vmul.f32 0.6931472, %v7582_v29 }
 0xaca   : > { %7583 = vlog2.f32 %v5206_v4  ;;  %v5210_v61 = vadd.f32 1.0, %v5209_v59  ;;  %vm5213_vm13 = vcmp.lt.f32.partialorder %v5212_v33, 0.0004427343 }
 0xacb   : > { %v5205_v16 = vsel %vm5204_vm12, %v5202_v8, %v5199_v9 }
 0xacc   : > { %v5211_v3 = vmul.f32 %v7580_v50, %v5210_v61  ;;  %v5229_v60 = vsel %vm5037_vm14, %v5019_v40, %v5205_v16 }
 0xad0   : > { %v7584_v41 = vpop.eup %7583 }
 0xad1   : > { %v5208_v35 = vmul.f32 0.6931472, %v7584_v41 }
 0xad3   : > { %v5214_v34 = vsel %vm5213_vm13, %v5211_v3, %v5208_v35 }
 0xad4   : > { %v5230_v11 = vsel %vm5038_vm15, %v5021_v54, %v5214_v34 }
 0xad5   : > { %v5238_v7 = vpack.c.bf16 %v5230_v11, %v5229_v60 }
 0xad7   : > { %5282 = vmatmul.bf16.gmra.mxu3 %v5238_v7 }
 0xaea   : > { %v5248_v24 = vpop.f32.mrf.mxu3 }
 0xaeb   : > { %v5249_v19 = vadd.f32 %v9833_v51, %v5248_v24 }
 0xaed   : > { %v5304_v36 = vmul.f32 1.442695, %v5249_v19  ;;  %vm5288_vm1 = vcmp.gt.f32.partialorder %v5249_v19, 20.0 }
 0xaef   : > { %7585 = vpow2.f32 %v5304_v36 }
 0xaf2   : > { %v5250_v15 = vpop.f32.mrf.mxu3 }
 0xaf3   : > { %v5251_v50 = vadd.f32 %v9833_v51, %v5250_v15 }
 0xaf5   : > { %v7586_v1 = vpop.eup %7585  ;;  %v5306_v4 = vmul.f32 1.442695, %v5251_v50  ;;  %vm5289_vm3 = vcmp.gt.f32.partialorder %v5251_v50, 20.0 }
 0xaf6   : > { %v5336_v59 = vadd.f32 1.0, %v7586_v1  ;;  %v5339_v40 = vmul.f32 -0.5, %v7586_v1  ;;  %v5342_v33 = vand.u32 2147483647, %v7586_v1 }
 0xaf7   : > { %7587 = vpow2.f32 %v5306_v4 }
 0xaf8   : > { %7589 = vlog2.f32 %v5336_v59  ;;  %v5340_v58 = vadd.f32 1.0, %v5339_v40  ;;  %vm5343_vm0 = vcmp.lt.f32.partialorder %v5342_v33, 0.0004427343 }
 0xafa   : > { %v5253_v54 = vpop.f32.mrf.mxu3  ;;  %v5341_v35 = vmul.f32 %v7586_v1, %v5340_v58 }
 0xafb   : > { %v9838_v29 = vadd.f32 %v9833_v51, %v5253_v54 }
 0xafd   : > { %v7588_v38 = vpop.eup %7587  ;;  %v5308_v9 = vmul.f32 1.442695, %v9838_v29  ;;  %vm5290_vm5 = vcmp.gt.f32.partialorder %v9838_v29, 20.0 }
 0xafe   : > { %v7590_v61 = vpop.eup %7589  ;;  %v5345_v8 = vadd.f32 1.0, %v7588_v38  ;;  %v5348_v16 = vmul.f32 -0.5, %v7588_v38  ;;  %v5351_v7 = vand.u32 2147483647, %v7588_v38 }
 0xaff   : > { %v5338_v41 = vmul.f32 0.6931472, %v7590_v61  ;;  %7591 = vpow2.f32 %v5308_v9 }
 0xb00   : > { %7593 = vlog2.f32 %v5345_v8  ;;  %v5349_v60 = vadd.f32 1.0, %v5348_v16  ;;  %vm5352_vm2 = vcmp.lt.f32.partialorder %v5351_v7, 0.0004427343 }
 0xb01   : > { %v5344_v34 = vsel %vm5343_vm0, %v5341_v35, %v5338_v41 }
 0xb02   : > { %v5255_v3 = vpop.f32.mrf.mxu3  ;;  %v5480_v4 = vsel %vm5288_vm1, %v5249_v19, %v5344_v34  ;;  %v5350_v54 = vmul.f32 %v7588_v38, %v5349_v60 }
 0xb03   : > { %v5256_v11 = vadd.f32 %v9833_v51, %v5255_v3  ;;  %v5496_v9 = vpack.c.bf16 %v5480_v4, %v5480_v4 }
 0xb05   : > { %v7592_v24 = vpop.eup %7591  ;;  %v5310_v36 = vmul.f32 1.442695, %v5256_v11  ;;  %v5528_v35 = vunpack.c.l.b16 %v5496_v9  ;;  %vm5291_vm7 = vcmp.gt.f32.partialorder %v5256_v11, 20.0 }
 0xb06   : > { %v7594_v15 = vpop.eup %7593  ;;  %v5354_v59 = vadd.f32 1.0, %v7592_v24  ;;  %v5357_v58 = vmul.f32 -0.5, %v7592_v24  ;;  %v5360_v60 = vand.u32 2147483647, %v7592_v24 }
 0xb07   : > { %v5347_v40 = vmul.f32 0.6931472, %v7594_v15  ;;  %7595 = vpow2.f32 %v5310_v36 }
 0xb08   : > { %7597 = vlog2.f32 %v5354_v59  ;;  %v5358_v19 = vadd.f32 1.0, %v5357_v58  ;;  %vm5361_vm4 = vcmp.lt.f32.partialorder %v5360_v60, 0.0004427343 }
 0xb09   : > { %v5353_v1 = vsel %vm5352_vm2, %v5350_v54, %v5347_v40 }
 0xb0a   : > { %v5481_v61 = vsel %vm5289_vm3, %v5251_v50, %v5353_v1  ;;  %v5258_v33 = vpop.f32.mrf.mxu3  ;;  %v5359_v50 = vmul.f32 %v7592_v24, %v5358_v19 }
 0xb0b   : > { %v5497_v8 = vpack.c.bf16 %v5481_v61, %v5481_v61  ;;  %v9843_v41 = vadd.f32 %v9833_v51, %v5258_v33 }
 0xb0d   : > { %v7596_v16 = vpop.eup %7595  ;;  %v5529_v3 = vunpack.c.l.b16 %v5497_v8  ;;  %v5312_v34 = vmul.f32 1.442695, %v9843_v41  ;;  %vm5292_vm9 = vcmp.gt.f32.partialorder %v9843_v41, 20.0 }
 0xb0e   : > { %v7598_v38 = vpop.eup %7597  ;;  %v5363_v7 = vadd.f32 1.0, %v7596_v16  ;;  %v5366_v4 = vmul.f32 -0.5, %v7596_v16  ;;  %v5369_v1 = vand.u32 2147483647, %v7596_v16 }
 0xb0f   : > { %v5544_v36 = vpack.c.b16 %v5529_v3, %v5528_v35  ;;  %v5356_v15 = vmul.f32 0.6931472, %v7598_v38  ;;  %7599 = vpow2.f32 %v5312_v34 }
 0xb10   : > { %7601 = vlog2.f32 %v5363_v7  ;;  %v5367_v54 = vadd.f32 1.0, %v5366_v4  ;;  %vm5370_vm6 = vcmp.lt.f32.partialorder %v5369_v1, 0.0004427343 }
 0xb11   : > { %5617 = vmatmul.bf16.vlgmr.msrb.gmra.mxu1 %v5544_v36  ;;  %v5362_v40 = vsel %vm5361_vm4, %v5359_v50, %v5356_v15 }
 0xb12   : > { %v5260_v59 = vpop.f32.mrf.mxu3  ;;  %v5482_v8 = vsel %vm5290_vm5, %v9838_v29, %v5362_v40  ;;  %v5368_v34 = vmul.f32 %v7596_v16, %v5367_v54 }
 0xb13   : > { %v5261_v9 = vadd.f32 %v9833_v51, %v5260_v59  ;;  %v5498_v24 = vpack.c.bf16 %v5482_v8, %v5482_v8 }
 0xb15   : > { %v7600_v58 = vpop.eup %7599  ;;  %v5314_v61 = vmul.f32 1.442695, %v5261_v9  ;;  %v5530_v50 = vunpack.c.l.b16 %v5498_v24  ;;  %vm5293_vm11 = vcmp.gt.f32.partialorder %v5261_v9, 20.0 }
 0xb16   : > { %v7602_v33 = vpop.eup %7601  ;;  %v5372_v35 = vadd.f32 1.0, %v7600_v58  ;;  %v5375_v38 = vmul.f32 -0.5, %v7600_v58  ;;  %v5378_v54 = vand.u32 2147483647, %v7600_v58 }
 0xb17   : > { %v5365_v3 = vmul.f32 0.6931472, %v7602_v33  ;;  %7603 = vpow2.f32 %v5314_v61 }
 0xb18   : > { %7605 = vlog2.f32 %v5372_v35  ;;  %v5376_v59 = vadd.f32 1.0, %v5375_v38  ;;  %vm5379_vm8 = vcmp.lt.f32.partialorder %v5378_v54, 0.0004427343 }
 0xb19   : > { %v5371_v19 = vsel %vm5370_vm6, %v5368_v34, %v5365_v3 }
 0xb1a   : > { %v5483_v60 = vsel %vm5291_vm7, %v5256_v11, %v5371_v19  ;;  %v5263_v7 = vpop.f32.mrf.mxu3  ;;  %v5377_v11 = vmul.f32 %v7600_v58, %v5376_v59 }
 0xb1b   : > { %v9850_v36 = vadd.f32 %v9833_v51, %v5263_v7  ;;  %v5499_v15 = vpack.c.bf16 %v5483_v60, %v5483_v60 }
 0xb1d   : > { %v7604_v4 = vpop.eup %7603  ;;  %v5316_v29 = vmul.f32 1.442695, %v9850_v36  ;;  %v5531_v40 = vunpack.c.l.b16 %v5499_v15  ;;  %vm5294_vm13 = vcmp.gt.f32.partialorder %v9850_v36, 20.0 }
 0xb1e   : > { %v7606_v16 = vpop.eup %7605  ;;  %v5381_v1 = vadd.f32 1.0, %v7604_v4  ;;  %v5384_v33 = vmul.f32 -0.5, %v7604_v4  ;;  %v5387_v19 = vand.u32 2147483647, %v7604_v4 }
 0xb1f   : > { %v5374_v61 = vmul.f32 0.6931472, %v7606_v16  ;;  %7607 = vpow2.f32 %v5316_v29  ;;  %v5545_v8 = vpack.c.b16 %v5531_v40, %v5530_v50 }
 0xb20   : > { %7609 = vlog2.f32 %v5381_v1  ;;  %v5385_v34 = vadd.f32 1.0, %v5384_v33  ;;  %vm5388_vm10 = vcmp.lt.f32.partialorder %v5387_v19, 0.0004427343 }
 0xb21   : > { %5622 = vmatmul.bf16.gmra.mxu1 %v5545_v8  ;;  %v5380_v3 = vsel %vm5379_vm8, %v5377_v11, %v5374_v61 }
 0xb22   : > { %v5265_v35 = vpop.f32.mrf.mxu3  ;;  %v5484_v15 = vsel %vm5292_vm9, %v9843_v41, %v5380_v3  ;;  %v5386_v50 = vmul.f32 %v7604_v4, %v5385_v34 }
 0xb23   : > { %v5266_v24 = vadd.f32 %v9833_v51, %v5265_v35  ;;  %v5500_v58 = vpack.c.bf16 %v5484_v15, %v5484_v15 }
 0xb25   : > { %v7608_v38 = vpop.eup %7607  ;;  %v5318_v60 = vmul.f32 1.442695, %v5266_v24  ;;  %v5532_v11 = vunpack.c.l.b16 %v5500_v58  ;;  %vm5295_vm15 = vcmp.gt.f32.partialorder %v5266_v24, 20.0 }
 0xb26   : > { %v7610_v7 = vpop.eup %7609  ;;  %v5390_v16 = vadd.f32 1.0, %v7608_v38  ;;  %v5393_v40 = vmul.f32 -0.5, %v7608_v38  ;;  %v5396_v34 = vand.u32 2147483647, %v7608_v38 }
 0xb27   : > { %v5383_v29 = vmul.f32 0.6931472, %v7610_v7  ;;  %7611 = vpow2.f32 %v5318_v60 }
 0xb28   : > { %7613 = vlog2.f32 %v5390_v16  ;;  %v5394_v35 = vadd.f32 1.0, %v5393_v40  ;;  %vm5397_vm12 = vcmp.lt.f32.partialorder %v5396_v34, 0.0004427343 }
 0xb29   : > { %v5389_v59 = vsel %vm5388_vm10, %v5386_v50, %v5383_v29 }
 0xb2a   : > { %v5485_v54 = vsel %vm5293_vm11, %v5261_v9, %v5389_v59  ;;  %v5268_v1 = vpop.f32.mrf.mxu3  ;;  %v5395_v9 = vmul.f32 %v7608_v38, %v5394_v35 }
 0xb2b   : > { %v9857_v61 = vadd.f32 %v9833_v51, %v5268_v1  ;;  %v5501_v33 = vpack.c.bf16 %v5485_v54, %v5485_v54 }
 0xb2d   : > { %v7612_v8 = vpop.eup %7611  ;;  %v5320_v41 = vmul.f32 1.442695, %v9857_v61  ;;  %v5533_v3 = vunpack.c.l.b16 %v5501_v33  ;;  %vm5296_vm1 = vcmp.gt.f32.partialorder %v9857_v61, 20.0 }
 0xb2e   : > { %v7614_v4 = vpop.eup %7613  ;;  %v5399_v19 = vadd.f32 1.0, %v7612_v8  ;;  %v5402_v7 = vmul.f32 -0.5, %v7612_v8  ;;  %v5405_v59 = vand.u32 2147483647, %v7612_v8 }
 0xb2f   : > { %v5392_v60 = vmul.f32 0.6931472, %v7614_v4  ;;  %7615 = vpow2.f32 %v5320_v41  ;;  %v5546_v15 = vpack.c.b16 %v5533_v3, %v5532_v11 }
 0xb30   : > { %7617 = vlog2.f32 %v5399_v19  ;;  %v5403_v50 = vadd.f32 1.0, %v5402_v7  ;;  %vm5406_vm14 = vcmp.lt.f32.partialorder %v5405_v59, 0.0004427343 }
 0xb31   : > { %5627 = vmatmul.bf16.gmra.mxu1 %v5546_v15  ;;  %v5398_v29 = vsel %vm5397_vm12, %v5395_v9, %v5392_v60 }
 0xb32   : > { %v5270_v16 = vpop.f32.mrf.mxu3  ;;  %v5486_v33 = vsel %vm5294_vm13, %v9850_v36, %v5398_v29  ;;  %v5404_v11 = vmul.f32 %v7612_v8, %v5403_v50 }
 0xb33   : > { %v5271_v58 = vadd.f32 %v9833_v51, %v5270_v16  ;;  %v5502_v38 = vpack.c.bf16 %v5486_v33, %v5486_v33 }
 0xb35   : > { %v7616_v40 = vpop.eup %7615  ;;  %v5322_v54 = vmul.f32 1.442695, %v5271_v58  ;;  %v5534_v9 = vunpack.c.l.b16 %v5502_v38  ;;  %vm5297_vm3 = vcmp.gt.f32.partialorder %v5271_v58, 20.0 }
 0xb36   : > { %v7618_v1 = vpop.eup %7617  ;;  %v5408_v4 = vadd.f32 1.0, %v7616_v40  ;;  %v5411_v3 = vmul.f32 -0.5, %v7616_v40  ;;  %v5414_v50 = vand.u32 2147483647, %v7616_v40 }
 0xb37   : > { %v5401_v41 = vmul.f32 0.6931472, %v7618_v1  ;;  %7619 = vpow2.f32 %v5322_v54 }
 0xb38   : > { %7621 = vlog2.f32 %v5408_v4  ;;  %v5412_v16 = vadd.f32 1.0, %v5411_v3  ;;  %vm5415_vm0 = vcmp.lt.f32.partialorder %v5414_v50, 0.0004427343 }
 0xb39   : > { %v5407_v35 = vsel %vm5406_vm14, %v5404_v11, %v5401_v41 }
 0xb3a   : > { %v5487_v34 = vsel %vm5295_vm15, %v5266_v24, %v5407_v35  ;;  %v5273_v19 = vpop.f32.mrf.mxu3  ;;  %v5413_v24 = vmul.f32 %v7616_v40, %v5412_v16 }
 0xb3b   : > { %v9864_v60 = vadd.f32 %v9833_v51, %v5273_v19  ;;  %v5503_v7 = vpack.c.bf16 %v5487_v34, %v5487_v34 }
 0xb3d   : > { %v7620_v15 = vpop.eup %7619  ;;  %v5324_v36 = vmul.f32 1.442695, %v9864_v60  ;;  %v5535_v29 = vunpack.c.l.b16 %v5503_v7  ;;  %vm5298_vm5 = vcmp.gt.f32.partialorder %v9864_v60, 20.0 }
 0xb3e   : > { %v7622_v8 = vpop.eup %7621  ;;  %v5417_v59 = vadd.f32 1.0, %v7620_v15  ;;  %v5420_v1 = vmul.f32 -0.5, %v7620_v15  ;;  %v5423_v35 = vand.u32 2147483647, %v7620_v15 }
 0xb3f   : > { %v5410_v54 = vmul.f32 0.6931472, %v7622_v8  ;;  %7623 = vpow2.f32 %v5324_v36  ;;  %v5547_v33 = vpack.c.b16 %v5535_v29, %v5534_v9 }
 0xb40   : > { %7625 = vlog2.f32 %v5417_v59  ;;  %v5421_v11 = vadd.f32 1.0, %v5420_v1  ;;  %vm5424_vm2 = vcmp.lt.f32.partialorder %v5423_v35, 0.0004427343 }
 0xb41   : > { %5632 = vmatmul.bf16.gmra.mxu1 %v5547_v33  ;;  %v5416_v41 = vsel %vm5415_vm0, %v5413_v24, %v5410_v54 }
 0xb42   : > { %v5275_v4 = vpop.f32.mrf.mxu3  ;;  %v5488_v7 = vsel %vm5296_vm1, %v9857_v61, %v5416_v41  ;;  %v5422_v9 = vmul.f32 %v7620_v15, %v5421_v11 }
 0xb43   : > { %v5276_v38 = vadd.f32 %v9833_v51, %v5275_v4  ;;  %v5504_v40 = vpack.c.bf16 %v5488_v7, %v5488_v7 }
 0xb45   : > { %v7624_v3 = vpop.eup %7623  ;;  %v5326_v34 = vmul.f32 1.442695, %v5276_v38  ;;  %v5536_v24 = vunpack.c.l.b16 %v5504_v40  ;;  %vm5299_vm7 = vcmp.gt.f32.partialorder %v5276_v38, 20.0 }
 0xb46   : > { %v7626_v19 = vpop.eup %7625  ;;  %v5426_v8 = vadd.f32 1.0, %v7624_v3  ;;  %v5429_v29 = vmul.f32 -0.5, %v7624_v3  ;;  %v5432_v11 = vand.u32 2147483647, %v7624_v3 }
 0xb47   : > { %v5419_v36 = vmul.f32 0.6931472, %v7626_v19  ;;  %7627 = vpow2.f32 %v5326_v34 }
 0xb48   : > { %7629 = vlog2.f32 %v5426_v8  ;;  %v5430_v61 = vadd.f32 1.0, %v5429_v29  ;;  %vm5433_vm4 = vcmp.lt.f32.partialorder %v5432_v11, 0.0004427343 }
 0xb49   : > { %v5425_v16 = vsel %vm5424_vm2, %v5422_v9, %v5419_v36 }
 0xb4a   : > { %v5489_v50 = vsel %vm5297_vm3, %v5271_v58, %v5425_v16  ;;  %v5278_v59 = vpop.f32.mrf.mxu3  ;;  %v5431_v58 = vmul.f32 %v7624_v3, %v5430_v61 }
 0xb4b   : > { %v5505_v54 = vpack.c.bf16 %v5489_v50, %v5489_v50  ;;  %v9871_v1 = vadd.f32 %v9833_v51, %v5278_v59 }
 0xb4d   : > { %v7628_v33 = vpop.eup %7627  ;;  %v5537_v4 = vunpack.c.l.b16 %v5505_v54  ;;  %v5328_v41 = vmul.f32 1.442695, %v9871_v1  ;;  %vm5300_vm9 = vcmp.gt.f32.partialorder %v9871_v1, 20.0 }
 0xb4e   : > { %v7630_v15 = vpop.eup %7629  ;;  %v5435_v35 = vadd.f32 1.0, %v7628_v33  ;;  %v5438_v19 = vmul.f32 -0.5, %v7628_v33  ;;  %v5441_v16 = vand.u32 2147483647, %v7628_v33 }
 0xb4f   : > { %v5428_v34 = vmul.f32 0.6931472, %v7630_v15  ;;  %7631 = vpow2.f32 %v5328_v41  ;;  %v5548_v7 = vpack.c.b16 %v5537_v4, %v5536_v24 }
 0xb50   : > { %7633 = vlog2.f32 %v5435_v35  ;;  %v5439_v9 = vadd.f32 1.0, %v5438_v19  ;;  %vm5442_vm6 = vcmp.lt.f32.partialorder %v5441_v16, 0.0004427343 }
 0xb51   : > { %5637 = vmatmul.bf16.gmra.mxu1 %v5548_v7  ;;  %v5434_v36 = vsel %vm5433_vm4, %v5431_v58, %v5428_v34 }
 0xb52   : > { %v5280_v8 = vpop.f32.mrf.mxu3  ;;  %v5490_v54 = vsel %vm5298_vm5, %v9864_v60, %v5434_v36  ;;  %v5440_v24 = vmul.f32 %v7628_v33, %v5439_v9 }
 0xb53   : > { %v5281_v40 = vadd.f32 %v9833_v51, %v5280_v8  ;;  %v5506_v3 = vpack.c.bf16 %v5490_v54, %v5490_v54 }
 0xb55   : > { %v7632_v29 = vpop.eup %7631  ;;  %v5330_v50 = vmul.f32 1.442695, %v5281_v40  ;;  %v5538_v58 = vunpack.c.l.b16 %v5506_v3  ;;  %vm5301_vm11 = vcmp.gt.f32.partialorder %v5281_v40, 20.0 }
 0xb56   : > { %v7634_v59 = vpop.eup %7633  ;;  %v5444_v15 = vadd.f32 1.0, %v7632_v29  ;;  %v5447_v61 = vmul.f32 -0.5, %v7632_v29 }
 0xb57   : > { %v5437_v41 = vmul.f32 0.6931472, %v7634_v59  ;;  %7635 = vpow2.f32 %v5330_v50  ;;  %v5450_v59 = vand.u32 2147483647, %v7632_v29 }
 0xb58   : > { %7637 = vlog2.f32 %v5444_v15  ;;  %v5448_v63 = vadd.f32 1.0, %v5447_v61 }
 0xb59   : > { %v5443_v4 = vsel %vm5442_vm6, %v5440_v24, %v5437_v41  ;;  %vm5451_vm8 = vcmp.lt.f32.partialorder %v5450_v59, 0.0004427343  ;;  %v5569_v59 = vpop.f32.mrf.mxu0 }
 0xb5a   : > { %v5491_v11 = vsel %vm5299_vm7, %v5276_v38, %v5443_v4  ;;  %v5283_v35 = vpop.f32.mrf.mxu3  ;;  %v5449_v54 = vmul.f32 %v7632_v29, %v5448_v63 }
 0xb5b   : > { %v5507_v34 = vpack.c.bf16 %v5491_v11, %v5491_v11  ;;  %v5284_v19 = vadd.f32 %v9833_v51, %v5283_v35 }
 0xb5d   : > { %v7636_v7 = vpop.eup %7635  ;;  %v5539_v8 = vunpack.c.l.b16 %v5507_v34  ;;  %v5332_v60 = vmul.f32 1.442695, %v5284_v19  ;;  %vm5302_vm13 = vcmp.gt.f32.partialorder %v5284_v19, 20.0 }
 0xb5e   : > { %v7638_v36 = vpop.eup %7637  ;;  %v5453_v33 = vadd.f32 1.0, %v7636_v7  ;;  %v5456_v16 = vmul.f32 -0.5, %v7636_v7  ;;  %v5459_v3 = vand.u32 2147483647, %v7636_v7 }
 0xb5f   : > { %v5446_v9 = vmul.f32 0.6931472, %v7638_v36  ;;  %7639 = vpow2.f32 %v5332_v60  ;;  %v5549_v50 = vpack.c.b16 %v5539_v8, %v5538_v58 }
 0xb60   : > { %7641 = vlog2.f32 %v5453_v33  ;;  %v5457_v41 = vadd.f32 1.0, %v5456_v16  ;;  %vm5460_vm10 = vcmp.lt.f32.partialorder %v5459_v3, 0.0004427343 }
 0xb61   : > { %5642 = vmatmul.bf16.gmra.mxu1 %v5549_v50  ;;  %v5452_v15 = vsel %vm5451_vm8, %v5449_v54, %v5446_v9 }
 0xb62   : > { %v5285_v38 = vpop.f32.mrf.mxu3  ;;  %v5492_v35 = vsel %vm5300_vm9, %v9871_v1, %v5452_v15  ;;  %v5458_v58 = vmul.f32 %v7636_v7, %v5457_v41 }
 0xb63   : > { %v5286_v24 = vadd.f32 %v9833_v51, %v5285_v38  ;;  %v5508_v63 = vpack.c.bf16 %v5492_v35, %v5492_v35 }
 0xb65   : > { %v7640_v4 = vpop.eup %7639  ;;  %v5334_v61 = vmul.f32 1.442695, %v5286_v24  ;;  %v5540_v9 = vunpack.c.l.b16 %v5508_v63  ;;  %vm5303_vm15 = vcmp.gt.f32.partialorder %v5286_v24, 20.0 }
 0xb66   : > { %v7642_v11 = vpop.eup %7641  ;;  %v5462_v34 = vadd.f32 1.0, %v7640_v4  ;;  %v5465_v8 = vmul.f32 -0.5, %v7640_v4  ;;  %v5468_v38 = vand.u32 2147483647, %v7640_v4 }
 0xb67   : > { %v5455_v60 = vmul.f32 0.6931472, %v7642_v11  ;;  %7643 = vpow2.f32 %v5334_v61 }
 0xb68   : > { %7645 = vlog2.f32 %v5462_v34  ;;  %v5466_v50 = vadd.f32 1.0, %v5465_v8  ;;  %vm5469_vm12 = vcmp.lt.f32.partialorder %v5468_v38, 0.0004427343  ;;  %v5571_v34 = vpop.f32.mrf.mxu0  ;;  %v9884_v38 = vld [vmem:[%s10124_s7] ss:$0 sm:$0xff] }
 0xb69   : > { %v5461_v29 = vsel %vm5460_vm10, %v5458_v58, %v5455_v60 }
 0xb6a   : > { %v5493_v36 = vsel %vm5301_vm11, %v5281_v40, %v5461_v29  ;;  %v5467_v41 = vmul.f32 %v7640_v4, %v5466_v50 }
 0xb6b   : > { %v5509_v51 = vpack.c.bf16 %v5493_v36, %v5493_v36 }
 0xb6d   : > { %v7644_v33 = vpop.eup %7643  ;;  %v5541_v16 = vunpack.c.l.b16 %v5509_v51 }
 0xb6e   : > { %v7646_v54 = vpop.eup %7645  ;;  %v5471_v1 = vadd.f32 1.0, %v7644_v33  ;;  %v5474_v11 = vmul.f32 -0.5, %v7644_v33  ;;  %v5477_v35 = vand.u32 2147483647, %v7644_v33 }
 0xb6f   : > { %v5464_v15 = vmul.f32 0.6931472, %v7646_v54  ;;  %v5550_v7 = vpack.c.b16 %v5541_v16, %v5540_v9 }
 0xb70   : > { %7647 = vlog2.f32 %v5471_v1  ;;  %v5475_v61 = vadd.f32 1.0, %v5474_v11  ;;  %vm5478_vm14 = vcmp.lt.f32.partialorder %v5477_v35, 0.0004427343  ;;  %v5574_v50 = vpop.f32.mrf.mxu0 }
 0xb71   : > { %5647 = vmatmul.bf16.gmra.mxu1 %v5550_v7  ;;  %v5470_v3 = vsel %vm5469_vm12, %v5467_v41, %v5464_v15 }
 0xb72   : > { %v5494_v60 = vsel %vm5302_vm13, %v5284_v19, %v5470_v3  ;;  %v5476_v63 = vmul.f32 %v7644_v33, %v5475_v61  ;;  %v5570_v19 = vadd.f32 %v9884_v38, %v5569_v59 }
 0xb73   : > { %v5510_v29 = vpack.c.bf16 %v5494_v60, %v5494_v60 }
 0xb75   : > { %v5542_v9 = vunpack.c.l.b16 %v5510_v29 }
 0xb76   : > { %v7648_v40 = vpop.eup %7647 }
 0xb77   : > { %v5473_v58 = vmul.f32 0.6931472, %v7648_v40  ;;  %v5575_v40 = vadd.f32 %v9884_v38, %v5574_v50 }
 0xb78   : > { %v5576_v54 = vpop.f32.mrf.mxu0 }
 0xb79   : > { %v5479_v8 = vsel %vm5478_vm14, %v5476_v63, %v5473_v58 }
 0xb7a   : > { %v5495_v36 = vsel %vm5303_vm15, %v5286_v24, %v5479_v8  ;;  %v5572_v24 = vadd.f32 %v9884_v38, %v5571_v34 }
 0xb7b   : > { %v5511_v51 = vpack.c.bf16 %v5495_v36, %v5495_v36 }
 0xb7d   : > { %v5543_v16 = vunpack.c.l.b16 %v5511_v51 }
 0xb7f   : > { %v5551_v4 = vpack.c.b16 %v5543_v16, %v5542_v9  ;;  %v5577_v9 = vadd.f32 %v9884_v38, %v5576_v54 }
 0xb80   : > { %v5579_v11 = vpop.f32.mrf.mxu0 }
 0xb81   : > { %5652 = vmatmul.bf16.gmra.mxu1 %v5551_v4  ;;  %v5580_v54 = vadd.f32 %v9884_v38, %v5579_v11 }
 0xb88   : > { %v5581_v60 = vpop.f32.mrf.mxu0 }
 0xb8e   : > { %v5618_v33 = vpop.f32.mrf.mxu1 }
 0xb8f   : > { %v5619_v1 = vadd.f32 %v5618_v33, %v5570_v19 }
 0xb91   : > { %v5674_v15 = vmul.f32 1.442695, %v5619_v1  ;;  %vm5658_vm2 = vcmp.gt.f32.partialorder %v5619_v1, 20.0 }
 0xb93   : > { %7649 = vpow2.f32 %v5674_v15 }
 0xb96   : > { %v5620_v7 = vpop.f32.mrf.mxu1 }
 0xb97   : > { %v5621_v41 = vadd.f32 %v5620_v7, %v5572_v24  ;;  %v5584_v24 = vpop.f32.mrf.mxu0 }
 0xb99   : > { %v7650_v3 = vpop.eup %7649  ;;  %v5676_v61 = vmul.f32 1.442695, %v5621_v41  ;;  %vm5659_vm3 = vcmp.gt.f32.partialorder %v5621_v41, 20.0 }
 0xb9a   : > { %v5706_v35 = vadd.f32 1.0, %v7650_v3  ;;  %v5709_v29 = vmul.f32 -0.5, %v7650_v3  ;;  %v5712_v4 = vand.u32 2147483647, %v7650_v3 }
 0xb9b   : > { %7651 = vpow2.f32 %v5676_v61 }
 0xb9c   : > { %7653 = vlog2.f32 %v5706_v35  ;;  %v5710_v16 = vadd.f32 1.0, %v5709_v29  ;;  %vm5713_vm0 = vcmp.lt.f32.partialorder %v5712_v4, 0.0004427343 }
 0xb9e   : > { %v5623_v58 = vpop.f32.mrf.mxu1  ;;  %v5711_v35 = vmul.f32 %v7650_v3, %v5710_v16 }
 0xb9f   : > { %v9889_v63 = vadd.f32 %v5623_v58, %v5575_v40 }
 0xba1   : > { %v7652_v59 = vpop.eup %7651  ;;  %v5678_v8 = vmul.f32 1.442695, %v9889_v63  ;;  %vm5660_vm6 = vcmp.gt.f32.partialorder %v9889_v63, 20.0 }
 0xba2   : > { %v5715_v36 = vadd.f32 1.0, %v7652_v59  ;;  %v5718_v51 = vmul.f32 -0.5, %v7652_v59  ;;  %v7654_v34 = vpop.eup %7653  ;;  %v5721_v7 = vand.u32 2147483647, %v7652_v59 }
 0xba3   : > { %7655 = vpow2.f32 %v5678_v8  ;;  %v5708_v50 = vmul.f32 0.6931472, %v7654_v34 }
 0xba4   : > { %7657 = vlog2.f32 %v5715_v36  ;;  %v5719_v33 = vadd.f32 1.0, %v5718_v51  ;;  %vm5722_vm1 = vcmp.lt.f32.partialorder %v5721_v7, 0.0004427343 }
 0xba5   : > { %v5714_v42 = vsel %vm5713_vm0, %v5711_v35, %v5708_v50 }
 0xba6   : > { %v5625_v19 = vpop.f32.mrf.mxu1  ;;  %v5720_v39 = vmul.f32 %v7652_v59, %v5719_v33  ;;  %v5850_v36 = vsel %vm5658_vm2, %v5619_v1, %v5714_v42  ;;  %v5586_v59 = vpop.f32.mrf.mxu0 }
 0xba7   : > { %v5626_v15 = vadd.f32 %v5625_v19, %v5577_v9 }
 0xba9   : > { %v7656_v61 = vpop.eup %7655  ;;  %v5680_v40 = vmul.f32 1.442695, %v5626_v15  ;;  %vm5661_vm7 = vcmp.gt.f32.partialorder %v5626_v15, 20.0 }
 0xbaa   : > { %v7658_v58 = vpop.eup %7657  ;;  %v5724_v13 = vadd.f32 1.0, %v7656_v61  ;;  %v5727_v19 = vmul.f32 -0.5, %v7656_v61 }
 0xbab   : > { %v5717_v8 = vmul.f32 0.6931472, %v7658_v58  ;;  %7659 = vpow2.f32 %v5680_v40 }
 0xbac   : > { %7661 = vlog2.f32 %v5724_v13  ;;  %v5728_v42 = vadd.f32 1.0, %v5727_v19 }
 0xbad   : > { %v5723_v29 = vsel %vm5722_vm1, %v5720_v39, %v5717_v8  ;;  %v5582_v39 = vadd.f32 %v9884_v38, %v5581_v60  ;;  %v5585_v60 = vadd.f32 %v9884_v38, %v5584_v24 }
 0xbae   : > { %v5851_v51 = vsel %vm5659_vm3, %v5621_v41, %v5723_v29  ;;  %v5628_v34 = vpop.f32.mrf.mxu1  ;;  %v5730_v41 = vand.u32 2147483647, %v7656_v61 }
 0xbaf   : > { %v5866_v9 = vpack.c.bf16 %v5851_v51, %v5850_v36  ;;  %v9894_v3 = vadd.f32 %v5628_v34, %v5580_v54  ;;  %v5729_v54 = vmul.f32 %v7656_v61, %v5728_v42 }
 0xbb0   : > { %vm5731_vm4 = vcmp.lt.f32.partialorder %v5730_v41, 0.0004427343 }
 0xbb1   : > { %v7660_v16 = vpop.eup %7659  ;;  %v5682_v4 = vmul.f32 1.442695, %v9894_v3  ;;  %5882 = vmatmul.bf16.vlgmr.msrb.gmra.mxu2 %v5866_v9  ;;  %vm5662_vm10 = vcmp.gt.f32.partialorder %v9894_v3, 20.0 }
 0xbb2   : > { %v5733_v50 = vadd.f32 1.0, %v7660_v16  ;;  %v5736_v33 = vmul.f32 -0.5, %v7660_v16  ;;  %v7662_v11 = vpop.eup %7661  ;;  %v5739_v40 = vand.u32 2147483647, %v7660_v16 }
 0xbb3   : > { %7663 = vpow2.f32 %v5682_v4  ;;  %v5726_v7 = vmul.f32 0.6931472, %v7662_v11  ;;  %v5589_v4 = vpop.f32.mrf.mxu0 }
 0xbb4   : > { %7665 = vlog2.f32 %v5733_v50  ;;  %v5737_v35 = vadd.f32 1.0, %v5736_v33  ;;  %vm5740_vm5 = vcmp.lt.f32.partialorder %v5739_v40, 0.0004427343 }
 0xbb5   : > { %v5732_v51 = vsel %vm5731_vm4, %v5729_v54, %v5726_v7 }
 0xbb6   : > { %v5630_v1 = vpop.f32.mrf.mxu1  ;;  %v5738_v9 = vmul.f32 %v7660_v16, %v5737_v35  ;;  %v5852_v33 = vsel %vm5660_vm6, %v9889_v63, %v5732_v51  ;;  %v5587_v35 = vadd.f32 %v9884_v38, %v5586_v59  ;;  %v5590_v59 = vadd.f32 %v9884_v38, %v5589_v4 }
 0xbb7   : > { %v5631_v13 = vadd.f32 %v5630_v1, %v5582_v39 }
 0xbb9   : > { %v7664_v58 = vpop.eup %7663  ;;  %v5684_v8 = vmul.f32 1.442695, %v5631_v13  ;;  %vm5663_vm11 = vcmp.gt.f32.partialorder %v5631_v13, 20.0 }
 0xbba   : > { %v7666_v29 = vpop.eup %7665  ;;  %v5742_v36 = vadd.f32 1.0, %v7664_v58  ;;  %v5745_v16 = vmul.f32 -0.5, %v7664_v58 }
 0xbbb   : > { %7667 = vpow2.f32 %v5684_v8  ;;  %v5735_v34 = vmul.f32 0.6931472, %v7666_v29  ;;  %v5591_v8 = vpop.f32.mrf.mxu0 }
 0xbbc   : > { %7669 = vlog2.f32 %v5742_v36  ;;  %v5746_v40 = vadd.f32 1.0, %v5745_v16 }
 0xbbd   : > { %v5741_v19 = vsel %vm5740_vm5, %v5738_v9, %v5735_v34 }
 0xbbe   : > { %v5633_v50 = vpop.f32.mrf.mxu1  ;;  %v5853_v11 = vsel %vm5661_vm7, %v5626_v15, %v5741_v19  ;;  %v5748_v15 = vand.u32 2147483647, %v7664_v58 }
 0xbbf   : > { %v9901_v61 = vadd.f32 %v5633_v50, %v5585_v60  ;;  %v5867_v39 = vpack.c.bf16 %v5853_v11, %v5852_v33  ;;  %v5747_v60 = vmul.f32 %v7664_v58, %v5746_v40 }
 0xbc0   : > { %vm5749_vm8 = vcmp.lt.f32.partialorder %v5748_v15, 0.0004427343 }
 0xbc1   : > { %v7668_v42 = vpop.eup %7667  ;;  %v5686_v1 = vmul.f32 1.442695, %v9901_v61  ;;  %5887 = vmatmul.bf16.gmra.mxu2 %v5867_v39  ;;  %vm5664_vm14 = vcmp.gt.f32.partialorder %v9901_v61, 20.0 }
 0xbc2   : > { %v5751_v41 = vadd.f32 1.0, %v7668_v42  ;;  %v5754_v24 = vmul.f32 -0.5, %v7668_v42  ;;  %v7670_v7 = vpop.eup %7669  ;;  %v5757_v51 = vand.u32 2147483647, %v7668_v42 }
 0xbc3   : > { %7671 = vpow2.f32 %v5686_v1  ;;  %v5744_v29 = vmul.f32 0.6931472, %v7670_v7 }
 0xbc4   : > { %7673 = vlog2.f32 %v5751_v41  ;;  %v5755_v36 = vadd.f32 1.0, %v5754_v24  ;;  %vm5758_vm9 = vcmp.lt.f32.partialorder %v5757_v51, 0.0004427343 }
 0xbc5   : > { %v5750_v33 = vsel %vm5749_vm8, %v5747_v60, %v5744_v29 }
 0xbc6   : > { %v5635_v63 = vpop.f32.mrf.mxu1  ;;  %v5756_v39 = vmul.f32 %v7668_v42, %v5755_v36  ;;  %v5854_v41 = vsel %vm5662_vm10, %v9894_v3, %v5750_v33  ;;  %v5592_v36 = vadd.f32 %v9884_v38, %v5591_v8 }
 0xbc7   : > { %v5636_v54 = vadd.f32 %v5635_v63, %v5587_v35  ;;  %v5594_v35 = vpop.f32.mrf.mxu0 }
 0xbc9   : > { %v7672_v34 = vpop.eup %7671  ;;  %v5688_v9 = vmul.f32 1.442695, %v5636_v54  ;;  %vm5665_vm15 = vcmp.gt.f32.partialorder %v5636_v54, 20.0 }
 0xbca   : > { %v7674_v19 = vpop.eup %7673  ;;  %v5760_v50 = vadd.f32 1.0, %v7672_v34  ;;  %v5763_v42 = vmul.f32 -0.5, %v7672_v34 }
 0xbcb   : > { %7675 = vpow2.f32 %v5688_v9  ;;  %v5753_v11 = vmul.f32 0.6931472, %v7674_v19 }
 0xbcc   : > { %7677 = vlog2.f32 %v5760_v50  ;;  %v5764_v51 = vadd.f32 1.0, %v5763_v42 }
 0xbcd   : > { %v5759_v1 = vsel %vm5758_vm9, %v5756_v39, %v5753_v11 }
 0xbce   : > { %v5638_v16 = vpop.f32.mrf.mxu1  ;;  %v5855_v24 = vsel %vm5663_vm11, %v5631_v13, %v5759_v1  ;;  %v5766_v13 = vand.u32 2147483647, %v7672_v34  ;;  %v5765_v39 = vmul.f32 %v7672_v34, %v5764_v51 }
 0xbcf   : > { %v9908_v58 = vadd.f32 %v5638_v16, %v5590_v59  ;;  %v5868_v7 = vpack.c.bf16 %v5855_v24, %v5854_v41  ;;  %v5596_v1 = vpop.f32.mrf.mxu0 }
 0xbd0   : > { %vm5767_vm12 = vcmp.lt.f32.partialorder %v5766_v13, 0.0004427343 }
 0xbd1   : > { %v7676_v40 = vpop.eup %7675  ;;  %v5690_v63 = vmul.f32 1.442695, %v9908_v58  ;;  %5892 = vmatmul.bf16.gmra.mxu2 %v5868_v7  ;;  %v5595_v7 = vadd.f32 %v9884_v38, %v5594_v35  ;;  %vm5666_vm2 = vcmp.gt.f32.partialorder %v9908_v58, 20.0 }
 0xbd2   : > { %v5769_v15 = vadd.f32 1.0, %v7676_v40  ;;  %v5772_v4 = vmul.f32 -0.5, %v7676_v40  ;;  %v7678_v29 = vpop.eup %7677  ;;  %v5775_v50 = vand.u32 2147483647, %v7676_v40 }
 0xbd3   : > { %7679 = vpow2.f32 %v5690_v63  ;;  %v5762_v60 = vmul.f32 0.6931472, %v7678_v29 }
 0xbd4   : > { %7681 = vlog2.f32 %v5769_v15  ;;  %v5773_v19 = vadd.f32 1.0, %v5772_v4  ;;  %vm5776_vm13 = vcmp.lt.f32.partialorder %v5775_v50, 0.0004427343 }
 0xbd5   : > { %v5768_v41 = vsel %vm5767_vm12, %v5765_v39, %v5762_v60 }
 0xbd6   : > { %v5640_v3 = vpop.f32.mrf.mxu1  ;;  %v5774_v8 = vmul.f32 %v7676_v40, %v5773_v19  ;;  %v5856_v15 = vsel %vm5664_vm14, %v9901_v61, %v5768_v41  ;;  %v5597_v19 = vadd.f32 %v9884_v38, %v5596_v1 }
 0xbd7   : > { %v9912_v9 = vadd.f32 %v5640_v3, %v5592_v36  ;;  %v5599_v60 = vpop.f32.mrf.mxu0 }
 0xbd8   : > { %v5600_v1 = vadd.f32 %v9884_v38, %v5599_v60 }
 0xbd9   : > { %v7680_v33 = vpop.eup %7679  ;;  %v5692_v11 = vmul.f32 1.442695, %v9912_v9  ;;  %vm5667_vm3 = vcmp.gt.f32.partialorder %v9912_v9, 20.0 }
 0xbda   : > { %v7682_v59 = vpop.eup %7681  ;;  %v5778_v16 = vadd.f32 1.0, %v7680_v33  ;;  %v5781_v40 = vmul.f32 -0.5, %v7680_v33 }
 0xbdb   : > { %7683 = vpow2.f32 %v5692_v11  ;;  %v5771_v24 = vmul.f32 0.6931472, %v7682_v59 }
 0xbdc   : > { %7685 = vlog2.f32 %v5778_v16  ;;  %v5782_v50 = vadd.f32 1.0, %v5781_v40 }
 0xbdd   : > { %v5777_v63 = vsel %vm5776_vm13, %v5774_v8, %v5771_v24 }
 0xbde   : > { %v5643_v42 = vpop.f32.mrf.mxu1  ;;  %v5857_v4 = vsel %vm5665_vm15, %v5636_v54, %v5777_v63  ;;  %v5784_v54 = vand.u32 2147483647, %v7680_v33  ;;  %v5783_v8 = vmul.f32 %v7680_v33, %v5782_v50 }
 0xbdf   : > { %v9918_v34 = vadd.f32 %v5643_v42, %v5595_v7  ;;  %v5869_v29 = vpack.c.bf16 %v5857_v4, %v5856_v15 }
 0xbe0   : > { %vm5785_vm0 = vcmp.lt.f32.partialorder %v5784_v54, 0.0004427343 }
 0xbe1   : > { %v7684_v36 = vpop.eup %7683  ;;  %v5694_v51 = vmul.f32 1.442695, %v9918_v34  ;;  %5897 = vmatmul.bf16.gmra.mxu2 %v5869_v29  ;;  %vm5668_vm6 = vcmp.gt.f32.partialorder %v9918_v34, 20.0 }
 0xbe2   : > { %v5787_v3 = vadd.f32 1.0, %v7684_v36  ;;  %v5790_v35 = vmul.f32 -0.5, %v7684_v36  ;;  %v7686_v13 = vpop.eup %7685  ;;  %v5793_v16 = vand.u32 2147483647, %v7684_v36 }
 0xbe3   : > { %7687 = vpow2.f32 %v5694_v51  ;;  %v5780_v39 = vmul.f32 0.6931472, %v7686_v13  ;;  %v5601_v51 = vpop.f32.mrf.mxu0 }
 0xbe4   : > { %7689 = vlog2.f32 %v5787_v3  ;;  %v5791_v59 = vadd.f32 1.0, %v5790_v35  ;;  %vm5794_vm1 = vcmp.lt.f32.partialorder %v5793_v16, 0.0004427343 }
 0xbe5   : > { %v5786_v42 = vsel %vm5785_vm0, %v5783_v8, %v5780_v39  ;;  %v5602_v39 = vadd.f32 %v9884_v38, %v5601_v51 }
 0xbe6   : > { %v5645_v61 = vpop.f32.mrf.mxu1  ;;  %v5792_v4 = vmul.f32 %v7684_v36, %v5791_v59  ;;  %v5858_v3 = vsel %vm5666_vm2, %v9908_v58, %v5786_v42 }
 0xbe7   : > { %v5646_v11 = vadd.f32 %v5645_v61, %v5597_v19 }
 0xbe9   : > { %v7688_v41 = vpop.eup %7687  ;;  %v5696_v24 = vmul.f32 1.442695, %v5646_v11  ;;  %vm5669_vm7 = vcmp.gt.f32.partialorder %v5646_v11, 20.0 }
 0xbea   : > { %v7690_v7 = vpop.eup %7689  ;;  %v5796_v63 = vadd.f32 1.0, %v7688_v41  ;;  %v5799_v60 = vmul.f32 -0.5, %v7688_v41  ;;  %v5802_v16 = vand.u32 2147483647, %v7688_v41 }
 0xbeb   : > { %7691 = vpow2.f32 %v5696_v24  ;;  %v5789_v15 = vmul.f32 0.6931472, %v7690_v7  ;;  %v5604_v7 = vpop.f32.mrf.mxu0 }
 0xbec   : > { %7693 = vlog2.f32 %v5796_v63  ;;  %v5800_v59 = vadd.f32 1.0, %v5799_v60  ;;  %vm5803_vm4 = vcmp.lt.f32.partialorder %v5802_v16, 0.0004427343  ;;  %v5605_v51 = vadd.f32 %v9884_v38, %v5604_v7 }
 0xbed   : > { %v5795_v29 = vsel %vm5794_vm1, %v5792_v4, %v5789_v15 }
 0xbee   : > { %v5648_v40 = vpop.f32.mrf.mxu1  ;;  %v5859_v33 = vsel %vm5667_vm3, %v9912_v9, %v5795_v29  ;;  %v5801_v4 = vmul.f32 %v7688_v41, %v5800_v59 }
 0xbef   : > { %v9927_v35 = vadd.f32 %v5648_v40, %v5600_v1  ;;  %v5870_v13 = vpack.c.bf16 %v5859_v33, %v5858_v3 }
 0xbf1   : > { %v7692_v19 = vpop.eup %7691  ;;  %v5698_v36 = vmul.f32 1.442695, %v9927_v35  ;;  %5902 = vmatmul.bf16.gmra.mxu2 %v5870_v13  ;;  %vm5670_vm10 = vcmp.gt.f32.partialorder %v9927_v35, 20.0 }
 0xbf2   : > { %v5805_v50 = vadd.f32 1.0, %v7692_v19  ;;  %v5808_v61 = vmul.f32 -0.5, %v7692_v19  ;;  %v7694_v54 = vpop.eup %7693  ;;  %v5811_v63 = vand.u32 2147483647, %v7692_v19 }
 0xbf3   : > { %7695 = vpow2.f32 %v5698_v36  ;;  %v5798_v24 = vmul.f32 0.6931472, %v7694_v54 }
 0xbf4   : > { %7697 = vlog2.f32 %v5805_v50  ;;  %v5809_v8 = vadd.f32 1.0, %v5808_v61  ;;  %vm5812_vm5 = vcmp.lt.f32.partialorder %v5811_v63, 0.0004427343 }
 0xbf5   : > { %v5804_v40 = vsel %vm5803_vm4, %v5801_v4, %v5798_v24 }
 0xbf6   : > { %v5650_v58 = vpop.f32.mrf.mxu1  ;;  %v5810_v33 = vmul.f32 %v7692_v19, %v5809_v8  ;;  %v5860_v60 = vsel %vm5668_vm6, %v9918_v34, %v5804_v40 }
 0xbf7   : > { %v5651_v9 = vadd.f32 %v5650_v58, %v5602_v39  ;;  %v5606_v58 = vpop.f32.mrf.mxu0 }
 0xbf8   : > { %v5607_v8 = vadd.f32 %v9884_v38, %v5606_v58 }
 0xbf9   : > { %v7696_v42 = vpop.eup %7695  ;;  %v5700_v15 = vmul.f32 1.442695, %v5651_v9  ;;  %vm5671_vm11 = vcmp.gt.f32.partialorder %v5651_v9, 20.0 }
 0xbfa   : > { %v7698_v1 = vpop.eup %7697  ;;  %v5814_v29 = vadd.f32 1.0, %v7696_v42  ;;  %v5817_v59 = vmul.f32 -0.5, %v7696_v42 }
 0xbfb   : > { %7699 = vpow2.f32 %v5700_v15  ;;  %v5807_v3 = vmul.f32 0.6931472, %v7698_v1  ;;  %v5820_v15 = vand.u32 2147483647, %v7696_v42 }
 0xbfc   : > { %7701 = vlog2.f32 %v5814_v29  ;;  %v5818_v7 = vadd.f32 1.0, %v5817_v59 }
 0xbfd   : > { %v5813_v13 = vsel %vm5812_vm5, %v5810_v33, %v5807_v3  ;;  %vm5821_vm8 = vcmp.lt.f32.partialorder %v5820_v15, 0.0004427343 }
 0xbfe   : > { %v5653_v36 = vpop.f32.mrf.mxu1  ;;  %v5861_v50 = vsel %vm5669_vm7, %v5646_v11, %v5813_v13  ;;  %v5819_v3 = vmul.f32 %v7696_v42, %v5818_v7 }
 0xbff   : > { %v5654_v41 = vadd.f32 %v5653_v36, %v5605_v51  ;;  %v5871_v61 = vpack.c.bf16 %v5861_v50, %v5860_v60 }
 0xc01   : > { %v7700_v54 = vpop.eup %7699  ;;  %v5702_v39 = vmul.f32 1.442695, %v5654_v41  ;;  %5907 = vmatmul.bf16.gmra.mxu2 %v5871_v61  ;;  %vm5672_vm14 = vcmp.gt.f32.partialorder %v5654_v41, 20.0 }
 0xc02   : > { %v5823_v19 = vadd.f32 1.0, %v7700_v54  ;;  %v5826_v16 = vmul.f32 -0.5, %v7700_v54  ;;  %v7702_v24 = vpop.eup %7701  ;;  %v5829_v1 = vand.u32 2147483647, %v7700_v54 }
 0xc03   : > { %7703 = vpow2.f32 %v5702_v39  ;;  %v5816_v11 = vmul.f32 0.6931472, %v7702_v24 }
 0xc04   : > { %7705 = vlog2.f32 %v5823_v19  ;;  %v5827_v4 = vadd.f32 1.0, %v5826_v16  ;;  %vm5830_vm9 = vcmp.lt.f32.partialorder %v5829_v1, 0.0004427343 }
 0xc05   : > { %v5822_v13 = vsel %vm5821_vm8, %v5819_v3, %v5816_v11 }
 0xc06   : > { %v5655_v63 = vpop.f32.mrf.mxu1  ;;  %v5828_v60 = vmul.f32 %v7700_v54, %v5827_v4  ;;  %v5862_v50 = vsel %vm5670_vm10, %v9927_v35, %v5822_v13  ;;  %v9940_v13 = vld [vmem:[%s10126_s9] ss:$0 sm:$0xff] }
 0xc07   : > { %v5656_v34 = vadd.f32 %v5655_v63, %v5607_v8 }
 0xc09   : > { %v7704_v29 = vpop.eup %7703  ;;  %v5704_v40 = vmul.f32 1.442695, %v5656_v34  ;;  %vm5673_vm15 = vcmp.gt.f32.partialorder %v5656_v34, 20.0 }
 0xc0a   : > { %v7706_v33 = vpop.eup %7705  ;;  %v5832_v51 = vadd.f32 1.0, %v7704_v29  ;;  %v5835_v42 = vmul.f32 -0.5, %v7704_v29  ;;  %v5838_v8 = vand.u32 2147483647, %v7704_v29 }
 0xc0b   : > { %7707 = vpow2.f32 %v5704_v40  ;;  %v5825_v36 = vmul.f32 0.6931472, %v7706_v33 }
 0xc0c   : > { %7709 = vlog2.f32 %v5832_v51  ;;  %v5836_v24 = vadd.f32 1.0, %v5835_v42  ;;  %vm5839_vm12 = vcmp.lt.f32.partialorder %v5838_v8, 0.0004427343 }
 0xc0d   : > { %v5831_v38 = vsel %vm5830_vm9, %v5828_v60, %v5825_v36 }
 0xc0e   : > { %v5863_v61 = vsel %vm5671_vm11, %v5651_v9, %v5831_v38  ;;  %v5837_v15 = vmul.f32 %v7704_v29, %v5836_v24 }
 0xc0f   : > { %v5872_v39 = vpack.c.bf16 %v5863_v61, %v5862_v50 }
 0xc11   : > { %v7708_v59 = vpop.eup %7707  ;;  %5912 = vmatmul.bf16.gmra.mxu2 %v5872_v39 }
 0xc12   : > { %v5841_v58 = vadd.f32 1.0, %v7708_v59  ;;  %v5844_v19 = vmul.f32 -0.5, %v7708_v59  ;;  %v7710_v16 = vpop.eup %7709  ;;  %v5847_v63 = vand.u32 2147483647, %v7708_v59 }
 0xc13   : > { %v5834_v54 = vmul.f32 0.6931472, %v7710_v16 }
 0xc14   : > { %7711 = vlog2.f32 %v5841_v58  ;;  %v5845_v7 = vadd.f32 1.0, %v5844_v19  ;;  %vm5848_vm13 = vcmp.lt.f32.partialorder %v5847_v63, 0.0004427343 }
 0xc15   : > { %v5840_v4 = vsel %vm5839_vm12, %v5837_v15, %v5834_v54 }
 0xc16   : > { %v5846_v9 = vmul.f32 %v7708_v59, %v5845_v7  ;;  %v5864_v40 = vsel %vm5672_vm14, %v5654_v41, %v5840_v4 }
 0xc1a   : > { %v7712_v11 = vpop.eup %7711 }
 0xc1b   : > { %v5843_v35 = vmul.f32 0.6931472, %v7712_v11 }
 0xc1d   : > { %v5849_v1 = vsel %vm5848_vm13, %v5846_v9, %v5843_v35 }
 0xc1e   : > { %v5865_v3 = vsel %vm5673_vm15, %v5656_v34, %v5849_v1 }
 0xc1f   : > { %v5873_v33 = vpack.c.bf16 %v5865_v3, %v5864_v40 }
 0xc21   : > { %5917 = vmatmul.bf16.gmra.mxu2 %v5873_v33 }
 0xc34   : > { %v5883_v51 = vpop.f32.mrf.mxu2 }
 0xc35   : > { %v5884_v29 = vadd.f32 %v9940_v13, %v5883_v51 }
 0xc37   : > { %v5939_v36 = vmul.f32 1.442695, %v5884_v29  ;;  %vm5923_vm2 = vcmp.gt.f32.partialorder %v5884_v29, 20.0 }
 0xc39   : > { %7713 = vpow2.f32 %v5939_v36 }
 0xc3c   : > { %v5885_v60 = vpop.f32.mrf.mxu2 }
 0xc3d   : > { %v5886_v38 = vadd.f32 %v9940_v13, %v5885_v60 }
 0xc3f   : > { %v7714_v50 = vpop.eup %7713  ;;  %v5941_v61 = vmul.f32 1.442695, %v5886_v38  ;;  %vm5924_vm3 = vcmp.gt.f32.partialorder %v5886_v38, 20.0 }
 0xc40   : > { %v5971_v39 = vadd.f32 1.0, %v7714_v50  ;;  %v5974_v42 = vmul.f32 -0.5, %v7714_v50  ;;  %v5977_v54 = vand.u32 2147483647, %v7714_v50 }
 0xc41   : > { %7715 = vpow2.f32 %v5941_v61 }
 0xc42   : > { %7717 = vlog2.f32 %v5971_v39  ;;  %v5975_v8 = vadd.f32 1.0, %v5974_v42  ;;  %vm5978_vm0 = vcmp.lt.f32.partialorder %v5977_v54, 0.0004427343 }
 0xc44   : > { %v5888_v41 = vpop.f32.mrf.mxu2  ;;  %v5976_v9 = vmul.f32 %v7714_v50, %v5975_v8 }
 0xc45   : > { %v9945_v34 = vadd.f32 %v9940_v13, %v5888_v41 }
 0xc47   : > { %v7716_v59 = vpop.eup %7715  ;;  %v5943_v58 = vmul.f32 1.442695, %v9945_v34  ;;  %vm5925_vm6 = vcmp.gt.f32.partialorder %v9945_v34, 20.0 }
 0xc48   : > { %v5980_v19 = vadd.f32 1.0, %v7716_v59  ;;  %v5983_v16 = vmul.f32 -0.5, %v7716_v59  ;;  %v7718_v24 = vpop.eup %7717  ;;  %v5986_v4 = vand.u32 2147483647, %v7716_v59 }
 0xc49   : > { %7719 = vpow2.f32 %v5943_v58  ;;  %v5973_v63 = vmul.f32 0.6931472, %v7718_v24 }
 0xc4a   : > { %7721 = vlog2.f32 %v5980_v19  ;;  %v5984_v15 = vadd.f32 1.0, %v5983_v16  ;;  %vm5987_vm1 = vcmp.lt.f32.partialorder %v5986_v4, 0.0004427343 }
 0xc4b   : > { %v5979_v33 = vsel %vm5978_vm0, %v5976_v9, %v5973_v63 }
 0xc4c   : > { %v5890_v7 = vpop.f32.mrf.mxu2  ;;  %v5985_v36 = vmul.f32 %v7716_v59, %v5984_v15  ;;  %v6115_v61 = vsel %vm5923_vm2, %v5884_v29, %v5979_v33 }
 0xc4d   : > { %v5891_v11 = vadd.f32 %v9940_v13, %v5890_v7 }
 0xc4f   : > { %v7720_v35 = vpop.eup %7719  ;;  %v5945_v1 = vmul.f32 1.442695, %v5891_v11  ;;  %vm5926_vm7 = vcmp.gt.f32.partialorder %v5891_v11, 20.0 }
 0xc50   : > { %v7722_v40 = vpop.eup %7721  ;;  %v5989_v3 = vadd.f32 1.0, %v7720_v35  ;;  %v5992_v16 = vmul.f32 -0.5, %v7720_v35  ;;  %v5995_v29 = vand.u32 2147483647, %v7720_v35 }
 0xc51   : > { %v5982_v51 = vmul.f32 0.6931472, %v7722_v40  ;;  %7723 = vpow2.f32 %v5945_v1 }
 0xc52   : > { %7725 = vlog2.f32 %v5989_v3  ;;  %v5993_v54 = vadd.f32 1.0, %v5992_v16  ;;  %vm5996_vm4 = vcmp.lt.f32.partialorder %v5995_v29, 0.0004427343 }
 0xc53   : > { %v5988_v60 = vsel %vm5987_vm1, %v5985_v36, %v5982_v51 }
 0xc54   : > { %v6116_v39 = vsel %vm5924_vm3, %v5886_v38, %v5988_v60  ;;  %v5893_v41 = vpop.f32.mrf.mxu2  ;;  %v5994_v40 = vmul.f32 %v7720_v35, %v5993_v54 }
 0xc55   : > { %v6131_v42 = vpack.c.bf16 %v6116_v39, %v6115_v61  ;;  %v9950_v58 = vadd.f32 %v9940_v13, %v5893_v41 }
 0xc57   : > { %v7724_v50 = vpop.eup %7723  ;;  %v5947_v19 = vmul.f32 1.442695, %v9950_v58  ;;  %6147 = vmatmul.bf16.vlgmr.msrb.gmra.mxu3 %v6131_v42  ;;  %vm5927_vm10 = vcmp.gt.f32.partialorder %v9950_v58, 20.0 }
 0xc58   : > { %v5998_v24 = vadd.f32 1.0, %v7724_v50  ;;  %v6001_v59 = vmul.f32 -0.5, %v7724_v50  ;;  %v7726_v8 = vpop.eup %7725  ;;  %v6004_v4 = vand.u32 2147483647, %v7724_v50 }
 0xc59   : > { %7727 = vpow2.f32 %v5947_v19  ;;  %v5991_v63 = vmul.f32 0.6931472, %v7726_v8 }
 0xc5a   : > { %7729 = vlog2.f32 %v5998_v24  ;;  %v6002_v15 = vadd.f32 1.0, %v6001_v59  ;;  %vm6005_vm5 = vcmp.lt.f32.partialorder %v6004_v4, 0.0004427343 }
 0xc5b   : > { %v5997_v51 = vsel %vm5996_vm4, %v5994_v40, %v5991_v63 }
 0xc5c   : > { %v5895_v7 = vpop.f32.mrf.mxu2  ;;  %v6003_v60 = vmul.f32 %v7724_v50, %v6002_v15  ;;  %v6117_v41 = vsel %vm5925_vm6, %v9945_v34, %v5997_v51 }
 0xc5d   : > { %v5896_v38 = vadd.f32 %v9940_v13, %v5895_v7 }
 0xc5f   : > { %v7728_v9 = vpop.eup %7727  ;;  %v5949_v1 = vmul.f32 1.442695, %v5896_v38  ;;  %vm5928_vm11 = vcmp.gt.f32.partialorder %v5896_v38, 20.0 }
 0xc60   : > { %v7730_v3 = vpop.eup %7729  ;;  %v6007_v33 = vadd.f32 1.0, %v7728_v9  ;;  %v6010_v59 = vmul.f32 -0.5, %v7728_v9  ;;  %v6013_v63 = vand.u32 2147483647, %v7728_v9 }
 0xc61   : > { %7731 = vpow2.f32 %v5949_v1  ;;  %v6000_v36 = vmul.f32 0.6931472, %v7730_v3 }
 0xc62   : > { %7733 = vlog2.f32 %v6007_v33  ;;  %v6011_v7 = vadd.f32 1.0, %v6010_v59  ;;  %vm6014_vm8 = vcmp.lt.f32.partialorder %v6013_v63, 0.0004427343 }
 0xc63   : > { %v6006_v61 = vsel %vm6005_vm5, %v6003_v60, %v6000_v36 }
 0xc64   : > { %v5898_v39 = vpop.f32.mrf.mxu2  ;;  %v6118_v42 = vsel %vm5926_vm7, %v5891_v11, %v6006_v61  ;;  %v6012_v3 = vmul.f32 %v7728_v9, %v6011_v7 }
 0xc65   : > { %v9957_v19 = vadd.f32 %v9940_v13, %v5898_v39  ;;  %v6132_v35 = vpack.c.bf16 %v6118_v42, %v6117_v41 }
 0xc67   : > { %v7732_v16 = vpop.eup %7731  ;;  %v5951_v24 = vmul.f32 1.442695, %v9957_v19  ;;  %6152 = vmatmul.bf16.gmra.mxu3 %v6132_v35  ;;  %vm5929_vm14 = vcmp.gt.f32.partialorder %v9957_v19, 20.0 }
 0xc68   : > { %v6016_v50 = vadd.f32 1.0, %v7732_v16  ;;  %v6019_v8 = vmul.f32 -0.5, %v7732_v16  ;;  %v7734_v54 = vpop.eup %7733  ;;  %v6022_v4 = vand.u32 2147483647, %v7732_v16 }
 0xc69   : > { %7735 = vpow2.f32 %v5951_v24  ;;  %v6009_v11 = vmul.f32 0.6931472, %v7734_v54 }
 0xc6a   : > { %7737 = vlog2.f32 %v6016_v50  ;;  %v6020_v15 = vadd.f32 1.0, %v6019_v8  ;;  %vm6023_vm9 = vcmp.lt.f32.partialorder %v6022_v4, 0.0004427343 }
 0xc6b   : > { %v6015_v36 = vsel %vm6014_vm8, %v6012_v3, %v6009_v11 }
 0xc6c   : > { %v5900_v29 = vpop.f32.mrf.mxu2  ;;  %v6021_v61 = vmul.f32 %v7732_v16, %v6020_v15  ;;  %v6119_v42 = vsel %vm5927_vm10, %v9950_v58, %v6015_v36 }
 0xc6d   : > { %v5901_v34 = vadd.f32 %v9940_v13, %v5900_v29 }
 0xc6f   : > { %v7736_v1 = vpop.eup %7735  ;;  %v5953_v40 = vmul.f32 1.442695, %v5901_v34  ;;  %vm5930_vm15 = vcmp.gt.f32.partialorder %v5901_v34, 20.0 }
 0xc70   : > { %v7738_v33 = vpop.eup %7737  ;;  %v6025_v51 = vadd.f32 1.0, %v7736_v1  ;;  %v6028_v8 = vmul.f32 -0.5, %v7736_v1  ;;  %v6031_v11 = vand.u32 2147483647, %v7736_v1 }
 0xc71   : > { %7739 = vpow2.f32 %v5953_v40  ;;  %v6018_v60 = vmul.f32 0.6931472, %v7738_v33 }
 0xc72   : > { %7741 = vlog2.f32 %v6025_v51  ;;  %v6029_v29 = vadd.f32 1.0, %v6028_v8  ;;  %vm6032_vm12 = vcmp.lt.f32.partialorder %v6031_v11, 0.0004427343 }
 0xc73   : > { %v6024_v39 = vsel %vm6023_vm9, %v6021_v61, %v6018_v60 }
 0xc74   : > { %v5903_v41 = vpop.f32.mrf.mxu2  ;;  %v6120_v35 = vsel %vm5928_vm11, %v5896_v38, %v6024_v39  ;;  %v6030_v33 = vmul.f32 %v7736_v1, %v6029_v29 }
 0xc75   : > { %v9964_v24 = vadd.f32 %v9940_v13, %v5903_v41  ;;  %v6133_v9 = vpack.c.bf16 %v6120_v35, %v6119_v42 }
 0xc77   : > { %v7740_v59 = vpop.eup %7739  ;;  %v5955_v50 = vmul.f32 1.442695, %v9964_v24  ;;  %6157 = vmatmul.bf16.gmra.mxu3 %v6133_v9  ;;  %vm5931_vm2 = vcmp.gt.f32.partialorder %v9964_v24, 20.0 }
 0xc78   : > { %v6034_v16 = vadd.f32 1.0, %v7740_v59  ;;  %v6037_v54 = vmul.f32 -0.5, %v7740_v59  ;;  %v7742_v7 = vpop.eup %7741  ;;  %v6040_v4 = vand.u32 2147483647, %v7740_v59 }
 0xc79   : > { %7743 = vpow2.f32 %v5955_v50  ;;  %v6027_v38 = vmul.f32 0.6931472, %v7742_v7 }
 0xc7a   : > { %7745 = vlog2.f32 %v6034_v16  ;;  %v6038_v15 = vadd.f32 1.0, %v6037_v54  ;;  %vm6041_vm13 = vcmp.lt.f32.partialorder %v6040_v4, 0.0004427343 }
 0xc7b   : > { %v6033_v60 = vsel %vm6032_vm12, %v6030_v33, %v6027_v38 }
 0xc7c   : > { %v5905_v63 = vpop.f32.mrf.mxu2  ;;  %v6039_v39 = vmul.f32 %v7740_v59, %v6038_v15  ;;  %v6121_v35 = vsel %vm5929_vm14, %v9957_v19, %v6033_v60 }
 0xc7d   : > { %v5906_v58 = vadd.f32 %v9940_v13, %v5905_v63 }
 0xc7f   : > { %v7744_v40 = vpop.eup %7743  ;;  %v5957_v3 = vmul.f32 1.442695, %v5906_v58  ;;  %vm5932_vm3 = vcmp.gt.f32.partialorder %v5906_v58, 20.0 }
 0xc80   : > { %v7746_v51 = vpop.eup %7745  ;;  %v6043_v36 = vadd.f32 1.0, %v7744_v40  ;;  %v6046_v54 = vmul.f32 -0.5, %v7744_v40  ;;  %v6049_v38 = vand.u32 2147483647, %v7744_v40 }
 0xc81   : > { %7747 = vpow2.f32 %v5957_v3  ;;  %v6036_v61 = vmul.f32 0.6931472, %v7746_v51 }
 0xc82   : > { %7749 = vlog2.f32 %v6043_v36  ;;  %v6047_v63 = vadd.f32 1.0, %v6046_v54  ;;  %vm6050_vm0 = vcmp.lt.f32.partialorder %v6049_v38, 0.0004427343 }
 0xc83   : > { %v6042_v41 = vsel %vm6041_vm13, %v6039_v39, %v6036_v61 }
 0xc84   : > { %v5908_v42 = vpop.f32.mrf.mxu2  ;;  %v6122_v9 = vsel %vm5930_vm15, %v5901_v34, %v6042_v41  ;;  %v6048_v51 = vmul.f32 %v7744_v40, %v6047_v63 }
 0xc85   : > { %v9971_v50 = vadd.f32 %v9940_v13, %v5908_v42  ;;  %v6134_v1 = vpack.c.bf16 %v6122_v9, %v6121_v35 }
 0xc87   : > { %v7748_v8 = vpop.eup %7747  ;;  %v5959_v16 = vmul.f32 1.442695, %v9971_v50  ;;  %6162 = vmatmul.bf16.gmra.mxu3 %v6134_v1  ;;  %vm5933_vm6 = vcmp.gt.f32.partialorder %v9971_v50, 20.0 }
 0xc88   : > { %v6052_v59 = vadd.f32 1.0, %v7748_v8  ;;  %v6055_v7 = vmul.f32 -0.5, %v7748_v8  ;;  %v7750_v29 = vpop.eup %7749  ;;  %v6058_v4 = vand.u32 2147483647, %v7748_v8 }
 0xc89   : > { %7751 = vpow2.f32 %v5959_v16  ;;  %v6045_v34 = vmul.f32 0.6931472, %v7750_v29 }
 0xc8a   : > { %7753 = vlog2.f32 %v6052_v59  ;;  %v6056_v15 = vadd.f32 1.0, %v6055_v7  ;;  %vm6059_vm1 = vcmp.lt.f32.partialorder %v6058_v4, 0.0004427343 }
 0xc8b   : > { %v6051_v61 = vsel %vm6050_vm0, %v6048_v51, %v6045_v34  ;;  %vm6301_vm0 = vcmask 64512  }
 0xc8c   : > { %v5910_v11 = vpop.f32.mrf.mxu2  ;;  %v6057_v41 = vmul.f32 %v7748_v8, %v6056_v15  ;;  %v6123_v9 = vsel %vm5931_vm2, %v9964_v24, %v6051_v61 }
 0xc8d   : > { %v5911_v19 = vadd.f32 %v9940_v13, %v5910_v11 }
 0xc8f   : > { %v7752_v3 = vpop.eup %7751  ;;  %v5961_v33 = vmul.f32 1.442695, %v5911_v19  ;;  %vm5934_vm7 = vcmp.gt.f32.partialorder %v5911_v19, 20.0 }
 0xc90   : > { %v7754_v36 = vpop.eup %7753  ;;  %v6061_v60 = vadd.f32 1.0, %v7752_v3  ;;  %v6064_v7 = vmul.f32 -0.5, %v7752_v3  ;;  %v6067_v34 = vand.u32 2147483647, %v7752_v3 }
 0xc91   : > { %7755 = vpow2.f32 %v5961_v33  ;;  %v6054_v39 = vmul.f32 0.6931472, %v7754_v36 }
 0xc92   : > { %7757 = vlog2.f32 %v6061_v60  ;;  %v6065_v11 = vadd.f32 1.0, %v6064_v7  ;;  %vm6068_vm4 = vcmp.lt.f32.partialorder %v6067_v34, 0.0004427343 }
 0xc93   : > { %v6060_v42 = vsel %vm6059_vm1, %v6057_v41, %v6054_v39 }
 0xc94   : > { %v5913_v35 = vpop.f32.mrf.mxu2  ;;  %v6124_v1 = vsel %vm5932_vm3, %v5906_v58, %v6060_v42  ;;  %v6066_v36 = vmul.f32 %v7752_v3, %v6065_v11 }
 0xc95   : > { %v9978_v16 = vadd.f32 %v9940_v13, %v5913_v35  ;;  %v6135_v40 = vpack.c.bf16 %v6124_v1, %v6123_v9 }
 0xc97   : > { %v7756_v54 = vpop.eup %7755  ;;  %v5963_v59 = vmul.f32 1.442695, %v9978_v16  ;;  %6167 = vmatmul.bf16.gmra.mxu3 %v6135_v40  ;;  %vm5935_vm10 = vcmp.gt.f32.partialorder %v9978_v16, 20.0 }
 0xc98   : > { %v6070_v8 = vadd.f32 1.0, %v7756_v54  ;;  %v6073_v29 = vmul.f32 -0.5, %v7756_v54  ;;  %v7758_v63 = vpop.eup %7757  ;;  %v6076_v4 = vand.u32 2147483647, %v7756_v54 }
 0xc99   : > { %7759 = vpow2.f32 %v5963_v59  ;;  %v6063_v58 = vmul.f32 0.6931472, %v7758_v63 }
 0xc9a   : > { %7761 = vlog2.f32 %v6070_v8  ;;  %v6074_v15 = vadd.f32 1.0, %v6073_v29  ;;  %vm6077_vm5 = vcmp.lt.f32.partialorder %v6076_v4, 0.0004427343 }
 0xc9b   : > { %v6069_v39 = vsel %vm6068_vm4, %v6066_v36, %v6063_v58 }
 0xc9c   : > { %v5915_v38 = vpop.f32.mrf.mxu2  ;;  %v6075_v42 = vmul.f32 %v7756_v54, %v6074_v15  ;;  %v6125_v1 = vsel %vm5933_vm6, %v9971_v50, %v6069_v39 }
 0xc9d   : > { %v5916_v24 = vadd.f32 %v9940_v13, %v5915_v38 }
 0xc9f   : > { %v7760_v33 = vpop.eup %7759  ;;  %v5965_v51 = vmul.f32 1.442695, %v5916_v24  ;;  %vm5936_vm11 = vcmp.gt.f32.partialorder %v5916_v24, 20.0 }
 0xca0   : > { %v7762_v60 = vpop.eup %7761  ;;  %v6079_v61 = vadd.f32 1.0, %v7760_v33  ;;  %v6082_v29 = vmul.f32 -0.5, %v7760_v33  ;;  %v6085_v58 = vand.u32 2147483647, %v7760_v33 }
 0xca1   : > { %7763 = vpow2.f32 %v5965_v51  ;;  %v6072_v41 = vmul.f32 0.6931472, %v7762_v60 }
 0xca2   : > { %7765 = vlog2.f32 %v6079_v61  ;;  %v6083_v38 = vadd.f32 1.0, %v6082_v29  ;;  %vm6086_vm8 = vcmp.lt.f32.partialorder %v6085_v58, 0.0004427343 }
 0xca3   : > { %v6078_v35 = vsel %vm6077_vm5, %v6075_v42, %v6072_v41 }
 0xca4   : > { %v5918_v9 = vpop.f32.mrf.mxu2  ;;  %v6126_v40 = vsel %vm5934_vm7, %v5911_v19, %v6078_v35  ;;  %v6084_v60 = vmul.f32 %v7760_v33, %v6083_v38 }
 0xca5   : > { %v5919_v59 = vadd.f32 %v9940_v13, %v5918_v9  ;;  %v6136_v3 = vpack.c.bf16 %v6126_v40, %v6125_v1 }
 0xca7   : > { %v7764_v7 = vpop.eup %7763  ;;  %v5967_v8 = vmul.f32 1.442695, %v5919_v59  ;;  %6172 = vmatmul.bf16.gmra.mxu3 %v6136_v3  ;;  %vm5937_vm14 = vcmp.gt.f32.partialorder %v5919_v59, 20.0 }
 0xca8   : > { %v6088_v63 = vadd.f32 1.0, %v7764_v7  ;;  %v6091_v54 = vmul.f32 -0.5, %v7764_v7  ;;  %v7766_v11 = vpop.eup %7765  ;;  %v6094_v4 = vand.u32 2147483647, %v7764_v7 }
 0xca9   : > { %7767 = vpow2.f32 %v5967_v8  ;;  %v6081_v50 = vmul.f32 0.6931472, %v7766_v11 }
 0xcaa   : > { %7769 = vlog2.f32 %v6088_v63  ;;  %v6092_v19 = vadd.f32 1.0, %v6091_v54  ;;  %vm6095_vm9 = vcmp.lt.f32.partialorder %v6094_v4, 0.0004427343 }
 0xcab   : > { %v6087_v41 = vsel %vm6086_vm8, %v6084_v60, %v6081_v50 }
 0xcac   : > { %v5920_v34 = vpop.f32.mrf.mxu2  ;;  %v6093_v35 = vmul.f32 %v7764_v7, %v6092_v19 }
 0xcad   : > { %v5921_v15 = vadd.f32 %v9940_v13, %v5920_v34  ;;  %v6127_v13 = vsel %vm5935_vm10, %v9978_v16, %v6087_v41 }
 0xcaf   : > { %v7768_v51 = vpop.eup %7767  ;;  %v5969_v36 = vmul.f32 1.442695, %v5921_v15  ;;  %vm5938_vm15 = vcmp.gt.f32.partialorder %v5921_v15, 20.0 }
 0xcb0   : > { %v7770_v61 = vpop.eup %7769  ;;  %v6097_v39 = vadd.f32 1.0, %v7768_v51  ;;  %v6100_v33 = vmul.f32 -0.5, %v7768_v51  ;;  %v6103_v11 = vand.u32 2147483647, %v7768_v51 }
 0xcb1   : > { %7771 = vpow2.f32 %v5969_v36  ;;  %v6090_v42 = vmul.f32 0.6931472, %v7770_v61 }
 0xcb2   : > { %7773 = vlog2.f32 %v6097_v39  ;;  %v6101_v54 = vadd.f32 1.0, %v6100_v33  ;;  %vm6104_vm12 = vcmp.lt.f32.partialorder %v6103_v11, 0.0004427343  ;;  %v6188_v39 = vadd.f32 %v9668_v47, %v9295_v12 }
 0xcb3   : > { %v6096_v9 = vsel %vm6095_vm9, %v6093_v35, %v6090_v42  ;;  %v6189_v42 = vadd.f32 %v9675_v57, %v9300_v6  ;;  %v9996_v35 = vld [vmem:[%s10128_s11] ss:$0 sm:$0xff]  ;;  %v6190_v57 = vadd.f32 %v9682_v21, %v9307_v30 }
 0xcb4   : > { %v6128_v1 = vsel %vm5936_vm11, %v5916_v24, %v6096_v9  ;;  %v6102_v58 = vmul.f32 %v7768_v51, %v6101_v54  ;;  %v6204_v41 = vmul.f32 3.0, %v6188_v39  ;;  %v10000_v9 = vstv %s525_s28 }
 0xcb5   : > { %v6137_v40 = vpack.c.bf16 %v6128_v1, %v6127_v13  ;;  %v6205_v12 = vmul.f32 3.0, %v6189_v42  ;;  %v7942_v1 = vld [vmem:[#allocation2 + $0x30] sm:$0xff]  ;;  %v6193_v39 = vadd.f32 %v9703_v27, %v9339_v44 }
 0xcb6   : > { %v7946_v42 = vld [vmem:[#allocation2 + $0x50] sm:$0xff] }
 0xcb7   : > { %v7772_v3 = vpop.eup %7771  ;;  %6177 = vmatmul.bf16.gmra.mxu3 %v6137_v40  ;;  %v6221_v33 = vadd.f32 %v6205_v12, %v8848_v10 }
 0xcb8   : > { %v6106_v8 = vadd.f32 1.0, %v7772_v3  ;;  %v6109_v29 = vmul.f32 -0.5, %v7772_v3  ;;  %v7774_v63 = vpop.eup %7773  ;;  %v6112_v34 = vand.u32 2147483647, %v7772_v3 }
 0xcb9   : > { %v6099_v7 = vmul.f32 0.6931472, %v7774_v63  ;;  %v7943_v63 = vld [vmem:[#allocation2] sm:$0xff] }
 0xcba   : > { %7775 = vlog2.f32 %v6106_v8  ;;  %v6110_v38 = vadd.f32 1.0, %v6109_v29  ;;  %vm6113_vm13 = vcmp.lt.f32.partialorder %v6112_v34, 0.0004427343  ;;  %v6206_v8 = vmul.f32 3.0, %v6190_v57 }
 0xcbb   : > { %v6105_v16 = vsel %vm6104_vm12, %v6102_v58, %v6099_v7  ;;  %v6191_v7 = vadd.f32 %v9689_v14, %v9315_v53  ;;  %v7944_v58 = vld [vmem:[#allocation2 + $0x58] sm:$0xff]  ;;  %v6195_v57 = vadd.f32 %v9717_v26, %v9360_v56 }
 0xcbc   : > { %v6111_v19 = vmul.f32 %v7772_v3, %v6110_v38  ;;  %v6129_v36 = vsel %vm5937_vm14, %v5919_v59, %v6105_v16  ;;  %v6222_v21 = vadd.f32 %v6206_v8, %v8857_v43 }
 0xcbd   : > { %v6207_v38 = vmul.f32 3.0, %v6191_v7  ;;  %v7949_v7 = vld [vmem:[#allocation2 + $0x48] sm:$0xff] }
 0xcbf   : > { %v6223_v14 = vadd.f32 %v6207_v38, %v8867_v20 }
 0xcc0   : > { %v7776_v50 = vpop.eup %7775 }
 0xcc1   : > { %v6108_v24 = vmul.f32 0.6931472, %v7776_v50 }
 0xcc3   : > { %v6114_v4 = vsel %vm6113_vm13, %v6111_v19, %v6108_v24  ;;  %v6192_v24 = vadd.f32 %v9696_v46, %v9328_v18 }
 0xcc4   : > { %v6130_v60 = vsel %vm5938_vm15, %v5921_v15, %v6114_v4  ;;  %v6220_v15 = vadd.f32 %v6204_v41, %v8839_v23  ;;  %v6209_v41 = vmul.f32 3.0, %v6193_v39 }
 0xcc5   : > { %v6138_v61 = vpack.c.bf16 %v6130_v60, %v6129_v36  ;;  %v6208_v19 = vmul.f32 3.0, %v6192_v24  ;;  %v7945_v36 = vld [vmem:[#allocation2 + $0x18] sm:$0xff]  ;;  %v6198_v24 = vadd.f32 %v9738_v2, %v9379_v22  ;;  %v10167_v2 = vld [vmem:[#allocation14_spill] sm:$0xff] }
 0xcc6   : > { %v6225_v27 = vadd.f32 %v6209_v41, %v8895_v62  ;;  %v10168_v41 = vld [vmem:[#allocation20_spill] sm:$0xff] }
 0xcc7   : > { %6182 = vmatmul.bf16.gmra.mxu3 %v6138_v61  ;;  %v6224_v46 = vadd.f32 %v6208_v19, %v8882_v45 }
 0xcda   : > { %v6148_v51 = vpop.f32.mrf.mxu3 }
 0xcdb   : > { %v6149_v59 = vadd.f32 %v9996_v35, %v6148_v51 }
 0xcdd   : > { %v6236_v13 = vadd.f32 %v6220_v15, %v6149_v59 }
 0xcdf   : > { %v6253_v47 = vmul.f32 %v10000_v9, %v6236_v13  ;;  %v6194_v13 = vadd.f32 %v9710_v0, %v9352_v37 }
 0xce1   : > { %v6269_v40 = vadd.f32 %v7942_v1, %v6253_v47  ;;  %v6210_v12 = vmul.f32 3.0, %v6194_v13  ;;  %v7947_v1 = vld [vmem:[#allocation2 + $0x68] sm:$0xff] }
 0xce2   : > { %v6150_v6 = vpop.f32.mrf.mxu3 }
 0xce3   : > { %6285 = vst [vmem:[#allocation2 + $0x30] sm:$0xff] %v6269_v40  ;;  %v6151_v3 = vadd.f32 %v9996_v35, %v6150_v6  ;;  %v6226_v0 = vadd.f32 %v6210_v12, %v8910_v31 }
 0xce4   : > { %6302 = vst.msk [vmem:[%s8235_s16] sm:$0xff] %vm6301_vm0, %v6269_v40 }
 0xce5   : > { %v6237_v23 = vadd.f32 %v6221_v33, %v6151_v3  ;;  %v6211_v3 = vmul.f32 3.0, %v6195_v57  ;;  %v10173_v57 = vld [vmem:[#allocation16_spill] sm:$0xff] }
 0xce7   : > { %v6254_v29 = vmul.f32 %v10000_v9, %v6237_v23  ;;  %v7948_v23 = vld [vmem:[#allocation2 + $0x8] sm:$0xff]  ;;  %v6227_v26 = vadd.f32 %v6211_v3, %v8920_v32 }
 0xce9   : > { %v6270_v54 = vadd.f32 %v7943_v63, %v6254_v29  ;;  %v6196_v63 = vadd.f32 %v9724_v55, %v9367_v5 }
 0xcea   : > { %v6153_v11 = vpop.f32.mrf.mxu3 }
 0xceb   : > { %6286 = vst [vmem:[#allocation2] sm:$0xff] %v6270_v54  ;;  %v6154_v30 = vadd.f32 %v9996_v35, %v6153_v11 }
 0xcec   : > { %6303 = vst.msk [vmem:[%s8235_s16 + $0x8] sm:$0xff] %vm6301_vm0, %v6270_v54  ;;  %v6212_v54 = vmul.f32 3.0, %v6196_v63  ;;  %v10175_v63 = vld [vmem:[#allocation26_spill] sm:$0xff] }
 0xced   : > { %v6238_v10 = vadd.f32 %v6222_v21, %v6154_v30 }
 0xcee   : > { %v6228_v55 = vadd.f32 %v6212_v54, %v8929_v49 }
 0xcef   : > { %v6255_v34 = vmul.f32 %v10000_v9, %v6238_v10  ;;  %v6197_v10 = vadd.f32 %v9731_v17, %v9372_v28 }
 0xcf1   : > { %v6271_v50 = vadd.f32 %v7944_v58, %v6255_v34  ;;  %v6213_v38 = vmul.f32 3.0, %v6197_v10  ;;  %v7950_v58 = vld [vmem:[#allocation2 + $0x40] sm:$0xff] }
 0xcf2   : > { %v6155_v16 = vpop.f32.mrf.mxu3 }
 0xcf3   : > { %6287 = vst [vmem:[#allocation2 + $0x58] sm:$0xff] %v6271_v50  ;;  %v6156_v53 = vadd.f32 %v9996_v35, %v6155_v16  ;;  %v6229_v17 = vadd.f32 %v6213_v38, %v8936_v52 }
 0xcf4   : > { %6304 = vst.msk [vmem:[%s8235_s16 + $0x10] sm:$0xff] %vm6301_vm0, %v6271_v50 }
 0xcf5   : > { %v6239_v43 = vadd.f32 %v6223_v14, %v6156_v53  ;;  %v6214_v53 = vmul.f32 3.0, %v6198_v24 }
 0xcf7   : > { %v6256_v4 = vmul.f32 %v10000_v9, %v6239_v43  ;;  %v7951_v43 = vld [vmem:[#allocation2 + $0x20] sm:$0xff] }
 0xcf9   : > { %v6272_v60 = vadd.f32 %v7945_v36, %v6256_v4  ;;  %v6199_v36 = vadd.f32 %v9745_v25, %v9384_v48  ;;  %v10170_v25 = vld [vmem:[#allocation15_spill] sm:$0xff] }
 0xcfa   : > { %v6158_v61 = vpop.f32.mrf.mxu3 }
 0xcfb   : > { %6288 = vst [vmem:[#allocation2 + $0x18] sm:$0xff] %v6272_v60  ;;  %v6159_v18 = vadd.f32 %v9996_v35, %v6158_v61  ;;  %v6215_v61 = vmul.f32 3.0, %v6199_v36 }
 0xcfc   : > { %6305 = vst.msk [vmem:[%s8235_s16 + $0x18] sm:$0xff] %vm6301_vm0, %v6272_v60  ;;  %v6230_v60 = vadd.f32 %v6214_v53, %v10167_v2 }
 0xcfd   : > { %v6240_v20 = vadd.f32 %v6224_v46, %v6159_v18  ;;  %v7952_v18 = vld [vmem:[#allocation2 + $0x10] sm:$0xff] }
 0xcff   : > { %v6257_v51 = vmul.f32 %v10000_v9, %v6240_v20 }
 0xd01   : > { %v6273_v59 = vadd.f32 %v7946_v42, %v6257_v51  ;;  %v10169_v51 = vld [vmem:[#allocation24_spill] sm:$0xff] }
 0xd02   : > { %v6160_v15 = vpop.f32.mrf.mxu3  ;;  %v6200_v42 = vadd.f32 %v10169_v51, %v10168_v41 }
 0xd03   : > { %6289 = vst [vmem:[#allocation2 + $0x50] sm:$0xff] %v6273_v59  ;;  %v6161_v44 = vadd.f32 %v9996_v35, %v6160_v15 }
 0xd04   : > { %6306 = vst.msk [vmem:[%s8235_s16 + $0x20] sm:$0xff] %vm6301_vm0, %v6273_v59  ;;  %v6231_v59 = vadd.f32 %v6215_v61, %v10170_v25  ;;  %v6216_v13 = vmul.f32 3.0, %v6200_v42 }
 0xd05   : > { %v6241_v45 = vadd.f32 %v6225_v27, %v6161_v44  ;;  %v7953_v27 = vld [vmem:[#allocation2 + $0x38] sm:$0xff] }
 0xd07   : > { %v6258_v47 = vmul.f32 %v10000_v9, %v6241_v45 }
 0xd09   : > { %v6274_v40 = vadd.f32 %v7947_v1, %v6258_v47  ;;  %v10171_v47 = vld [vmem:[#allocation21_spill] sm:$0xff] }
 0xd0a   : > { %v6163_v6 = vpop.f32.mrf.mxu3  ;;  %v10172_v1 = vld [vmem:[#allocation25_spill] sm:$0xff] }
 0xd0b   : > { %6290 = vst [vmem:[#allocation2 + $0x68] sm:$0xff] %v6274_v40  ;;  %v6164_v37 = vadd.f32 %v9996_v35, %v6163_v6 }
 0xd0c   : > { %6307 = vst.msk [vmem:[%s8235_s16 + $0x28] sm:$0xff] %vm6301_vm0, %v6274_v40  ;;  %v6201_v40 = vadd.f32 %v10172_v1, %v10171_v47 }
 0xd0d   : > { %v6242_v62 = vadd.f32 %v6226_v0, %v6164_v37  ;;  %v6232_v37 = vadd.f32 %v6216_v13, %v10173_v57 }
 0xd0f   : > { %v6259_v33 = vmul.f32 %v10000_v9, %v6242_v62  ;;  %v6217_v62 = vmul.f32 3.0, %v6201_v40 }
 0xd11   : > { %v6275_v8 = vadd.f32 %v7948_v23, %v6259_v33  ;;  %v7954_v33 = vld [vmem:[#allocation2 + $0x60] sm:$0xff] }
 0xd12   : > { %v6165_v29 = vpop.f32.mrf.mxu3 }
 0xd13   : > { %6291 = vst [vmem:[#allocation2 + $0x8] sm:$0xff] %v6275_v8  ;;  %v6166_v56 = vadd.f32 %v9996_v35, %v6165_v29  ;;  %v10174_v29 = vld [vmem:[#allocation22_spill] sm:$0xff] }
 0xd14   : > { %6308 = vst.msk [vmem:[%s8235_s16 + $0x30] sm:$0xff] %vm6301_vm0, %v6275_v8 }
 0xd15   : > { %v6243_v31 = vadd.f32 %v6227_v26, %v6166_v56  ;;  %v6202_v56 = vadd.f32 %v10175_v63, %v10174_v29 }
 0xd17   : > { %v6260_v11 = vmul.f32 %v10000_v9, %v6243_v31  ;;  %v10176_v31 = vld [vmem:[#allocation17_spill] sm:$0xff] }
 0xd18   : > { %v6233_v54 = vadd.f32 %v6217_v62, %v10176_v31 }
 0xd19   : > { %v6276_v30 = vadd.f32 %v7949_v7, %v6260_v11  ;;  %v6218_v7 = vmul.f32 3.0, %v6202_v56 }
 0xd1a   : > { %v6168_v21 = vpop.f32.mrf.mxu3 }
 0xd1b   : > { %6292 = vst [vmem:[#allocation2 + $0x48] sm:$0xff] %v6276_v30  ;;  %v6169_v5 = vadd.f32 %v9996_v35, %v6168_v21  ;;  %v7955_v21 = vld [vmem:[#allocation2 + $0x70] sm:$0xff] }
 0xd1c   : > { %6309 = vst.msk [vmem:[%s8235_s16 + $0x38] sm:$0xff] %vm6301_vm0, %v6276_v30 }
 0xd1d   : > { %v6244_v32 = vadd.f32 %v6228_v55, %v6169_v5  ;;  %v10177_v55 = vld [vmem:[#allocation23_spill] sm:$0xff] }
 0xd1f   : > { %v6261_v34 = vmul.f32 %v10000_v9, %v6244_v32  ;;  %v10178_v32 = vld [vmem:[#allocation27_spill] sm:$0xff] }
 0xd20   : > { %v6203_v38 = vadd.f32 %v10178_v32, %v10177_v55 }
 0xd21   : > { %v6277_v50 = vadd.f32 %v7950_v58, %v6261_v34  ;;  %v10179_v58 = vld [vmem:[#allocation18_spill] sm:$0xff] }
 0xd22   : > { %v6170_v16 = vpop.f32.mrf.mxu3  ;;  %v6219_v24 = vmul.f32 3.0, %v6203_v38 }
 0xd23   : > { %6293 = vst [vmem:[#allocation2 + $0x40] sm:$0xff] %v6277_v50  ;;  %v6171_v28 = vadd.f32 %v9996_v35, %v6170_v16 }
 0xd24   : > { %6310 = vst.msk [vmem:[%s8235_s16 + $0x40] sm:$0xff] %vm6301_vm0, %v6277_v50  ;;  %v6234_v50 = vadd.f32 %v6218_v7, %v10179_v58 }
 0xd25   : > { %v6245_v49 = vadd.f32 %v6229_v17, %v6171_v28  ;;  %v7956_v17 = vld [vmem:[#allocation2 + $0x78] sm:$0xff] }
 0xd27   : > { %v6262_v14 = vmul.f32 %v10000_v9, %v6245_v49 }
 0xd29   : > { %v6278_v19 = vadd.f32 %v7951_v43, %v6262_v14  ;;  %v10180_v43 = vld [vmem:[#allocation19_spill] sm:$0xff] }
 0xd2a   : > { %v6173_v4 = vpop.f32.mrf.mxu3 }
 0xd2b   : > { %6294 = vst [vmem:[#allocation2 + $0x20] sm:$0xff] %v6278_v19  ;;  %v6174_v22 = vadd.f32 %v9996_v35, %v6173_v4 }
 0xd2c   : > { %6311 = vst.msk [vmem:[%s8235_s16 + $0x48] sm:$0xff] %vm6301_vm0, %v6278_v19  ;;  %v6235_v19 = vadd.f32 %v6219_v24, %v10180_v43 }
 0xd2d   : > { %v6246_v52 = vadd.f32 %v6230_v60, %v6174_v22  ;;  %v7957_v22 = vld [vmem:[#allocation2 + $0x28] sm:$0xff] }
 0xd2f   : > { %v6263_v39 = vmul.f32 %v10000_v9, %v6246_v52 }
 0xd31   : > { %v6279_v46 = vadd.f32 %v7952_v18, %v6263_v39 }
 0xd32   : > { %v6175_v20 = vpop.f32.mrf.mxu3 }
 0xd33   : > { %6295 = vst [vmem:[#allocation2 + $0x10] sm:$0xff] %v6279_v46  ;;  %v6176_v48 = vadd.f32 %v9996_v35, %v6175_v20 }
 0xd34   : > { %6312 = vst.msk [vmem:[%s8235_s16 + $0x50] sm:$0xff] %vm6301_vm0, %v6279_v46 }
 0xd35   : > { %v6247_v15 = vadd.f32 %v6231_v59, %v6176_v48 }
 0xd37   : > { %v6264_v44 = vmul.f32 %v10000_v9, %v6247_v15 }
 0xd39   : > { %v6280_v45 = vadd.f32 %v7953_v27, %v6264_v44 }
 0xd3a   : > { %v6178_v12 = vpop.f32.mrf.mxu3 }
 0xd3b   : > { %6296 = vst [vmem:[#allocation2 + $0x38] sm:$0xff] %v6280_v45  ;;  %v6179_v6 = vadd.f32 %v9996_v35, %v6178_v12 }
 0xd3c   : > { %6313 = vst.msk [vmem:[%s8235_s16 + $0x58] sm:$0xff] %vm6301_vm0, %v6280_v45 }
 0xd3d   : > { %v6248_v0 = vadd.f32 %v6232_v37, %v6179_v6 }
 0xd3f   : > { %v6265_v3 = vmul.f32 %v10000_v9, %v6248_v0 }
 0xd41   : > { %v6281_v23 = vadd.f32 %v7954_v33, %v6265_v3 }
 0xd42   : > { %v6180_v8 = vpop.f32.mrf.mxu3 }
 0xd43   : > { %6297 = vst [vmem:[#allocation2 + $0x60] sm:$0xff] %v6281_v23  ;;  %v6181_v26 = vadd.f32 %v9996_v35, %v6180_v8 }
 0xd44   : > { %6314 = vst.msk [vmem:[%s8235_s16 + $0x60] sm:$0xff] %vm6301_vm0, %v6281_v23 }
 0xd45   : > { %v6249_v11 = vadd.f32 %v6233_v54, %v6181_v26 }
 0xd47   : > { %v6266_v30 = vmul.f32 %v10000_v9, %v6249_v11 }
 0xd49   : > { %v6282_v10 = vadd.f32 %v7955_v21, %v6266_v30 }
 0xd4a   : > { %v6183_v5 = vpop.f32.mrf.mxu3 }
 0xd4b   : > { %6298 = vst [vmem:[#allocation2 + $0x70] sm:$0xff] %v6282_v10  ;;  %v6184_v34 = vadd.f32 %v9996_v35, %v6183_v5 }
 0xd4c   : > { %6315 = vst.msk [vmem:[%s8235_s16 + $0x68] sm:$0xff] %vm6301_vm0, %v6282_v10 }
 0xd4d   : > { %v6250_v16 = vadd.f32 %v6234_v50, %v6184_v34 }
 0xd4f   : > { %v6267_v28 = vmul.f32 %v10000_v9, %v6250_v16 }
 0xd51   : > { %v6283_v49 = vadd.f32 %v7956_v17, %v6267_v28 }
 0xd52   : > { %v6185_v53 = vpop.f32.mrf.mxu3 }
 0xd53   : > { %6299 = vst [vmem:[#allocation2 + $0x78] sm:$0xff] %v6283_v49  ;;  %v6186_v14 = vadd.f32 %v9996_v35, %v6185_v53 }
 0xd54   : > { %6316 = vst.msk [vmem:[%s8235_s16 + $0x70] sm:$0xff] %vm6301_vm0, %v6283_v49 }
 0xd55   : > { %v6251_v4 = vadd.f32 %v6235_v19, %v6186_v14 }
 0xd57   : > { %v6268_v36 = vmul.f32 %v10000_v9, %v6251_v4 }
 0xd59   : > { %v6284_v2 = vadd.f32 %v7957_v22, %v6268_v36 }
 0xd5b   : > { %6300 = vst [vmem:[#allocation2 + $0x28] sm:$0xff] %v6284_v2 }
 0xd5c   : > { %6317 = vst.msk [vmem:[%s8235_s16 + $0x78] sm:$0xff] %vm6301_vm0, %v6284_v2 }
 0xd5d PF: > { %s32_s27 = sadd.s32 1, %s8092_s27   ;;  %s10181_s25 = sld [smem:[#allocation13_spill]] }
 0xd5e   : > { %p29_p9 = scmp.ge.s32.totalorder %s32_s27, 5   ;;  %s10182_s26 = smov %s10184_s18 }
 0xd60   :  { %31 = sbr.rel (!%p29_p9) target bundleno = 9 (0x9), region = 111 }
 0xd65   :  { %6348 = vsyncpa [#allocation6], 1 }
 0xd66   :  { %6350 = vsyncpa [#allocation6 + $0x1], 1 }
 0xd67   :  { %6351 = vsyncpa [#allocation8], 1 }

</bundles_post_ra>
